<compile_context>
chip_gen: v6e
topology: v6e:2x2x1
jax: 0.10.0
libtpu: 0.0.40
codegen_flags: <defaults>
</compile_context>

<pallas_src>
import functools
import math

import numpy as np
import jax
import jax.numpy as jnp
from jax.experimental import pallas as pl
from jax.experimental.pallas import tpu as pltpu


# ---------------------------------------------------------------------------
# Elementwise helpers
# ---------------------------------------------------------------------------
def _erf_approx(z):
    # Abramowitz & Stegun 7.1.26 (max abs err ~1.5e-7, i.e. float32 precision).
    a1, a2, a3, a4, a5 = 0.254829592, -0.284496736, 1.421413741, -1.453152027, 1.061405429
    p = 0.3275911
    za = jnp.abs(z)
    t = 1.0 / (1.0 + p * za)
    poly = ((((a5 * t + a4) * t + a3) * t + a2) * t + a1) * t
    e = 1.0 - poly * jnp.exp(-za * za)
    return jnp.where(z >= 0, e, -e)


def _gelu_exact(u):
    return 0.5 * u * (1.0 + _erf_approx(u * (2.0 ** -0.5)))


# ---------------------------------------------------------------------------
# Kernel
# ---------------------------------------------------------------------------
def rope_transformer_kernel(
    x_ref, sin_ref, cos_ref, e_ref, hsel_ref, nbias_ref, pscram_ref, sel_ref,
    wp_ref, bp_ref,
    g1_ref, be1_ref, wqkv_ref, bqkv_ref, wo_ref, bo_ref,
    g2_ref, be2_ref, w1_ref, bm1_ref, w2_ref, bm2_ref,
    wd_ref, bd_ref,
    o_ref,
    *, B, T, D, H, num_layers,
):
    hd = D // H
    hd2 = hd // 2
    Z = B * T
    scale = hd ** -0.5
    eps = 1e-5
    f32 = jnp.float32

    sin = sin_ref[...]       # [Z*H, hd2]   per-row (=per (b,t,head)) RoPE sin
    cos = cos_ref[...]       # [Z*H, hd2]
    e_mat = e_ref[...]       # [Z*H, Z]     0/1 row-repeat matrix (row r -> row r//H)
    hsel = hsel_ref[...]     # [Z*H, H]     0/1 head-select columns (col i==r%H)
    nbias = nbias_ref[...]   # [Z*H, Z*H]   additive block-diagonal mask (0 / -1e30)
    pscram = pscram_ref[...] # [Z*H, Z*H]   0/1 row permutation for transpose(1,2).reshape

    def layer_norm(v, gamma, beta):
        mu = jnp.mean(v, axis=-1, keepdims=True)
        var = jnp.mean((v - mu) ** 2, axis=-1, keepdims=True)
        return (v - mu) * jax.lax.rsqrt(var + eps) * gamma + beta

    def head_layout(slab):
        # slab: [Z*H, D] (row r holds all H head blocks of token r//H)
        # -> [Z*H, hd]: row r keeps only head block (r % H).
        acc = hsel[:, 0:1] * slab[:, 0:hd]
        for i in range(1, H):
            acc = acc + hsel[:, i:i + 1] * slab[:, i * hd:(i + 1) * hd]
        return acc

    def rope(v):
        # v: [Z*H, hd] with [even-half | odd-half] column layout (weights pre-permuted),
        # rotated for all heads / rows in one vectorized pass.
        v1, v2 = v[:, :hd2], v[:, hd2:]
        return jnp.concatenate([v1 * cos - v2 * sin, v1 * sin + v2 * cos], axis=-1)

    # input projection: [Z, input_dim] @ [input_dim, D]
    xcur = jnp.dot(x_ref[...], wp_ref[...], preferred_element_type=f32) + bp_ref[...]

    for l in range(num_layers):
        # ----- attention branch -----
        hn = layer_norm(xcur, g1_ref[l], be1_ref[l])
        qkv = jnp.dot(hn, wqkv_ref[l], preferred_element_type=f32) + bqkv_ref[l]   # [Z, 3D]
        qkv_h = jnp.dot(e_mat, qkv, preferred_element_type=f32)                    # [Z*H, 3D]

        q2 = rope(head_layout(qkv_h[:, 0:D]))          # [Z*H, hd]
        k2 = rope(head_layout(qkv_h[:, D:2 * D]))      # [Z*H, hd]
        v2 = head_layout(qkv_h[:, 2 * D:3 * D])        # [Z*H, hd]

        # attention over the HEAD axis: full [Z*H, Z*H] scores with a block-diagonal
        # additive mask so softmax only mixes rows of the same (b, t).
        s = jax.lax.dot_general(q2, k2, (((1,), (1,)), ((), ())),
                                preferred_element_type=f32) * scale + nbias
        m = jnp.max(s, axis=-1, keepdims=True)
        p = jnp.exp(s - m)                              # masked entries underflow to 0
        w = p / jnp.sum(p, axis=-1, keepdims=True)
        o2 = jnp.dot(w, v2, preferred_element_type=f32)                             # [Z*H, hd]

        # out.transpose(1, 2).reshape(B, T, D): one permutation matmul + 4 block slices.
        ys = jnp.dot(pscram, o2, preferred_element_type=f32)                        # [Z*H, hd]
        y = jnp.concatenate([ys[mm * Z:(mm + 1) * Z, :] for mm in range(H)], axis=-1)  # [Z, D]

        xcur = xcur + jnp.dot(y, wo_ref[l], preferred_element_type=f32) + bo_ref[l]

        # ----- MLP branch (dropout == identity at inference) -----
        hn2 = layer_norm(xcur, g2_ref[l], be2_ref[l])
        u = jnp.dot(hn2, w1_ref[l], preferred_element_type=f32) + bm1_ref[l]
        g = _gelu_exact(u)
        xcur = xcur + jnp.dot(g, w2_ref[l], preferred_element_type=f32) + bm2_ref[l]

    # x[:, -1] via a tiny selection matmul, then the (lane-dense, padded) decoder.
    last = jnp.dot(sel_ref[...], xcur, preferred_element_type=f32)                  # [B, D]
    o_ref[...] = jnp.dot(last, wd_ref[...], preferred_element_type=f32) + bd_ref[...]


# ---------------------------------------------------------------------------
# Parameter initialization (deterministic, PyTorch-Linear-style uniform init)
# ---------------------------------------------------------------------------
def init_params(key, *, input_dim, model_dim, num_heads, num_layers, horizon):
    D, H, L = model_dim, num_heads, num_layers
    hd = D // H

    def linear(k, fin, fout):
        kw, kb = jax.random.split(k)
        bound = 1.0 / math.sqrt(fin)
        w = jax.random.uniform(kw, (fin, fout), jnp.float32, minval=-bound, maxval=bound)
        b = jax.random.uniform(kb, (fout,), jnp.float32, minval=-bound, maxval=bound)
        return w, b

    keys = jax.random.split(key, 2 + 4 * L)
    wp, bp = linear(keys[0], input_dim, D)
    wd, bd = linear(keys[1], D, horizon)

    wqkv_l, bqkv_l, wo_l, bo_l, w1_l, b1_l, w2_l, b2_l = ([] for _ in range(8))
    for l in range(L):
        k0, k1, k2, k3 = keys[2 + 4 * l: 6 + 4 * l]
        w, b = linear(k0, D, 3 * D); wqkv_l.append(w); bqkv_l.append(b)
        w, b = linear(k1, D, D);     wo_l.append(w);   bo_l.append(b)
        w, b = linear(k2, D, 4 * D); w1_l.append(w);   b1_l.append(b)
        w, b = linear(k3, 4 * D, D); w2_l.append(w);   b2_l.append(b)

    wqkv = jnp.stack(wqkv_l)            # [L, D, 3D]
    bqkv = jnp.stack(bqkv_l)            # [L, 3D]

    # Pre-permute q/k output columns so RoPE's even/odd split becomes contiguous halves.
    perm_head = np.concatenate([np.arange(0, hd, 2), np.arange(1, hd, 2)])
    qcols = np.concatenate([h * hd + perm_head for h in range(H)])
    col_idx = np.concatenate([qcols, D + qcols, 2 * D + np.arange(D)]).astype(np.int32)
    wqkv = wqkv[:, :, col_idx]
    bqkv = bqkv[:, col_idx]

    return dict(
        wp=wp, bp=bp[None, :],
        g1=jnp.ones((L, 1, D), jnp.float32), be1=jnp.zeros((L, 1, D), jnp.float32),
        wqkv=wqkv, bqkv=bqkv[:, None, :],
        wo=jnp.stack(wo_l), bo=jnp.stack(bo_l)[:, None, :],
        g2=jnp.ones((L, 1, D), jnp.float32), be2=jnp.zeros((L, 1, D), jnp.float32),
        w1=jnp.stack(w1_l), bm1=jnp.stack(b1_l)[:, None, :],
        w2=jnp.stack(w2_l), bm2=jnp.stack(b2_l)[:, None, :],
        wd=wd, bd=bd[None, :],
    )


# ---------------------------------------------------------------------------
# Wrapper
# ---------------------------------------------------------------------------
def rope_transformer_masked(x, params, *, num_heads, num_layers):
    B, T, Din = x.shape
    D = params["wp"].shape[1]
    horizon = params["wd"].shape[1]
    H = num_heads
    hd = D // H
    Z = B * T
    ZH = Z * H
    HP = ((horizon + 127) // 128) * 128          # lane-dense padded decoder width

    # ---- deterministic constant setup (plain numpy glue) ----
    # RoPE cache tiled to "head layout" rows r = (b*T + t)*H + h  ->  position t.
    pos = np.arange(T, dtype=np.float64)[:, None]
    dim_idx = np.arange(0, hd, 2, dtype=np.float64)
    freqs = 1.0 / (10000.0 ** (dim_idx / hd))
    phase = pos * freqs                                            # [T, hd/2]
    t_of_r = (np.arange(ZH) // H) % T
    sin2 = np.sin(phase)[t_of_r].astype(np.float32)                # [ZH, hd/2]
    cos2 = np.cos(phase)[t_of_r].astype(np.float32)

    r = np.arange(ZH)
    e_mat = (r[:, None] // H == np.arange(Z)[None, :]).astype(np.float32)      # [ZH, Z]
    hselm = (r[:, None] % H == np.arange(H)[None, :]).astype(np.float32)       # [ZH, H]
    nbias = np.where(r[:, None] // H == r[None, :] // H,
                     0.0, -1e30).astype(np.float32)                            # [ZH, ZH]

    # Row permutation reproducing out.transpose(1,2).reshape(B,T,D) exactly.
    pscram = np.zeros((ZH, ZH), np.float32)
    for m in range(D // hd):
        for z in range(Z):
            b, t_out = divmod(z, T)
            f = t_out * D + m * hd
            h_src, rem = divmod(f, T * hd)
            t_src = rem // hd
            pscram[m * Z + z, (b * T + t_src) * H + h_src] = 1.0

    sel_last = np.zeros((B, Z), np.float32)                                    # x[:, -1]
    sel_last[np.arange(B), np.arange(B) * T + T - 1] = 1.0

    # Pad decoder to a lane-dense output width (sliced back after the call).
    wd_pad = jnp.zeros((D, HP), jnp.float32).at[:, :horizon].set(params["wd"])
    bd_pad = jnp.zeros((1, HP), jnp.float32).at[:, :horizon].set(params["bd"])

    x2 = x.reshape(Z, Din).astype(jnp.float32)

    args = (
        x2, jnp.asarray(sin2), jnp.asarray(cos2), jnp.asarray(e_mat),
        jnp.asarray(hselm), jnp.asarray(nbias), jnp.asarray(pscram), jnp.asarray(sel_last),
        params["wp"], params["bp"],
        params["g1"], params["be1"], params["wqkv"], params["bqkv"],
        params["wo"], params["bo"],
        params["g2"], params["be2"], params["w1"], params["bm1"],
        params["w2"], params["bm2"],
        wd_pad, bd_pad,
    )

    kernel = functools.partial(
        rope_transformer_kernel, B=B, T=T, D=D, H=H, num_layers=num_layers)

    # Advisory cost estimate for XLA's scheduler.
    L = num_layers
    flops = 2 * Z * Din * D
    flops += L * (2 * Z * D * 3 * D + 2 * ZH * Z * 3 * D + 2 * ZH * hd * ZH
                  + 2 * ZH * ZH * hd + 2 * ZH * ZH * hd
                  + 2 * Z * D * D + 2 * Z * D * 4 * D + 2 * Z * 4 * D * D)
    flops += 2 * B * Z * D + 2 * B * D * HP
    transcendentals = L * (ZH * ZH + Z * 4 * D)
    bytes_accessed = sum(int(np.prod(a.shape)) * 4 for a in args) + B * HP * 4

    # Tiny problem (Z=16, D=64, params ~0.6 MB): single invocation, everything resident
    # in VMEM, no grid -> no pipelining / double-buffering machinery.
    vmem = pltpu.MemorySpace.VMEM
    out = pl.pallas_call(
        kernel,
        out_shape=jax.ShapeDtypeStruct((B, HP), jnp.float32),
        in_specs=[pl.BlockSpec(memory_space=vmem)] * len(args),
        out_specs=pl.BlockSpec(memory_space=vmem),
        cost_estimate=pl.CostEstimate(flops=flops,
                                      transcendentals=transcendentals,
                                      bytes_accessed=bytes_accessed),
    )(*args)
    return out[:, :horizon]


# ---------------------------------------------------------------------------
# Main
# ---------------------------------------------------------------------------
if __name__ == "__main__":
    B, T = 2, 8
    input_dim, model_dim, num_heads, num_layers, horizon = 2, 64, 4, 3, 1

    key = jax.random.PRNGKey(0)
    kx, kp = jax.random.split(key)
    x = jax.random.normal(kx, (B, T, input_dim), dtype=jnp.float32)

    params = init_params(
        kp, input_dim=input_dim, model_dim=model_dim,
        num_heads=num_heads, num_layers=num_layers, horizon=horizon)

    y = rope_transformer_masked(x, params, num_heads=num_heads, num_layers=num_layers)
    jax.block_until_ready(y)
    assert y.shape == (B, horizon) and y.dtype == jnp.float32
    print("KERNEL_OK")
</pallas_src>

<mosaic_0001>
module attributes {stable_mosaic.version = 11 : i64} {
  func.func @rope_transformer_kernel(%arg0: memref<16x2xf32, #tpu.memory_space<vmem>>, %arg1: memref<64x8xf32, #tpu.memory_space<vmem>>, %arg2: memref<64x8xf32, #tpu.memory_space<vmem>>, %arg3: memref<64x16xf32, #tpu.memory_space<vmem>>, %arg4: memref<64x4xf32, #tpu.memory_space<vmem>>, %arg5: memref<64x64xf32, #tpu.memory_space<vmem>>, %arg6: memref<64x64xf32, #tpu.memory_space<vmem>>, %arg7: memref<2x16xf32, #tpu.memory_space<vmem>>, %arg8: memref<2x64xf32, #tpu.memory_space<vmem>>, %arg9: memref<1x64xf32, #tpu.memory_space<vmem>>, %arg10: memref<3x1x64xf32, #tpu.memory_space<vmem>>, %arg11: memref<3x1x64xf32, #tpu.memory_space<vmem>>, %arg12: memref<3x64x192xf32, #tpu.memory_space<vmem>>, %arg13: memref<3x1x192xf32, #tpu.memory_space<vmem>>, %arg14: memref<3x64x64xf32, #tpu.memory_space<vmem>>, %arg15: memref<3x1x64xf32, #tpu.memory_space<vmem>>, %arg16: memref<3x1x64xf32, #tpu.memory_space<vmem>>, %arg17: memref<3x1x64xf32, #tpu.memory_space<vmem>>, %arg18: memref<3x64x256xf32, #tpu.memory_space<vmem>>, %arg19: memref<3x1x256xf32, #tpu.memory_space<vmem>>, %arg20: memref<3x256x64xf32, #tpu.memory_space<vmem>>, %arg21: memref<3x1x64xf32, #tpu.memory_space<vmem>>, %arg22: memref<64x128xf32, #tpu.memory_space<vmem>>, %arg23: memref<1x128xf32, #tpu.memory_space<vmem>>, %arg24: memref<2x128xf32, #tpu.memory_space<vmem>>) attributes {dimension_semantics = [], scalar_prefetch = 0 : i64, scratch_operands = 0 : i64, tpu.core_type = #tpu.core_type<tc>} {
    %c0 = arith.constant 0 : index
    %c0_0 = arith.constant 0 : index
    %0 = vector.load %arg1[%c0, %c0_0] : memref<64x8xf32, #tpu.memory_space<vmem>>, vector<64x8xf32>
    %c0_1 = arith.constant 0 : index
    %c0_2 = arith.constant 0 : index
    %1 = vector.load %arg2[%c0_1, %c0_2] : memref<64x8xf32, #tpu.memory_space<vmem>>, vector<64x8xf32>
    %c0_3 = arith.constant 0 : index
    %c0_4 = arith.constant 0 : index
    %2 = vector.load %arg3[%c0_3, %c0_4] : memref<64x16xf32, #tpu.memory_space<vmem>>, vector<64x16xf32>
    %c0_5 = arith.constant 0 : index
    %c0_6 = arith.constant 0 : index
    %3 = vector.load %arg4[%c0_5, %c0_6] : memref<64x4xf32, #tpu.memory_space<vmem>>, vector<64x4xf32>
    %c0_7 = arith.constant 0 : index
    %c0_8 = arith.constant 0 : index
    %4 = vector.load %arg5[%c0_7, %c0_8] : memref<64x64xf32, #tpu.memory_space<vmem>>, vector<64x64xf32>
    %c0_9 = arith.constant 0 : index
    %c0_10 = arith.constant 0 : index
    %5 = vector.load %arg6[%c0_9, %c0_10] : memref<64x64xf32, #tpu.memory_space<vmem>>, vector<64x64xf32>
    %c0_11 = arith.constant 0 : index
    %c0_12 = arith.constant 0 : index
    %6 = vector.load %arg0[%c0_11, %c0_12] : memref<16x2xf32, #tpu.memory_space<vmem>>, vector<16x2xf32>
    %c0_13 = arith.constant 0 : index
    %c0_14 = arith.constant 0 : index
    %7 = vector.load %arg8[%c0_13, %c0_14] : memref<2x64xf32, #tpu.memory_space<vmem>>, vector<2x64xf32>
    %cst = arith.constant dense<0.000000e+00> : vector<16x64xf32>
    %8 = tpu.matmul %6, %7, %cst {dimension_numbers = #tpu.dot_dimension_numbers<[1], [0], [0], [1], [0, 0, 1, 1], [], []>} : vector<16x2xf32>, vector<2x64xf32>, vector<16x64xf32> -> vector<16x64xf32>
    %c0_15 = arith.constant 0 : index
    %c0_16 = arith.constant 0 : index
    %9 = vector.load %arg9[%c0_15, %c0_16] : memref<1x64xf32, #tpu.memory_space<vmem>>, vector<1x64xf32>
    %10 = vector.broadcast %9 : vector<1x64xf32> to vector<16x64xf32>
    %11 = arith.addf %8, %10 : vector<16x64xf32>
    %c0_17 = arith.constant 0 : index
    %c0_18 = arith.constant 0 : index
    %c0_19 = arith.constant 0 : index
    %12 = vector.load %arg10[%c0_17, %c0_18, %c0_19] : memref<3x1x64xf32, #tpu.memory_space<vmem>>, vector<1x1x64xf32>
    %13 = vector.shape_cast %12 : vector<1x1x64xf32> to vector<1x64xf32>
    %c0_20 = arith.constant 0 : index
    %c0_21 = arith.constant 0 : index
    %c0_22 = arith.constant 0 : index
    %14 = vector.load %arg11[%c0_20, %c0_21, %c0_22] : memref<3x1x64xf32, #tpu.memory_space<vmem>>, vector<1x1x64xf32>
    %15 = vector.shape_cast %14 : vector<1x1x64xf32> to vector<1x64xf32>
    %cst_23 = arith.constant dense<0.000000e+00> : vector<16xf32>
    %16 = vector.multi_reduction <add>, %11, %cst_23 [1] : vector<16x64xf32> to vector<16xf32>
    %17 = vector.shape_cast %16 : vector<16xf32> to vector<16x1xf32>
    %cst_24 = arith.constant 6.400000e+01 : f32
    %18 = vector.broadcast %cst_24 : f32 to vector<16x1xf32>
    %19 = arith.divf %17, %18 : vector<16x1xf32>
    %20 = vector.broadcast %19 : vector<16x1xf32> to vector<16x64xf32>
    %21 = arith.subf %11, %20 : vector<16x64xf32>
    %22 = arith.mulf %21, %21 : vector<16x64xf32>
    %cst_25 = arith.constant dense<0.000000e+00> : vector<16xf32>
    %23 = vector.multi_reduction <add>, %22, %cst_25 [1] : vector<16x64xf32> to vector<16xf32>
    %24 = vector.shape_cast %23 : vector<16xf32> to vector<16x1xf32>
    %cst_26 = arith.constant 6.400000e+01 : f32
    %25 = vector.broadcast %cst_26 : f32 to vector<16x1xf32>
    %26 = arith.divf %24, %25 : vector<16x1xf32>
    %27 = vector.broadcast %19 : vector<16x1xf32> to vector<16x64xf32>
    %28 = arith.subf %11, %27 : vector<16x64xf32>
    %cst_27 = arith.constant 9.99999974E-6 : f32
    %29 = vector.broadcast %cst_27 : f32 to vector<16x1xf32>
    %30 = arith.addf %26, %29 : vector<16x1xf32>
    %31 = math.rsqrt %30 : vector<16x1xf32>
    %32 = vector.broadcast %31 : vector<16x1xf32> to vector<16x64xf32>
    %33 = arith.mulf %28, %32 : vector<16x64xf32>
    %34 = vector.broadcast %13 : vector<1x64xf32> to vector<16x64xf32>
    %35 = arith.mulf %33, %34 : vector<16x64xf32>
    %36 = vector.broadcast %15 : vector<1x64xf32> to vector<16x64xf32>
    %37 = arith.addf %35, %36 : vector<16x64xf32>
    %c0_28 = arith.constant 0 : index
    %c0_29 = arith.constant 0 : index
    %c0_30 = arith.constant 0 : index
    %38 = vector.load %arg12[%c0_28, %c0_29, %c0_30] : memref<3x64x192xf32, #tpu.memory_space<vmem>>, vector<1x64x192xf32>
    %39 = vector.shape_cast %38 : vector<1x64x192xf32> to vector<64x192xf32>
    %cst_31 = arith.constant dense<0.000000e+00> : vector<16x192xf32>
    %40 = tpu.matmul %37, %39, %cst_31 {dimension_numbers = #tpu.dot_dimension_numbers<[1], [0], [0], [1], [0, 0, 1, 1], [], []>} : vector<16x64xf32>, vector<64x192xf32>, vector<16x192xf32> -> vector<16x192xf32>
    %c0_32 = arith.constant 0 : index
    %c0_33 = arith.constant 0 : index
    %c0_34 = arith.constant 0 : index
    %41 = vector.load %arg13[%c0_32, %c0_33, %c0_34] : memref<3x1x192xf32, #tpu.memory_space<vmem>>, vector<1x1x192xf32>
    %42 = vector.shape_cast %41 : vector<1x1x192xf32> to vector<1x192xf32>
    %43 = vector.broadcast %42 : vector<1x192xf32> to vector<16x192xf32>
    %44 = arith.addf %40, %43 : vector<16x192xf32>
    %cst_35 = arith.constant dense<0.000000e+00> : vector<64x192xf32>
    %45 = tpu.matmul %2, %44, %cst_35 {dimension_numbers = #tpu.dot_dimension_numbers<[1], [0], [0], [1], [0, 0, 1, 1], [], []>} : vector<64x16xf32>, vector<16x192xf32>, vector<64x192xf32> -> vector<64x192xf32>
    %46 = vector.extract_strided_slice %45 {offsets = [0, 0], sizes = [64, 64], strides = [1, 1]} : vector<64x192xf32> to vector<64x64xf32>
    %47 = vector.extract_strided_slice %3 {offsets = [0, 0], sizes = [64, 1], strides = [1, 1]} : vector<64x4xf32> to vector<64x1xf32>
    %48 = vector.extract_strided_slice %46 {offsets = [0, 0], sizes = [64, 16], strides = [1, 1]} : vector<64x64xf32> to vector<64x16xf32>
    %49 = vector.broadcast %47 : vector<64x1xf32> to vector<64x16xf32>
    %50 = arith.mulf %49, %48 : vector<64x16xf32>
    %51 = vector.extract_strided_slice %3 {offsets = [0, 1], sizes = [64, 1], strides = [1, 1]} : vector<64x4xf32> to vector<64x1xf32>
    %52 = vector.extract_strided_slice %46 {offsets = [0, 16], sizes = [64, 16], strides = [1, 1]} : vector<64x64xf32> to vector<64x16xf32>
    %53 = vector.broadcast %51 : vector<64x1xf32> to vector<64x16xf32>
    %54 = arith.mulf %53, %52 : vector<64x16xf32>
    %55 = arith.addf %50, %54 : vector<64x16xf32>
    %56 = vector.extract_strided_slice %3 {offsets = [0, 2], sizes = [64, 1], strides = [1, 1]} : vector<64x4xf32> to vector<64x1xf32>
    %57 = vector.extract_strided_slice %46 {offsets = [0, 32], sizes = [64, 16], strides = [1, 1]} : vector<64x64xf32> to vector<64x16xf32>
    %58 = vector.broadcast %56 : vector<64x1xf32> to vector<64x16xf32>
    %59 = arith.mulf %58, %57 : vector<64x16xf32>
    %60 = arith.addf %55, %59 : vector<64x16xf32>
    %61 = vector.extract_strided_slice %3 {offsets = [0, 3], sizes = [64, 1], strides = [1, 1]} : vector<64x4xf32> to vector<64x1xf32>
    %62 = vector.extract_strided_slice %46 {offsets = [0, 48], sizes = [64, 16], strides = [1, 1]} : vector<64x64xf32> to vector<64x16xf32>
    %63 = vector.broadcast %61 : vector<64x1xf32> to vector<64x16xf32>
    %64 = arith.mulf %63, %62 : vector<64x16xf32>
    %65 = arith.addf %60, %64 : vector<64x16xf32>
    %66 = vector.extract_strided_slice %65 {offsets = [0, 0], sizes = [64, 8], strides = [1, 1]} : vector<64x16xf32> to vector<64x8xf32>
    %67 = vector.extract_strided_slice %65 {offsets = [0, 8], sizes = [64, 8], strides = [1, 1]} : vector<64x16xf32> to vector<64x8xf32>
    %68 = arith.mulf %66, %1 : vector<64x8xf32>
    %69 = arith.mulf %67, %0 : vector<64x8xf32>
    %70 = arith.subf %68, %69 : vector<64x8xf32>
    %71 = arith.mulf %66, %0 : vector<64x8xf32>
    %72 = arith.mulf %67, %1 : vector<64x8xf32>
    %73 = arith.addf %71, %72 : vector<64x8xf32>
    %74 = tpu.concatenate %70, %73 in 1 : vector<64x8xf32>, vector<64x8xf32> -> vector<64x16xf32>
    %75 = vector.extract_strided_slice %45 {offsets = [0, 64], sizes = [64, 64], strides = [1, 1]} : vector<64x192xf32> to vector<64x64xf32>
    %76 = vector.extract_strided_slice %3 {offsets = [0, 0], sizes = [64, 1], strides = [1, 1]} : vector<64x4xf32> to vector<64x1xf32>
    %77 = vector.extract_strided_slice %75 {offsets = [0, 0], sizes = [64, 16], strides = [1, 1]} : vector<64x64xf32> to vector<64x16xf32>
    %78 = vector.broadcast %76 : vector<64x1xf32> to vector<64x16xf32>
    %79 = arith.mulf %78, %77 : vector<64x16xf32>
    %80 = vector.extract_strided_slice %3 {offsets = [0, 1], sizes = [64, 1], strides = [1, 1]} : vector<64x4xf32> to vector<64x1xf32>
    %81 = vector.extract_strided_slice %75 {offsets = [0, 16], sizes = [64, 16], strides = [1, 1]} : vector<64x64xf32> to vector<64x16xf32>
    %82 = vector.broadcast %80 : vector<64x1xf32> to vector<64x16xf32>
    %83 = arith.mulf %82, %81 : vector<64x16xf32>
    %84 = arith.addf %79, %83 : vector<64x16xf32>
    %85 = vector.extract_strided_slice %3 {offsets = [0, 2], sizes = [64, 1], strides = [1, 1]} : vector<64x4xf32> to vector<64x1xf32>
    %86 = vector.extract_strided_slice %75 {offsets = [0, 32], sizes = [64, 16], strides = [1, 1]} : vector<64x64xf32> to vector<64x16xf32>
    %87 = vector.broadcast %85 : vector<64x1xf32> to vector<64x16xf32>
    %88 = arith.mulf %87, %86 : vector<64x16xf32>
    %89 = arith.addf %84, %88 : vector<64x16xf32>
    %90 = vector.extract_strided_slice %3 {offsets = [0, 3], sizes = [64, 1], strides = [1, 1]} : vector<64x4xf32> to vector<64x1xf32>
    %91 = vector.extract_strided_slice %75 {offsets = [0, 48], sizes = [64, 16], strides = [1, 1]} : vector<64x64xf32> to vector<64x16xf32>
    %92 = vector.broadcast %90 : vector<64x1xf32> to vector<64x16xf32>
    %93 = arith.mulf %92, %91 : vector<64x16xf32>
    %94 = arith.addf %89, %93 : vector<64x16xf32>
    %95 = vector.extract_strided_slice %94 {offsets = [0, 0], sizes = [64, 8], strides = [1, 1]} : vector<64x16xf32> to vector<64x8xf32>
    %96 = vector.extract_strided_slice %94 {offsets = [0, 8], sizes = [64, 8], strides = [1, 1]} : vector<64x16xf32> to vector<64x8xf32>
    %97 = arith.mulf %95, %1 : vector<64x8xf32>
    %98 = arith.mulf %96, %0 : vector<64x8xf32>
    %99 = arith.subf %97, %98 : vector<64x8xf32>
    %100 = arith.mulf %95, %0 : vector<64x8xf32>
    %101 = arith.mulf %96, %1 : vector<64x8xf32>
    %102 = arith.addf %100, %101 : vector<64x8xf32>
    %103 = tpu.concatenate %99, %102 in 1 : vector<64x8xf32>, vector<64x8xf32> -> vector<64x16xf32>
    %104 = vector.extract_strided_slice %45 {offsets = [0, 128], sizes = [64, 64], strides = [1, 1]} : vector<64x192xf32> to vector<64x64xf32>
    %105 = vector.extract_strided_slice %3 {offsets = [0, 0], sizes = [64, 1], strides = [1, 1]} : vector<64x4xf32> to vector<64x1xf32>
    %106 = vector.extract_strided_slice %104 {offsets = [0, 0], sizes = [64, 16], strides = [1, 1]} : vector<64x64xf32> to vector<64x16xf32>
    %107 = vector.broadcast %105 : vector<64x1xf32> to vector<64x16xf32>
    %108 = arith.mulf %107, %106 : vector<64x16xf32>
    %109 = vector.extract_strided_slice %3 {offsets = [0, 1], sizes = [64, 1], strides = [1, 1]} : vector<64x4xf32> to vector<64x1xf32>
    %110 = vector.extract_strided_slice %104 {offsets = [0, 16], sizes = [64, 16], strides = [1, 1]} : vector<64x64xf32> to vector<64x16xf32>
    %111 = vector.broadcast %109 : vector<64x1xf32> to vector<64x16xf32>
    %112 = arith.mulf %111, %110 : vector<64x16xf32>
    %113 = arith.addf %108, %112 : vector<64x16xf32>
    %114 = vector.extract_strided_slice %3 {offsets = [0, 2], sizes = [64, 1], strides = [1, 1]} : vector<64x4xf32> to vector<64x1xf32>
    %115 = vector.extract_strided_slice %104 {offsets = [0, 32], sizes = [64, 16], strides = [1, 1]} : vector<64x64xf32> to vector<64x16xf32>
    %116 = vector.broadcast %114 : vector<64x1xf32> to vector<64x16xf32>
    %117 = arith.mulf %116, %115 : vector<64x16xf32>
    %118 = arith.addf %113, %117 : vector<64x16xf32>
    %119 = vector.extract_strided_slice %3 {offsets = [0, 3], sizes = [64, 1], strides = [1, 1]} : vector<64x4xf32> to vector<64x1xf32>
    %120 = vector.extract_strided_slice %104 {offsets = [0, 48], sizes = [64, 16], strides = [1, 1]} : vector<64x64xf32> to vector<64x16xf32>
    %121 = vector.broadcast %119 : vector<64x1xf32> to vector<64x16xf32>
    %122 = arith.mulf %121, %120 : vector<64x16xf32>
    %123 = arith.addf %118, %122 : vector<64x16xf32>
    %cst_36 = arith.constant dense<0.000000e+00> : vector<64x64xf32>
    %124 = tpu.matmul %74, %103, %cst_36 {dimension_numbers = #tpu.dot_dimension_numbers<[1], [1], [0], [0], [0, 0, 1, 0], [], []>} : vector<64x16xf32>, vector<64x16xf32>, vector<64x64xf32> -> vector<64x64xf32>
    %cst_37 = arith.constant 2.500000e-01 : f32
    %125 = vector.broadcast %cst_37 : f32 to vector<64x64xf32>
    %126 = arith.mulf %124, %125 : vector<64x64xf32>
    %127 = arith.addf %126, %4 : vector<64x64xf32>
    %cst_38 = arith.constant dense<0xFF800000> : vector<64xf32>
    %128 = vector.multi_reduction <maximumf>, %127, %cst_38 [1] : vector<64x64xf32> to vector<64xf32>
    %129 = vector.shape_cast %128 : vector<64xf32> to vector<64x1xf32>
    %130 = vector.broadcast %129 : vector<64x1xf32> to vector<64x64xf32>
    %131 = arith.subf %127, %130 : vector<64x64xf32>
    %132 = math.exp %131 : vector<64x64xf32>
    %cst_39 = arith.constant dense<0.000000e+00> : vector<64xf32>
    %133 = vector.multi_reduction <add>, %132, %cst_39 [1] : vector<64x64xf32> to vector<64xf32>
    %134 = vector.shape_cast %133 : vector<64xf32> to vector<64x1xf32>
    %135 = vector.broadcast %134 : vector<64x1xf32> to vector<64x64xf32>
    %136 = arith.divf %132, %135 : vector<64x64xf32>
    %cst_40 = arith.constant dense<0.000000e+00> : vector<64x16xf32>
    %137 = tpu.matmul %136, %123, %cst_40 {dimension_numbers = #tpu.dot_dimension_numbers<[1], [0], [0], [1], [0, 0, 1, 1], [], []>} : vector<64x64xf32>, vector<64x16xf32>, vector<64x16xf32> -> vector<64x16xf32>
    %cst_41 = arith.constant dense<0.000000e+00> : vector<64x16xf32>
    %138 = tpu.matmul %5, %137, %cst_41 {dimension_numbers = #tpu.dot_dimension_numbers<[1], [0], [0], [1], [0, 0, 1, 1], [], []>} : vector<64x64xf32>, vector<64x16xf32>, vector<64x16xf32> -> vector<64x16xf32>
    %139 = vector.extract_strided_slice %138 {offsets = [0, 0], sizes = [16, 16], strides = [1, 1]} : vector<64x16xf32> to vector<16x16xf32>
    %140 = vector.extract_strided_slice %138 {offsets = [16, 0], sizes = [16, 16], strides = [1, 1]} : vector<64x16xf32> to vector<16x16xf32>
    %141 = vector.extract_strided_slice %138 {offsets = [32, 0], sizes = [16, 16], strides = [1, 1]} : vector<64x16xf32> to vector<16x16xf32>
    %142 = vector.extract_strided_slice %138 {offsets = [48, 0], sizes = [16, 16], strides = [1, 1]} : vector<64x16xf32> to vector<16x16xf32>
    %143 = tpu.concatenate %139, %140, %141, %142 in 1 : vector<16x16xf32>, vector<16x16xf32>, vector<16x16xf32>, vector<16x16xf32> -> vector<16x64xf32>
    %c0_42 = arith.constant 0 : index
    %c0_43 = arith.constant 0 : index
    %c0_44 = arith.constant 0 : index
    %144 = vector.load %arg14[%c0_42, %c0_43, %c0_44] : memref<3x64x64xf32, #tpu.memory_space<vmem>>, vector<1x64x64xf32>
    %145 = vector.shape_cast %144 : vector<1x64x64xf32> to vector<64x64xf32>
    %cst_45 = arith.constant dense<0.000000e+00> : vector<16x64xf32>
    %146 = tpu.matmul %143, %145, %cst_45 {dimension_numbers = #tpu.dot_dimension_numbers<[1], [0], [0], [1], [0, 0, 1, 1], [], []>} : vector<16x64xf32>, vector<64x64xf32>, vector<16x64xf32> -> vector<16x64xf32>
    %147 = arith.addf %11, %146 : vector<16x64xf32>
    %c0_46 = arith.constant 0 : index
    %c0_47 = arith.constant 0 : index
    %c0_48 = arith.constant 0 : index
    %148 = vector.load %arg15[%c0_46, %c0_47, %c0_48] : memref<3x1x64xf32, #tpu.memory_space<vmem>>, vector<1x1x64xf32>
    %149 = vector.shape_cast %148 : vector<1x1x64xf32> to vector<1x64xf32>
    %150 = vector.broadcast %149 : vector<1x64xf32> to vector<16x64xf32>
    %151 = arith.addf %147, %150 : vector<16x64xf32>
    %c0_49 = arith.constant 0 : index
    %c0_50 = arith.constant 0 : index
    %c0_51 = arith.constant 0 : index
    %152 = vector.load %arg16[%c0_49, %c0_50, %c0_51] : memref<3x1x64xf32, #tpu.memory_space<vmem>>, vector<1x1x64xf32>
    %153 = vector.shape_cast %152 : vector<1x1x64xf32> to vector<1x64xf32>
    %c0_52 = arith.constant 0 : index
    %c0_53 = arith.constant 0 : index
    %c0_54 = arith.constant 0 : index
    %154 = vector.load %arg17[%c0_52, %c0_53, %c0_54] : memref<3x1x64xf32, #tpu.memory_space<vmem>>, vector<1x1x64xf32>
    %155 = vector.shape_cast %154 : vector<1x1x64xf32> to vector<1x64xf32>
    %cst_55 = arith.constant dense<0.000000e+00> : vector<16xf32>
    %156 = vector.multi_reduction <add>, %151, %cst_55 [1] : vector<16x64xf32> to vector<16xf32>
    %157 = vector.shape_cast %156 : vector<16xf32> to vector<16x1xf32>
    %cst_56 = arith.constant 6.400000e+01 : f32
    %158 = vector.broadcast %cst_56 : f32 to vector<16x1xf32>
    %159 = arith.divf %157, %158 : vector<16x1xf32>
    %160 = vector.broadcast %159 : vector<16x1xf32> to vector<16x64xf32>
    %161 = arith.subf %151, %160 : vector<16x64xf32>
    %162 = arith.mulf %161, %161 : vector<16x64xf32>
    %cst_57 = arith.constant dense<0.000000e+00> : vector<16xf32>
    %163 = vector.multi_reduction <add>, %162, %cst_57 [1] : vector<16x64xf32> to vector<16xf32>
    %164 = vector.shape_cast %163 : vector<16xf32> to vector<16x1xf32>
    %cst_58 = arith.constant 6.400000e+01 : f32
    %165 = vector.broadcast %cst_58 : f32 to vector<16x1xf32>
    %166 = arith.divf %164, %165 : vector<16x1xf32>
    %167 = vector.broadcast %159 : vector<16x1xf32> to vector<16x64xf32>
    %168 = arith.subf %151, %167 : vector<16x64xf32>
    %cst_59 = arith.constant 9.99999974E-6 : f32
    %169 = vector.broadcast %cst_59 : f32 to vector<16x1xf32>
    %170 = arith.addf %166, %169 : vector<16x1xf32>
    %171 = math.rsqrt %170 : vector<16x1xf32>
    %172 = vector.broadcast %171 : vector<16x1xf32> to vector<16x64xf32>
    %173 = arith.mulf %168, %172 : vector<16x64xf32>
    %174 = vector.broadcast %153 : vector<1x64xf32> to vector<16x64xf32>
    %175 = arith.mulf %173, %174 : vector<16x64xf32>
    %176 = vector.broadcast %155 : vector<1x64xf32> to vector<16x64xf32>
    %177 = arith.addf %175, %176 : vector<16x64xf32>
    %c0_60 = arith.constant 0 : index
    %c0_61 = arith.constant 0 : index
    %c0_62 = arith.constant 0 : index
    %178 = vector.load %arg18[%c0_60, %c0_61, %c0_62] : memref<3x64x256xf32, #tpu.memory_space<vmem>>, vector<1x64x256xf32>
    %179 = vector.shape_cast %178 : vector<1x64x256xf32> to vector<64x256xf32>
    %cst_63 = arith.constant dense<0.000000e+00> : vector<16x256xf32>
    %180 = tpu.matmul %177, %179, %cst_63 {dimension_numbers = #tpu.dot_dimension_numbers<[1], [0], [0], [1], [0, 0, 1, 1], [], []>} : vector<16x64xf32>, vector<64x256xf32>, vector<16x256xf32> -> vector<16x256xf32>
    %c0_64 = arith.constant 0 : index
    %c0_65 = arith.constant 0 : index
    %c0_66 = arith.constant 0 : index
    %181 = vector.load %arg19[%c0_64, %c0_65, %c0_66] : memref<3x1x256xf32, #tpu.memory_space<vmem>>, vector<1x1x256xf32>
    %182 = vector.shape_cast %181 : vector<1x1x256xf32> to vector<1x256xf32>
    %183 = vector.broadcast %182 : vector<1x256xf32> to vector<16x256xf32>
    %184 = arith.addf %180, %183 : vector<16x256xf32>
    %cst_67 = arith.constant 5.000000e-01 : f32
    %185 = vector.broadcast %cst_67 : f32 to vector<16x256xf32>
    %186 = arith.mulf %185, %184 : vector<16x256xf32>
    %cst_68 = arith.constant 0.707106769 : f32
    %187 = vector.broadcast %cst_68 : f32 to vector<16x256xf32>
    %188 = arith.mulf %184, %187 : vector<16x256xf32>
    %189 = math.absf %188 : vector<16x256xf32>
    %cst_69 = arith.constant 0.327591091 : f32
    %190 = vector.broadcast %cst_69 : f32 to vector<16x256xf32>
    %191 = arith.mulf %190, %189 : vector<16x256xf32>
    %cst_70 = arith.constant 1.000000e+00 : f32
    %192 = vector.broadcast %cst_70 : f32 to vector<16x256xf32>
    %193 = arith.addf %192, %191 : vector<16x256xf32>
    %cst_71 = arith.constant 1.000000e+00 : f32
    %194 = vector.broadcast %cst_71 : f32 to vector<16x256xf32>
    %195 = arith.divf %194, %193 : vector<16x256xf32>
    %cst_72 = arith.constant 1.06140542 : f32
    %196 = vector.broadcast %cst_72 : f32 to vector<16x256xf32>
    %197 = arith.mulf %196, %195 : vector<16x256xf32>
    %cst_73 = arith.constant -1.45315206 : f32
    %198 = vector.broadcast %cst_73 : f32 to vector<16x256xf32>
    %199 = arith.addf %197, %198 : vector<16x256xf32>
    %200 = arith.mulf %199, %195 : vector<16x256xf32>
    %cst_74 = arith.constant 1.42141378 : f32
    %201 = vector.broadcast %cst_74 : f32 to vector<16x256xf32>
    %202 = arith.addf %200, %201 : vector<16x256xf32>
    %203 = arith.mulf %202, %195 : vector<16x256xf32>
    %cst_75 = arith.constant -0.284496725 : f32
    %204 = vector.broadcast %cst_75 : f32 to vector<16x256xf32>
    %205 = arith.addf %203, %204 : vector<16x256xf32>
    %206 = arith.mulf %205, %195 : vector<16x256xf32>
    %cst_76 = arith.constant 0.254829586 : f32
    %207 = vector.broadcast %cst_76 : f32 to vector<16x256xf32>
    %208 = arith.addf %206, %207 : vector<16x256xf32>
    %209 = arith.mulf %208, %195 : vector<16x256xf32>
    %cst_77 = arith.constant 0.000000e+00 : f32
    %210 = vector.broadcast %cst_77 : f32 to vector<16x256xf32>
    %211 = arith.subf %210, %189 : vector<16x256xf32>
    %212 = arith.mulf %211, %189 : vector<16x256xf32>
    %213 = math.exp %212 : vector<16x256xf32>
    %214 = arith.mulf %209, %213 : vector<16x256xf32>
    %cst_78 = arith.constant 1.000000e+00 : f32
    %215 = vector.broadcast %cst_78 : f32 to vector<16x256xf32>
    %216 = arith.subf %215, %214 : vector<16x256xf32>
    %cst_79 = arith.constant 0.000000e+00 : f32
    %217 = vector.broadcast %cst_79 : f32 to vector<16x256xf32>
    %218 = arith.cmpf oge, %188, %217 : vector<16x256xf32>
    %cst_80 = arith.constant 0.000000e+00 : f32
    %219 = vector.broadcast %cst_80 : f32 to vector<16x256xf32>
    %220 = arith.subf %219, %216 : vector<16x256xf32>
    %221 = arith.select %218, %216, %220 : vector<16x256xi1>, vector<16x256xf32>
    %cst_81 = arith.constant 1.000000e+00 : f32
    %222 = vector.broadcast %cst_81 : f32 to vector<16x256xf32>
    %223 = arith.addf %222, %221 : vector<16x256xf32>
    %224 = arith.mulf %186, %223 : vector<16x256xf32>
    %c0_82 = arith.constant 0 : index
    %c0_83 = arith.constant 0 : index
    %c0_84 = arith.constant 0 : index
    %225 = vector.load %arg20[%c0_82, %c0_83, %c0_84] : memref<3x256x64xf32, #tpu.memory_space<vmem>>, vector<1x256x64xf32>
    %226 = vector.shape_cast %225 : vector<1x256x64xf32> to vector<256x64xf32>
    %cst_85 = arith.constant dense<0.000000e+00> : vector<16x64xf32>
    %227 = tpu.matmul %224, %226, %cst_85 {dimension_numbers = #tpu.dot_dimension_numbers<[1], [0], [0], [1], [0, 0, 1, 1], [], []>} : vector<16x256xf32>, vector<256x64xf32>, vector<16x64xf32> -> vector<16x64xf32>
    %228 = arith.addf %151, %227 : vector<16x64xf32>
    %c0_86 = arith.constant 0 : index
    %c0_87 = arith.constant 0 : index
    %c0_88 = arith.constant 0 : index
    %229 = vector.load %arg21[%c0_86, %c0_87, %c0_88] : memref<3x1x64xf32, #tpu.memory_space<vmem>>, vector<1x1x64xf32>
    %230 = vector.shape_cast %229 : vector<1x1x64xf32> to vector<1x64xf32>
    %231 = vector.broadcast %230 : vector<1x64xf32> to vector<16x64xf32>
    %232 = arith.addf %228, %231 : vector<16x64xf32>
    %c1 = arith.constant 1 : index
    %c0_89 = arith.constant 0 : index
    %c0_90 = arith.constant 0 : index
    %233 = vector.load %arg10[%c1, %c0_89, %c0_90] : memref<3x1x64xf32, #tpu.memory_space<vmem>>, vector<1x1x64xf32>
    %234 = vector.shape_cast %233 : vector<1x1x64xf32> to vector<1x64xf32>
    %c1_91 = arith.constant 1 : index
    %c0_92 = arith.constant 0 : index
    %c0_93 = arith.constant 0 : index
    %235 = vector.load %arg11[%c1_91, %c0_92, %c0_93] : memref<3x1x64xf32, #tpu.memory_space<vmem>>, vector<1x1x64xf32>
    %236 = vector.shape_cast %235 : vector<1x1x64xf32> to vector<1x64xf32>
    %cst_94 = arith.constant dense<0.000000e+00> : vector<16xf32>
    %237 = vector.multi_reduction <add>, %232, %cst_94 [1] : vector<16x64xf32> to vector<16xf32>
    %238 = vector.shape_cast %237 : vector<16xf32> to vector<16x1xf32>
    %cst_95 = arith.constant 6.400000e+01 : f32
    %239 = vector.broadcast %cst_95 : f32 to vector<16x1xf32>
    %240 = arith.divf %238, %239 : vector<16x1xf32>
    %241 = vector.broadcast %240 : vector<16x1xf32> to vector<16x64xf32>
    %242 = arith.subf %232, %241 : vector<16x64xf32>
    %243 = arith.mulf %242, %242 : vector<16x64xf32>
    %cst_96 = arith.constant dense<0.000000e+00> : vector<16xf32>
    %244 = vector.multi_reduction <add>, %243, %cst_96 [1] : vector<16x64xf32> to vector<16xf32>
    %245 = vector.shape_cast %244 : vector<16xf32> to vector<16x1xf32>
    %cst_97 = arith.constant 6.400000e+01 : f32
    %246 = vector.broadcast %cst_97 : f32 to vector<16x1xf32>
    %247 = arith.divf %245, %246 : vector<16x1xf32>
    %248 = vector.broadcast %240 : vector<16x1xf32> to vector<16x64xf32>
    %249 = arith.subf %232, %248 : vector<16x64xf32>
    %cst_98 = arith.constant 9.99999974E-6 : f32
    %250 = vector.broadcast %cst_98 : f32 to vector<16x1xf32>
    %251 = arith.addf %247, %250 : vector<16x1xf32>
    %252 = math.rsqrt %251 : vector<16x1xf32>
    %253 = vector.broadcast %252 : vector<16x1xf32> to vector<16x64xf32>
    %254 = arith.mulf %249, %253 : vector<16x64xf32>
    %255 = vector.broadcast %234 : vector<1x64xf32> to vector<16x64xf32>
    %256 = arith.mulf %254, %255 : vector<16x64xf32>
    %257 = vector.broadcast %236 : vector<1x64xf32> to vector<16x64xf32>
    %258 = arith.addf %256, %257 : vector<16x64xf32>
    %c1_99 = arith.constant 1 : index
    %c0_100 = arith.constant 0 : index
    %c0_101 = arith.constant 0 : index
    %259 = vector.load %arg12[%c1_99, %c0_100, %c0_101] : memref<3x64x192xf32, #tpu.memory_space<vmem>>, vector<1x64x192xf32>
    %260 = vector.shape_cast %259 : vector<1x64x192xf32> to vector<64x192xf32>
    %cst_102 = arith.constant dense<0.000000e+00> : vector<16x192xf32>
    %261 = tpu.matmul %258, %260, %cst_102 {dimension_numbers = #tpu.dot_dimension_numbers<[1], [0], [0], [1], [0, 0, 1, 1], [], []>} : vector<16x64xf32>, vector<64x192xf32>, vector<16x192xf32> -> vector<16x192xf32>
    %c1_103 = arith.constant 1 : index
    %c0_104 = arith.constant 0 : index
    %c0_105 = arith.constant 0 : index
    %262 = vector.load %arg13[%c1_103, %c0_104, %c0_105] : memref<3x1x192xf32, #tpu.memory_space<vmem>>, vector<1x1x192xf32>
    %263 = vector.shape_cast %262 : vector<1x1x192xf32> to vector<1x192xf32>
    %264 = vector.broadcast %263 : vector<1x192xf32> to vector<16x192xf32>
    %265 = arith.addf %261, %264 : vector<16x192xf32>
    %cst_106 = arith.constant dense<0.000000e+00> : vector<64x192xf32>
    %266 = tpu.matmul %2, %265, %cst_106 {dimension_numbers = #tpu.dot_dimension_numbers<[1], [0], [0], [1], [0, 0, 1, 1], [], []>} : vector<64x16xf32>, vector<16x192xf32>, vector<64x192xf32> -> vector<64x192xf32>
    %267 = vector.extract_strided_slice %266 {offsets = [0, 0], sizes = [64, 64], strides = [1, 1]} : vector<64x192xf32> to vector<64x64xf32>
    %268 = vector.extract_strided_slice %3 {offsets = [0, 0], sizes = [64, 1], strides = [1, 1]} : vector<64x4xf32> to vector<64x1xf32>
    %269 = vector.extract_strided_slice %267 {offsets = [0, 0], sizes = [64, 16], strides = [1, 1]} : vector<64x64xf32> to vector<64x16xf32>
    %270 = vector.broadcast %268 : vector<64x1xf32> to vector<64x16xf32>
    %271 = arith.mulf %270, %269 : vector<64x16xf32>
    %272 = vector.extract_strided_slice %3 {offsets = [0, 1], sizes = [64, 1], strides = [1, 1]} : vector<64x4xf32> to vector<64x1xf32>
    %273 = vector.extract_strided_slice %267 {offsets = [0, 16], sizes = [64, 16], strides = [1, 1]} : vector<64x64xf32> to vector<64x16xf32>
    %274 = vector.broadcast %272 : vector<64x1xf32> to vector<64x16xf32>
    %275 = arith.mulf %274, %273 : vector<64x16xf32>
    %276 = arith.addf %271, %275 : vector<64x16xf32>
    %277 = vector.extract_strided_slice %3 {offsets = [0, 2], sizes = [64, 1], strides = [1, 1]} : vector<64x4xf32> to vector<64x1xf32>
    %278 = vector.extract_strided_slice %267 {offsets = [0, 32], sizes = [64, 16], strides = [1, 1]} : vector<64x64xf32> to vector<64x16xf32>
    %279 = vector.broadcast %277 : vector<64x1xf32> to vector<64x16xf32>
    %280 = arith.mulf %279, %278 : vector<64x16xf32>
    %281 = arith.addf %276, %280 : vector<64x16xf32>
    %282 = vector.extract_strided_slice %3 {offsets = [0, 3], sizes = [64, 1], strides = [1, 1]} : vector<64x4xf32> to vector<64x1xf32>
    %283 = vector.extract_strided_slice %267 {offsets = [0, 48], sizes = [64, 16], strides = [1, 1]} : vector<64x64xf32> to vector<64x16xf32>
    %284 = vector.broadcast %282 : vector<64x1xf32> to vector<64x16xf32>
    %285 = arith.mulf %284, %283 : vector<64x16xf32>
    %286 = arith.addf %281, %285 : vector<64x16xf32>
    %287 = vector.extract_strided_slice %286 {offsets = [0, 0], sizes = [64, 8], strides = [1, 1]} : vector<64x16xf32> to vector<64x8xf32>
    %288 = vector.extract_strided_slice %286 {offsets = [0, 8], sizes = [64, 8], strides = [1, 1]} : vector<64x16xf32> to vector<64x8xf32>
    %289 = arith.mulf %287, %1 : vector<64x8xf32>
    %290 = arith.mulf %288, %0 : vector<64x8xf32>
    %291 = arith.subf %289, %290 : vector<64x8xf32>
    %292 = arith.mulf %287, %0 : vector<64x8xf32>
    %293 = arith.mulf %288, %1 : vector<64x8xf32>
    %294 = arith.addf %292, %293 : vector<64x8xf32>
    %295 = tpu.concatenate %291, %294 in 1 : vector<64x8xf32>, vector<64x8xf32> -> vector<64x16xf32>
    %296 = vector.extract_strided_slice %266 {offsets = [0, 64], sizes = [64, 64], strides = [1, 1]} : vector<64x192xf32> to vector<64x64xf32>
    %297 = vector.extract_strided_slice %3 {offsets = [0, 0], sizes = [64, 1], strides = [1, 1]} : vector<64x4xf32> to vector<64x1xf32>
    %298 = vector.extract_strided_slice %296 {offsets = [0, 0], sizes = [64, 16], strides = [1, 1]} : vector<64x64xf32> to vector<64x16xf32>
    %299 = vector.broadcast %297 : vector<64x1xf32> to vector<64x16xf32>
    %300 = arith.mulf %299, %298 : vector<64x16xf32>
    %301 = vector.extract_strided_slice %3 {offsets = [0, 1], sizes = [64, 1], strides = [1, 1]} : vector<64x4xf32> to vector<64x1xf32>
    %302 = vector.extract_strided_slice %296 {offsets = [0, 16], sizes = [64, 16], strides = [1, 1]} : vector<64x64xf32> to vector<64x16xf32>
    %303 = vector.broadcast %301 : vector<64x1xf32> to vector<64x16xf32>
    %304 = arith.mulf %303, %302 : vector<64x16xf32>
    %305 = arith.addf %300, %304 : vector<64x16xf32>
    %306 = vector.extract_strided_slice %3 {offsets = [0, 2], sizes = [64, 1], strides = [1, 1]} : vector<64x4xf32> to vector<64x1xf32>
    %307 = vector.extract_strided_slice %296 {offsets = [0, 32], sizes = [64, 16], strides = [1, 1]} : vector<64x64xf32> to vector<64x16xf32>
    %308 = vector.broadcast %306 : vector<64x1xf32> to vector<64x16xf32>
    %309 = arith.mulf %308, %307 : vector<64x16xf32>
    %310 = arith.addf %305, %309 : vector<64x16xf32>
    %311 = vector.extract_strided_slice %3 {offsets = [0, 3], sizes = [64, 1], strides = [1, 1]} : vector<64x4xf32> to vector<64x1xf32>
    %312 = vector.extract_strided_slice %296 {offsets = [0, 48], sizes = [64, 16], strides = [1, 1]} : vector<64x64xf32> to vector<64x16xf32>
    %313 = vector.broadcast %311 : vector<64x1xf32> to vector<64x16xf32>
    %314 = arith.mulf %313, %312 : vector<64x16xf32>
    %315 = arith.addf %310, %314 : vector<64x16xf32>
    %316 = vector.extract_strided_slice %315 {offsets = [0, 0], sizes = [64, 8], strides = [1, 1]} : vector<64x16xf32> to vector<64x8xf32>
    %317 = vector.extract_strided_slice %315 {offsets = [0, 8], sizes = [64, 8], strides = [1, 1]} : vector<64x16xf32> to vector<64x8xf32>
    %318 = arith.mulf %316, %1 : vector<64x8xf32>
    %319 = arith.mulf %317, %0 : vector<64x8xf32>
    %320 = arith.subf %318, %319 : vector<64x8xf32>
    %321 = arith.mulf %316, %0 : vector<64x8xf32>
    %322 = arith.mulf %317, %1 : vector<64x8xf32>
    %323 = arith.addf %321, %322 : vector<64x8xf32>
    %324 = tpu.concatenate %320, %323 in 1 : vector<64x8xf32>, vector<64x8xf32> -> vector<64x16xf32>
    %325 = vector.extract_strided_slice %266 {offsets = [0, 128], sizes = [64, 64], strides = [1, 1]} : vector<64x192xf32> to vector<64x64xf32>
    %326 = vector.extract_strided_slice %3 {offsets = [0, 0], sizes = [64, 1], strides = [1, 1]} : vector<64x4xf32> to vector<64x1xf32>
    %327 = vector.extract_strided_slice %325 {offsets = [0, 0], sizes = [64, 16], strides = [1, 1]} : vector<64x64xf32> to vector<64x16xf32>
    %328 = vector.broadcast %326 : vector<64x1xf32> to vector<64x16xf32>
    %329 = arith.mulf %328, %327 : vector<64x16xf32>
    %330 = vector.extract_strided_slice %3 {offsets = [0, 1], sizes = [64, 1], strides = [1, 1]} : vector<64x4xf32> to vector<64x1xf32>
    %331 = vector.extract_strided_slice %325 {offsets = [0, 16], sizes = [64, 16], strides = [1, 1]} : vector<64x64xf32> to vector<64x16xf32>
    %332 = vector.broadcast %330 : vector<64x1xf32> to vector<64x16xf32>
    %333 = arith.mulf %332, %331 : vector<64x16xf32>
    %334 = arith.addf %329, %333 : vector<64x16xf32>
    %335 = vector.extract_strided_slice %3 {offsets = [0, 2], sizes = [64, 1], strides = [1, 1]} : vector<64x4xf32> to vector<64x1xf32>
    %336 = vector.extract_strided_slice %325 {offsets = [0, 32], sizes = [64, 16], strides = [1, 1]} : vector<64x64xf32> to vector<64x16xf32>
    %337 = vector.broadcast %335 : vector<64x1xf32> to vector<64x16xf32>
    %338 = arith.mulf %337, %336 : vector<64x16xf32>
    %339 = arith.addf %334, %338 : vector<64x16xf32>
    %340 = vector.extract_strided_slice %3 {offsets = [0, 3], sizes = [64, 1], strides = [1, 1]} : vector<64x4xf32> to vector<64x1xf32>
    %341 = vector.extract_strided_slice %325 {offsets = [0, 48], sizes = [64, 16], strides = [1, 1]} : vector<64x64xf32> to vector<64x16xf32>
    %342 = vector.broadcast %340 : vector<64x1xf32> to vector<64x16xf32>
    %343 = arith.mulf %342, %341 : vector<64x16xf32>
    %344 = arith.addf %339, %343 : vector<64x16xf32>
    %cst_107 = arith.constant dense<0.000000e+00> : vector<64x64xf32>
    %345 = tpu.matmul %295, %324, %cst_107 {dimension_numbers = #tpu.dot_dimension_numbers<[1], [1], [0], [0], [0, 0, 1, 0], [], []>} : vector<64x16xf32>, vector<64x16xf32>, vector<64x64xf32> -> vector<64x64xf32>
    %cst_108 = arith.constant 2.500000e-01 : f32
    %346 = vector.broadcast %cst_108 : f32 to vector<64x64xf32>
    %347 = arith.mulf %345, %346 : vector<64x64xf32>
    %348 = arith.addf %347, %4 : vector<64x64xf32>
    %cst_109 = arith.constant dense<0xFF800000> : vector<64xf32>
    %349 = vector.multi_reduction <maximumf>, %348, %cst_109 [1] : vector<64x64xf32> to vector<64xf32>
    %350 = vector.shape_cast %349 : vector<64xf32> to vector<64x1xf32>
    %351 = vector.broadcast %350 : vector<64x1xf32> to vector<64x64xf32>
    %352 = arith.subf %348, %351 : vector<64x64xf32>
    %353 = math.exp %352 : vector<64x64xf32>
    %cst_110 = arith.constant dense<0.000000e+00> : vector<64xf32>
    %354 = vector.multi_reduction <add>, %353, %cst_110 [1] : vector<64x64xf32> to vector<64xf32>
    %355 = vector.shape_cast %354 : vector<64xf32> to vector<64x1xf32>
    %356 = vector.broadcast %355 : vector<64x1xf32> to vector<64x64xf32>
    %357 = arith.divf %353, %356 : vector<64x64xf32>
    %cst_111 = arith.constant dense<0.000000e+00> : vector<64x16xf32>
    %358 = tpu.matmul %357, %344, %cst_111 {dimension_numbers = #tpu.dot_dimension_numbers<[1], [0], [0], [1], [0, 0, 1, 1], [], []>} : vector<64x64xf32>, vector<64x16xf32>, vector<64x16xf32> -> vector<64x16xf32>
    %cst_112 = arith.constant dense<0.000000e+00> : vector<64x16xf32>
    %359 = tpu.matmul %5, %358, %cst_112 {dimension_numbers = #tpu.dot_dimension_numbers<[1], [0], [0], [1], [0, 0, 1, 1], [], []>} : vector<64x64xf32>, vector<64x16xf32>, vector<64x16xf32> -> vector<64x16xf32>
    %360 = vector.extract_strided_slice %359 {offsets = [0, 0], sizes = [16, 16], strides = [1, 1]} : vector<64x16xf32> to vector<16x16xf32>
    %361 = vector.extract_strided_slice %359 {offsets = [16, 0], sizes = [16, 16], strides = [1, 1]} : vector<64x16xf32> to vector<16x16xf32>
    %362 = vector.extract_strided_slice %359 {offsets = [32, 0], sizes = [16, 16], strides = [1, 1]} : vector<64x16xf32> to vector<16x16xf32>
    %363 = vector.extract_strided_slice %359 {offsets = [48, 0], sizes = [16, 16], strides = [1, 1]} : vector<64x16xf32> to vector<16x16xf32>
    %364 = tpu.concatenate %360, %361, %362, %363 in 1 : vector<16x16xf32>, vector<16x16xf32>, vector<16x16xf32>, vector<16x16xf32> -> vector<16x64xf32>
    %c1_113 = arith.constant 1 : index
    %c0_114 = arith.constant 0 : index
    %c0_115 = arith.constant 0 : index
    %365 = vector.load %arg14[%c1_113, %c0_114, %c0_115] : memref<3x64x64xf32, #tpu.memory_space<vmem>>, vector<1x64x64xf32>
    %366 = vector.shape_cast %365 : vector<1x64x64xf32> to vector<64x64xf32>
    %cst_116 = arith.constant dense<0.000000e+00> : vector<16x64xf32>
    %367 = tpu.matmul %364, %366, %cst_116 {dimension_numbers = #tpu.dot_dimension_numbers<[1], [0], [0], [1], [0, 0, 1, 1], [], []>} : vector<16x64xf32>, vector<64x64xf32>, vector<16x64xf32> -> vector<16x64xf32>
    %368 = arith.addf %232, %367 : vector<16x64xf32>
    %c1_117 = arith.constant 1 : index
    %c0_118 = arith.constant 0 : index
    %c0_119 = arith.constant 0 : index
    %369 = vector.load %arg15[%c1_117, %c0_118, %c0_119] : memref<3x1x64xf32, #tpu.memory_space<vmem>>, vector<1x1x64xf32>
    %370 = vector.shape_cast %369 : vector<1x1x64xf32> to vector<1x64xf32>
    %371 = vector.broadcast %370 : vector<1x64xf32> to vector<16x64xf32>
    %372 = arith.addf %368, %371 : vector<16x64xf32>
    %c1_120 = arith.constant 1 : index
    %c0_121 = arith.constant 0 : index
    %c0_122 = arith.constant 0 : index
    %373 = vector.load %arg16[%c1_120, %c0_121, %c0_122] : memref<3x1x64xf32, #tpu.memory_space<vmem>>, vector<1x1x64xf32>
    %374 = vector.shape_cast %373 : vector<1x1x64xf32> to vector<1x64xf32>
    %c1_123 = arith.constant 1 : index
    %c0_124 = arith.constant 0 : index
    %c0_125 = arith.constant 0 : index
    %375 = vector.load %arg17[%c1_123, %c0_124, %c0_125] : memref<3x1x64xf32, #tpu.memory_space<vmem>>, vector<1x1x64xf32>
    %376 = vector.shape_cast %375 : vector<1x1x64xf32> to vector<1x64xf32>
    %cst_126 = arith.constant dense<0.000000e+00> : vector<16xf32>
    %377 = vector.multi_reduction <add>, %372, %cst_126 [1] : vector<16x64xf32> to vector<16xf32>
    %378 = vector.shape_cast %377 : vector<16xf32> to vector<16x1xf32>
    %cst_127 = arith.constant 6.400000e+01 : f32
    %379 = vector.broadcast %cst_127 : f32 to vector<16x1xf32>
    %380 = arith.divf %378, %379 : vector<16x1xf32>
    %381 = vector.broadcast %380 : vector<16x1xf32> to vector<16x64xf32>
    %382 = arith.subf %372, %381 : vector<16x64xf32>
    %383 = arith.mulf %382, %382 : vector<16x64xf32>
    %cst_128 = arith.constant dense<0.000000e+00> : vector<16xf32>
    %384 = vector.multi_reduction <add>, %383, %cst_128 [1] : vector<16x64xf32> to vector<16xf32>
    %385 = vector.shape_cast %384 : vector<16xf32> to vector<16x1xf32>
    %cst_129 = arith.constant 6.400000e+01 : f32
    %386 = vector.broadcast %cst_129 : f32 to vector<16x1xf32>
    %387 = arith.divf %385, %386 : vector<16x1xf32>
    %388 = vector.broadcast %380 : vector<16x1xf32> to vector<16x64xf32>
    %389 = arith.subf %372, %388 : vector<16x64xf32>
    %cst_130 = arith.constant 9.99999974E-6 : f32
    %390 = vector.broadcast %cst_130 : f32 to vector<16x1xf32>
    %391 = arith.addf %387, %390 : vector<16x1xf32>
    %392 = math.rsqrt %391 : vector<16x1xf32>
    %393 = vector.broadcast %392 : vector<16x1xf32> to vector<16x64xf32>
    %394 = arith.mulf %389, %393 : vector<16x64xf32>
    %395 = vector.broadcast %374 : vector<1x64xf32> to vector<16x64xf32>
    %396 = arith.mulf %394, %395 : vector<16x64xf32>
    %397 = vector.broadcast %376 : vector<1x64xf32> to vector<16x64xf32>
    %398 = arith.addf %396, %397 : vector<16x64xf32>
    %c1_131 = arith.constant 1 : index
    %c0_132 = arith.constant 0 : index
    %c0_133 = arith.constant 0 : index
    %399 = vector.load %arg18[%c1_131, %c0_132, %c0_133] : memref<3x64x256xf32, #tpu.memory_space<vmem>>, vector<1x64x256xf32>
    %400 = vector.shape_cast %399 : vector<1x64x256xf32> to vector<64x256xf32>
    %cst_134 = arith.constant dense<0.000000e+00> : vector<16x256xf32>
    %401 = tpu.matmul %398, %400, %cst_134 {dimension_numbers = #tpu.dot_dimension_numbers<[1], [0], [0], [1], [0, 0, 1, 1], [], []>} : vector<16x64xf32>, vector<64x256xf32>, vector<16x256xf32> -> vector<16x256xf32>
    %c1_135 = arith.constant 1 : index
    %c0_136 = arith.constant 0 : index
    %c0_137 = arith.constant 0 : index
    %402 = vector.load %arg19[%c1_135, %c0_136, %c0_137] : memref<3x1x256xf32, #tpu.memory_space<vmem>>, vector<1x1x256xf32>
    %403 = vector.shape_cast %402 : vector<1x1x256xf32> to vector<1x256xf32>
    %404 = vector.broadcast %403 : vector<1x256xf32> to vector<16x256xf32>
    %405 = arith.addf %401, %404 : vector<16x256xf32>
    %cst_138 = arith.constant 5.000000e-01 : f32
    %406 = vector.broadcast %cst_138 : f32 to vector<16x256xf32>
    %407 = arith.mulf %406, %405 : vector<16x256xf32>
    %cst_139 = arith.constant 0.707106769 : f32
    %408 = vector.broadcast %cst_139 : f32 to vector<16x256xf32>
    %409 = arith.mulf %405, %408 : vector<16x256xf32>
    %410 = math.absf %409 : vector<16x256xf32>
    %cst_140 = arith.constant 0.327591091 : f32
    %411 = vector.broadcast %cst_140 : f32 to vector<16x256xf32>
    %412 = arith.mulf %411, %410 : vector<16x256xf32>
    %cst_141 = arith.constant 1.000000e+00 : f32
    %413 = vector.broadcast %cst_141 : f32 to vector<16x256xf32>
    %414 = arith.addf %413, %412 : vector<16x256xf32>
    %cst_142 = arith.constant 1.000000e+00 : f32
    %415 = vector.broadcast %cst_142 : f32 to vector<16x256xf32>
    %416 = arith.divf %415, %414 : vector<16x256xf32>
    %cst_143 = arith.constant 1.06140542 : f32
    %417 = vector.broadcast %cst_143 : f32 to vector<16x256xf32>
    %418 = arith.mulf %417, %416 : vector<16x256xf32>
    %cst_144 = arith.constant -1.45315206 : f32
    %419 = vector.broadcast %cst_144 : f32 to vector<16x256xf32>
    %420 = arith.addf %418, %419 : vector<16x256xf32>
    %421 = arith.mulf %420, %416 : vector<16x256xf32>
    %cst_145 = arith.constant 1.42141378 : f32
    %422 = vector.broadcast %cst_145 : f32 to vector<16x256xf32>
    %423 = arith.addf %421, %422 : vector<16x256xf32>
    %424 = arith.mulf %423, %416 : vector<16x256xf32>
    %cst_146 = arith.constant -0.284496725 : f32
    %425 = vector.broadcast %cst_146 : f32 to vector<16x256xf32>
    %426 = arith.addf %424, %425 : vector<16x256xf32>
    %427 = arith.mulf %426, %416 : vector<16x256xf32>
    %cst_147 = arith.constant 0.254829586 : f32
    %428 = vector.broadcast %cst_147 : f32 to vector<16x256xf32>
    %429 = arith.addf %427, %428 : vector<16x256xf32>
    %430 = arith.mulf %429, %416 : vector<16x256xf32>
    %cst_148 = arith.constant 0.000000e+00 : f32
    %431 = vector.broadcast %cst_148 : f32 to vector<16x256xf32>
    %432 = arith.subf %431, %410 : vector<16x256xf32>
    %433 = arith.mulf %432, %410 : vector<16x256xf32>
    %434 = math.exp %433 : vector<16x256xf32>
    %435 = arith.mulf %430, %434 : vector<16x256xf32>
    %cst_149 = arith.constant 1.000000e+00 : f32
    %436 = vector.broadcast %cst_149 : f32 to vector<16x256xf32>
    %437 = arith.subf %436, %435 : vector<16x256xf32>
    %cst_150 = arith.constant 0.000000e+00 : f32
    %438 = vector.broadcast %cst_150 : f32 to vector<16x256xf32>
    %439 = arith.cmpf oge, %409, %438 : vector<16x256xf32>
    %cst_151 = arith.constant 0.000000e+00 : f32
    %440 = vector.broadcast %cst_151 : f32 to vector<16x256xf32>
    %441 = arith.subf %440, %437 : vector<16x256xf32>
    %442 = arith.select %439, %437, %441 : vector<16x256xi1>, vector<16x256xf32>
    %cst_152 = arith.constant 1.000000e+00 : f32
    %443 = vector.broadcast %cst_152 : f32 to vector<16x256xf32>
    %444 = arith.addf %443, %442 : vector<16x256xf32>
    %445 = arith.mulf %407, %444 : vector<16x256xf32>
    %c1_153 = arith.constant 1 : index
    %c0_154 = arith.constant 0 : index
    %c0_155 = arith.constant 0 : index
    %446 = vector.load %arg20[%c1_153, %c0_154, %c0_155] : memref<3x256x64xf32, #tpu.memory_space<vmem>>, vector<1x256x64xf32>
    %447 = vector.shape_cast %446 : vector<1x256x64xf32> to vector<256x64xf32>
    %cst_156 = arith.constant dense<0.000000e+00> : vector<16x64xf32>
    %448 = tpu.matmul %445, %447, %cst_156 {dimension_numbers = #tpu.dot_dimension_numbers<[1], [0], [0], [1], [0, 0, 1, 1], [], []>} : vector<16x256xf32>, vector<256x64xf32>, vector<16x64xf32> -> vector<16x64xf32>
    %449 = arith.addf %372, %448 : vector<16x64xf32>
    %c1_157 = arith.constant 1 : index
    %c0_158 = arith.constant 0 : index
    %c0_159 = arith.constant 0 : index
    %450 = vector.load %arg21[%c1_157, %c0_158, %c0_159] : memref<3x1x64xf32, #tpu.memory_space<vmem>>, vector<1x1x64xf32>
    %451 = vector.shape_cast %450 : vector<1x1x64xf32> to vector<1x64xf32>
    %452 = vector.broadcast %451 : vector<1x64xf32> to vector<16x64xf32>
    %453 = arith.addf %449, %452 : vector<16x64xf32>
    %c2 = arith.constant 2 : index
    %c0_160 = arith.constant 0 : index
    %c0_161 = arith.constant 0 : index
    %454 = vector.load %arg10[%c2, %c0_160, %c0_161] : memref<3x1x64xf32, #tpu.memory_space<vmem>>, vector<1x1x64xf32>
    %455 = vector.shape_cast %454 : vector<1x1x64xf32> to vector<1x64xf32>
    %c2_162 = arith.constant 2 : index
    %c0_163 = arith.constant 0 : index
    %c0_164 = arith.constant 0 : index
    %456 = vector.load %arg11[%c2_162, %c0_163, %c0_164] : memref<3x1x64xf32, #tpu.memory_space<vmem>>, vector<1x1x64xf32>
    %457 = vector.shape_cast %456 : vector<1x1x64xf32> to vector<1x64xf32>
    %cst_165 = arith.constant dense<0.000000e+00> : vector<16xf32>
    %458 = vector.multi_reduction <add>, %453, %cst_165 [1] : vector<16x64xf32> to vector<16xf32>
    %459 = vector.shape_cast %458 : vector<16xf32> to vector<16x1xf32>
    %cst_166 = arith.constant 6.400000e+01 : f32
    %460 = vector.broadcast %cst_166 : f32 to vector<16x1xf32>
    %461 = arith.divf %459, %460 : vector<16x1xf32>
    %462 = vector.broadcast %461 : vector<16x1xf32> to vector<16x64xf32>
    %463 = arith.subf %453, %462 : vector<16x64xf32>
    %464 = arith.mulf %463, %463 : vector<16x64xf32>
    %cst_167 = arith.constant dense<0.000000e+00> : vector<16xf32>
    %465 = vector.multi_reduction <add>, %464, %cst_167 [1] : vector<16x64xf32> to vector<16xf32>
    %466 = vector.shape_cast %465 : vector<16xf32> to vector<16x1xf32>
    %cst_168 = arith.constant 6.400000e+01 : f32
    %467 = vector.broadcast %cst_168 : f32 to vector<16x1xf32>
    %468 = arith.divf %466, %467 : vector<16x1xf32>
    %469 = vector.broadcast %461 : vector<16x1xf32> to vector<16x64xf32>
    %470 = arith.subf %453, %469 : vector<16x64xf32>
    %cst_169 = arith.constant 9.99999974E-6 : f32
    %471 = vector.broadcast %cst_169 : f32 to vector<16x1xf32>
    %472 = arith.addf %468, %471 : vector<16x1xf32>
    %473 = math.rsqrt %472 : vector<16x1xf32>
    %474 = vector.broadcast %473 : vector<16x1xf32> to vector<16x64xf32>
    %475 = arith.mulf %470, %474 : vector<16x64xf32>
    %476 = vector.broadcast %455 : vector<1x64xf32> to vector<16x64xf32>
    %477 = arith.mulf %475, %476 : vector<16x64xf32>
    %478 = vector.broadcast %457 : vector<1x64xf32> to vector<16x64xf32>
    %479 = arith.addf %477, %478 : vector<16x64xf32>
    %c2_170 = arith.constant 2 : index
    %c0_171 = arith.constant 0 : index
    %c0_172 = arith.constant 0 : index
    %480 = vector.load %arg12[%c2_170, %c0_171, %c0_172] : memref<3x64x192xf32, #tpu.memory_space<vmem>>, vector<1x64x192xf32>
    %481 = vector.shape_cast %480 : vector<1x64x192xf32> to vector<64x192xf32>
    %cst_173 = arith.constant dense<0.000000e+00> : vector<16x192xf32>
    %482 = tpu.matmul %479, %481, %cst_173 {dimension_numbers = #tpu.dot_dimension_numbers<[1], [0], [0], [1], [0, 0, 1, 1], [], []>} : vector<16x64xf32>, vector<64x192xf32>, vector<16x192xf32> -> vector<16x192xf32>
    %c2_174 = arith.constant 2 : index
    %c0_175 = arith.constant 0 : index
    %c0_176 = arith.constant 0 : index
    %483 = vector.load %arg13[%c2_174, %c0_175, %c0_176] : memref<3x1x192xf32, #tpu.memory_space<vmem>>, vector<1x1x192xf32>
    %484 = vector.shape_cast %483 : vector<1x1x192xf32> to vector<1x192xf32>
    %485 = vector.broadcast %484 : vector<1x192xf32> to vector<16x192xf32>
    %486 = arith.addf %482, %485 : vector<16x192xf32>
    %cst_177 = arith.constant dense<0.000000e+00> : vector<64x192xf32>
    %487 = tpu.matmul %2, %486, %cst_177 {dimension_numbers = #tpu.dot_dimension_numbers<[1], [0], [0], [1], [0, 0, 1, 1], [], []>} : vector<64x16xf32>, vector<16x192xf32>, vector<64x192xf32> -> vector<64x192xf32>
    %488 = vector.extract_strided_slice %487 {offsets = [0, 0], sizes = [64, 64], strides = [1, 1]} : vector<64x192xf32> to vector<64x64xf32>
    %489 = vector.extract_strided_slice %3 {offsets = [0, 0], sizes = [64, 1], strides = [1, 1]} : vector<64x4xf32> to vector<64x1xf32>
    %490 = vector.extract_strided_slice %488 {offsets = [0, 0], sizes = [64, 16], strides = [1, 1]} : vector<64x64xf32> to vector<64x16xf32>
    %491 = vector.broadcast %489 : vector<64x1xf32> to vector<64x16xf32>
    %492 = arith.mulf %491, %490 : vector<64x16xf32>
    %493 = vector.extract_strided_slice %3 {offsets = [0, 1], sizes = [64, 1], strides = [1, 1]} : vector<64x4xf32> to vector<64x1xf32>
    %494 = vector.extract_strided_slice %488 {offsets = [0, 16], sizes = [64, 16], strides = [1, 1]} : vector<64x64xf32> to vector<64x16xf32>
    %495 = vector.broadcast %493 : vector<64x1xf32> to vector<64x16xf32>
    %496 = arith.mulf %495, %494 : vector<64x16xf32>
    %497 = arith.addf %492, %496 : vector<64x16xf32>
    %498 = vector.extract_strided_slice %3 {offsets = [0, 2], sizes = [64, 1], strides = [1, 1]} : vector<64x4xf32> to vector<64x1xf32>
    %499 = vector.extract_strided_slice %488 {offsets = [0, 32], sizes = [64, 16], strides = [1, 1]} : vector<64x64xf32> to vector<64x16xf32>
    %500 = vector.broadcast %498 : vector<64x1xf32> to vector<64x16xf32>
    %501 = arith.mulf %500, %499 : vector<64x16xf32>
    %502 = arith.addf %497, %501 : vector<64x16xf32>
    %503 = vector.extract_strided_slice %3 {offsets = [0, 3], sizes = [64, 1], strides = [1, 1]} : vector<64x4xf32> to vector<64x1xf32>
    %504 = vector.extract_strided_slice %488 {offsets = [0, 48], sizes = [64, 16], strides = [1, 1]} : vector<64x64xf32> to vector<64x16xf32>
    %505 = vector.broadcast %503 : vector<64x1xf32> to vector<64x16xf32>
    %506 = arith.mulf %505, %504 : vector<64x16xf32>
    %507 = arith.addf %502, %506 : vector<64x16xf32>
    %508 = vector.extract_strided_slice %507 {offsets = [0, 0], sizes = [64, 8], strides = [1, 1]} : vector<64x16xf32> to vector<64x8xf32>
    %509 = vector.extract_strided_slice %507 {offsets = [0, 8], sizes = [64, 8], strides = [1, 1]} : vector<64x16xf32> to vector<64x8xf32>
    %510 = arith.mulf %508, %1 : vector<64x8xf32>
    %511 = arith.mulf %509, %0 : vector<64x8xf32>
    %512 = arith.subf %510, %511 : vector<64x8xf32>
    %513 = arith.mulf %508, %0 : vector<64x8xf32>
    %514 = arith.mulf %509, %1 : vector<64x8xf32>
    %515 = arith.addf %513, %514 : vector<64x8xf32>
    %516 = tpu.concatenate %512, %515 in 1 : vector<64x8xf32>, vector<64x8xf32> -> vector<64x16xf32>
    %517 = vector.extract_strided_slice %487 {offsets = [0, 64], sizes = [64, 64], strides = [1, 1]} : vector<64x192xf32> to vector<64x64xf32>
    %518 = vector.extract_strided_slice %3 {offsets = [0, 0], sizes = [64, 1], strides = [1, 1]} : vector<64x4xf32> to vector<64x1xf32>
    %519 = vector.extract_strided_slice %517 {offsets = [0, 0], sizes = [64, 16], strides = [1, 1]} : vector<64x64xf32> to vector<64x16xf32>
    %520 = vector.broadcast %518 : vector<64x1xf32> to vector<64x16xf32>
    %521 = arith.mulf %520, %519 : vector<64x16xf32>
    %522 = vector.extract_strided_slice %3 {offsets = [0, 1], sizes = [64, 1], strides = [1, 1]} : vector<64x4xf32> to vector<64x1xf32>
    %523 = vector.extract_strided_slice %517 {offsets = [0, 16], sizes = [64, 16], strides = [1, 1]} : vector<64x64xf32> to vector<64x16xf32>
    %524 = vector.broadcast %522 : vector<64x1xf32> to vector<64x16xf32>
    %525 = arith.mulf %524, %523 : vector<64x16xf32>
    %526 = arith.addf %521, %525 : vector<64x16xf32>
    %527 = vector.extract_strided_slice %3 {offsets = [0, 2], sizes = [64, 1], strides = [1, 1]} : vector<64x4xf32> to vector<64x1xf32>
    %528 = vector.extract_strided_slice %517 {offsets = [0, 32], sizes = [64, 16], strides = [1, 1]} : vector<64x64xf32> to vector<64x16xf32>
    %529 = vector.broadcast %527 : vector<64x1xf32> to vector<64x16xf32>
    %530 = arith.mulf %529, %528 : vector<64x16xf32>
    %531 = arith.addf %526, %530 : vector<64x16xf32>
    %532 = vector.extract_strided_slice %3 {offsets = [0, 3], sizes = [64, 1], strides = [1, 1]} : vector<64x4xf32> to vector<64x1xf32>
    %533 = vector.extract_strided_slice %517 {offsets = [0, 48], sizes = [64, 16], strides = [1, 1]} : vector<64x64xf32> to vector<64x16xf32>
    %534 = vector.broadcast %532 : vector<64x1xf32> to vector<64x16xf32>
    %535 = arith.mulf %534, %533 : vector<64x16xf32>
    %536 = arith.addf %531, %535 : vector<64x16xf32>
    %537 = vector.extract_strided_slice %536 {offsets = [0, 0], sizes = [64, 8], strides = [1, 1]} : vector<64x16xf32> to vector<64x8xf32>
    %538 = vector.extract_strided_slice %536 {offsets = [0, 8], sizes = [64, 8], strides = [1, 1]} : vector<64x16xf32> to vector<64x8xf32>
    %539 = arith.mulf %537, %1 : vector<64x8xf32>
    %540 = arith.mulf %538, %0 : vector<64x8xf32>
    %541 = arith.subf %539, %540 : vector<64x8xf32>
    %542 = arith.mulf %537, %0 : vector<64x8xf32>
    %543 = arith.mulf %538, %1 : vector<64x8xf32>
    %544 = arith.addf %542, %543 : vector<64x8xf32>
    %545 = tpu.concatenate %541, %544 in 1 : vector<64x8xf32>, vector<64x8xf32> -> vector<64x16xf32>
    %546 = vector.extract_strided_slice %487 {offsets = [0, 128], sizes = [64, 64], strides = [1, 1]} : vector<64x192xf32> to vector<64x64xf32>
    %547 = vector.extract_strided_slice %3 {offsets = [0, 0], sizes = [64, 1], strides = [1, 1]} : vector<64x4xf32> to vector<64x1xf32>
    %548 = vector.extract_strided_slice %546 {offsets = [0, 0], sizes = [64, 16], strides = [1, 1]} : vector<64x64xf32> to vector<64x16xf32>
    %549 = vector.broadcast %547 : vector<64x1xf32> to vector<64x16xf32>
    %550 = arith.mulf %549, %548 : vector<64x16xf32>
    %551 = vector.extract_strided_slice %3 {offsets = [0, 1], sizes = [64, 1], strides = [1, 1]} : vector<64x4xf32> to vector<64x1xf32>
    %552 = vector.extract_strided_slice %546 {offsets = [0, 16], sizes = [64, 16], strides = [1, 1]} : vector<64x64xf32> to vector<64x16xf32>
    %553 = vector.broadcast %551 : vector<64x1xf32> to vector<64x16xf32>
    %554 = arith.mulf %553, %552 : vector<64x16xf32>
    %555 = arith.addf %550, %554 : vector<64x16xf32>
    %556 = vector.extract_strided_slice %3 {offsets = [0, 2], sizes = [64, 1], strides = [1, 1]} : vector<64x4xf32> to vector<64x1xf32>
    %557 = vector.extract_strided_slice %546 {offsets = [0, 32], sizes = [64, 16], strides = [1, 1]} : vector<64x64xf32> to vector<64x16xf32>
    %558 = vector.broadcast %556 : vector<64x1xf32> to vector<64x16xf32>
    %559 = arith.mulf %558, %557 : vector<64x16xf32>
    %560 = arith.addf %555, %559 : vector<64x16xf32>
    %561 = vector.extract_strided_slice %3 {offsets = [0, 3], sizes = [64, 1], strides = [1, 1]} : vector<64x4xf32> to vector<64x1xf32>
    %562 = vector.extract_strided_slice %546 {offsets = [0, 48], sizes = [64, 16], strides = [1, 1]} : vector<64x64xf32> to vector<64x16xf32>
    %563 = vector.broadcast %561 : vector<64x1xf32> to vector<64x16xf32>
    %564 = arith.mulf %563, %562 : vector<64x16xf32>
    %565 = arith.addf %560, %564 : vector<64x16xf32>
    %cst_178 = arith.constant dense<0.000000e+00> : vector<64x64xf32>
    %566 = tpu.matmul %516, %545, %cst_178 {dimension_numbers = #tpu.dot_dimension_numbers<[1], [1], [0], [0], [0, 0, 1, 0], [], []>} : vector<64x16xf32>, vector<64x16xf32>, vector<64x64xf32> -> vector<64x64xf32>
    %cst_179 = arith.constant 2.500000e-01 : f32
    %567 = vector.broadcast %cst_179 : f32 to vector<64x64xf32>
    %568 = arith.mulf %566, %567 : vector<64x64xf32>
    %569 = arith.addf %568, %4 : vector<64x64xf32>
    %cst_180 = arith.constant dense<0xFF800000> : vector<64xf32>
    %570 = vector.multi_reduction <maximumf>, %569, %cst_180 [1] : vector<64x64xf32> to vector<64xf32>
    %571 = vector.shape_cast %570 : vector<64xf32> to vector<64x1xf32>
    %572 = vector.broadcast %571 : vector<64x1xf32> to vector<64x64xf32>
    %573 = arith.subf %569, %572 : vector<64x64xf32>
    %574 = math.exp %573 : vector<64x64xf32>
    %cst_181 = arith.constant dense<0.000000e+00> : vector<64xf32>
    %575 = vector.multi_reduction <add>, %574, %cst_181 [1] : vector<64x64xf32> to vector<64xf32>
    %576 = vector.shape_cast %575 : vector<64xf32> to vector<64x1xf32>
    %577 = vector.broadcast %576 : vector<64x1xf32> to vector<64x64xf32>
    %578 = arith.divf %574, %577 : vector<64x64xf32>
    %cst_182 = arith.constant dense<0.000000e+00> : vector<64x16xf32>
    %579 = tpu.matmul %578, %565, %cst_182 {dimension_numbers = #tpu.dot_dimension_numbers<[1], [0], [0], [1], [0, 0, 1, 1], [], []>} : vector<64x64xf32>, vector<64x16xf32>, vector<64x16xf32> -> vector<64x16xf32>
    %cst_183 = arith.constant dense<0.000000e+00> : vector<64x16xf32>
    %580 = tpu.matmul %5, %579, %cst_183 {dimension_numbers = #tpu.dot_dimension_numbers<[1], [0], [0], [1], [0, 0, 1, 1], [], []>} : vector<64x64xf32>, vector<64x16xf32>, vector<64x16xf32> -> vector<64x16xf32>
    %581 = vector.extract_strided_slice %580 {offsets = [0, 0], sizes = [16, 16], strides = [1, 1]} : vector<64x16xf32> to vector<16x16xf32>
    %582 = vector.extract_strided_slice %580 {offsets = [16, 0], sizes = [16, 16], strides = [1, 1]} : vector<64x16xf32> to vector<16x16xf32>
    %583 = vector.extract_strided_slice %580 {offsets = [32, 0], sizes = [16, 16], strides = [1, 1]} : vector<64x16xf32> to vector<16x16xf32>
    %584 = vector.extract_strided_slice %580 {offsets = [48, 0], sizes = [16, 16], strides = [1, 1]} : vector<64x16xf32> to vector<16x16xf32>
    %585 = tpu.concatenate %581, %582, %583, %584 in 1 : vector<16x16xf32>, vector<16x16xf32>, vector<16x16xf32>, vector<16x16xf32> -> vector<16x64xf32>
    %c2_184 = arith.constant 2 : index
    %c0_185 = arith.constant 0 : index
    %c0_186 = arith.constant 0 : index
    %586 = vector.load %arg14[%c2_184, %c0_185, %c0_186] : memref<3x64x64xf32, #tpu.memory_space<vmem>>, vector<1x64x64xf32>
    %587 = vector.shape_cast %586 : vector<1x64x64xf32> to vector<64x64xf32>
    %cst_187 = arith.constant dense<0.000000e+00> : vector<16x64xf32>
    %588 = tpu.matmul %585, %587, %cst_187 {dimension_numbers = #tpu.dot_dimension_numbers<[1], [0], [0], [1], [0, 0, 1, 1], [], []>} : vector<16x64xf32>, vector<64x64xf32>, vector<16x64xf32> -> vector<16x64xf32>
    %589 = arith.addf %453, %588 : vector<16x64xf32>
    %c2_188 = arith.constant 2 : index
    %c0_189 = arith.constant 0 : index
    %c0_190 = arith.constant 0 : index
    %590 = vector.load %arg15[%c2_188, %c0_189, %c0_190] : memref<3x1x64xf32, #tpu.memory_space<vmem>>, vector<1x1x64xf32>
    %591 = vector.shape_cast %590 : vector<1x1x64xf32> to vector<1x64xf32>
    %592 = vector.broadcast %591 : vector<1x64xf32> to vector<16x64xf32>
    %593 = arith.addf %589, %592 : vector<16x64xf32>
    %c2_191 = arith.constant 2 : index
    %c0_192 = arith.constant 0 : index
    %c0_193 = arith.constant 0 : index
    %594 = vector.load %arg16[%c2_191, %c0_192, %c0_193] : memref<3x1x64xf32, #tpu.memory_space<vmem>>, vector<1x1x64xf32>
    %595 = vector.shape_cast %594 : vector<1x1x64xf32> to vector<1x64xf32>
    %c2_194 = arith.constant 2 : index
    %c0_195 = arith.constant 0 : index
    %c0_196 = arith.constant 0 : index
    %596 = vector.load %arg17[%c2_194, %c0_195, %c0_196] : memref<3x1x64xf32, #tpu.memory_space<vmem>>, vector<1x1x64xf32>
    %597 = vector.shape_cast %596 : vector<1x1x64xf32> to vector<1x64xf32>
    %cst_197 = arith.constant dense<0.000000e+00> : vector<16xf32>
    %598 = vector.multi_reduction <add>, %593, %cst_197 [1] : vector<16x64xf32> to vector<16xf32>
    %599 = vector.shape_cast %598 : vector<16xf32> to vector<16x1xf32>
    %cst_198 = arith.constant 6.400000e+01 : f32
    %600 = vector.broadcast %cst_198 : f32 to vector<16x1xf32>
    %601 = arith.divf %599, %600 : vector<16x1xf32>
    %602 = vector.broadcast %601 : vector<16x1xf32> to vector<16x64xf32>
    %603 = arith.subf %593, %602 : vector<16x64xf32>
    %604 = arith.mulf %603, %603 : vector<16x64xf32>
    %cst_199 = arith.constant dense<0.000000e+00> : vector<16xf32>
    %605 = vector.multi_reduction <add>, %604, %cst_199 [1] : vector<16x64xf32> to vector<16xf32>
    %606 = vector.shape_cast %605 : vector<16xf32> to vector<16x1xf32>
    %cst_200 = arith.constant 6.400000e+01 : f32
    %607 = vector.broadcast %cst_200 : f32 to vector<16x1xf32>
    %608 = arith.divf %606, %607 : vector<16x1xf32>
    %609 = vector.broadcast %601 : vector<16x1xf32> to vector<16x64xf32>
    %610 = arith.subf %593, %609 : vector<16x64xf32>
    %cst_201 = arith.constant 9.99999974E-6 : f32
    %611 = vector.broadcast %cst_201 : f32 to vector<16x1xf32>
    %612 = arith.addf %608, %611 : vector<16x1xf32>
    %613 = math.rsqrt %612 : vector<16x1xf32>
    %614 = vector.broadcast %613 : vector<16x1xf32> to vector<16x64xf32>
    %615 = arith.mulf %610, %614 : vector<16x64xf32>
    %616 = vector.broadcast %595 : vector<1x64xf32> to vector<16x64xf32>
    %617 = arith.mulf %615, %616 : vector<16x64xf32>
    %618 = vector.broadcast %597 : vector<1x64xf32> to vector<16x64xf32>
    %619 = arith.addf %617, %618 : vector<16x64xf32>
    %c2_202 = arith.constant 2 : index
    %c0_203 = arith.constant 0 : index
    %c0_204 = arith.constant 0 : index
    %620 = vector.load %arg18[%c2_202, %c0_203, %c0_204] : memref<3x64x256xf32, #tpu.memory_space<vmem>>, vector<1x64x256xf32>
    %621 = vector.shape_cast %620 : vector<1x64x256xf32> to vector<64x256xf32>
    %cst_205 = arith.constant dense<0.000000e+00> : vector<16x256xf32>
    %622 = tpu.matmul %619, %621, %cst_205 {dimension_numbers = #tpu.dot_dimension_numbers<[1], [0], [0], [1], [0, 0, 1, 1], [], []>} : vector<16x64xf32>, vector<64x256xf32>, vector<16x256xf32> -> vector<16x256xf32>
    %c2_206 = arith.constant 2 : index
    %c0_207 = arith.constant 0 : index
    %c0_208 = arith.constant 0 : index
    %623 = vector.load %arg19[%c2_206, %c0_207, %c0_208] : memref<3x1x256xf32, #tpu.memory_space<vmem>>, vector<1x1x256xf32>
    %624 = vector.shape_cast %623 : vector<1x1x256xf32> to vector<1x256xf32>
    %625 = vector.broadcast %624 : vector<1x256xf32> to vector<16x256xf32>
    %626 = arith.addf %622, %625 : vector<16x256xf32>
    %cst_209 = arith.constant 5.000000e-01 : f32
    %627 = vector.broadcast %cst_209 : f32 to vector<16x256xf32>
    %628 = arith.mulf %627, %626 : vector<16x256xf32>
    %cst_210 = arith.constant 0.707106769 : f32
    %629 = vector.broadcast %cst_210 : f32 to vector<16x256xf32>
    %630 = arith.mulf %626, %629 : vector<16x256xf32>
    %631 = math.absf %630 : vector<16x256xf32>
    %cst_211 = arith.constant 0.327591091 : f32
    %632 = vector.broadcast %cst_211 : f32 to vector<16x256xf32>
    %633 = arith.mulf %632, %631 : vector<16x256xf32>
    %cst_212 = arith.constant 1.000000e+00 : f32
    %634 = vector.broadcast %cst_212 : f32 to vector<16x256xf32>
    %635 = arith.addf %634, %633 : vector<16x256xf32>
    %cst_213 = arith.constant 1.000000e+00 : f32
    %636 = vector.broadcast %cst_213 : f32 to vector<16x256xf32>
    %637 = arith.divf %636, %635 : vector<16x256xf32>
    %cst_214 = arith.constant 1.06140542 : f32
    %638 = vector.broadcast %cst_214 : f32 to vector<16x256xf32>
    %639 = arith.mulf %638, %637 : vector<16x256xf32>
    %cst_215 = arith.constant -1.45315206 : f32
    %640 = vector.broadcast %cst_215 : f32 to vector<16x256xf32>
    %641 = arith.addf %639, %640 : vector<16x256xf32>
    %642 = arith.mulf %641, %637 : vector<16x256xf32>
    %cst_216 = arith.constant 1.42141378 : f32
    %643 = vector.broadcast %cst_216 : f32 to vector<16x256xf32>
    %644 = arith.addf %642, %643 : vector<16x256xf32>
    %645 = arith.mulf %644, %637 : vector<16x256xf32>
    %cst_217 = arith.constant -0.284496725 : f32
    %646 = vector.broadcast %cst_217 : f32 to vector<16x256xf32>
    %647 = arith.addf %645, %646 : vector<16x256xf32>
    %648 = arith.mulf %647, %637 : vector<16x256xf32>
    %cst_218 = arith.constant 0.254829586 : f32
    %649 = vector.broadcast %cst_218 : f32 to vector<16x256xf32>
    %650 = arith.addf %648, %649 : vector<16x256xf32>
    %651 = arith.mulf %650, %637 : vector<16x256xf32>
    %cst_219 = arith.constant 0.000000e+00 : f32
    %652 = vector.broadcast %cst_219 : f32 to vector<16x256xf32>
    %653 = arith.subf %652, %631 : vector<16x256xf32>
    %654 = arith.mulf %653, %631 : vector<16x256xf32>
    %655 = math.exp %654 : vector<16x256xf32>
    %656 = arith.mulf %651, %655 : vector<16x256xf32>
    %cst_220 = arith.constant 1.000000e+00 : f32
    %657 = vector.broadcast %cst_220 : f32 to vector<16x256xf32>
    %658 = arith.subf %657, %656 : vector<16x256xf32>
    %cst_221 = arith.constant 0.000000e+00 : f32
    %659 = vector.broadcast %cst_221 : f32 to vector<16x256xf32>
    %660 = arith.cmpf oge, %630, %659 : vector<16x256xf32>
    %cst_222 = arith.constant 0.000000e+00 : f32
    %661 = vector.broadcast %cst_222 : f32 to vector<16x256xf32>
    %662 = arith.subf %661, %658 : vector<16x256xf32>
    %663 = arith.select %660, %658, %662 : vector<16x256xi1>, vector<16x256xf32>
    %cst_223 = arith.constant 1.000000e+00 : f32
    %664 = vector.broadcast %cst_223 : f32 to vector<16x256xf32>
    %665 = arith.addf %664, %663 : vector<16x256xf32>
    %666 = arith.mulf %628, %665 : vector<16x256xf32>
    %c2_224 = arith.constant 2 : index
    %c0_225 = arith.constant 0 : index
    %c0_226 = arith.constant 0 : index
    %667 = vector.load %arg20[%c2_224, %c0_225, %c0_226] : memref<3x256x64xf32, #tpu.memory_space<vmem>>, vector<1x256x64xf32>
    %668 = vector.shape_cast %667 : vector<1x256x64xf32> to vector<256x64xf32>
    %cst_227 = arith.constant dense<0.000000e+00> : vector<16x64xf32>
    %669 = tpu.matmul %666, %668, %cst_227 {dimension_numbers = #tpu.dot_dimension_numbers<[1], [0], [0], [1], [0, 0, 1, 1], [], []>} : vector<16x256xf32>, vector<256x64xf32>, vector<16x64xf32> -> vector<16x64xf32>
    %670 = arith.addf %593, %669 : vector<16x64xf32>
    %c2_228 = arith.constant 2 : index
    %c0_229 = arith.constant 0 : index
    %c0_230 = arith.constant 0 : index
    %671 = vector.load %arg21[%c2_228, %c0_229, %c0_230] : memref<3x1x64xf32, #tpu.memory_space<vmem>>, vector<1x1x64xf32>
    %672 = vector.shape_cast %671 : vector<1x1x64xf32> to vector<1x64xf32>
    %673 = vector.broadcast %672 : vector<1x64xf32> to vector<16x64xf32>
    %674 = arith.addf %670, %673 : vector<16x64xf32>
    %c0_231 = arith.constant 0 : index
    %c0_232 = arith.constant 0 : index
    %675 = vector.load %arg7[%c0_231, %c0_232] : memref<2x16xf32, #tpu.memory_space<vmem>>, vector<2x16xf32>
    %cst_233 = arith.constant dense<0.000000e+00> : vector<2x64xf32>
    %676 = tpu.matmul %675, %674, %cst_233 {dimension_numbers = #tpu.dot_dimension_numbers<[1], [0], [0], [1], [0, 0, 1, 1], [], []>} : vector<2x16xf32>, vector<16x64xf32>, vector<2x64xf32> -> vector<2x64xf32>
    %c0_234 = arith.constant 0 : index
    %c0_235 = arith.constant 0 : index
    %677 = vector.load %arg22[%c0_234, %c0_235] : memref<64x128xf32, #tpu.memory_space<vmem>>, vector<64x128xf32>
    %cst_236 = arith.constant dense<0.000000e+00> : vector<2x128xf32>
    %678 = tpu.matmul %676, %677, %cst_236 {dimension_numbers = #tpu.dot_dimension_numbers<[1], [0], [0], [1], [0, 0, 1, 1], [], []>} : vector<2x64xf32>, vector<64x128xf32>, vector<2x128xf32> -> vector<2x128xf32>
    %c0_237 = arith.constant 0 : index
    %c0_238 = arith.constant 0 : index
    %679 = vector.load %arg23[%c0_237, %c0_238] : memref<1x128xf32, #tpu.memory_space<vmem>>, vector<1x128xf32>
    %680 = vector.broadcast %679 : vector<1x128xf32> to vector<2x128xf32>
    %681 = arith.addf %678, %680 : vector<2x128xf32>
    %c0_239 = arith.constant 0 : index
    %c0_240 = arith.constant 0 : index
    %682 = vector.load %arg24[%c0_239, %c0_240] : memref<2x128xf32, #tpu.memory_space<vmem>>, vector<2x128xf32>
    tpu.vector_store %arg24[%c0_239, %c0_240], %681 {strides = array<i32>} : memref<2x128xf32, #tpu.memory_space<vmem>>, vector<2x128xf32>,
    return
  }
}

</mosaic_0001>

<bundles_post_ra>
// kernel: tpu_custom_call.1
= control target key start
LH: loop header
LB: loop body
LE: loop exit
PB: predicated region body
PF: predicated region fallthrough
CT: control target
= control target key end

     0   :  { %s11221_s0 = inlined_call_operand.vmem [shape: f32[16,2], index: 0, kind: input, shape index: {}]   ;;  %s11222_s1 = inlined_call_operand.vmem [shape: f32[64,8], index: 1, kind: input, shape index: {}]   ;;  %s11223_s2 = inlined_call_operand.vmem [shape: f32[64,8], index: 2, kind: input, shape index: {}]   ;;  %s11224_s3 = inlined_call_operand.vmem [shape: f32[64,16], index: 3, kind: input, shape index: {}]   ;;  %s11225_s4 = inlined_call_operand.vmem [shape: f32[64,4], index: 4, kind: input, shape index: {}]   ;;  %s11226_s5 = inlined_call_operand.vmem [shape: f32[64,64], index: 5, kind: input, shape index: {}]   ;;  %s11227_s6 = inlined_call_operand.vmem [shape: f32[64,64], index: 6, kind: input, shape index: {}]   ;;  %s11228_s7 = inlined_call_operand.vmem [shape: f32[2,16], index: 7, kind: input, shape index: {}]   ;;  %s11229_s8 = inlined_call_operand.vmem [shape: f32[2,64], index: 8, kind: input, shape index: {}]   ;;  %s11230_s9 = inlined_call_operand.vmem [shape: f32[1,64], index: 9, kind: input, shape index: {}]   ;;  %s11231_s10 = inlined_call_operand.vmem [shape: f32[3,1,64], index: 10, kind: input, shape index: {}]   ;;  %s11232_s11 = inlined_call_operand.vmem [shape: f32[3,1,64], index: 11, kind: input, shape index: {}]   ;;  %s11233_s12 = inlined_call_operand.vmem [shape: f32[3,64,192], index: 12, kind: input, shape index: {}]   ;;  %s11234_s13 = inlined_call_operand.vmem [shape: f32[3,1,192], index: 13, kind: input, shape index: {}]   ;;  %s11235_s14 = inlined_call_operand.vmem [shape: f32[3,64,64], index: 14, kind: input, shape index: {}]   ;;  %s11236_s15 = inlined_call_operand.vmem [shape: f32[3,1,64], index: 15, kind: input, shape index: {}]   ;;  %s11237_s16 = inlined_call_operand.vmem [shape: f32[3,1,64], index: 16, kind: input, shape index: {}]   ;;  %s11238_s17 = inlined_call_operand.vmem [shape: f32[3,1,64], index: 17, kind: input, shape index: {}]   ;;  %s11239_s18 = inlined_call_operand.vmem [shape: f32[3,64,256], index: 18, kind: input, shape index: {}]   ;;  %s11240_s19 = inlined_call_operand.vmem [shape: f32[3,1,256], index: 19, kind: input, shape index: {}]   ;;  %s11241_s20 = inlined_call_operand.vmem [shape: f32[3,256,64], index: 20, kind: input, shape index: {}]   ;;  %s11242_s21 = inlined_call_operand.vmem [shape: f32[3,1,64], index: 21, kind: input, shape index: {}]   ;;  %s11243_s22 = inlined_call_operand.vmem [shape: f32[64,128], index: 22, kind: input, shape index: {}]   ;;  %s11244_s23 = inlined_call_operand.vmem [shape: f32[1,128], index: 23, kind: input, shape index: {}]   ;;  %s11245_s24 = inlined_call_operand.hbm [shape: f32[2,128], index: 24, kind: output, shape index: {}]  }
   0x1   :  { %11475 = sst [smem:[#allocation94_spill]] %s11221_s0 }
   0x2   :  { %11476 = sst [smem:[#allocation95_spill]] %s11222_s1 }
   0x3   :  { %11477 = sst [smem:[#allocation96_spill]] %s11223_s2 }
   0x4   :  { %11478 = sst [smem:[#allocation97_spill]] %s11224_s3 }
   0x5   :  { %11479 = sst [smem:[#allocation98_spill]] %s11225_s4 }
   0x6   :  { %11480 = sst [smem:[#allocation99_spill]] %s11226_s5 }
   0x7   :  { %11481 = sst [smem:[#allocation100_spill]] %s11227_s6 }
   0x8   :  { %11482 = sst [smem:[#allocation101_spill]] %s11228_s7 }
   0x9   :  { %11483 = sst [smem:[#allocation102_spill]] %s11229_s8 }
   0xa   :  { %11484 = sst [smem:[#allocation103_spill]] %s11235_s14 }
   0xb   :  { %11485 = sst [smem:[#allocation104_spill]] %s11236_s15 }
   0xc   :  { %11486 = sst [smem:[#allocation105_spill]] %s11243_s22 }
   0xd   :  { %11487 = sst [smem:[#allocation106_spill]] %s11244_s23 }
   0xe   :  { %11488 = sst [smem:[#allocation107_spill]] %s11245_s24 }
   0xf   :  { %s11489_s27 = sld [smem:[#allocation102_spill]]  ;;  %vm143_vm0 = vcmask 1041408   ;;  %vm136_vm1 = vcmask 15360  }
  0x10   :  { %s11490_s2 = sld [smem:[#allocation94_spill]] }
  0x15   :  { %v128_v0 = vld [vmem:[%s11489_s27] sm:$0x3] }
  0x16   :  { %v126_v1 = vld [vmem:[%s11490_s2] sm:$0xff]  ;;  %v127_v2 = vld [vmem:[%s11490_s2 + $0x8] sm:$0xff]  ;;  %7129 = vmatprep.subr.msk.mxu0 %vm143_vm0, %v128_v0 }
  0x17   :  { %7131 = vmatprep.mubr.msk.f32.mxu0 %vm136_vm1, %v126_v1 }
  0x18   :  { %29 = vsyncpa [#allocation3], 0  ;;  %7130 = vmatpush3.msk.msra.mxu0 %vm143_vm0, %v128_v0  ;;  %v6503_v4 = vld [vmem:[%s11230_s9] ss:$0 sm:$0xff]  ;;  %vm224_vm2 = vcmask 523264   ;;  %v283_v20 = vld [vmem:[%s11233_s12 + $0x78] sm:$0xff] }
  0x19   :  { %7132 = vmatmul.mubr.msk.f32.vlgmr.msra.gmra.mxu0 %vm136_vm1, %v127_v2  ;;  %318 = vmatprep.subr.mxu1 %v283_v20  ;;  %v282_v21 = vld [vmem:[%s11233_s12 + $0x70] sm:$0xff]  ;;  %v281_v22 = vld [vmem:[%s11233_s12 + $0x68] sm:$0xff]  ;;  %v280_v23 = vld [vmem:[%s11233_s12 + $0x60] sm:$0xff]  ;;  %v11253_v25 = vmov 0.0   ;;  %v7787_v53 = vmov 2   ;;  %s11493_s5 = sld [smem:[#allocation98_spill]] }
  0x1a   :  { %319 = vmatpush1.msra.mxu1 %v282_v21  ;;  %v279_v24 = vld [vmem:[%s11233_s12 + $0x58] sm:$0xff]  ;;  %366 = vmatprep.mubr.f32.mxu1 %v11253_v25  ;;  %v278_v26 = vld [vmem:[%s11233_s12 + $0x50] sm:$0xff]  ;;  %v277_v27 = vld [vmem:[%s11233_s12 + $0x48] sm:$0xff]  ;;  %v7788_v55 = vmov 1   ;;  %v7789_v57 = vmov 3   ;;  %v7790_v63 = vmov 0  }
  0x1b   :  { %320 = vmatprep.subr.mxu1 %v281_v22  ;;  %468 = vmatprep.mubr.f32.mxu0 %v11253_v25  ;;  %v276_v28 = vld [vmem:[%s11233_s12 + $0x40] sm:$0xff]  ;;  %v275_v29 = vld [vmem:[%s11233_s12 + $0x38] sm:$0xff]  ;;  %v274_v30 = vld [vmem:[%s11233_s12 + $0x30] sm:$0xff]  ;;  %s11494_s27 = sld [smem:[#allocation95_spill]]  ;;  %s11405_s28 = smov 72   ;;  %vm379_vm3 = vcmask 130048  }
  0x1c   :  { %321 = vmatpush1.msra.mxu1 %v280_v23  ;;  %v273_v31 = vld [vmem:[%s11233_s12 + $0x28] sm:$0xff]  ;;  %v272_v32 = vld [vmem:[%s11233_s12 + $0x20] sm:$0xff]  ;;  %v271_v33 = vld [vmem:[%s11233_s12 + $0x18] sm:$0xff]  ;;  %7486 = vset.pattern.permute.xlu1 %v7787_v53  ;;  %s11495_s8 = sld [smem:[#allocation96_spill]]  ;;  %s11399_s1 = smov 8   ;;  %vm1013_vm4 = vcmask 64512  }
  0x1d   :  { %322 = vmatprep.subr.mxu1 %v279_v24  ;;  %v270_v34 = vld [vmem:[%s11233_s12 + $0x10] sm:$0xff]  ;;  %v269_v35 = vld [vmem:[%s11233_s12 + $0x8] sm:$0xff]  ;;  %v268_v36 = vld [vmem:[%s11233_s12] sm:$0xff]  ;;  %7494 = vset.pattern.permute.xlu0 %v7789_v57  ;;  %s11498_s25 = sld [smem:[#allocation97_spill]]  ;;  %s11417_s6 = smov 80   ;;  %vm1995_vm5 = vcmask 261120  }
  0x1e   :  { %323 = vmatpush1.msra.mxu1 %v278_v26  ;;  %v6507_v44 = vld [vmem:[%s11231_s10] ss:$0 sm:$0xff]  ;;  %s11451_s2 = smov 112   ;;  %s11419_s29 = smov 96   ;;  %vm1998_vm6 = vcmask 392192  }
  0x1f   :  { %324 = vmatprep.subr.mxu1 %v277_v27  ;;  %v6508_v46 = vld [vmem:[%s11232_s11] ss:$0 sm:$0xff]  ;;  %v109_v54 = vld [vmem:[%s11493_s5 + $0x38] sm:$0xff]  ;;  %v8017_v56 = vld [vmem:[%s11493_s5 + $0x30] sm:$0xff]  ;;  %s11407_s0 = smov 64   ;;  %s11409_s7 = smov 120  }
  0x20   :  { %325 = vmatpush1.msra.mxu1 %v276_v28  ;;  %v107_v58 = vld [vmem:[%s11493_s5 + $0x28] sm:$0xff]  ;;  %v106_v59 = vld [vmem:[%s11493_s5 + $0x20] sm:$0xff]  ;;  %v104_v60 = vld [vmem:[%s11493_s5 + $0x10] sm:$0xff]  ;;  %s11606_s30 = sld [smem:[#allocation99_spill]]  ;;  %s11663_s4 = smov 72  }
  0x21   :  { %326 = vmatprep.subr.mxu1 %v275_v29  ;;  %v103_v61 = vld [vmem:[%s11493_s5 + $0x8] sm:$0xff]  ;;  %v102_v62 = vld [vmem:[%s11493_s5] sm:$0xff]  ;;  %v105_v0 = vld [vmem:[%s11493_s5 + $0x18] sm:$0xff]  ;;  %s11614_s26 = sld [smem:[#allocation100_spill]]  ;;  %s11411_s5 = smov 48  }
  0x22   :  { %327 = vmatpush1.msra.mxu1 %v274_v30  ;;  %v8046_v1 = vld [vmem:[%s11494_s27 + $0x38] sm:$0xff]  ;;  %v8054_v2 = vld [vmem:[%s11494_s27 + $0x30] sm:$0xff]  ;;  %v284_v26 = vld [vmem:[%s11234_s13] sm:$0x3]  ;;  %s11685_s9 = smov 112   ;;  %s11694_s22 = smov 16  }
  0x23   :  { %328 = vmatprep.subr.mxu1 %v273_v31  ;;  %s11770_s23 = sld [smem:[#allocation103_spill]] }
  0x24   :  { %329 = vmatpush1.msra.mxu1 %v272_v32 }
  0x25   :  { %330 = vmatprep.subr.mxu1 %v271_v33 }
  0x26   :  { %331 = vmatpush1.msra.mxu1 %v270_v34 }
  0x27   :  { %332 = vmatprep.subr.mxu1 %v269_v35  ;;  %v94_v35 = vld [vmem:[%s11498_s25] sm:$0xff] }
  0x28   :  { %333 = vmatpush1.msra.mxu1 %v268_v36  ;;  %v95_v36 = vld [vmem:[%s11498_s25 + $0x8] sm:$0xff] }
  0xd9   :  { %v7133_v3 = vpop.f32.mrf.mxu0 }
  0xda   :  { %v7942_v7 = vadd.f32 %v7133_v3, %v6503_v4  ;;  %v8062_v3 = vld [vmem:[%s11494_s27 + $0x28] sm:$0xff] }
  0xdb   :  { %v213_v5 = vpop.f32.mrf.mxu0 }
  0xdc   :  { %v7940_v6 = vadd.f32 %v6503_v4, %v213_v5  ;;  %11492 = vst [vmem:[#allocation6_spill] sm:$0xff] %v7942_v7  ;;  %v228_v9 = vsel %vm224_vm2, %v7942_v7, 0.0  ;;  %v8069_v4 = vld [vmem:[%s11494_s27 + $0x20] sm:$0xff]  ;;  %v8077_v5 = vld [vmem:[%s11494_s27 + $0x18] sm:$0xff] }
  0xde   :  { %11491 = vst [vmem:[#allocation5_spill] sm:$0xff] %v7940_v6  ;;  %v225_v8 = vsel %vm224_vm2, %v7940_v6, 0.0 }
  0xdf   :  { %226 = vadd.xlane.f32.xlu0 %v225_v8  ;;  %v8085_v8 = vld [vmem:[%s11495_s8 + $0x10] sm:$0xff] }
  0xe3   :  { %229 = vadd.xlane.f32.xlu0 %v228_v9  ;;  %v8091_v9 = vld [vmem:[%s11495_s8 + $0x38] sm:$0xff] }
  0xf9   :  { %746 = vperm.xlu0 %7494, %v107_v58  }
  0xfd   :  { %742 = vperm.xlu0 %7494, %v106_v59  }
 0x101   :  { %7497 = vset.pattern.permute.xlu0 %v7788_v55 }
 0x102   :  { %594 = vperm.xlu0 %7497, %v109_v54  }
 0x106   :  { %574 = vperm.xlu0 %7497, %v104_v60  }
 0x10a   :  { %570 = vperm.xlu0 %7497, %v103_v61  }
 0x10e   :  { %7502 = vset.pattern.permute.xlu0 %v7787_v53 }
 0x10f   :  { %650 = vperm.xlu0 %7502, %v103_v61  }
 0x113   :  { %646 = vperm.xlu0 %7502, %v102_v62  }
 0x117   :  { %7505 = vset.pattern.permute.xlu0 %v7790_v63 }
 0x118   :  { %554 = vperm.xlu0 %7505, %v109_v54  }
 0x11c   :  { %544 = vperm.xlu0 %7505, %v107_v58  }
 0x120   :  { %539 = vperm.xlu0 %7505, %v106_v59  }
 0x124   :  { %1068 = vrot.lane.b32.xlu0 %v8046_v1, %s11405_s28 }
 0x128   :  { %534 = vperm.xlu0 %7505, %v105_v0  }
 0x12c   :  { %1066 = vrot.lane.b32.xlu0 %v8054_v2, %s11405_s28 }
 0x130   :  { %529 = vperm.xlu0 %7505, %v104_v60  }
 0x134   :  { %1064 = vrot.lane.b32.xlu0 %v8062_v3, %s11405_s28 }
 0x138   :  { %524 = vperm.xlu0 %7505, %v103_v61  }
 0x13c   :  { %1062 = vrot.lane.b32.xlu0 %v8069_v4, %s11405_s28 }
 0x140   :  { %519 = vperm.xlu0 %7505, %v102_v62  }
 0x144   :  { %1060 = vrot.lane.b32.xlu0 %v8077_v5, %s11405_s28 }
 0x145   :  { %7507 = vset.pattern.permute.xlu0 %v7789_v57 }
 0x148   :  { %1162 = vrot.lane.b32.xlu0 %v8085_v8, %s11405_s28 }
 0x168   :  { %v227_v10 = vpop.xlane.xlu0 %226 }
 0x169   :  { %v232_v11 = vmul.f32 0.015625, %v227_v10  ;;  %v8100_v10 = vld [vmem:[%s11494_s27 + $0x8] sm:$0xff] }
 0x16a   :  { %1056 = vrot.lane.b32.xlu0 %v8100_v10, %s11405_s28 }
 0x16b   :  { %v234_v12 = vsub.f32 %v7940_v6, %v232_v11  ;;  %v8105_v11 = vld [vmem:[%s11495_s8 + $0x30] sm:$0xff] }
 0x16c   :  { %v230_v13 = vpop.xlane.xlu0 %229 }
 0x16d   :  { %v233_v14 = vmul.f32 0.015625, %v230_v13  ;;  %v236_v15 = vmul.f32 %v234_v12, %v234_v12  ;;  %v8119_v13 = vld [vmem:[%s11495_s8 + $0x28] sm:$0xff] }
 0x16f   :  { %v235_v16 = vsub.f32 %v7942_v7, %v233_v14  ;;  %v238_v17 = vsel %vm224_vm2, %v236_v15, 0.0  ;;  %v8128_v14 = vld [vmem:[%s11495_s8 + $0x20] sm:$0xff]  ;;  %v8133_v15 = vld [vmem:[%s11495_s8 + $0x8] sm:$0xff] }
 0x170   :  { %239 = vadd.xlane.f32.xlu1 %v238_v17  ;;  %v8151_v17 = vld [vmem:[%s11494_s27 + $0x10] sm:$0xff] }
 0x171   :  { %v237_v18 = vmul.f32 %v235_v16, %v235_v16 }
 0x173   :  { %v241_v19 = vsel %vm224_vm2, %v237_v18, 0.0  ;;  %v8160_v18 = vld [vmem:[%s11494_s27] sm:$0xff] }
 0x174   :  { %242 = vadd.xlane.f32.xlu1 %v241_v19  ;;  %v286_v19 = vlaneseq }
 0x176   :  { %v287_v20 = vshrl.u32 %v286_v19, 7 }
 0x178   :  { %v8168_v22 = vsub.s32 1, %v287_v20  ;;  %v8170_v23 = vsub.s32 0, %v287_v20 }
 0x17a   :  { %11496 = vst [vmem:[#allocation7_spill] sm:$0xff] %v8168_v22  ;;  %11497 = vst [vmem:[#allocation8_spill] sm:$0xff] %v8170_v23  ;;  %v293_v28 = vrot.slane %v284_v26, %v8168_v22  ;;  %v289_v29 = vrot.slane %v284_v26, %v8170_v23 }
 0x185   :  { %674 = vperm.xlu1 %7486, %v109_v54  }
 0x189   :  { %7487 = vset.pattern.permute.xlu1 %v7788_v55 }
 0x18a   :  { %590 = vperm.xlu1 %7487, %v8017_v56  }
 0x18e   :  { %7488 = vset.pattern.permute.xlu1 %v7789_v57 }
 0x18f   :  { %754 = vperm.xlu1 %7488, %v109_v54   ;;  %v8238_v54 = vpop.permute.xlu0 %746 }
 0x190   :  { %11509 = vst [vmem:[#allocation19_spill] sm:$0xff] %v8238_v54 }
 0x193   :  { %7489 = vset.pattern.permute.xlu1 %v7787_v53 }
 0x194   :  { %670 = vperm.xlu1 %7489, %v8017_v56  }
 0x198   :  { %7490 = vset.pattern.permute.xlu1 %v7788_v55 }
 0x199   :  { %586 = vperm.xlu1 %7490, %v107_v58  }
 0x19d   :  { %7491 = vset.pattern.permute.xlu1 %v7789_v57 }
 0x19e   :  { %750 = vperm.xlu1 %7491, %v8017_v56  }
 0x1a2   :  { %7492 = vset.pattern.permute.xlu1 %v7787_v53 }
 0x1a3   :  { %666 = vperm.xlu1 %7492, %v107_v58  }
 0x1a7   :  { %7493 = vset.pattern.permute.xlu1 %v7788_v55 }
 0x1a8   :  { %582 = vperm.xlu1 %7493, %v106_v59  }
 0x1ac   :  { %7495 = vset.pattern.permute.xlu1 %v7787_v53 }
 0x1ad   :  { %662 = vperm.xlu1 %7495, %v106_v59  }
 0x1b1   :  { %7496 = vset.pattern.permute.xlu1 %v7788_v55 }
 0x1b2   :  { %578 = vperm.xlu1 %7496, %v105_v0  }
 0x1b6   :  { %7498 = vset.pattern.permute.xlu1 %v7787_v53 }
 0x1b7   :  { %658 = vperm.xlu1 %7498, %v105_v0  }
 0x1bb   :  { %7499 = vset.pattern.permute.xlu1 %v7789_v57 }
 0x1bc   :  { %738 = vperm.xlu1 %7499, %v105_v0  }
 0x1c0   :  { %7500 = vset.pattern.permute.xlu1 %v7787_v53 }
 0x1c1   :  { %654 = vperm.xlu1 %7500, %v104_v60  }
 0x1c5   :  { %7501 = vset.pattern.permute.xlu1 %v7789_v57 }
 0x1c6   :  { %734 = vperm.xlu1 %7501, %v104_v60  }
 0x1ca   :  { %7503 = vset.pattern.permute.xlu1 %v7788_v55 }
 0x1cb   :  { %566 = vperm.xlu1 %7503, %v102_v62  }
 0x1cf   :  { %7504 = vset.pattern.permute.xlu1 %v7789_v57 }
 0x1d0   :  { %730 = vperm.xlu1 %7504, %v103_v61  }
 0x1d4   :  { %726 = vperm.xlu1 %7504, %v102_v62  }
 0x1d8   :  { %7506 = vset.pattern.permute.xlu1 %v7790_v63 }
 0x1d9   :  { %549 = vperm.xlu1 %7506, %v8017_v56   ;;  %v8242_v56 = vpop.permute.xlu0 %742 }
 0x1da   :  { %11511 = vst [vmem:[#allocation21_spill] sm:$0xff] %v8242_v56 }
 0x1dd   :  { %1172 = vrot.lane.b32.xlu1 %v8091_v9, %s11405_s28  ;;  %v8246_v58 = vpop.permute.xlu0 %594 }
 0x1de   :  { %11513 = vst [vmem:[#allocation23_spill] sm:$0xff] %v8246_v58 }
 0x1e1   :  { %1170 = vrot.lane.b32.xlu1 %v8105_v11, %s11405_s28  ;;  %v8250_v60 = vpop.permute.xlu0 %574 }
 0x1e2   :  { %11515 = vst [vmem:[#allocation25_spill] sm:$0xff] %v8250_v60 }
 0x1e5   :  { %1168 = vrot.lane.b32.xlu1 %v8119_v13, %s11405_s28  ;;  %v8254_v62 = vpop.permute.xlu0 %570 }
 0x1e6   :  { %11517 = vst [vmem:[#allocation27_spill] sm:$0xff] %v8254_v62 }
 0x1e9   :  { %1166 = vrot.lane.b32.xlu1 %v8128_v14, %s11405_s28  ;;  %v8258_v0 = vpop.permute.xlu0 %650 }
 0x1ea   :  { %11519 = vst [vmem:[#allocation29_spill] sm:$0xff] %v8258_v0 }
 0x1f9   :  { %v240_v37 = vpop.xlane.xlu1 %239 }
 0x1fa   :  { %v244_v38 = vmul.f32 0.015625, %v240_v37  ;;  %v96_v37 = vld [vmem:[%s11498_s25 + $0x10] sm:$0xff] }
 0x1fc   :  { %v246_v39 = vadd.f32 1e-05, %v244_v38  ;;  %v97_v38 = vld [vmem:[%s11498_s25 + $0x18] sm:$0xff] }
 0x1fd   :  { %v243_v40 = vpop.xlane.xlu1 %242 }
 0x1fe   :  { %7508 = vrsqrt.f32 %v246_v39  ;;  %v245_v41 = vmul.f32 0.015625, %v243_v40  ;;  %v98_v39 = vld [vmem:[%s11498_s25 + $0x20] sm:$0xff]  ;;  %v99_v40 = vld [vmem:[%s11498_s25 + $0x28] sm:$0xff] }
 0x200   :  { %v247_v42 = vadd.f32 1e-05, %v245_v41  ;;  %v100_v41 = vld [vmem:[%s11498_s25 + $0x30] sm:$0xff] }
 0x202   :  { %7510 = vrsqrt.f32 %v247_v42  ;;  %v101_v42 = vld [vmem:[%s11498_s25 + $0x38] sm:$0xff] }
 0x20b   :  { %v7509_v43 = vpop.eup %7508 }
 0x20c   :  { %v250_v45 = vmul.f32 %v7509_v43, %v234_v12  ;;  %v8114_v12 = vld [vmem:[%s11495_s8] sm:$0xff]  ;;  %v8216_v43 = vpop.permute.xlu1 %674 }
 0x20d   :  { %1158 = vrot.lane.b32.xlu0 %v8114_v12, %s11405_s28  ;;  %11499 = vst [vmem:[#allocation9_spill] sm:$0xff] %v8216_v43 }
 0x20e   :  { %v258_v47 = vmul.f32 %v6507_v44, %v250_v45 }
 0x20f   :  { %v7511_v48 = vpop.eup %7510 }
 0x210   :  { %v266_v49 = vadd.f32 %v6508_v46, %v258_v47  ;;  %v251_v50 = vmul.f32 %v7511_v48, %v235_v16  ;;  %v8142_v16 = vld [vmem:[%s11495_s8 + $0x18] sm:$0xff] }
 0x211   :  { %911 = vrot.lane.b32.xlu0 %v8133_v15, %s11399_s1  ;;  %1164 = vrot.lane.b32.xlu1 %v8142_v16, %s11405_s28 }
 0x212   :  { %6509 = vmatmul.mubr.msk.f32.vlgmr.msra.gmra.mxu1 %vm224_vm2, %v266_v49  ;;  %v259_v51 = vmul.f32 %v6507_v44, %v251_v50  ;;  %v8218_v44 = vpop.permute.xlu1 %590 }
 0x213   :  { %372 = vmatprep.mubr.f32.mxu1 %v11253_v25 }
 0x214   :  { %v267_v52 = vadd.f32 %v6508_v46, %v259_v51 }
 0x215   :  { %915 = vrot.lane.b32.xlu0 %v8142_v16, %s11399_s1  ;;  %1058 = vrot.lane.b32.xlu1 %v8151_v17, %s11405_s28 }
 0x216   :  { %6510 = vmatmul.mubr.msk.f32.gmra.mxu1 %vm224_vm2, %v267_v52  ;;  %v8220_v45 = vpop.permute.xlu1 %754 }
 0x217   :  { %11500 = vst [vmem:[#allocation10_spill] sm:$0xff] %v8220_v45 }
 0x219   :  { %1160 = vrot.lane.b32.xlu1 %v8133_v15, %s11405_s28 }
 0x21a   :  { %v8222_v46 = vpop.permute.xlu1 %670 }
 0x21b   :  { %11501 = vst [vmem:[#allocation11_spill] sm:$0xff] %v8222_v46 }
 0x21d   :  { %1054 = vrot.lane.b32.xlu1 %v8160_v18, %s11405_s28 }
 0x21e   :  { %v8224_v47 = vpop.permute.xlu1 %586 }
 0x21f   :  { %11502 = vst [vmem:[#allocation12_spill] sm:$0xff] %v8224_v47 }
 0x221   :  { %909 = vrot.lane.b32.xlu1 %v8114_v12, %s11399_s1 }
 0x222   :  { %v8226_v48 = vpop.permute.xlu1 %750 }
 0x223   :  { %11503 = vst [vmem:[#allocation13_spill] sm:$0xff] %v8226_v48 }
 0x225   :  { %913 = vrot.lane.b32.xlu1 %v8085_v8, %s11399_s1 }
 0x226   :  { %v8228_v49 = vpop.permute.xlu1 %666 }
 0x227   :  { %11504 = vst [vmem:[#allocation14_spill] sm:$0xff] %v8228_v49 }
 0x22a   :  { %v8230_v50 = vpop.permute.xlu1 %582 }
 0x22b   :  { %11505 = vst [vmem:[#allocation15_spill] sm:$0xff] %v8230_v50 }
 0x22e   :  { %v8232_v51 = vpop.permute.xlu1 %662 }
 0x22f   :  { %11506 = vst [vmem:[#allocation16_spill] sm:$0xff] %v8232_v51 }
 0x232   :  { %v8234_v52 = vpop.permute.xlu1 %578 }
 0x233   :  { %11507 = vst [vmem:[#allocation17_spill] sm:$0xff] %v8234_v52 }
 0x236   :  { %v8236_v53 = vpop.permute.xlu1 %658 }
 0x237   :  { %11508 = vst [vmem:[#allocation18_spill] sm:$0xff] %v8236_v53 }
 0x23a   :  { %v8240_v55 = vpop.permute.xlu1 %738 }
 0x23b   :  { %11510 = vst [vmem:[#allocation20_spill] sm:$0xff] %v8240_v55 }
 0x23e   :  { %v8244_v57 = vpop.permute.xlu1 %654 }
 0x23f   :  { %11512 = vst [vmem:[#allocation22_spill] sm:$0xff] %v8244_v57 }
 0x242   :  { %v8248_v59 = vpop.permute.xlu1 %734 }
 0x243   :  { %11514 = vst [vmem:[#allocation24_spill] sm:$0xff] %v8248_v59 }
 0x246   :  { %v8252_v61 = vpop.permute.xlu1 %566 }
 0x247   :  { %11516 = vst [vmem:[#allocation26_spill] sm:$0xff] %v8252_v61 }
 0x24b   :  { %v8256_v63 = vpop.permute.xlu1 %730 }
 0x24c   :  { %11518 = vst [vmem:[#allocation28_spill] sm:$0xff] %v8256_v63 }
 0x24f   :  { %v8260_v19 = vpop.permute.xlu1 %726 }
 0x250   :  { %11520 = vst [vmem:[#allocation30_spill] sm:$0xff] %v8260_v19 }
 0x2d2   :  { %v368_v21 = vpop.f32.mrf.mxu1 }
 0x2d3   :  { %v369_v34 = vadd.f32 %v368_v21, %v289_v29 }
 0x2d4   :  { %v370_v24 = vpop.f32.mrf.mxu1 }
 0x2d5   :  { %v371_v33 = vadd.f32 %v370_v24, %v293_v28 }
 0x2d6   :  { %v374_v27 = vpop.f32.mrf.mxu1 }
 0x2d7   :  { %v375_v32 = vadd.f32 %v374_v27, %v289_v29  ;;  %v8272_v27 = vpop.permute.xlu0 %646 }
 0x2d8   :  { %v376_v30 = vpop.f32.mrf.mxu1  ;;  %11522 = vst [vmem:[#allocation32_spill] sm:$0xff] %v8272_v27 }
 0x2d9   :  { %v377_v31 = vadd.f32 %v376_v30, %v293_v28 }
 0x2db   :  { %432 = vmatprep.subr.mxu0 %v377_v31 }
 0x2dc   :  { %433 = vmatpush1.msra.mxu0 %v375_v32 }
 0x2dd   :  { %434 = vmatprep.subr.mxu0 %v371_v33 }
 0x2de   :  { %435 = vmatpush1.msra.mxu0 %v369_v34 }
 0x2df   :  { %6511 = vmatmul.mubr.msk.f32.vlgmr.msra.gmra.mxu0 %vm379_vm3, %v94_v35 }
 0x2e0   :  { %474 = vmatprep.mubr.f32.mxu0 %v11253_v25 }
 0x2e3   :  { %6512 = vmatmul.mubr.msk.f32.gmra.mxu0 %vm379_vm3, %v95_v36 }
 0x2e4   :  { %480 = vmatprep.mubr.f32.mxu0 %v11253_v25 }
 0x2e7   :  { %6513 = vmatmul.mubr.msk.f32.gmra.mxu0 %vm379_vm3, %v96_v37 }
 0x2e8   :  { %486 = vmatprep.mubr.f32.mxu0 %v11253_v25 }
 0x2eb   :  { %6514 = vmatmul.mubr.msk.f32.gmra.mxu0 %vm379_vm3, %v97_v38 }
 0x2ec   :  { %492 = vmatprep.mubr.f32.mxu0 %v11253_v25 }
 0x2ef   :  { %6515 = vmatmul.mubr.msk.f32.gmra.mxu0 %vm379_vm3, %v98_v39 }
 0x2f0   :  { %498 = vmatprep.mubr.f32.mxu0 %v11253_v25 }
 0x2f3   :  { %6516 = vmatmul.mubr.msk.f32.gmra.mxu0 %vm379_vm3, %v99_v40 }
 0x2f4   :  { %504 = vmatprep.mubr.f32.mxu0 %v11253_v25 }
 0x2f7   :  { %6517 = vmatmul.mubr.msk.f32.gmra.mxu0 %vm379_vm3, %v100_v41  ;;  %v8306_v41 = vpop.permute.xlu0 %554 }
 0x2f8   :  { %510 = vmatprep.mubr.f32.mxu0 %v11253_v25  ;;  %11526 = vst [vmem:[#allocation36_spill] sm:$0xff] %v8306_v41 }
 0x2fb   :  { %6518 = vmatmul.mubr.msk.f32.gmra.mxu0 %vm379_vm3, %v101_v42 }
 0x39f   :  { %v8262_v20 = vpop.f32.mrf.mxu0 }
 0x3a0   :  { %v757_v21 = vmul.f32 %v8260_v19, %v8262_v20  ;;  %v597_v24 = vmul.f32 %v8252_v61, %v8262_v20  ;;  %v677_v30 = vmul.f32 %v8272_v27, %v8262_v20 }
 0x3a1   :  { %v8268_v26 = vpop.f32.mrf.mxu0 }
 0x3a2   :  { %11521 = vst [vmem:[#allocation31_spill] sm:$0xff] %v8268_v26  ;;  %773 = vrot.lane.b32.xlu0 %v757_v21, %s11417_s6  ;;  %613 = vrot.lane.b32.xlu1 %v597_v24, %s11451_s2 }
 0x3a3   :  { %v8274_v28 = vpop.f32.mrf.mxu0 }
 0x3a4   :  { %v598_v29 = vmul.f32 %v8254_v62, %v8274_v28  ;;  %v678_v33 = vmul.f32 %v8258_v0, %v8274_v28  ;;  %v758_v37 = vmul.f32 %v8256_v63, %v8274_v28  ;;  %v8382_v63 = vpop.permute.xlu1 %549 }
 0x3a5   :  { %v8280_v31 = vpop.f32.mrf.mxu0  ;;  %11535 = vst [vmem:[#allocation45_spill] sm:$0xff] %v8382_v63 }
 0x3a6   :  { %11523 = vst [vmem:[#allocation33_spill] sm:$0xff] %v8280_v31  ;;  %615 = vrot.lane.b32.xlu0 %v598_v29, %s11451_s2  ;;  %693 = vrot.lane.b32.xlu1 %v677_v30, %s11419_s29 }
 0x3a7   :  { %v8284_v32 = vpop.f32.mrf.mxu0 }
 0x3a8   :  { %v679_v34 = vmul.f32 %v8244_v57, %v8284_v32  ;;  %v759_v38 = vmul.f32 %v8248_v59, %v8284_v32  ;;  %v599_v42 = vmul.f32 %v8250_v60, %v8284_v32  ;;  %v8391_v59 = vpop.permute.xlu1 %1172 }
 0x3a9   :  { %v8290_v35 = vpop.f32.mrf.mxu0  ;;  %11536 = vst [vmem:[#allocation46_spill] sm:$0xff] %v8391_v59 }
 0x3aa   :  { %11524 = vst [vmem:[#allocation34_spill] sm:$0xff] %v8290_v35  ;;  %695 = vrot.lane.b32.xlu0 %v678_v33, %s11419_s29  ;;  %697 = vrot.lane.b32.xlu1 %v679_v34, %s11419_s29  ;;  %v8322_v34 = vpop.permute.xlu0 %544 }
 0x3ab   :  { %v8294_v36 = vpop.f32.mrf.mxu0  ;;  %11528 = vst [vmem:[#allocation38_spill] sm:$0xff] %v8322_v34 }
 0x3ac   :  { %v680_v21 = vmul.f32 %v8236_v53, %v8294_v36  ;;  %v600_v29 = vmul.f32 %v8234_v52, %v8294_v36  ;;  %v760_v30 = vmul.f32 %v8240_v55, %v8294_v36 }
 0x3ad   :  { %v8300_v39 = vpop.f32.mrf.mxu0 }
 0x3ae   :  { %11525 = vst [vmem:[#allocation35_spill] sm:$0xff] %v8300_v39  ;;  %775 = vrot.lane.b32.xlu0 %v758_v37, %s11417_s6  ;;  %777 = vrot.lane.b32.xlu1 %v759_v38, %s11417_s6 }
 0x3af   :  { %v8304_v40 = vpop.f32.mrf.mxu0 }
 0x3b0   :  { %v601_v37 = vmul.f32 %v8230_v50, %v8304_v40  ;;  %v681_v38 = vmul.f32 %v8232_v51, %v8304_v40 }
 0x3b1   :  { %v8312_v24 = vpop.f32.mrf.mxu0 }
 0x3b2   :  { %11527 = vst [vmem:[#allocation37_spill] sm:$0xff] %v8312_v24  ;;  %617 = vrot.lane.b32.xlu0 %v599_v42, %s11451_s2  ;;  %699 = vrot.lane.b32.xlu1 %v680_v21, %s11419_s29  ;;  %v8334_v21 = vpop.permute.xlu0 %539 }
 0x3b3   :  { %v8320_v33 = vpop.f32.mrf.mxu0  ;;  %11530 = vst [vmem:[#allocation40_spill] sm:$0xff] %v8334_v21 }
 0x3b4   :  { %v602_v25 = vmul.f32 %v8224_v47, %v8320_v33  ;;  %v762_v23 = vmul.f32 %v8238_v54, %v8320_v33 }
 0x3b5   :  { %v8330_v42 = vpop.f32.mrf.mxu0 }
 0x3b6   :  { %619 = vrot.lane.b32.xlu0 %v600_v29, %s11451_s2  ;;  %779 = vrot.lane.b32.xlu1 %v760_v30, %s11417_s6  ;;  %11529 = vst [vmem:[#allocation39_spill] sm:$0xff] %v8330_v42  ;;  %v761_v29 = vmul.f32 %v8242_v56, %v8304_v40 }
 0x3b7   :  { %v8340_v30 = vpop.f32.mrf.mxu0 }
 0x3b8   :  { %v603_v22 = vmul.f32 %v8218_v44, %v8340_v30 }
 0x3b9   :  { %v8361_v6 = vpop.f32.mrf.mxu0 }
 0x3ba   :  { %621 = vrot.lane.b32.xlu0 %v601_v37, %s11451_s2  ;;  %701 = vrot.lane.b32.xlu1 %v681_v38, %s11419_s29  ;;  %v682_v37 = vmul.f32 %v8228_v49, %v8320_v33  ;;  %v8348_v38 = vpop.permute.xlu0 %1068 }
 0x3bb   :  { %11531 = vst [vmem:[#allocation41_spill] sm:$0xff] %v8348_v38 }
 0x3be   :  { %623 = vrot.lane.b32.xlu0 %v602_v25, %s11451_s2  ;;  %781 = vrot.lane.b32.xlu1 %v761_v29, %s11417_s6  ;;  %v8357_v25 = vpop.permute.xlu0 %534  ;;  %v683_v29 = vmul.f32 %v8222_v46, %v8340_v30 }
 0x3bf   :  { %11532 = vst [vmem:[#allocation42_spill] sm:$0xff] %v8357_v25 }
 0x3c2   :  { %625 = vrot.lane.b32.xlu0 %v603_v22, %s11451_s2  ;;  %703 = vrot.lane.b32.xlu1 %v682_v37, %s11419_s29  ;;  %v763_v22 = vmul.f32 %v8226_v48, %v8340_v30  ;;  %v8368_v37 = vpop.f32.mrf.mxu0  ;;  %v8370_v7 = vpop.permute.xlu0 %1066 }
 0x3c3   :  { %11533 = vst [vmem:[#allocation43_spill] sm:$0xff] %v8370_v7  ;;  %v684_v19 = vmul.f32 %v8216_v43, %v8368_v37 }
 0x3c6   :  { %919 = vrot.lane.b32.xlu0 %v8119_v13, %s11399_s1  ;;  %783 = vrot.lane.b32.xlu1 %v762_v23, %s11417_s6  ;;  %v604_v23 = vmul.f32 %v8246_v58, %v8368_v37 }
 0x3ca   :  { %923 = vrot.lane.b32.xlu0 %v8091_v9, %s11399_s1  ;;  %705 = vrot.lane.b32.xlu1 %v683_v29, %s11419_s29  ;;  %v8380_v29 = vpop.permute.xlu0 %529 }
 0x3cb   :  { %11534 = vst [vmem:[#allocation44_spill] sm:$0xff] %v8380_v29  ;;  %v559_v42 = vmul.f32 %v8380_v29, %v8284_v32 }
 0x3ce   :  { %1140 = vrot.lane.b32.xlu0 %v8046_v1, %s11407_s0  ;;  %785 = vrot.lane.b32.xlu1 %v763_v22, %s11417_s6  ;;  %v764_v22 = vmul.f32 %v8220_v45, %v8368_v37  ;;  %v8393_v0 = vpop.permute.xlu0 %1064 }
 0x3cf   :  { %11537 = vst [vmem:[#allocation47_spill] sm:$0xff] %v8393_v0 }
 0x3d2   :  { %1138 = vrot.lane.b32.xlu0 %v8054_v2, %s11407_s0  ;;  %627 = vrot.lane.b32.xlu1 %v604_v23, %s11451_s2  ;;  %v8402_v23 = vpop.permute.xlu1 %1170 }
 0x3d3   :  { %11538 = vst [vmem:[#allocation48_spill] sm:$0xff] %v8402_v23 }
 0x3d6   :  { %1136 = vrot.lane.b32.xlu0 %v8062_v3, %s11407_s0  ;;  %707 = vrot.lane.b32.xlu1 %v684_v19, %s11419_s29  ;;  %v8404_v19 = vpop.permute.xlu0 %524  ;;  %v8410_v61 = vpop.permute.xlu1 %1168 }
 0x3d7   :  { %11539 = vst [vmem:[#allocation49_spill] sm:$0xff] %v8404_v19  ;;  %11540 = vst [vmem:[#allocation50_spill] sm:$0xff] %v8410_v61 }
 0x3da   :  { %1134 = vrot.lane.b32.xlu0 %v8069_v4, %s11407_s0  ;;  %787 = vrot.lane.b32.xlu1 %v764_v22, %s11417_s6  ;;  %v8412_v27 = vpop.permute.xlu0 %1062  ;;  %v8420_v22 = vpop.permute.xlu1 %1166 }
 0x3db   :  { %11541 = vst [vmem:[#allocation51_spill] sm:$0xff] %v8412_v27  ;;  %11542 = vst [vmem:[#allocation52_spill] sm:$0xff] %v8420_v22 }
 0x3de   :  { %1132 = vrot.lane.b32.xlu0 %v8077_v5, %s11407_s0  ;;  %917 = vrot.lane.b32.xlu1 %v8128_v14, %s11399_s1  ;;  %v8422_v26 = vpop.permute.xlu0 %519  ;;  %v8426_v55 = vpop.permute.xlu1 %1164 }
 0x3df   :  { %11543 = vst [vmem:[#allocation53_spill] sm:$0xff] %v8422_v26  ;;  %11544 = vst [vmem:[#allocation54_spill] sm:$0xff] %v8426_v55 }
 0x3e2   :  { %1130 = vrot.lane.b32.xlu0 %v8151_v17, %s11407_s0  ;;  %921 = vrot.lane.b32.xlu1 %v8105_v11, %s11399_s1  ;;  %v8428_v62 = vpop.permute.xlu0 %1060 }
 0x3e3   :  { %11545 = vst [vmem:[#allocation55_spill] sm:$0xff] %v8428_v62 }
 0x3e6   :  { %1128 = vrot.lane.b32.xlu0 %v8100_v10, %s11407_s0  ;;  %1036 = vrot.lane.b32.xlu1 %v8091_v9, %s11407_s0  ;;  %v8434_v9 = vpop.permute.xlu0 %1162 }
 0x3e7   :  { %11546 = vst [vmem:[#allocation56_spill] sm:$0xff] %v8434_v9 }
 0x3ea   :  { %1034 = vrot.lane.b32.xlu1 %v8105_v11, %s11407_s0  ;;  %v8436_v11 = vpop.permute.xlu1 %1058 }
 0x3eb   :  { %11547 = vst [vmem:[#allocation57_spill] sm:$0xff] %v8436_v11 }
 0x3ee   :  { %1032 = vrot.lane.b32.xlu1 %v8119_v13, %s11407_s0  ;;  %v8440_v31 = vpop.permute.xlu1 %1160  ;;  %v8442_v13 = vpop.permute.xlu0 %1056 }
 0x3ef   :  { %11548 = vst [vmem:[#allocation58_spill] sm:$0xff] %v8440_v31  ;;  %11549 = vst [vmem:[#allocation59_spill] sm:$0xff] %v8442_v13 }
 0x3f2   :  { %1030 = vrot.lane.b32.xlu1 %v8128_v14, %s11407_s0  ;;  %v8446_v56 = vpop.permute.xlu0 %1158  ;;  %v8448_v14 = vpop.permute.xlu1 %1054 }
 0x3f3   :  { %11550 = vst [vmem:[#allocation60_spill] sm:$0xff] %v8446_v56  ;;  %11551 = vst [vmem:[#allocation61_spill] sm:$0xff] %v8448_v14 }
 0x3f6   :  { %1028 = vrot.lane.b32.xlu1 %v8142_v16, %s11407_s0  ;;  %v8450_v53 = vpop.permute.xlu0 %911  ;;  %v8452_v16 = vpop.permute.xlu1 %909 }
 0x3f7   :  { %11552 = vst [vmem:[#allocation62_spill] sm:$0xff] %v8450_v53  ;;  %11553 = vst [vmem:[#allocation63_spill] sm:$0xff] %v8452_v16 }
 0x3fa   :  { %1026 = vrot.lane.b32.xlu1 %v8085_v8, %s11407_s0  ;;  %v8454_v60 = vpop.permute.xlu0 %915  ;;  %v8456_v54 = vpop.permute.xlu1 %913 }
 0x3fb   :  { %11554 = vst [vmem:[#allocation64_spill] sm:$0xff] %v8454_v60  ;;  %11555 = vst [vmem:[#allocation65_spill] sm:$0xff] %v8456_v54 }
 0x3fe   :  { %1024 = vrot.lane.b32.xlu1 %v8133_v15, %s11407_s0  ;;  %v558_v15 = vmul.f32 %v8404_v19, %v8274_v28 }
 0x414   :  { %v8458_v8 = vpop.permute.xlu0 %773  ;;  %v8460_v51 = vpop.permute.xlu1 %613 }
 0x418   :  { %v616_v52 = vpop.permute.xlu0 %615  ;;  %v8462_v39 = vpop.permute.xlu1 %693 }
 0x419   :  { %v638_v46 = vadd.f32 %v616_v52, %v558_v15 }
 0x41c   :  { %v696_v49 = vpop.permute.xlu0 %695  ;;  %v698_v45 = vpop.permute.xlu1 %697 }
 0x41d   :  { %v718_v57 = vadd.f32 %v696_v49, %v638_v46  ;;  %v560_v49 = vmul.f32 %v8357_v25, %v8294_v36 }
 0x420   :  { %v776_v35 = vpop.permute.xlu0 %775  ;;  %v778_v48 = vpop.permute.xlu1 %777 }
 0x421   :  { %v8466_v47 = vadd.f32 %v776_v35, %v718_v57 }
 0x423   :  { %v1183_v43 = vmul.f32 %v8440_v31, %v8466_v47  ;;  %v1079_v50 = vmul.f32 %v8442_v13, %v8466_v47  ;;  %v561_v13 = vmul.f32 %v8334_v21, %v8304_v40 }
 0x424   :  { %v618_v24 = vpop.permute.xlu0 %617  ;;  %v700_v58 = vpop.permute.xlu1 %699 }
 0x425   :  { %v639_v28 = vadd.f32 %v618_v24, %v559_v42  ;;  %1200 = vrot.lane.b32.xlu0 %v1183_v43, %s11409_s7  ;;  %1096 = vrot.lane.b32.xlu1 %v1079_v50, %s11409_s7 }
 0x427   :  { %v719_v46 = vadd.f32 %v698_v45, %v639_v28 }
 0x428   :  { %v620_v52 = vpop.permute.xlu0 %619  ;;  %v780_v57 = vpop.permute.xlu1 %779 }
 0x429   :  { %v8478_v32 = vadd.f32 %v778_v48, %v719_v46  ;;  %v640_v35 = vadd.f32 %v620_v52, %v560_v49 }
 0x42b   :  { %v720_v15 = vadd.f32 %v700_v58, %v640_v35  ;;  %v1184_v24 = vmul.f32 %v8434_v9, %v8478_v32  ;;  %v1080_v43 = vmul.f32 %v8436_v11, %v8478_v32 }
 0x42c   :  { %v622_v50 = vpop.permute.xlu0 %621  ;;  %v702_v45 = vpop.permute.xlu1 %701 }
 0x42d   :  { %v8486_v42 = vadd.f32 %v780_v57, %v720_v15  ;;  %v641_v36 = vadd.f32 %v622_v50, %v561_v13  ;;  %1202 = vrot.lane.b32.xlu0 %v1184_v24, %s11409_s7  ;;  %1098 = vrot.lane.b32.xlu1 %v1080_v43, %s11409_s7  ;;  %v562_v13 = vmul.f32 %v8322_v34, %v8320_v33 }
 0x42e   :  { %v563_v33 = vmul.f32 %v8382_v63, %v8340_v30 }
 0x42f   :  { %v721_v48 = vadd.f32 %v702_v45, %v641_v36  ;;  %v1185_v58 = vmul.f32 %v8426_v55, %v8486_v42  ;;  %v1081_v40 = vmul.f32 %v8428_v62, %v8486_v42 }
 0x430   :  { %v782_v28 = vpop.permute.xlu1 %781  ;;  %v624_v49 = vpop.permute.xlu0 %623 }
 0x431   :  { %v8494_v46 = vadd.f32 %v782_v28, %v721_v48  ;;  %1204 = vrot.lane.b32.xlu0 %v1185_v58, %s11409_s7  ;;  %1100 = vrot.lane.b32.xlu1 %v1081_v40, %s11409_s7  ;;  %v642_v15 = vadd.f32 %v624_v49, %v562_v13 }
 0x433   :  { %v1186_v52 = vmul.f32 %v8420_v22, %v8494_v46  ;;  %v1082_v57 = vmul.f32 %v8412_v27, %v8494_v46 }
 0x434   :  { %v704_v35 = vpop.permute.xlu1 %703  ;;  %v626_v45 = vpop.permute.xlu0 %625 }
 0x435   :  { %1206 = vrot.lane.b32.xlu0 %v1186_v52, %s11409_s7  ;;  %1102 = vrot.lane.b32.xlu1 %v1082_v57, %s11409_s7  ;;  %v722_v24 = vadd.f32 %v704_v35, %v642_v15  ;;  %v643_v40 = vadd.f32 %v626_v45, %v563_v33  ;;  %v564_v35 = vmul.f32 %v8306_v41, %v8368_v37 }
 0x436   :  { %v934_v37 = vmul.f32 %v8450_v53, %v8466_v47 }
 0x438   :  { %v784_v43 = vpop.permute.xlu1 %783 }
 0x439   :  { %v8506_v50 = vadd.f32 %v784_v43, %v722_v24  ;;  %v557_v43 = vmul.f32 %v8422_v26, %v8262_v20 }
 0x43b   :  { %v1187_v36 = vmul.f32 %v8410_v61, %v8506_v50  ;;  %v1083_v48 = vmul.f32 %v8393_v0, %v8506_v50 }
 0x43c   :  { %v706_v58 = vpop.permute.xlu1 %705 }
 0x43d   :  { %1208 = vrot.lane.b32.xlu0 %v1187_v36, %s11409_s7  ;;  %1104 = vrot.lane.b32.xlu1 %v1083_v48, %s11409_s7  ;;  %v723_v28 = vadd.f32 %v706_v58, %v643_v40  ;;  %v637_v36 = vadd.f32 %v8460_v51, %v557_v43 }
 0x43f   :  { %v717_v58 = vadd.f32 %v8462_v39, %v637_v36 }
 0x440   :  { %v786_v49 = vpop.permute.xlu1 %785 }
 0x441   :  { %v8516_v13 = vadd.f32 %v786_v49, %v723_v28  ;;  %v8539_v20 = vadd.f32 %v8458_v8, %v717_v58  ;;  %v8565_v8 = vpop.permute.xlu0 %919 }
 0x442   :  { %11556 = vst [vmem:[#allocation66_spill] sm:$0xff] %v8565_v8 }
 0x443   :  { %v1188_v52 = vmul.f32 %v8402_v23, %v8516_v13  ;;  %v1084_v30 = vmul.f32 %v8370_v7, %v8516_v13  ;;  %v1182_v51 = vmul.f32 %v8446_v56, %v8539_v20  ;;  %v1078_v39 = vmul.f32 %v8448_v14, %v8539_v20 }
 0x444   :  { %v628_v57 = vpop.permute.xlu1 %627 }
 0x445   :  { %1210 = vrot.lane.b32.xlu0 %v1188_v52, %s11409_s7  ;;  %1106 = vrot.lane.b32.xlu1 %v1084_v30, %s11409_s7  ;;  %v644_v24 = vadd.f32 %v628_v57, %v564_v35  ;;  %v936_v52 = vmul.f32 %v8454_v60, %v8486_v42  ;;  %v935_v30 = vmul.f32 %v8456_v54, %v8478_v32  ;;  %v8575_v57 = vpop.permute.xlu0 %923 }
 0x446   :  { %11558 = vst [vmem:[#allocation68_spill] sm:$0xff] %v8575_v57 }
 0x448   :  { %v708_v15 = vpop.permute.xlu1 %707 }
 0x449   :  { %v724_v45 = vadd.f32 %v708_v15, %v644_v24  ;;  %v938_v24 = vmul.f32 %v8565_v8, %v8506_v50  ;;  %v8589_v43 = vpop.permute.xlu0 %1140 }
 0x44a   :  { %11560 = vst [vmem:[#allocation70_spill] sm:$0xff] %v8589_v43 }
 0x44c   :  { %v788_v33 = vpop.permute.xlu1 %787 }
 0x44d   :  { %v8529_v48 = vadd.f32 %v788_v33, %v724_v45  ;;  %v8601_v58 = vpop.permute.xlu0 %1138 }
 0x44e   :  { %11562 = vst [vmem:[#allocation72_spill] sm:$0xff] %v8601_v58 }
 0x44f   :  { %v1189_v40 = vmul.f32 %v8391_v59, %v8529_v48  ;;  %v1085_v28 = vmul.f32 %v8348_v38, %v8529_v48  ;;  %v940_v36 = vmul.f32 %v8575_v57, %v8529_v48 }
 0x450   :  { %v8567_v49 = vpop.permute.xlu1 %917 }
 0x451   :  { %1212 = vrot.lane.b32.xlu0 %v1189_v40, %s11409_s7  ;;  %1108 = vrot.lane.b32.xlu1 %v1085_v28, %s11409_s7  ;;  %11557 = vst [vmem:[#allocation67_spill] sm:$0xff] %v8567_v49  ;;  %v937_v15 = vmul.f32 %v8567_v49, %v8494_v46  ;;  %v8607_v28 = vpop.permute.xlu0 %1136 }
 0x452   :  { %11564 = vst [vmem:[#allocation74_spill] sm:$0xff] %v8607_v28 }
 0x454   :  { %v8577_v35 = vpop.permute.xlu1 %921 }
 0x455   :  { %1126 = vrot.lane.b32.xlu0 %v8160_v18, %s11407_s0  ;;  %1022 = vrot.lane.b32.xlu1 %v8114_v12, %s11407_s0  ;;  %v933_v12 = vmul.f32 %v8452_v16, %v8539_v20  ;;  %11559 = vst [vmem:[#allocation69_spill] sm:$0xff] %v8577_v35  ;;  %v939_v33 = vmul.f32 %v8577_v35, %v8516_v13 }
 0x458   :  { %v8591_v45 = vpop.permute.xlu1 %1036 }
 0x459   :  { %1198 = vrot.lane.b32.xlu0 %v1182_v51, %s11409_s7  ;;  %1094 = vrot.lane.b32.xlu1 %v1078_v39, %s11409_s7  ;;  %11561 = vst [vmem:[#allocation71_spill] sm:$0xff] %v8591_v45  ;;  %v8611_v39 = vpop.permute.xlu0 %1134 }
 0x45a   :  { %11566 = vst [vmem:[#allocation76_spill] sm:$0xff] %v8611_v39  ;;  %v1154_v56 = vmul.f32 %v8611_v39, %v8494_v46 }
 0x45c   :  { %v8603_v40 = vpop.permute.xlu1 %1034 }
 0x45d   :  { %823 = vrot.lane.b32.xlu0 %v8100_v10, %s11399_s1  ;;  %821 = vrot.lane.b32.xlu1 %v8160_v18, %s11399_s1  ;;  %11563 = vst [vmem:[#allocation73_spill] sm:$0xff] %v8603_v40 }
 0x460   :  { %v8609_v51 = vpop.permute.xlu1 %1032 }
 0x461   :  { %951 = vrot.lane.b32.xlu0 %v934_v37, %s11409_s7  ;;  %949 = vrot.lane.b32.xlu1 %v933_v12, %s11409_s7  ;;  %11565 = vst [vmem:[#allocation75_spill] sm:$0xff] %v8609_v51  ;;  %v8615_v12 = vpop.permute.xlu0 %1132 }
 0x462   :  { %11568 = vst [vmem:[#allocation78_spill] sm:$0xff] %v8615_v12  ;;  %v1153_v8 = vmul.f32 %v8615_v12, %v8486_v42 }
 0x464   :  { %v8613_v37 = vpop.permute.xlu1 %1030 }
 0x465   :  { %827 = vrot.lane.b32.xlu0 %v8077_v5, %s11399_s1  ;;  %825 = vrot.lane.b32.xlu1 %v8151_v17, %s11399_s1  ;;  %11567 = vst [vmem:[#allocation77_spill] sm:$0xff] %v8613_v37  ;;  %v1050_v31 = vmul.f32 %v8613_v37, %v8494_v46 }
 0x469   :  { %955 = vrot.lane.b32.xlu0 %v936_v52, %s11409_s7  ;;  %953 = vrot.lane.b32.xlu1 %v935_v30, %s11409_s7  ;;  %v8617_v52 = vpop.permute.xlu1 %1028  ;;  %v8619_v30 = vpop.permute.xlu0 %1130 }
 0x46a   :  { %11569 = vst [vmem:[#allocation79_spill] sm:$0xff] %v8617_v52  ;;  %11570 = vst [vmem:[#allocation80_spill] sm:$0xff] %v8619_v30  ;;  %v1049_v54 = vmul.f32 %v8617_v52, %v8486_v42 }
 0x46d   :  { %831 = vrot.lane.b32.xlu0 %v8062_v3, %s11399_s1  ;;  %829 = vrot.lane.b32.xlu1 %v8069_v4, %s11399_s1 }
 0x471   :  { %959 = vrot.lane.b32.xlu0 %v938_v24, %s11409_s7  ;;  %957 = vrot.lane.b32.xlu1 %v937_v15, %s11409_s7  ;;  %v8621_v15 = vpop.permute.xlu1 %1026  ;;  %v8623_v24 = vpop.permute.xlu0 %1128 }
 0x472   :  { %11571 = vst [vmem:[#allocation81_spill] sm:$0xff] %v8621_v15  ;;  %11572 = vst [vmem:[#allocation82_spill] sm:$0xff] %v8623_v24 }
 0x475   :  { %835 = vrot.lane.b32.xlu0 %v8046_v1, %s11399_s1  ;;  %833 = vrot.lane.b32.xlu1 %v8054_v2, %s11399_s1 }
 0x479   :  { %963 = vrot.lane.b32.xlu0 %v940_v36, %s11409_s7  ;;  %961 = vrot.lane.b32.xlu1 %v939_v33, %s11409_s7  ;;  %v8625_v36 = vpop.permute.xlu1 %1024 }
 0x47a   :  { %11573 = vst [vmem:[#allocation83_spill] sm:$0xff] %v8625_v36 }
 0x497   :  { %v1201_v33 = vpop.permute.xlu0 %1200  ;;  %v1097_v57 = vpop.permute.xlu1 %1096 }
 0x49f   :  { %v1203_v35 = vpop.permute.xlu0 %1202  ;;  %v1099_v49 = vpop.permute.xlu1 %1098 }
 0x4a3   :  { %v1205_v60 = vpop.permute.xlu0 %1204  ;;  %v1101_v16 = vpop.permute.xlu1 %1100 }
 0x4a4   :  { %v1225_v53 = vadd.f32 %v1205_v60, %v1153_v8  ;;  %v1121_v14 = vsub.f32 %v1049_v54, %v1101_v16  ;;  %v1155_v54 = vmul.f32 %v8607_v28, %v8506_v50 }
 0x4a6   :  { %1276 = vrot.lane.b32.xlu0 %v1225_v53, %s11405_s28  ;;  %1244 = vrot.lane.b32.xlu1 %v1121_v14, %s11407_s0  ;;  %v1051_v53 = vmul.f32 %v8609_v51, %v8506_v50 }
 0x4a7   :  { %v1207_v11 = vpop.permute.xlu0 %1206  ;;  %v1103_v9 = vpop.permute.xlu1 %1102 }
 0x4a8   :  { %v1226_v12 = vadd.f32 %v1207_v11, %v1154_v56  ;;  %v1122_v62 = vsub.f32 %v1050_v31, %v1103_v9  ;;  %v1156_v56 = vmul.f32 %v8601_v58, %v8516_v13  ;;  %v1152_v58 = vmul.f32 %v8619_v30, %v8478_v32  ;;  %v11605_v30 = vld [vmem:[#allocation20_spill] sm:$0xff] }
 0x4aa   :  { %1278 = vrot.lane.b32.xlu0 %v1226_v12, %s11405_s28  ;;  %1246 = vrot.lane.b32.xlu1 %v1122_v62, %s11407_s0  ;;  %v1052_v62 = vmul.f32 %v8603_v40, %v8516_v13 }
 0x4af   :  { %v1209_v60 = vpop.permute.xlu0 %1208  ;;  %v1105_v14 = vpop.permute.xlu1 %1104 }
 0x4b0   :  { %v1227_v16 = vadd.f32 %v1209_v60, %v1155_v54  ;;  %v1123_v8 = vsub.f32 %v1051_v53, %v1105_v14  ;;  %v1157_v54 = vmul.f32 %v8589_v43, %v8529_v48  ;;  %v1053_v53 = vmul.f32 %v8591_v45, %v8529_v48 }
 0x4b2   :  { %1280 = vrot.lane.b32.xlu0 %v1227_v16, %s11405_s28  ;;  %1248 = vrot.lane.b32.xlu1 %v1123_v8, %s11407_s0 }
 0x4b7   :  { %v1211_v31 = vpop.permute.xlu0 %1210  ;;  %v1107_v9 = vpop.permute.xlu1 %1106 }
 0x4b8   :  { %v1228_v11 = vadd.f32 %v1211_v31, %v1156_v56  ;;  %v1124_v12 = vsub.f32 %v1052_v62, %v1107_v9  ;;  %v1048_v56 = vmul.f32 %v8621_v15, %v8478_v32  ;;  %v1224_v9 = vadd.f32 %v1203_v35, %v1152_v58 }
 0x4ba   :  { %1282 = vrot.lane.b32.xlu0 %v1228_v11, %s11405_s28  ;;  %1250 = vrot.lane.b32.xlu1 %v1124_v12, %s11407_s0  ;;  %v1120_v11 = vsub.f32 %v1048_v56, %v1099_v49  ;;  %v1151_v12 = vmul.f32 %v8623_v24, %v8466_v47 }
 0x4c3   :  { %v1213_v60 = vpop.permute.xlu0 %1212  ;;  %v1109_v14 = vpop.permute.xlu1 %1108 }
 0x4c4   :  { %v1229_v16 = vadd.f32 %v1213_v60, %v1157_v54  ;;  %v1125_v8 = vsub.f32 %v1053_v53, %v1109_v14  ;;  %v1047_v54 = vmul.f32 %v8625_v36, %v8466_v47  ;;  %v1223_v14 = vadd.f32 %v1201_v33, %v1151_v12  ;;  %v11604_v36 = vld [vmem:[#allocation27_spill] sm:$0xff] }
 0x4c6   :  { %1284 = vrot.lane.b32.xlu0 %v1229_v16, %s11405_s28  ;;  %1252 = vrot.lane.b32.xlu1 %v1125_v8, %s11407_s0  ;;  %v1119_v16 = vsub.f32 %v1047_v54, %v1097_v57  ;;  %v894_v54 = vmul.f32 %v8466_v47, %v8100_v10 }
 0x4c7   :  { %v8661_v62 = vpop.permute.xlu0 %1126  ;;  %v8663_v31 = vpop.permute.xlu1 %1022 }
 0x4c8   :  { %11574 = vst [vmem:[#allocation84_spill] sm:$0xff] %v8661_v62  ;;  %11575 = vst [vmem:[#allocation85_spill] sm:$0xff] %v8663_v31  ;;  %v1150_v8 = vmul.f32 %v8661_v62, %v8539_v20  ;;  %v1046_v49 = vmul.f32 %v8663_v31, %v8539_v20 }
 0x4ca   :  { %1274 = vrot.lane.b32.xlu0 %v1224_v9, %s11405_s28  ;;  %1242 = vrot.lane.b32.xlu1 %v1120_v11, %s11407_s0 }
 0x4cb   :  { %v1199_v53 = vpop.permute.xlu0 %1198  ;;  %v1095_v60 = vpop.permute.xlu1 %1094 }
 0x4cc   :  { %v1222_v56 = vadd.f32 %v1199_v53, %v1150_v8  ;;  %v1118_v9 = vsub.f32 %v1046_v49, %v1095_v60 }
 0x4ce   :  { %1272 = vrot.lane.b32.xlu0 %v1223_v14, %s11405_s28  ;;  %1240 = vrot.lane.b32.xlu1 %v1119_v16, %s11407_s0  ;;  %v893_v14 = vmul.f32 %v8539_v20, %v8160_v18 }
 0x4cf   :  { %v8677_v35 = vpop.permute.xlu0 %823  ;;  %v8679_v58 = vpop.permute.xlu1 %821 }
 0x4d0   :  { %11576 = vst [vmem:[#allocation86_spill] sm:$0xff] %v8677_v35  ;;  %11577 = vst [vmem:[#allocation87_spill] sm:$0xff] %v8679_v58  ;;  %v846_v11 = vmul.f32 %v8677_v35, %v8466_v47  ;;  %v845_v12 = vmul.f32 %v8679_v58, %v8539_v20 }
 0x4d2   :  { %1270 = vrot.lane.b32.xlu0 %v1222_v56, %s11405_s28  ;;  %1238 = vrot.lane.b32.xlu1 %v1118_v9, %s11407_s0  ;;  %v896_v9 = vmul.f32 %v8486_v42, %v8077_v5  ;;  %s11415_s0 = smov 16   ;;  %s11662_s28 = smov 64  }
 0x4d3   :  { %v952_v57 = vpop.permute.xlu0 %951  ;;  %v950_v33 = vpop.permute.xlu1 %949 }
 0x4d4   :  { %v974_v16 = vadd.f32 %v952_v57, %v894_v54  ;;  %v973_v8 = vadd.f32 %v950_v33, %v893_v14 }
 0x4d6   :  { %863 = vrot.lane.b32.xlu0 %v846_v11, %s11409_s7  ;;  %861 = vrot.lane.b32.xlu1 %v845_v12, %s11409_s7  ;;  %v895_v11 = vmul.f32 %v8478_v32, %v8151_v17 }
 0x4d7   :  { %v8693_v53 = vpop.permute.xlu0 %827  ;;  %v8695_v60 = vpop.permute.xlu1 %825 }
 0x4d8   :  { %11578 = vst [vmem:[#allocation88_spill] sm:$0xff] %v8693_v53  ;;  %11579 = vst [vmem:[#allocation89_spill] sm:$0xff] %v8695_v60  ;;  %v848_v10 = vmul.f32 %v8693_v53, %v8486_v42  ;;  %v847_v18 = vmul.f32 %v8695_v60, %v8478_v32  ;;  %v11598_v60 = vld [vmem:[#allocation16_spill] sm:$0xff] }
 0x4da   :  { %991 = vrot.lane.b32.xlu0 %v974_v16, %s11399_s1  ;;  %989 = vrot.lane.b32.xlu1 %v973_v8, %s11399_s1  ;;  %v898_v8 = vmul.f32 %v8506_v50, %v8062_v3 }
 0x4db   :  { %v956_v49 = vpop.permute.xlu0 %955  ;;  %v954_v56 = vpop.permute.xlu1 %953 }
 0x4dc   :  { %v976_v12 = vadd.f32 %v956_v49, %v896_v9  ;;  %v975_v54 = vadd.f32 %v954_v56, %v895_v11 }
 0x4de   :  { %867 = vrot.lane.b32.xlu0 %v848_v10, %s11409_s7  ;;  %865 = vrot.lane.b32.xlu1 %v847_v18, %s11409_s7  ;;  %v897_v10 = vmul.f32 %v8494_v46, %v8069_v4 }
 0x4df   :  { %v8709_v57 = vpop.permute.xlu0 %831  ;;  %v8711_v33 = vpop.permute.xlu1 %829 }
 0x4e0   :  { %11580 = vst [vmem:[#allocation90_spill] sm:$0xff] %v8709_v57  ;;  %11581 = vst [vmem:[#allocation91_spill] sm:$0xff] %v8711_v33  ;;  %v850_v5 = vmul.f32 %v8709_v57, %v8506_v50  ;;  %v849_v17 = vmul.f32 %v8711_v33, %v8494_v46  ;;  %v11595_v57 = vld [vmem:[#allocation14_spill] sm:$0xff]  ;;  %v11597_v33 = vld [vmem:[#allocation17_spill] sm:$0xff] }
 0x4e2   :  { %995 = vrot.lane.b32.xlu0 %v976_v12, %s11399_s1  ;;  %993 = vrot.lane.b32.xlu1 %v975_v54, %s11399_s1  ;;  %v900_v54 = vmul.f32 %v8529_v48, %v8046_v1  ;;  %v11584_v1 = vld [vmem:[#allocation23_spill] sm:$0xff] }
 0x4e3   :  { %v960_v14 = vpop.permute.xlu0 %959  ;;  %v958_v16 = vpop.permute.xlu1 %957 }
 0x4e4   :  { %v978_v18 = vadd.f32 %v960_v14, %v898_v8  ;;  %v977_v9 = vadd.f32 %v958_v16, %v897_v10  ;;  %v1316_v8 = vmul.f32 %v8218_v44, %v8361_v6 }
 0x4e6   :  { %871 = vrot.lane.b32.xlu0 %v850_v5, %s11409_s7  ;;  %869 = vrot.lane.b32.xlu1 %v849_v17, %s11409_s7  ;;  %v899_v5 = vmul.f32 %v8516_v13, %v8054_v2  ;;  %v8741_v17 = vpop.f32.mrf.mxu0  ;;  %v11585_v2 = vld [vmem:[#allocation37_spill] sm:$0xff] }
 0x4e7   :  { %v8725_v49 = vpop.permute.xlu0 %835  ;;  %v8727_v56 = vpop.permute.xlu1 %833  ;;  %v1317_v10 = vmul.f32 %v11584_v1, %v8741_v17 }
 0x4e8   :  { %11582 = vst [vmem:[#allocation92_spill] sm:$0xff] %v8725_v49  ;;  %11583 = vst [vmem:[#allocation93_spill] sm:$0xff] %v8727_v56  ;;  %v852_v3 = vmul.f32 %v8725_v49, %v8529_v48  ;;  %v851_v4 = vmul.f32 %v8727_v56, %v8516_v13  ;;  %v11593_v49 = vld [vmem:[#allocation11_spill] sm:$0xff] }
 0x4e9   :  { %v1364_v56 = vmul.f32 %v11593_v49, %v8361_v6 }
 0x4ea   :  { %999 = vrot.lane.b32.xlu0 %v978_v18, %s11399_s1  ;;  %997 = vrot.lane.b32.xlu1 %v977_v9, %s11399_s1  ;;  %v11586_v18 = vld [vmem:[#allocation15_spill] sm:$0xff] }
 0x4eb   :  { %v964_v11 = vpop.permute.xlu0 %963  ;;  %v962_v12 = vpop.permute.xlu1 %961  ;;  %v1314_v9 = vmul.f32 %v11586_v18, %v11585_v2 }
 0x4ec   :  { %v980_v14 = vadd.f32 %v964_v11, %v900_v54  ;;  %v979_v16 = vadd.f32 %v962_v12, %v899_v5  ;;  %v11588_v11 = vld [vmem:[#allocation39_spill] sm:$0xff]  ;;  %v11589_v12 = vld [vmem:[#allocation12_spill] sm:$0xff]  ;;  %v11590_v5 = vld [vmem:[#allocation13_spill] sm:$0xff] }
 0x4ed   :  { %v1315_v54 = vmul.f32 %v11589_v12, %v11588_v11 }
 0x4ee   :  { %875 = vrot.lane.b32.xlu0 %v852_v3, %s11409_s7  ;;  %873 = vrot.lane.b32.xlu1 %v851_v4, %s11409_s7  ;;  %v11587_v3 = vld [vmem:[#allocation9_spill] sm:$0xff]  ;;  %s11413_s7 = smov 32  }
 0x4ef   :  { %v1365_v4 = vmul.f32 %v11587_v3, %v8741_v17 }
 0x4f2   :  { %1003 = vrot.lane.b32.xlu0 %v980_v14, %s11399_s1  ;;  %1001 = vrot.lane.b32.xlu1 %v979_v16, %s11399_s1  ;;  %v1412_v14 = vmul.f32 %v11590_v5, %v8361_v6  ;;  %v11591_v16 = vld [vmem:[#allocation34_spill] sm:$0xff]  ;;  %s11631_s1 = smov 120  }
 0x4f6   :  { %1340 = vrot.lane.b32.xlu0 %v1317_v10, %s11451_s2  ;;  %1338 = vrot.lane.b32.xlu1 %v1316_v8, %s11451_s2  ;;  %v11592_v8 = vld [vmem:[#allocation22_spill] sm:$0xff] }
 0x4f7   :  { %v1360_v10 = vmul.f32 %v11592_v8, %v11591_v16 }
 0x4fa   :  { %1388 = vrot.lane.b32.xlu0 %v1365_v4, %s11419_s29  ;;  %1334 = vrot.lane.b32.xlu1 %v1314_v9, %s11451_s2  ;;  %v11594_v9 = vld [vmem:[#allocation10_spill] sm:$0xff] }
 0x4fb   :  { %v1413_v4 = vmul.f32 %v11594_v9, %v8741_v17 }
 0x4fe   :  { %1336 = vrot.lane.b32.xlu0 %v1315_v54, %s11451_s2  ;;  %1434 = vrot.lane.b32.xlu1 %v1412_v14, %s11417_s6  ;;  %v1363_v54 = vmul.f32 %v11595_v57, %v11588_v11  ;;  %v11596_v14 = vld [vmem:[#allocation35_spill] sm:$0xff] }
 0x4ff   :  { %v1313_v53 = vmul.f32 %v11597_v33, %v11596_v14 }
 0x502   :  { %1386 = vrot.lane.b32.xlu0 %v1364_v56, %s11419_s29  ;;  %1378 = vrot.lane.b32.xlu1 %v1360_v10, %s11419_s29  ;;  %v1362_v56 = vmul.f32 %v11598_v60, %v11585_v2  ;;  %v11599_v10 = vld [vmem:[#allocation19_spill] sm:$0xff] }
 0x503   :  { %v1411_v35 = vmul.f32 %v11599_v10, %v11588_v11 }
 0x506   :  { %1436 = vrot.lane.b32.xlu0 %v1413_v4, %s11417_s6  ;;  %v11600_v4 = vld [vmem:[#allocation25_spill] sm:$0xff] }
 0x507   :  { %v1312_v58 = vmul.f32 %v11600_v4, %v11591_v16 }
 0x50a   :  { %1384 = vrot.lane.b32.xlu0 %v1363_v54, %s11419_s29  ;;  %v11601_v54 = vld [vmem:[#allocation18_spill] sm:$0xff] }
 0x50b   :  { %v1361_v31 = vmul.f32 %v11601_v54, %v11596_v14 }
 0x50e   :  { %1332 = vrot.lane.b32.xlu0 %v1313_v53, %s11451_s2  ;;  %v11602_v53 = vld [vmem:[#allocation21_spill] sm:$0xff] }
 0x50f   :  { %v1410_v62 = vmul.f32 %v11602_v53, %v11585_v2 }
 0x512   :  { %1382 = vrot.lane.b32.xlu0 %v1362_v56, %s11419_s29  ;;  %v11603_v56 = vld [vmem:[#allocation33_spill] sm:$0xff] }
 0x513   :  { %v1311_v24 = vmul.f32 %v11604_v36, %v11603_v56 }
 0x516   :  { %1432 = vrot.lane.b32.xlu0 %v1411_v35, %s11417_s6 }
 0x518   :  { %v1277_v15 = vpop.permute.xlu0 %1276  ;;  %v1245_v35 = vpop.permute.xlu1 %1244 }
 0x51a   :  { %1330 = vrot.lane.b32.xlu0 %v1312_v58, %s11451_s2  ;;  %v1409_v58 = vmul.f32 %v11605_v30, %v11596_v14 }
 0x51c   :  { %v1279_v45 = vpop.permute.xlu0 %1278  ;;  %v1247_v43 = vpop.permute.xlu1 %1246 }
 0x51e   :  { %1380 = vrot.lane.b32.xlu0 %v1361_v31, %s11419_s29 }
 0x522   :  { %1430 = vrot.lane.b32.xlu0 %v1410_v62, %s11417_s6 }
 0x524   :  { %v1281_v31 = vpop.permute.xlu0 %1280  ;;  %v1249_v40 = vpop.permute.xlu1 %1248 }
 0x525   :  { %v1299_v55 = vsel %vm1013_vm4, %v1249_v40, %v1281_v31  ;;  %v7676_v31 = vld [vmem:[%s11495_s8] sm:$0xff] }
 0x526   :  { %1328 = vrot.lane.b32.xlu0 %v1311_v24, %s11451_s2 }
 0x52a   :  { %1428 = vrot.lane.b32.xlu0 %v1409_v58, %s11417_s6 }
 0x52c   :  { %v1283_v51 = vpop.permute.xlu0 %1282  ;;  %v1251_v28 = vpop.permute.xlu1 %1250 }
 0x52d   :  { %v1300_v24 = vsel %vm1013_vm4, %v1251_v28, %v1283_v51  ;;  %v1297_v51 = vsel %vm1013_vm4, %v1245_v35, %v1277_v15 }
 0x538   :  { %v1285_v62 = vpop.permute.xlu0 %1284  ;;  %v1253_v37 = vpop.permute.xlu1 %1252 }
 0x539   :  { %v1301_v39 = vsel %vm1013_vm4, %v1253_v37, %v1285_v62  ;;  %v1298_v37 = vsel %vm1013_vm4, %v1247_v43, %v1279_v45  ;;  %v805_v43 = vmul.f32 %v7676_v31, %v8539_v20 }
 0x53a   :  { %7134 = vmatprep.subr.msk.mxu0 %vm379_vm3, %v1301_v39 }
 0x53b   :  { %7135 = vmatpush3.xpose.msk.msra.mxu0 %vm379_vm3, %v1301_v39 }
 0x53c   :  { %v1275_v52 = vpop.permute.xlu0 %1274  ;;  %7136 = vmatprep.subr.msk.mxu0 %vm379_vm3, %v1300_v24  ;;  %v1243_v58 = vpop.permute.xlu1 %1242 }
 0x53f   :  { %7137 = vmatpush3.xpose.msk.msra.mxu0 %vm379_vm3, %v1300_v24 }
 0x540   :  { %v1273_v27 = vpop.permute.xlu0 %1272  ;;  %7138 = vmatprep.subr.msk.mxu0 %vm379_vm3, %v1299_v55  ;;  %v1241_v22 = vpop.permute.xlu1 %1240 }
 0x543   :  { %7139 = vmatpush3.xpose.msk.msra.mxu0 %vm379_vm3, %v1299_v55  ;;  %v1296_v55 = vsel %vm1013_vm4, %v1243_v58, %v1275_v52 }
 0x544   :  { %v1271_v62 = vpop.permute.xlu0 %1270  ;;  %7140 = vmatprep.subr.msk.mxu0 %vm379_vm3, %v1298_v37  ;;  %v1239_v28 = vpop.permute.xlu1 %1238 }
 0x545   :  { %v1294_v52 = vsel %vm1013_vm4, %v1239_v28, %v1271_v62 }
 0x547   :  { %7141 = vmatpush3.xpose.msk.msra.mxu0 %vm379_vm3, %v1298_v37  ;;  %v1295_v37 = vsel %vm1013_vm4, %v1241_v22, %v1273_v27  ;;  %v7678_v22 = vld [vmem:[%s11495_s8 + $0x10] sm:$0xff] }
 0x548   :  { %v864_v39 = vpop.permute.xlu0 %863  ;;  %7142 = vmatprep.subr.msk.mxu0 %vm379_vm3, %v1297_v51  ;;  %v862_v40 = vpop.permute.xlu1 %861  ;;  %v807_v31 = vmul.f32 %v7678_v22, %v8478_v32 }
 0x549   :  { %v885_v45 = vsub.f32 %v805_v43, %v862_v40  ;;  %v7677_v40 = vld [vmem:[%s11495_s8 + $0x8] sm:$0xff] }
 0x54a   :  { %v806_v27 = vmul.f32 %v7677_v40, %v8466_v47 }
 0x54b   :  { %7143 = vmatpush3.xpose.msk.msra.mxu0 %vm379_vm3, %v1297_v51 }
 0x54c   :  { %v992_v24 = vpop.permute.xlu0 %991  ;;  %7144 = vmatprep.subr.msk.mxu0 %vm379_vm3, %v1296_v55  ;;  %v990_v15 = vpop.permute.xlu1 %989  ;;  %v886_v43 = vsub.f32 %v806_v27, %v864_v39 }
 0x54d   :  { %v1014_v35 = vsel %vm1013_vm4, %v885_v45, %v990_v15  ;;  %v7679_v15 = vld [vmem:[%s11495_s8 + $0x18] sm:$0xff] }
 0x54e   :  { %7150 = vmatprep.mubr.msk.f32.mxu0 %vm379_vm3, %v1014_v35  ;;  %v1015_v45 = vsel %vm1013_vm4, %v886_v43, %v992_v24  ;;  %v808_v47 = vmul.f32 %v7679_v15, %v8486_v42  ;;  %v7680_v35 = vld [vmem:[%s11495_s8 + $0x20] sm:$0xff]  ;;  %v7681_v42 = vld [vmem:[%s11495_s8 + $0x28] sm:$0xff] }
 0x54f   :  { %7145 = vmatpush3.xpose.msk.msra.mxu0 %vm379_vm3, %v1296_v55  ;;  %v809_v32 = vmul.f32 %v7680_v35, %v8494_v46  ;;  %v810_v27 = vmul.f32 %v7681_v42, %v8506_v50  ;;  %v7683_v50 = vld [vmem:[%s11495_s8 + $0x30] sm:$0xff] }
 0x550   :  { %v868_v0 = vpop.permute.xlu0 %867  ;;  %7146 = vmatprep.subr.msk.mxu0 %vm379_vm3, %v1295_v37  ;;  %v866_v20 = vpop.permute.xlu1 %865 }
 0x551   :  { %v887_v62 = vsub.f32 %v807_v31, %v866_v20 }
 0x553   :  { %7147 = vmatpush3.xpose.msk.msra.mxu0 %vm379_vm3, %v1295_v37  ;;  %v888_v37 = vsub.f32 %v808_v47, %v868_v0 }
 0x554   :  { %v996_v58 = vpop.permute.xlu0 %995  ;;  %7148 = vmatprep.subr.msk.mxu0 %vm379_vm3, %v1294_v52  ;;  %v994_v51 = vpop.permute.xlu1 %993 }
 0x555   :  { %v1016_v39 = vsel %vm1013_vm4, %v887_v62, %v994_v51  ;;  %v1017_v40 = vsel %vm1013_vm4, %v888_v37, %v996_v58  ;;  %v7682_v58 = vld [vmem:[%s11495_s8 + $0x38] sm:$0xff]  ;;  %v811_v62 = vmul.f32 %v7683_v50, %v8516_v13  ;;  %v1309_v13 = vmul.f32 %v8306_v41, %v8741_v17 }
 0x556   :  { %v812_v43 = vmul.f32 %v7682_v58, %v8529_v48  ;;  %v1307_v17 = vmul.f32 %v8322_v34, %v11588_v11  ;;  %v1305_v11 = vmul.f32 %v8357_v25, %v11596_v14  ;;  %v110_v14 = vld [vmem:[%s11606_s30] sm:$0xff] }
 0x557   :  { %7149 = vmatpush3.xpose.msk.msra.mxu0 %vm379_vm3, %v1294_v52 }
 0x558   :  { %v872_v28 = vpop.permute.xlu0 %871  ;;  %v870_v55 = vpop.permute.xlu1 %869 }
 0x559   :  { %v889_v20 = vsub.f32 %v809_v32, %v870_v55  ;;  %v890_v51 = vsub.f32 %v810_v27, %v872_v28 }
 0x55a   :  { %7151 = vmatmul.mubr.msk.f32.vlgmr.msra.gmra.mxu0 %vm379_vm3, %v1015_v45 }
 0x55b   :  { %7153 = vmatprep.mubr.msk.f32.mxu0 %vm379_vm3, %v1016_v39 }
 0x55c   :  { %v1000_v24 = vpop.permute.xlu0 %999  ;;  %v998_v52 = vpop.permute.xlu1 %997 }
 0x55d   :  { %v1018_v46 = vsel %vm1013_vm4, %v889_v20, %v998_v52  ;;  %v1019_v31 = vsel %vm1013_vm4, %v890_v51, %v1000_v24  ;;  %v1308_v20 = vmul.f32 %v8382_v63, %v8361_v6 }
 0x55e   :  { %7154 = vmatmul.mubr.msk.f32.gmra.mxu0 %vm379_vm3, %v1017_v40 }
 0x55f   :  { %7156 = vmatprep.mubr.msk.f32.mxu0 %vm379_vm3, %v1018_v46 }
 0x560   :  { %v876_v0 = vpop.permute.xlu0 %875  ;;  %v874_v22 = vpop.permute.xlu1 %873 }
 0x561   :  { %v892_v28 = vsub.f32 %v812_v43, %v876_v0  ;;  %v891_v55 = vsub.f32 %v811_v62, %v874_v22 }
 0x562   :  { %7157 = vmatmul.mubr.msk.f32.gmra.mxu0 %vm379_vm3, %v1019_v31 }
 0x564   :  { %v1004_v45 = vpop.permute.xlu0 %1003  ;;  %v1002_v15 = vpop.permute.xlu1 %1001 }
 0x565   :  { %v1021_v47 = vsel %vm1013_vm4, %v892_v28, %v1004_v45  ;;  %v1020_v35 = vsel %vm1013_vm4, %v891_v55, %v1002_v15  ;;  %v1306_v15 = vmul.f32 %v8334_v21, %v11585_v2  ;;  %v111_v2 = vld [vmem:[%s11606_s30 + $0x8] sm:$0xff] }
 0x566   :  { %7159 = vmatprep.mubr.msk.f32.mxu0 %vm379_vm3, %v1020_v35 }
 0x567   :  { %7160 = vmatmul.mubr.msk.f32.gmra.mxu0 %vm379_vm3, %v1021_v47 }
 0x568   :  { %v1341_v48 = vpop.permute.xlu0 %1340  ;;  %v1339_v39 = vpop.permute.xlu1 %1338 }
 0x569   :  { %v1357_v40 = vadd.f32 %v1341_v48, %v1309_v13  ;;  %v1356_v42 = vadd.f32 %v1339_v39, %v1308_v20 }
 0x56c   :  { %v1389_v32 = vpop.permute.xlu0 %1388  ;;  %v1335_v24 = vpop.permute.xlu1 %1334 }
 0x56d   :  { %v1405_v27 = vadd.f32 %v1389_v32, %v1357_v40  ;;  %v1354_v35 = vadd.f32 %v1335_v24, %v1306_v15 }
 0x570   :  { %v1337_v37 = vpop.permute.xlu0 %1336  ;;  %v1435_v22 = vpop.permute.xlu1 %1434 }
 0x571   :  { %v1355_v50 = vadd.f32 %v1337_v37, %v1307_v17  ;;  %v112_v17 = vld [vmem:[%s11606_s30 + $0x10] sm:$0xff] }
 0x574   :  { %v1387_v52 = vpop.permute.xlu0 %1386 }
 0x575   :  { %v1404_v46 = vadd.f32 %v1387_v52, %v1356_v42 }
 0x577   :  { %v1452_v31 = vadd.f32 %v1435_v22, %v1404_v46 }
 0x578   :  { %v1437_v51 = vpop.permute.xlu0 %1436 }
 0x579   :  { %v1453_v0 = vadd.f32 %v1437_v51, %v1405_v27 }
 0x57b   :  { %7162 = vmatprep.subr.mxu1 %v1453_v0 }
 0x57c   :  { %7163 = vmatpush3.msra.mxu1 %v1453_v0  ;;  %v1385_v58 = vpop.permute.xlu0 %1384  ;;  %v113_v0 = vld [vmem:[%s11606_s30 + $0x18] sm:$0xff] }
 0x57d   :  { %7164 = vmatprep.subr.mxu1 %v1452_v31  ;;  %v1403_v62 = vadd.f32 %v1385_v58, %v1355_v50 }
 0x57e   :  { %7165 = vmatpush3.msra.mxu1 %v1452_v31 }
 0x580   :  { %v1333_v43 = vpop.permute.xlu0 %1332 }
 0x581   :  { %v1353_v13 = vadd.f32 %v1333_v43, %v1305_v11 }
 0x584   :  { %v1383_v6 = vpop.permute.xlu0 %1382 }
 0x585   :  { %v1402_v48 = vadd.f32 %v1383_v6, %v1354_v35 }
 0x588   :  { %v1433_v28 = vpop.permute.xlu0 %1432 }
 0x589   :  { %v1451_v55 = vadd.f32 %v1433_v28, %v1403_v62 }
 0x58b   :  { %7166 = vmatprep.subr.mxu1 %v1451_v55 }
 0x58c   :  { %v8877_v45 = vpop.permute.xlu0 %1330  ;;  %7167 = vmatpush3.msra.mxu1 %v1451_v55  ;;  %v115_v55 = vld [vmem:[%s11606_s30 + $0x28] sm:$0xff] }
 0x590   :  { %v1381_v47 = vpop.permute.xlu0 %1380 }
 0x591   :  { %v1401_v20 = vadd.f32 %v1381_v47, %v1353_v13 }
 0x594   :  { %v1431_v32 = vpop.permute.xlu0 %1430 }
 0x595   :  { %v1450_v39 = vadd.f32 %v1431_v32, %v1402_v48  ;;  %v114_v48 = vld [vmem:[%s11606_s30 + $0x20] sm:$0xff] }
 0x597   :  { %7168 = vmatprep.subr.mxu1 %v1450_v39 }
 0x598   :  { %v8883_v37 = vpop.permute.xlu0 %1328  ;;  %7169 = vmatpush3.msra.mxu1 %v1450_v39 }
 0x59c   :  { %v1429_v52 = vpop.permute.xlu0 %1428 }
 0x59d   :  { %v1449_v40 = vadd.f32 %v1429_v52, %v1401_v20 }
 0x59f   :  { %7170 = vmatprep.subr.mxu1 %v1449_v40 }
 0x5a0   :  { %7171 = vmatpush3.msra.mxu1 %v1449_v40  ;;  %v117_v40 = vld [vmem:[%s11606_s30 + $0x38] sm:$0xff] }
 0x61a   :  { %v7152_v24 = vpop.f32.mrf.mxu0 }
 0x61b   :  { %v1608_v42 = vmul.f32 0.25, %v7152_v24 }
 0x61c   :  { %v1568_v27 = vpop.f32.mrf.mxu0 }
 0x61d   :  { %v1616_v46 = vadd.f32 %v1608_v42, %v111_v2  ;;  %v1607_v51 = vmul.f32 0.25, %v1568_v27  ;;  %v116_v42 = vld [vmem:[%s11606_s30 + $0x30] sm:$0xff] }
 0x61e   :  { %v7155_v22 = vpop.f32.mrf.mxu0 }
 0x61f   :  { %v1615_v31 = vadd.f32 %v1607_v51, %v110_v14  ;;  %v1610_v58 = vmul.f32 0.25, %v7155_v22  ;;  %v1626_v43 = vsel %vm224_vm2, %v1616_v46, -inf }
 0x620   :  { %1627 = vmax.xlane.f32.xlu0 %v1626_v43  ;;  %v1578_v6 = vpop.f32.mrf.mxu0 }
 0x621   :  { %v1618_v50 = vadd.f32 %v1610_v58, %v113_v0  ;;  %v1609_v62 = vmul.f32 0.25, %v1578_v6  ;;  %v1623_v28 = vsel %vm224_vm2, %v1615_v31, -inf  ;;  %v11607_v6 = vld [vmem:[#allocation31_spill] sm:$0xff] }
 0x622   :  { %1624 = vmax.xlane.f32.xlu1 %v1623_v28  ;;  %v7158_v15 = vpop.f32.mrf.mxu0 }
 0x623   :  { %v1617_v47 = vadd.f32 %v1609_v62, %v112_v17  ;;  %v1612_v35 = vmul.f32 0.25, %v7158_v15  ;;  %v1632_v13 = vsel %vm224_vm2, %v1618_v50, -inf  ;;  %v11608_v62 = vld [vmem:[#allocation32_spill] sm:$0xff] }
 0x624   :  { %v1588_v32 = vpop.f32.mrf.mxu0  ;;  %v1358_v28 = vmul.f32 %v11608_v62, %v11607_v6 }
 0x625   :  { %v1620_v39 = vadd.f32 %v1612_v35, %v115_v55  ;;  %v1611_v11 = vmul.f32 0.25, %v1588_v32  ;;  %v1629_v20 = vsel %vm224_vm2, %v1617_v47, -inf  ;;  %v11609_v55 = vld [vmem:[#allocation26_spill] sm:$0xff]  ;;  %v11610_v35 = vld [vmem:[#allocation29_spill] sm:$0xff]  ;;  %v11611_v32 = vld [vmem:[#allocation24_spill] sm:$0xff] }
 0x626   :  { %1633 = vmax.xlane.f32.xlu1 %v1632_v13  ;;  %1630 = vmax.xlane.f32.xlu0 %v1629_v20  ;;  %v1310_v15 = vmul.f32 %v11609_v55, %v11607_v6  ;;  %v1379_v13 = vpop.permute.xlu1 %1378 }
 0x627   :  { %v1619_v52 = vadd.f32 %v1611_v11, %v114_v48  ;;  %v7161_v2 = vpop.f32.mrf.mxu0  ;;  %v1638_v27 = vsel %vm224_vm2, %v1620_v39, -inf  ;;  %v1359_v48 = vmul.f32 %v11610_v35, %v11603_v56  ;;  %v1408_v11 = vmul.f32 %v11611_v32, %v11591_v16 }
 0x628   :  { %v1614_v24 = vmul.f32 0.25, %v7161_v2 }
 0x629   :  { %v1598_v14 = vpop.f32.mrf.mxu0  ;;  %v1635_v51 = vsel %vm224_vm2, %v1619_v52, -inf }
 0x62a   :  { %v1622_v0 = vadd.f32 %v1614_v24, %v117_v40  ;;  %v1613_v22 = vmul.f32 0.25, %v1598_v14  ;;  %1639 = vmax.xlane.f32.xlu1 %v1638_v27  ;;  %1636 = vmax.xlane.f32.xlu0 %v1635_v51 }
 0x62c   :  { %v1621_v58 = vadd.f32 %v1613_v22, %v116_v42  ;;  %v1644_v43 = vsel %vm224_vm2, %v1622_v0, -inf }
 0x62e   :  { %1645 = vmax.xlane.f32.xlu1 %v1644_v43  ;;  %v1641_v17 = vsel %vm224_vm2, %v1621_v58, -inf }
 0x62f   :  { %1642 = vmax.xlane.f32.xlu0 %v1641_v17 }
 0x63f   :  { %1374 = vrot.lane.b32.xlu1 %v1358_v28, %s11419_s29 }
 0x645   :  { %1326 = vrot.lane.b32.xlu0 %v1310_v15, %s11451_s2 }
 0x649   :  { %1376 = vrot.lane.b32.xlu0 %v1359_v48, %s11419_s29  ;;  %s11623_s29 = smov 80  }
 0x64d   :  { %1426 = vrot.lane.b32.xlu0 %v1408_v11, %s11417_s6 }
 0x6a9   :  { %v1628_v20 = vpop.xlane.xlu0 %1627 }
 0x6aa   :  { %v1648_v40 = vsub.f32 %v1616_v46, %v1628_v20 }
 0x6ab   :  { %v1625_v2 = vpop.xlane.xlu1 %1624 }
 0x6ac   :  { %v1657_v24 = vmul.f32 1.442695, %v1648_v40  ;;  %v1647_v42 = vsub.f32 %v1615_v31, %v1625_v2 }
 0x6ae   :  { %7512 = vpow2.f32 %v1657_v24  ;;  %v1655_v14 = vmul.f32 1.442695, %v1647_v42 }
 0x6af   :  { %v1631_v27 = vpop.xlane.xlu0 %1630  ;;  %v1634_v51 = vpop.xlane.xlu1 %1633 }
 0x6b0   :  { %7514 = vpow2.f32 %v1655_v14  ;;  %v1649_v22 = vsub.f32 %v1617_v47, %v1631_v27  ;;  %v1650_v43 = vsub.f32 %v1618_v50, %v1634_v51 }
 0x6b2   :  { %v1659_v17 = vmul.f32 1.442695, %v1649_v22  ;;  %v1661_v28 = vmul.f32 1.442695, %v1650_v43 }
 0x6b3   :  { %v1637_v15 = vpop.xlane.xlu0 %1636  ;;  %v1640_v48 = vpop.xlane.xlu1 %1639 }
 0x6b4   :  { %7516 = vpow2.f32 %v1659_v17  ;;  %v1651_v61 = vsub.f32 %v1619_v52, %v1637_v15  ;;  %v1652_v11 = vsub.f32 %v1620_v39, %v1640_v48  ;;  %v1304_v39 = vmul.f32 %v8380_v29, %v11591_v16 }
 0x6b5   :  { %7518 = vpow2.f32 %v1661_v28 }
 0x6b6   :  { %v1665_v25 = vmul.f32 1.442695, %v1652_v11  ;;  %v1663_v46 = vmul.f32 1.442695, %v1651_v61 }
 0x6b7   :  { %v1646_v20 = vpop.xlane.xlu1 %1645 }
 0x6b8   :  { %v1654_v40 = vsub.f32 %v1622_v0, %v1646_v20  ;;  %v1643_v31 = vpop.xlane.xlu0 %1642  ;;  %7520 = vpow2.f32 %v1665_v25  ;;  %v1352_v25 = vadd.f32 %v8877_v45, %v1304_v39 }
 0x6b9   :  { %v1653_v2 = vsub.f32 %v1621_v58, %v1643_v31  ;;  %7522 = vpow2.f32 %v1663_v46 }
 0x6ba   :  { %v1669_v47 = vmul.f32 1.442695, %v1654_v40  ;;  %v1400_v22 = vadd.f32 %v1379_v13, %v1352_v25  ;;  %v11612_v40 = vld [vmem:[#allocation30_spill] sm:$0xff] }
 0x6bb   :  { %v8929_v24 = vpop.eup %7512  ;;  %v1667_v50 = vmul.f32 1.442695, %v1653_v2  ;;  %v1406_v31 = vmul.f32 %v11612_v40, %v11607_v6  ;;  %v11613_v2 = vld [vmem:[#allocation28_spill] sm:$0xff] }
 0x6bc   :  { %v1327_v42 = vpop.permute.xlu0 %1326  ;;  %v1674_v14 = vsel %vm224_vm2, %v8929_v24, 0.0 }
 0x6bd   :  { %v7515_v27 = vpop.eup %7514  ;;  %7524 = vpow2.f32 %v1667_v50  ;;  %1675 = vadd.xlane.f32.xlu1 %v1674_v14  ;;  %v1375_v50 = vpop.permute.xlu1 %1374 }
 0x6be   :  { %v1671_v61 = vsel %vm224_vm2, %v7515_v27, 0.0  ;;  %7526 = vpow2.f32 %v1669_v47  ;;  %v1407_v47 = vmul.f32 %v11613_v2, %v11603_v56 }
 0x6bf   :  { %1672 = vadd.xlane.f32.xlu0 %v1671_v61 }
 0x6c0   :  { %v1377_v52 = vpop.permute.xlu0 %1376 }
 0x6c1   :  { %v8937_v0 = vpop.eup %7516 }
 0x6c2   :  { %v8939_v58 = vpop.eup %7518  ;;  %v1677_v51 = vsel %vm224_vm2, %v8937_v0, 0.0 }
 0x6c3   :  { %1678 = vadd.xlane.f32.xlu0 %v1677_v51  ;;  %v1680_v16 = vsel %vm224_vm2, %v8939_v58, 0.0 }
 0x6c4   :  { %1681 = vadd.xlane.f32.xlu1 %v1680_v16  ;;  %v1427_v43 = vpop.permute.xlu0 %1426  ;;  %v1303_v16 = vmul.f32 %v8404_v19, %v11603_v56 }
 0x6c5   :  { %v1448_v17 = vadd.f32 %v1427_v43, %v1400_v22  ;;  %v8945_v28 = vpop.eup %7520 }
 0x6c6   :  { %v1686_v45 = vsel %vm224_vm2, %v8945_v28, 0.0  ;;  %v7523_v15 = vpop.eup %7522 }
 0x6c7   :  { %7172 = vmatprep.subr.mxu1 %v1448_v17  ;;  %v1683_v11 = vsel %vm224_vm2, %v7523_v15, 0.0 }
 0x6c8   :  { %1687 = vadd.xlane.f32.xlu1 %v1686_v45  ;;  %7173 = vmatpush3.msra.mxu1 %v1448_v17  ;;  %v1351_v45 = vadd.f32 %v8883_v37, %v1303_v16 }
 0x6ca   :  { %v7525_v48 = vpop.eup %7524 }
 0x6cb   :  { %v1689_v46 = vsel %vm224_vm2, %v7525_v48, 0.0  ;;  %v7527_v20 = vpop.eup %7526 }
 0x6cc   :  { %1684 = vadd.xlane.f32.xlu1 %v1683_v11  ;;  %1690 = vadd.xlane.f32.xlu0 %v1689_v46  ;;  %v1692_v13 = vsel %vm224_vm2, %v7527_v20, 0.0  ;;  %v1302_v11 = vmul.f32 %v8422_v26, %v11607_v6 }
 0x6d0   :  { %1693 = vadd.xlane.f32.xlu1 %v1692_v13  ;;  %v1350_v13 = vadd.f32 %v1327_v42, %v1302_v11 }
 0x6e1   :  { %1422 = vrot.lane.b32.xlu1 %v1406_v31, %s11417_s6  ;;  %v1399_v31 = vadd.f32 %v1377_v52, %v1351_v45 }
 0x6e2   :  { %1424 = vrot.lane.b32.xlu0 %v1407_v47, %s11417_s6  ;;  %s11622_s6 = smov 96  }
 0x746   :  { %v1676_v39 = vpop.xlane.xlu1 %1675 }
 0x748   :  { %v1673_v14 = vpop.xlane.xlu0 %1672 }
 0x749   :  { %7528 = vrcp.f32 %v1673_v14 }
 0x74a   :  { %7530 = vrcp.f32 %v1676_v39  ;;  %v1398_v39 = vadd.f32 %v1375_v50, %v1350_v13 }
 0x74c   :  { %v1679_v25 = vpop.xlane.xlu0 %1678 }
 0x74d   :  { %v1682_v61 = vpop.xlane.xlu1 %1681  ;;  %7532 = vrcp.f32 %v1679_v25 }
 0x74e   :  { %7534 = vrcp.f32 %v1682_v61 }
 0x751   :  { %v1688_v51 = vpop.xlane.xlu1 %1687 }
 0x755   :  { %v1685_v22 = vpop.xlane.xlu1 %1684  ;;  %v1691_v43 = vpop.xlane.xlu0 %1690 }
 0x756   :  { %v7529_v17 = vpop.eup %7528  ;;  %7536 = vrcp.f32 %v1685_v22 }
 0x757   :  { %v1696_v46 = vmul.f32 %v7529_v17, %v7515_v27  ;;  %7538 = vrcp.f32 %v1688_v51  ;;  %v7531_v61 = vpop.eup %7530 }
 0x758   :  { %7540 = vrcp.f32 %v1691_v43  ;;  %v1698_v6 = vmul.f32 %v7531_v61, %v8929_v24  ;;  %v123_v61 = vld [vmem:[%s11614_s26 + $0x28] sm:$0xff] }
 0x759   :  { %v1694_v47 = vpop.xlane.xlu1 %1693  ;;  %7178 = vmatprep.mubr.msk.f32.mxu1 %vm224_vm2, %v1696_v46  ;;  %v1425_v14 = vpop.permute.xlu0 %1424 }
 0x75a   :  { %v1447_v56 = vadd.f32 %v1425_v14, %v1399_v31  ;;  %7542 = vrcp.f32 %v1694_v47  ;;  %v7533_v37 = vpop.eup %7532  ;;  %v120_v14 = vld [vmem:[%s11614_s26 + $0x10] sm:$0xff] }
 0x75b   :  { %v7535_v42 = vpop.eup %7534  ;;  %v1700_v27 = vmul.f32 %v7533_v37, %v8937_v0  ;;  %v125_v37 = vld [vmem:[%s11614_s26 + $0x38] sm:$0xff] }
 0x75c   :  { %7174 = vmatprep.subr.mxu1 %v1447_v56  ;;  %v1702_v51 = vmul.f32 %v7535_v42, %v8939_v58  ;;  %v118_v58 = vld [vmem:[%s11614_s26] sm:$0xff]  ;;  %v2007_v42 = vld [vmem:[%s11235_s14 + $0x30] sm:$0xff] }
 0x75d   :  { %v1423_v25 = vpop.permute.xlu1 %1422  ;;  %7175 = vmatpush3.msra.mxu1 %v1447_v56  ;;  %v121_v56 = vld [vmem:[%s11614_s26 + $0x18] sm:$0xff] }
 0x75e   :  { %v1446_v16 = vadd.f32 %v1423_v25, %v1398_v39  ;;  %v122_v39 = vld [vmem:[%s11614_s26 + $0x20] sm:$0xff]  ;;  %v124_v25 = vld [vmem:[%s11614_s26 + $0x30] sm:$0xff] }
 0x760   :  { %7176 = vmatprep.subr.mxu1 %v1446_v16 }
 0x761   :  { %7177 = vmatpush3.msra.mxu1 %v1446_v16  ;;  %v11615_v16 = vmov 0.0  }
 0x762   :  { %7179 = vmatmul.mubr.msk.f32.vlgmr.msra.gmra.mxu1 %vm224_vm2, %v1698_v6  ;;  %v2008_v6 = vld [vmem:[%s11235_s14 + $0x38] sm:$0xff] }
 0x763   :  { %v7537_v52 = vpop.eup %7536  ;;  %7181 = vmatprep.mubr.msk.f32.mxu1 %vm224_vm2, %v1700_v27  ;;  %7218 = vmatprep.subr.mxu0 %v2008_v6  ;;  %v2006_v27 = vld [vmem:[%s11235_s14 + $0x28] sm:$0xff] }
 0x764   :  { %v1704_v50 = vmul.f32 %v7537_v52, %v7523_v15  ;;  %v7539_v22 = vpop.eup %7538  ;;  %7219 = vmatpush3.msra.mxu0 %v2008_v6  ;;  %v2005_v52 = vld [vmem:[%s11235_s14 + $0x20] sm:$0xff] }
 0x765   :  { %v7541_v43 = vpop.eup %7540  ;;  %v1706_v24 = vmul.f32 %v7539_v22, %v8945_v28  ;;  %7220 = vmatprep.subr.mxu0 %v2007_v42  ;;  %v2002_v22 = vld [vmem:[%s11235_s14 + $0x8] sm:$0xff] }
 0x766   :  { %7182 = vmatmul.mubr.msk.f32.gmra.mxu1 %vm224_vm2, %v1702_v51  ;;  %v1708_v45 = vmul.f32 %v7541_v43, %v7525_v48  ;;  %7221 = vmatpush3.msra.mxu0 %v2007_v42  ;;  %v2004_v51 = vld [vmem:[%s11235_s14 + $0x18] sm:$0xff]  ;;  %v6553_v42 = vld [vmem:[%s11236_s15] ss:$0 sm:$0xff] }
 0x767   :  { %7184 = vmatprep.mubr.msk.f32.mxu1 %vm224_vm2, %v1704_v50  ;;  %v7543_v17 = vpop.eup %7542  ;;  %7222 = vmatprep.subr.mxu0 %v2006_v27  ;;  %v2003_v50 = vld [vmem:[%s11235_s14 + $0x10] sm:$0xff] }
 0x768   :  { %v1710_v0 = vmul.f32 %v7543_v17, %v7527_v20  ;;  %v119_v20 = vld [vmem:[%s11614_s26 + $0x8] sm:$0xff]  ;;  %7223 = vmatpush3.msra.mxu0 %v2006_v27 }
 0x769   :  { %7224 = vmatprep.subr.mxu0 %v2005_v52  ;;  %v11616_v27 = vld [vmem:[#allocation6_spill] sm:$0xff] }
 0x76a   :  { %7185 = vmatmul.mubr.msk.f32.gmra.mxu1 %vm224_vm2, %v1706_v24  ;;  %7225 = vmatpush3.msra.mxu0 %v2005_v52  ;;  %v2001_v24 = vld [vmem:[%s11235_s14] sm:$0xff] }
 0x76b   :  { %7187 = vmatprep.mubr.msk.f32.mxu1 %vm224_vm2, %v1708_v45  ;;  %7226 = vmatprep.subr.mxu0 %v2004_v51 }
 0x76c   :  { %7227 = vmatpush3.msra.mxu0 %v2004_v51 }
 0x76d   :  { %7228 = vmatprep.subr.mxu0 %v2003_v50 }
 0x76e   :  { %7188 = vmatmul.mubr.msk.f32.gmra.mxu1 %vm224_vm2, %v1710_v0  ;;  %7229 = vmatpush3.msra.mxu0 %v2003_v50 }
 0x76f   :  { %7206 = vmatprep.mubr.msk.f32.mxu1 %vm224_vm2, %v118_v58  ;;  %7230 = vmatprep.subr.mxu0 %v2002_v22 }
 0x770   :  { %7231 = vmatpush3.msra.mxu0 %v2002_v22  ;;  %v11617_v22 = vld [vmem:[#allocation5_spill] sm:$0xff] }
 0x771   :  { %7232 = vmatprep.subr.mxu0 %v2001_v24 }
 0x772   :  { %7233 = vmatpush3.msra.mxu0 %v2001_v24 }
 0x822   :  { %v7180_v15 = vpop.f32.mrf.mxu1 }
 0x824   :  { %v1801_v11 = vpop.f32.mrf.mxu1 }
 0x826   :  { %v7183_v46 = vpop.f32.mrf.mxu1 }
 0x828   :  { %v1811_v13 = vpop.f32.mrf.mxu1 }
 0x82a   :  { %v7186_v28 = vpop.f32.mrf.mxu1 }
 0x82c   :  { %v1821_v31 = vpop.f32.mrf.mxu1 }
 0x82e   :  { %v7189_v48 = vpop.f32.mrf.mxu1 }
 0x82f   :  { %7190 = vmatprep.subr.mxu1 %v7189_v48 }
 0x830   :  { %v1831_v47 = vpop.f32.mrf.mxu1  ;;  %7191 = vmatpush3.msra.mxu1 %v7189_v48 }
 0x831   :  { %7192 = vmatprep.subr.mxu1 %v1831_v47 }
 0x832   :  { %7193 = vmatpush3.msra.mxu1 %v1831_v47 }
 0x833   :  { %7194 = vmatprep.subr.mxu1 %v7186_v28 }
 0x834   :  { %7195 = vmatpush3.msra.mxu1 %v7186_v28 }
 0x835   :  { %7196 = vmatprep.subr.mxu1 %v1821_v31 }
 0x836   :  { %7197 = vmatpush3.msra.mxu1 %v1821_v31 }
 0x837   :  { %7198 = vmatprep.subr.mxu1 %v7183_v46 }
 0x838   :  { %7199 = vmatpush3.msra.mxu1 %v7183_v46 }
 0x839   :  { %7200 = vmatprep.subr.mxu1 %v1811_v13 }
 0x83a   :  { %7201 = vmatpush3.msra.mxu1 %v1811_v13 }
 0x83b   :  { %7202 = vmatprep.subr.mxu1 %v7180_v15 }
 0x83c   :  { %7203 = vmatpush3.msra.mxu1 %v7180_v15 }
 0x83d   :  { %7204 = vmatprep.subr.mxu1 %v1801_v11 }
 0x83e   :  { %7205 = vmatpush3.msra.mxu1 %v1801_v11 }
 0x83f   :  { %7207 = vmatmul.mubr.msk.f32.vlgmr.msra.gmra.mxu1 %vm224_vm2, %v119_v20 }
 0x840   :  { %7209 = vmatprep.mubr.msk.f32.mxu1 %vm224_vm2, %v120_v14 }
 0x843   :  { %7210 = vmatmul.mubr.msk.f32.gmra.mxu1 %vm224_vm2, %v121_v56 }
 0x844   :  { %7212 = vmatprep.mubr.msk.f32.mxu1 %vm224_vm2, %v122_v39 }
 0x847   :  { %7213 = vmatmul.mubr.msk.f32.gmra.mxu1 %vm224_vm2, %v123_v61 }
 0x848   :  { %7215 = vmatprep.mubr.msk.f32.mxu1 %vm224_vm2, %v124_v25 }
 0x84b   :  { %7216 = vmatmul.mubr.msk.f32.gmra.mxu1 %vm224_vm2, %v125_v37 }
 0x84c   :  { %2243 = vmatprep.mubr.f32.mxu1 %v11615_v16 }
 0x8ff   :  { %v7208_v43 = vpop.f32.mrf.mxu1 }
 0x901   :  { %v1930_v17 = vpop.f32.mrf.mxu1 }
 0x903   :  { %v7211_v45 = vpop.f32.mrf.mxu1 }
 0x904   :  { %1973 = vrot.lane.b32.xlu1 %v7211_v45, %s11415_s0 }
 0x905   :  { %v1940_v0 = vpop.f32.mrf.mxu1 }
 0x906   :  { %1971 = vrot.lane.b32.xlu0 %v1940_v0, %s11415_s0 }
 0x907   :  { %v7214_v58 = vpop.f32.mrf.mxu1 }
 0x908   :  { %1981 = vrot.lane.b32.xlu1 %v7214_v58, %s11413_s7 }
 0x909   :  { %v1950_v15 = vpop.f32.mrf.mxu1 }
 0x90a   :  { %1979 = vrot.lane.b32.xlu0 %v1950_v15, %s11413_s7  ;;  %s11678_s7 = smov 8  }
 0x90b   :  { %v7217_v11 = vpop.f32.mrf.mxu1 }
 0x90c   :  { %1989 = vrot.lane.b32.xlu1 %v7217_v11, %s11411_s5 }
 0x90d   :  { %v1960_v46 = vpop.f32.mrf.mxu1 }
 0x90e   :  { %1987 = vrot.lane.b32.xlu0 %v1960_v46, %s11411_s5 }
 0x976   :  { %v1974_v13 = vpop.permute.xlu1 %1973 }
 0x977   :  { %v1994_v14 = vsel %vm379_vm3, %v7208_v43, %v1974_v13 }
 0x978   :  { %v1972_v28 = vpop.permute.xlu0 %1971 }
 0x979   :  { %v1993_v47 = vsel %vm379_vm3, %v1930_v17, %v1972_v28 }
 0x97a   :  { %v1982_v31 = vpop.permute.xlu1 %1981 }
 0x97b   :  { %v1997_v61 = vsel %vm1995_vm5, %v1994_v14, %v1982_v31  ;;  %v2159_v14 = vld [vmem:[%s11239_s18 + $0x70] sm:$0xff] }
 0x97c   :  { %v1980_v48 = vpop.permute.xlu0 %1979 }
 0x97d   :  { %v1996_v56 = vsel %vm1995_vm5, %v1993_v47, %v1980_v48 }
 0x97e   :  { %v1990_v20 = vpop.permute.xlu1 %1989 }
 0x97f   :  { %v2000_v37 = vsel %vm1998_vm6, %v1997_v61, %v1990_v20  ;;  %v2160_v20 = vld [vmem:[%s11239_s18 + $0x78] sm:$0xff] }
 0x980   :  { %v1988_v39 = vpop.permute.xlu0 %1987  ;;  %2195 = vmatprep.subr.mxu1 %v2160_v20  ;;  %v2156_v61 = vld [vmem:[%s11239_s18 + $0x58] sm:$0xff] }
 0x981   :  { %v1999_v25 = vsel %vm1998_vm6, %v1996_v56, %v1988_v39  ;;  %2196 = vmatpush1.msra.mxu1 %v2159_v14  ;;  %v2158_v56 = vld [vmem:[%s11239_s18 + $0x68] sm:$0xff]  ;;  %v2157_v39 = vld [vmem:[%s11239_s18 + $0x60] sm:$0xff] }
 0x982   :  { %7234 = vmatprep.mubr.msk.f32.mxu0 %vm224_vm2, %v1999_v25  ;;  %2197 = vmatprep.subr.mxu1 %v2158_v56  ;;  %v2155_v25 = vld [vmem:[%s11239_s18 + $0x50] sm:$0xff]  ;;  %v6555_v14 = vld [vmem:[%s11238_s17] ss:$0 sm:$0xff] }
 0x983   :  { %7235 = vmatmul.mubr.msk.f32.vlgmr.msra.gmra.mxu0 %vm224_vm2, %v2000_v37  ;;  %2198 = vmatpush1.msra.mxu1 %v2157_v39  ;;  %v2154_v37 = vld [vmem:[%s11239_s18 + $0x48] sm:$0xff] }
 0x984   :  { %2199 = vmatprep.subr.mxu1 %v2156_v61 }
 0x985   :  { %2200 = vmatpush1.msra.mxu1 %v2155_v25 }
 0x986   :  { %2201 = vmatprep.subr.mxu1 %v2154_v37 }
 0xa43   :  { %v7236_v6 = vpop.f32.mrf.mxu0 }
 0xa44   :  { %v2091_v52 = vadd.f32 %v7236_v6, %v11616_v27  ;;  %v2153_v6 = vld [vmem:[%s11239_s18 + $0x40] sm:$0xff]  ;;  %v2151_v27 = vld [vmem:[%s11239_s18 + $0x30] sm:$0xff] }
 0xa45   :  { %v2081_v51 = vpop.f32.mrf.mxu0  ;;  %2202 = vmatpush1.msra.mxu1 %v2153_v6 }
 0xa46   :  { %v9050_v50 = vadd.f32 %v6553_v42, %v2091_v52  ;;  %v2090_v43 = vadd.f32 %v2081_v51, %v11617_v22  ;;  %v2150_v52 = vld [vmem:[%s11239_s18 + $0x28] sm:$0xff]  ;;  %v2149_v51 = vld [vmem:[%s11239_s18 + $0x20] sm:$0xff]  ;;  %v2148_v22 = vld [vmem:[%s11239_s18 + $0x18] sm:$0xff] }
 0xa48   :  { %v9053_v24 = vadd.f32 %v6553_v42, %v2090_v43  ;;  %v2106_v17 = vsel %vm224_vm2, %v9050_v50, 0.0  ;;  %v2152_v42 = vld [vmem:[%s11239_s18 + $0x38] sm:$0xff]  ;;  %v2147_v43 = vld [vmem:[%s11239_s18 + $0x10] sm:$0xff] }
 0xa49   :  { %2107 = vadd.xlane.f32.xlu1 %v2106_v17  ;;  %2203 = vmatprep.subr.mxu1 %v2152_v42  ;;  %v2146_v17 = vld [vmem:[%s11239_s18 + $0x8] sm:$0xff]  ;;  %v2379_v42 = vld [vmem:[%s11241_s20 + $0x78] sm:$0xff] }
 0xa4a   :  { %v2103_v45 = vsel %vm224_vm2, %v9053_v24, 0.0  ;;  %2204 = vmatpush1.msra.mxu1 %v2151_v27  ;;  %v2378_v27 = vld [vmem:[%s11241_s20 + $0x70] sm:$0xff] }
 0xa4b   :  { %2104 = vadd.xlane.f32.xlu0 %v2103_v45  ;;  %2205 = vmatprep.subr.mxu1 %v2150_v52  ;;  %v2145_v45 = vld [vmem:[%s11239_s18] sm:$0xff]  ;;  %v2393_v52 = vld [vmem:[%s11241_s20 + $0xe8] sm:$0xff] }
 0xa4c   :  { %2206 = vmatpush1.msra.mxu1 %v2149_v51  ;;  %v2377_v51 = vld [vmem:[%s11241_s20 + $0x68] sm:$0xff] }
 0xa4d   :  { %2207 = vmatprep.subr.mxu1 %v2148_v22  ;;  %v2392_v22 = vld [vmem:[%s11241_s20 + $0xe0] sm:$0xff] }
 0xa4e   :  { %2208 = vmatpush1.msra.mxu1 %v2147_v43  ;;  %v2376_v43 = vld [vmem:[%s11241_s20 + $0x60] sm:$0xff] }
 0xa4f   :  { %2209 = vmatprep.subr.mxu1 %v2146_v17  ;;  %v2391_v17 = vld [vmem:[%s11241_s20 + $0xd8] sm:$0xff] }
 0xa50   :  { %2210 = vmatpush1.msra.mxu1 %v2145_v45  ;;  %v2375_v45 = vld [vmem:[%s11241_s20 + $0x58] sm:$0xff] }
 0xad2   :  { %v2108_v0 = vpop.xlane.xlu1 %2107 }
 0xad3   :  { %v2110_v58 = vmul.f32 0.015625, %v2108_v0 }
 0xad4   :  { %v2105_v15 = vpop.xlane.xlu0 %2104 }
 0xad5   :  { %v2109_v11 = vmul.f32 0.015625, %v2105_v15  ;;  %v2112_v46 = vsub.f32 %v9050_v50, %v2110_v58 }
 0xad7   :  { %v2111_v13 = vsub.f32 %v9053_v24, %v2109_v11  ;;  %v2114_v48 = vmul.f32 %v2112_v46, %v2112_v46 }
 0xad9   :  { %v2113_v28 = vmul.f32 %v2111_v13, %v2111_v13  ;;  %v2118_v47 = vsel %vm224_vm2, %v2114_v48, 0.0 }
 0xadb   :  { %v2115_v31 = vsel %vm224_vm2, %v2113_v28, 0.0 }
 0xadc   :  { %2116 = vadd.xlane.f32.xlu0 %v2115_v31 }
 0xae0   :  { %2119 = vadd.xlane.f32.xlu0 %v2118_v47  ;;  %v6554_v47 = vld [vmem:[%s11237_s16] ss:$0 sm:$0xff] }
 0xb65   :  { %v2117_v0 = vpop.xlane.xlu0 %2116 }
 0xb66   :  { %v2121_v58 = vmul.f32 0.015625, %v2117_v0  ;;  %v2390_v0 = vld [vmem:[%s11241_s20 + $0xd0] sm:$0xff] }
 0xb68   :  { %v2123_v15 = vadd.f32 1e-05, %v2121_v58  ;;  %v2374_v58 = vld [vmem:[%s11241_s20 + $0x50] sm:$0xff] }
 0xb69   :  { %v2120_v11 = vpop.xlane.xlu0 %2119 }
 0xb6a   :  { %7544 = vrsqrt.f32 %v2123_v15  ;;  %v2122_v28 = vmul.f32 0.015625, %v2120_v11  ;;  %v2389_v15 = vld [vmem:[%s11241_s20 + $0xc8] sm:$0xff] }
 0xb6b   :  { %v2373_v11 = vld [vmem:[%s11241_s20 + $0x48] sm:$0xff] }
 0xb6c   :  { %v2124_v31 = vadd.f32 1e-05, %v2122_v28  ;;  %v2388_v28 = vld [vmem:[%s11241_s20 + $0xc0] sm:$0xff] }
 0xb6e   :  { %7546 = vrsqrt.f32 %v2124_v31  ;;  %v2372_v31 = vld [vmem:[%s11241_s20 + $0x40] sm:$0xff] }
 0xb77   :  { %v7545_v48 = vpop.eup %7544 }
 0xb78   :  { %v2127_v20 = vmul.f32 %v7545_v48, %v2111_v13  ;;  %v2395_v13 = vld [vmem:[%s11241_s20 + $0xf8] sm:$0xff] }
 0xb79   :  { %6887 = vmatprep.subr.mxu0 %v2395_v13  ;;  %v2387_v48 = vld [vmem:[%s11241_s20 + $0xb8] sm:$0xff]  ;;  %v2382_v13 = vld [vmem:[%s11241_s20 + $0x90] sm:$0xff] }
 0xb7a   :  { %v2135_v56 = vmul.f32 %v6554_v47, %v2127_v20  ;;  %6888 = vmatpush3.msra.mxu0 %v2379_v42  ;;  %v2386_v20 = vld [vmem:[%s11241_s20 + $0xb0] sm:$0xff] }
 0xb7b   :  { %v7547_v39 = vpop.eup %7546  ;;  %v2366_v42 = vld [vmem:[%s11241_s20 + $0x10] sm:$0xff] }
 0xb7c   :  { %v2143_v61 = vadd.f32 %v6555_v14, %v2135_v56  ;;  %v2128_v25 = vmul.f32 %v7547_v39, %v2112_v46  ;;  %v2394_v46 = vld [vmem:[%s11241_s20 + $0xf0] sm:$0xff]  ;;  %v2385_v56 = vld [vmem:[%s11241_s20 + $0xa8] sm:$0xff] }
 0xb7d   :  { %6889 = vmatprep.subr.mxu0 %v2394_v46  ;;  %v2369_v39 = vld [vmem:[%s11241_s20 + $0x28] sm:$0xff] }
 0xb7e   :  { %6556 = vmatmul.mubr.msk.f32.vlgmr.msra.gmra.mxu1 %vm224_vm2, %v2143_v61  ;;  %v2136_v37 = vmul.f32 %v6554_v47, %v2128_v25  ;;  %6890 = vmatpush3.msra.mxu0 %v2378_v27  ;;  %v2371_v47 = vld [vmem:[%s11241_s20 + $0x38] sm:$0xff]  ;;  %v2384_v61 = vld [vmem:[%s11241_s20 + $0xa0] sm:$0xff]  ;;  %v2381_v46 = vld [vmem:[%s11241_s20 + $0x88] sm:$0xff] }
 0xb7f   :  { %2249 = vmatprep.mubr.f32.mxu1 %v11615_v16  ;;  %6891 = vmatprep.subr.mxu0 %v2393_v52  ;;  %v2368_v25 = vld [vmem:[%s11241_s20 + $0x20] sm:$0xff]  ;;  %v2365_v27 = vld [vmem:[%s11241_s20 + $0x8] sm:$0xff] }
 0xb80   :  { %v2144_v6 = vadd.f32 %v6555_v14, %v2136_v37  ;;  %6892 = vmatpush3.msra.mxu0 %v2377_v51  ;;  %v2370_v14 = vld [vmem:[%s11241_s20 + $0x30] sm:$0xff]  ;;  %v2383_v37 = vld [vmem:[%s11241_s20 + $0x98] sm:$0xff]  ;;  %v2380_v52 = vld [vmem:[%s11241_s20 + $0x80] sm:$0xff] }
 0xb81   :  { %6893 = vmatprep.subr.mxu0 %v2392_v22  ;;  %v2364_v51 = vld [vmem:[%s11241_s20] sm:$0xff] }
 0xb82   :  { %6557 = vmatmul.mubr.msk.f32.gmra.mxu1 %vm224_vm2, %v2144_v6  ;;  %6894 = vmatpush3.msra.mxu0 %v2376_v43  ;;  %v2367_v6 = vld [vmem:[%s11241_s20 + $0x18] sm:$0xff]  ;;  %v2161_v22 = vld [vmem:[%s11240_s19] sm:$0x3] }
 0xb83   :  { %2628 = vmatprep.mubr.f32.mxu1 %v11615_v16  ;;  %6895 = vmatprep.subr.mxu0 %v2391_v17  ;;  %v11618_v43 = vld [vmem:[#allocation8_spill] sm:$0xff] }
 0xb84   :  { %6896 = vmatpush3.msra.mxu0 %v2375_v45  ;;  %v2166_v17 = vrot.slane %v2161_v22, %v11618_v43  ;;  %v11619_v45 = vld [vmem:[#allocation7_spill] sm:$0xff] }
 0xb85   :  { %6897 = vmatprep.subr.mxu0 %v2390_v0  ;;  %v2170_v0 = vrot.slane %v2161_v22, %v11619_v45 }
 0xb86   :  { %6898 = vmatpush3.msra.mxu0 %v2374_v58 }
 0xb87   :  { %6899 = vmatprep.subr.mxu0 %v2389_v15 }
 0xb88   :  { %6900 = vmatpush3.msra.mxu0 %v2373_v11 }
 0xb89   :  { %6901 = vmatprep.subr.mxu0 %v2388_v28 }
 0xb8a   :  { %6902 = vmatpush3.msra.mxu0 %v2372_v31 }
 0xb8b   :  { %6903 = vmatprep.subr.mxu0 %v2387_v48 }
 0xb8c   :  { %6904 = vmatpush3.msra.mxu0 %v2371_v47 }
 0xb8d   :  { %6905 = vmatprep.subr.mxu0 %v2386_v20 }
 0xb8e   :  { %6906 = vmatpush3.msra.mxu0 %v2370_v14 }
 0xb8f   :  { %6907 = vmatprep.subr.mxu0 %v2385_v56 }
 0xb90   :  { %6908 = vmatpush3.msra.mxu0 %v2369_v39 }
 0xb91   :  { %6909 = vmatprep.subr.mxu0 %v2384_v61 }
 0xb92   :  { %6910 = vmatpush3.msra.mxu0 %v2368_v25 }
 0xb93   :  { %6911 = vmatprep.subr.mxu0 %v2383_v37 }
 0xb94   :  { %6912 = vmatpush3.msra.mxu0 %v2367_v6 }
 0xb95   :  { %6913 = vmatprep.subr.mxu0 %v2382_v13 }
 0xb96   :  { %6914 = vmatpush3.msra.mxu0 %v2366_v42 }
 0xb97   :  { %6915 = vmatprep.subr.mxu0 %v2381_v46 }
 0xb98   :  { %6916 = vmatpush3.msra.mxu0 %v2365_v27 }
 0xb99   :  { %6917 = vmatprep.subr.mxu0 %v2380_v52 }
 0xb9a   :  { %6918 = vmatpush3.msra.mxu0 %v2364_v51 }
 0xc3e   :  { %v2245_v58 = vpop.f32.mrf.mxu1 }
 0xc3f   :  { %v9222_v15 = vadd.f32 %v2245_v58, %v2166_v17 }
 0xc40   :  { %v2247_v11 = vpop.f32.mrf.mxu1 }
 0xc41   :  { %v9225_v28 = vmul.f32 0.70710677, %v9222_v15  ;;  %v9227_v31 = vadd.f32 %v2247_v11, %v2170_v0 }
 0xc42   :  { %v2251_v48 = vpop.f32.mrf.mxu1 }
 0xc43   :  { %v2264_v47 = vand.u32 2147483647, %v9225_v28  ;;  %v9231_v20 = vmul.f32 0.70710677, %v9227_v31  ;;  %v9233_v14 = vadd.f32 %v2251_v48, %v2166_v17  ;;  %vm2344_vm7 = vcmp.ge.f32.partialorder %v9225_v28, 0.0 }
 0xc44   :  { %v2253_v56 = vpop.f32.mrf.mxu1  ;;  %v2256_v28 = vmul.f32 0.5, %v9222_v15 }
 0xc45   :  { %v2268_v39 = vmul.f32 0.3275911, %v2264_v47  ;;  %v2265_v61 = vand.u32 2147483647, %v9231_v20  ;;  %v9237_v25 = vmul.f32 0.70710677, %v9233_v14  ;;  %v9239_v37 = vadd.f32 %v2253_v56, %v2170_v0 }
 0xc46   :  { %v2320_v11 = vsub.f32 0.0, %v2264_v47  ;;  %vm2345_vm8 = vcmp.ge.f32.partialorder %v9231_v20, 0.0 }
 0xc47   :  { %v2272_v6 = vadd.f32 1.0, %v2268_v39  ;;  %v2269_v13 = vmul.f32 0.3275911, %v2265_v61  ;;  %v2266_v42 = vand.u32 2147483647, %v9237_v25  ;;  %v2321_v0 = vsub.f32 0.0, %v2265_v61 }
 0xc48   :  { %v9243_v46 = vmul.f32 0.70710677, %v9239_v37  ;;  %v2324_v48 = vmul.f32 %v2320_v11, %v2264_v47  ;;  %vm2346_vm9 = vcmp.ge.f32.partialorder %v9237_v25, 0.0 }
 0xc49   :  { %7548 = vrcp.f32 %v2272_v6  ;;  %v2273_v27 = vadd.f32 1.0, %v2269_v13  ;;  %v2270_v52 = vmul.f32 0.3275911, %v2266_v42  ;;  %v2322_v56 = vsub.f32 0.0, %v2266_v42 }
 0xc4a   :  { %v2267_v51 = vand.u32 2147483647, %v9243_v46  ;;  %v2325_v26 = vmul.f32 %v2321_v0, %v2265_v61  ;;  %v2328_v29 = vmul.f32 1.442695, %v2324_v48  ;;  %vm2347_vm10 = vcmp.ge.f32.partialorder %v9243_v46, 0.0 }
 0xc4b   :  { %7550 = vrcp.f32 %v2273_v27  ;;  %v2274_v22 = vadd.f32 1.0, %v2270_v52  ;;  %v2326_v6 = vmul.f32 %v2322_v56, %v2266_v42  ;;  %v6558_v46 = vld [vmem:[%s11242_s21] ss:$0 sm:$0xff] }
 0xc4c   :  { %v2271_v17 = vmul.f32 0.3275911, %v2267_v51  ;;  %v2323_v38 = vsub.f32 0.0, %v2267_v51  ;;  %v2330_v21 = vmul.f32 1.442695, %v2325_v26 }
 0xc4d   :  { %7552 = vrcp.f32 %v2274_v22 }
 0xc4e   :  { %v2275_v58 = vadd.f32 1.0, %v2271_v17  ;;  %v2327_v22 = vmul.f32 %v2323_v38, %v2267_v51  ;;  %v2332_v17 = vmul.f32 1.442695, %v2326_v6 }
 0xc50   :  { %7554 = vrcp.f32 %v2275_v58  ;;  %v2334_v48 = vmul.f32 1.442695, %v2327_v22 }
 0xc51   :  { %7556 = vpow2.f32 %v2328_v29 }
 0xc52   :  { %7558 = vpow2.f32 %v2330_v21 }
 0xc53   :  { %7560 = vpow2.f32 %v2332_v17 }
 0xc54   :  { %7562 = vpow2.f32 %v2334_v48 }
 0xc56   :  { %v7549_v39 = vpop.eup %7548 }
 0xc57   :  { %v2284_v19 = vmul.f32 1.0614054, %v7549_v39 }
 0xc58   :  { %v7551_v13 = vpop.eup %7550 }
 0xc59   :  { %v2288_v59 = vadd.f32 -1.4531521, %v2284_v19  ;;  %v2285_v23 = vmul.f32 1.0614054, %v7551_v13 }
 0xc5a   :  { %v7553_v27 = vpop.eup %7552 }
 0xc5b   :  { %v2292_v52 = vmul.f32 %v7549_v39, %v2288_v59  ;;  %v2289_v7 = vadd.f32 -1.4531521, %v2285_v23  ;;  %v2286_v58 = vmul.f32 1.0614054, %v7553_v27 }
 0xc5d   :  { %v2296_v34 = vadd.f32 1.4214138, %v2292_v52  ;;  %v7555_v47 = vpop.eup %7554  ;;  %v2293_v11 = vmul.f32 %v7551_v13, %v2289_v7  ;;  %v2290_v61 = vadd.f32 -1.4531521, %v2286_v58 }
 0xc5e   :  { %v2287_v41 = vmul.f32 1.0614054, %v7555_v47  ;;  %v7557_v22 = vpop.eup %7556 }
 0xc5f   :  { %v2300_v0 = vmul.f32 %v7549_v39, %v2296_v34  ;;  %v2297_v42 = vadd.f32 1.4214138, %v2293_v11  ;;  %v2294_v19 = vmul.f32 %v7553_v27, %v2290_v61 }
 0xc60   :  { %v2291_v56 = vadd.f32 -1.4531521, %v2287_v41 }
 0xc61   :  { %v2304_v26 = vadd.f32 -0.28449672, %v2300_v0  ;;  %v2301_v63 = vmul.f32 %v7551_v13, %v2297_v42  ;;  %v2298_v59 = vadd.f32 1.4214138, %v2294_v19  ;;  %v7559_v42 = vpop.eup %7558 }
 0xc62   :  { %v2295_v38 = vmul.f32 %v7555_v47, %v2291_v56 }
 0xc63   :  { %v2308_v29 = vmul.f32 %v7549_v39, %v2304_v26  ;;  %v2305_v23 = vadd.f32 -0.28449672, %v2301_v63  ;;  %v2302_v51 = vmul.f32 %v7553_v27, %v2298_v59  ;;  %v7561_v63 = vpop.eup %7560 }
 0xc64   :  { %v2299_v52 = vadd.f32 1.4214138, %v2295_v38 }
 0xc65   :  { %v2312_v6 = vadd.f32 0.2548296, %v2308_v29  ;;  %v2309_v21 = vmul.f32 %v7551_v13, %v2305_v23  ;;  %v2306_v7 = vadd.f32 -0.28449672, %v2302_v51 }
 0xc66   :  { %v2303_v34 = vmul.f32 %v7555_v47, %v2299_v52 }
 0xc67   :  { %v2316_v58 = vmul.f32 %v7549_v39, %v2312_v6  ;;  %v2313_v40 = vadd.f32 0.2548296, %v2309_v21  ;;  %v2310_v17 = vmul.f32 %v7553_v27, %v2306_v7  ;;  %v7563_v6 = vpop.eup %7562 }
 0xc68   :  { %v2307_v61 = vadd.f32 -0.28449672, %v2303_v34 }
 0xc69   :  { %v2336_v11 = vmul.f32 %v7557_v22, %v2316_v58  ;;  %v2317_v0 = vmul.f32 %v7551_v13, %v2313_v40  ;;  %v2314_v41 = vadd.f32 0.2548296, %v2310_v17 }
 0xc6a   :  { %v2311_v26 = vmul.f32 %v7555_v47, %v2307_v61 }
 0xc6b   :  { %v2340_v19 = vsub.f32 1.0, %v2336_v11  ;;  %v2337_v48 = vmul.f32 %v7559_v42, %v2317_v0  ;;  %v2318_v56 = vmul.f32 %v7553_v27, %v2314_v41  ;;  %v2257_v27 = vmul.f32 0.5, %v9227_v31 }
 0xc6c   :  { %v2315_v29 = vadd.f32 0.2548296, %v2311_v26  ;;  %v2259_v41 = vmul.f32 0.5, %v9239_v37  ;;  %v2258_v31 = vmul.f32 0.5, %v9233_v14 }
 0xc6d   :  { %v2348_v59 = vsub.f32 0.0, %v2340_v19  ;;  %v2341_v38 = vsub.f32 1.0, %v2337_v48  ;;  %v2338_v39 = vmul.f32 %v7561_v63, %v2318_v56 }
 0xc6e   :  { %v2319_v51 = vmul.f32 %v7555_v47, %v2315_v29 }
 0xc6f   :  { %v2352_v23 = vsel %vm2344_vm7, %v2340_v19, %v2348_v59  ;;  %v2349_v52 = vsub.f32 0.0, %v2341_v38  ;;  %v2342_v21 = vsub.f32 1.0, %v2338_v39 }
 0xc70   :  { %v2339_v40 = vmul.f32 %v7563_v6, %v2319_v51  ;;  %v2356_v13 = vadd.f32 1.0, %v2352_v23 }
 0xc71   :  { %v2353_v7 = vsel %vm2345_vm8, %v2341_v38, %v2349_v52  ;;  %v2350_v58 = vsub.f32 0.0, %v2342_v21 }
 0xc72   :  { %v2357_v34 = vadd.f32 1.0, %v2353_v7  ;;  %v2343_v22 = vsub.f32 1.0, %v2339_v40  ;;  %v2360_v61 = vmul.f32 %v2356_v13, %v2256_v28  ;;  %v6575_v28 = vld [vmem:[%s11233_s12 + $0xe0] sm:$0xff] }
 0xc73   :  { %v2354_v17 = vsel %vm2346_vm9, %v2342_v21, %v2350_v58 }
 0xc74   :  { %v2361_v11 = vmul.f32 %v2357_v34, %v2257_v27  ;;  %v2351_v47 = vsub.f32 0.0, %v2343_v22  ;;  %v2358_v0 = vadd.f32 1.0, %v2354_v17  ;;  %v6578_v27 = vld [vmem:[%s11233_s12 + $0xf8] sm:$0xff]  ;;  %v6577_v34 = vld [vmem:[%s11233_s12 + $0xf0] sm:$0xff] }
 0xc75   :  { %2580 = vmatprep.subr.mxu1 %v6578_v27  ;;  %v6574_v17 = vld [vmem:[%s11233_s12 + $0xd8] sm:$0xff] }
 0xc76   :  { %2460 = vmatprep.mubr.f32.mxu0 %v2361_v11  ;;  %v2355_v20 = vsel %vm2347_vm10, %v2343_v22, %v2351_v47  ;;  %v2362_v19 = vmul.f32 %v2358_v0, %v2258_v31  ;;  %2581 = vmatpush1.msra.mxu1 %v6577_v34  ;;  %v6576_v22 = vld [vmem:[%s11233_s12 + $0xe8] sm:$0xff]  ;;  %v6573_v11 = vld [vmem:[%s11233_s12 + $0xd0] sm:$0xff]  ;;  %v6566_v31 = vld [vmem:[%s11233_s12 + $0x98] sm:$0xff] }
 0xc77   :  { %2461 = vmatmul.mubr.f32.vlgmr.msra.gmra.mxu0 %v2360_v61  ;;  %v2359_v42 = vadd.f32 1.0, %v2355_v20  ;;  %2582 = vmatprep.subr.mxu1 %v6576_v22  ;;  %v6572_v47 = vld [vmem:[%s11233_s12 + $0xc8] sm:$0xff]  ;;  %v6571_v61 = vld [vmem:[%s11233_s12 + $0xc0] sm:$0xff]  ;;  %v6570_v20 = vld [vmem:[%s11233_s12 + $0xb8] sm:$0xff] }
 0xc78   :  { %2583 = vmatpush1.msra.mxu1 %v6575_v28  ;;  %v6569_v0 = vld [vmem:[%s11233_s12 + $0xb0] sm:$0xff] }
 0xc79   :  { %v2363_v25 = vmul.f32 %v2359_v42, %v2259_v41  ;;  %2584 = vmatprep.subr.mxu1 %v6574_v17  ;;  %v6568_v41 = vld [vmem:[%s11233_s12 + $0xa8] sm:$0xff]  ;;  %v6567_v42 = vld [vmem:[%s11233_s12 + $0xa0] sm:$0xff] }
 0xc7a   :  { %2585 = vmatpush1.msra.mxu1 %v6573_v11 }
 0xc7b   :  { %2465 = vmatprep.mubr.f32.mxu0 %v2363_v25  ;;  %2586 = vmatprep.subr.mxu1 %v6572_v47  ;;  %v6565_v25 = vld [vmem:[%s11233_s12 + $0x90] sm:$0xff] }
 0xc7c   :  { %2466 = vmatmul.mubr.f32.gmra.mxu0 %v2362_v19  ;;  %2587 = vmatpush1.msra.mxu1 %v6571_v61  ;;  %v6564_v19 = vld [vmem:[%s11233_s12 + $0x88] sm:$0xff]  ;;  %v7684_v61 = vld [vmem:[%s11498_s25] sm:$0xff] }
 0xc7d   :  { %2588 = vmatprep.subr.mxu1 %v6570_v20  ;;  %v7685_v20 = vld [vmem:[%s11498_s25 + $0x8] sm:$0xff] }
 0xc7e   :  { %2589 = vmatpush1.msra.mxu1 %v6569_v0  ;;  %v7686_v0 = vld [vmem:[%s11498_s25 + $0x10] sm:$0xff] }
 0xc7f   :  { %2590 = vmatprep.subr.mxu1 %v6568_v41  ;;  %v7687_v41 = vld [vmem:[%s11498_s25 + $0x18] sm:$0xff] }
 0xc80   :  { %2591 = vmatpush1.msra.mxu1 %v6567_v42  ;;  %v7688_v42 = vld [vmem:[%s11498_s25 + $0x20] sm:$0xff] }
 0xc81   :  { %2592 = vmatprep.subr.mxu1 %v6566_v31  ;;  %v7689_v31 = vld [vmem:[%s11498_s25 + $0x28] sm:$0xff] }
 0xc82   :  { %2593 = vmatpush1.msra.mxu1 %v6565_v25  ;;  %v7690_v25 = vld [vmem:[%s11498_s25 + $0x30] sm:$0xff] }
 0xc83   :  { %2594 = vmatprep.subr.mxu1 %v6564_v19  ;;  %v7691_v19 = vld [vmem:[%s11498_s25 + $0x38] sm:$0xff] }
 0xd37   :  { %v6919_v15 = vpop.f32.mrf.mxu0 }
 0xd39   :  { %v6920_v26 = vpop.f32.mrf.mxu0 }
 0xd3a   :  { %v6921_v48 = vadd.f32 %v6920_v26, %v6919_v15  ;;  %v6563_v15 = vld [vmem:[%s11233_s12 + $0x80] sm:$0xff] }
 0xd3b   :  { %2595 = vmatpush1.msra.mxu1 %v6563_v15 }
 0xd3c   :  { %v2471_v56 = vadd.f32 %v6921_v48, %v9053_v24  ;;  %v6922_v63 = vpop.f32.mrf.mxu0 }
 0xd3e   :  { %v9258_v59 = vadd.f32 %v6558_v46, %v2471_v56  ;;  %v6923_v37 = vpop.f32.mrf.mxu0 }
 0xd3f   :  { %v6924_v29 = vadd.f32 %v6923_v37, %v6922_v63 }
 0xd40   :  { %11620 = vst [vmem:[#allocation23_spill] sm:$0xff] %v9258_v59  ;;  %v2486_v14 = vsel %vm224_vm2, %v9258_v59, 0.0 }
 0xd41   :  { %v2472_v38 = vadd.f32 %v6924_v29, %v9050_v50  ;;  %2487 = vadd.xlane.f32.xlu1 %v2486_v14  ;;  %v6561_v14 = vld [vmem:[%s11231_s10 + $0x1] ss:$0 sm:$0xff] }
 0xd43   :  { %v9263_v39 = vadd.f32 %v6558_v46, %v2472_v38 }
 0xd45   :  { %11621 = vst [vmem:[#allocation37_spill] sm:$0xff] %v9263_v39  ;;  %v2489_v23 = vsel %vm224_vm2, %v9263_v39, 0.0 }
 0xd46   :  { %2490 = vadd.xlane.f32.xlu0 %v2489_v23  ;;  %v6562_v23 = vld [vmem:[%s11232_s11 + $0x1] ss:$0 sm:$0xff] }
 0xdca   :  { %v2488_v51 = vpop.xlane.xlu1 %2487 }
 0xdcb   :  { %v2492_v6 = vmul.f32 0.015625, %v2488_v51 }
 0xdcd   :  { %v2494_v24 = vsub.f32 %v9258_v59, %v2492_v6  ;;  %v11628_v59 = vld [vmem:[#allocation43_spill] sm:$0xff] }
 0xdcf   :  { %v2491_v52 = vpop.xlane.xlu0 %2490  ;;  %v2496_v21 = vmul.f32 %v2494_v24, %v2494_v24 }
 0xdd0   :  { %v2493_v40 = vmul.f32 0.015625, %v2491_v52 }
 0xdd1   :  { %v2498_v13 = vsel %vm224_vm2, %v2496_v21, 0.0 }
 0xdd2   :  { %v2495_v7 = vsub.f32 %v9263_v39, %v2493_v40  ;;  %2499 = vadd.xlane.f32.xlu1 %v2498_v13 }
 0xdd4   :  { %v2497_v50 = vmul.f32 %v2495_v7, %v2495_v7 }
 0xdd6   :  { %v2501_v58 = vsel %vm224_vm2, %v2497_v50, 0.0 }
 0xdd7   :  { %2502 = vadd.xlane.f32.xlu0 %v2501_v58  ;;  %v6579_v58 = vld [vmem:[%s11234_s13 + $0x2] sm:$0x3] }
 0xdd8   :  { %v2555_v34 = vrot.slane %v6579_v58, %v11619_v45 }
 0xe5b   :  { %v2500_v26 = vpop.xlane.xlu1 %2499 }
 0xe5c   :  { %v2504_v48 = vmul.f32 0.015625, %v2500_v26 }
 0xe5e   :  { %v2506_v46 = vadd.f32 1e-05, %v2504_v48 }
 0xe60   :  { %7564 = vrsqrt.f32 %v2506_v46  ;;  %v2503_v56 = vpop.xlane.xlu0 %2502 }
 0xe61   :  { %v2505_v63 = vmul.f32 0.015625, %v2503_v56 }
 0xe63   :  { %v2507_v37 = vadd.f32 1e-05, %v2505_v63 }
 0xe65   :  { %7566 = vrsqrt.f32 %v2507_v37 }
 0xe6d   :  { %v7565_v29 = vpop.eup %7564 }
 0xe6e   :  { %v2510_v38 = vmul.f32 %v7565_v29, %v2494_v24 }
 0xe70   :  { %v2518_v51 = vmul.f32 %v6561_v14, %v2510_v38 }
 0xe72   :  { %v7567_v6 = vpop.eup %7566  ;;  %v2526_v52 = vadd.f32 %v6562_v23, %v2518_v51 }
 0xe73   :  { %v2511_v21 = vmul.f32 %v7567_v6, %v2495_v7  ;;  %v2551_v7 = vrot.slane %v6579_v58, %v11618_v43 }
 0xe74   :  { %6580 = vmatmul.mubr.msk.f32.vlgmr.msra.gmra.mxu1 %vm224_vm2, %v2526_v52 }
 0xe75   :  { %2634 = vmatprep.mubr.f32.mxu1 %v11615_v16  ;;  %v2519_v40 = vmul.f32 %v6561_v14, %v2511_v21 }
 0xe77   :  { %v2527_v13 = vadd.f32 %v6562_v23, %v2519_v40 }
 0xe79   :  { %6581 = vmatmul.mubr.msk.f32.gmra.mxu1 %vm224_vm2, %v2527_v13 }
 0xe7a   :  { %2705 = vmatprep.mubr.f32.mxu1 %v11615_v16 }
 0xf34   :  { %v2630_v50 = vpop.f32.mrf.mxu1 }
 0xf35   :  { %v2631_v47 = vadd.f32 %v2630_v50, %v2551_v7 }
 0xf36   :  { %v2632_v24 = vpop.f32.mrf.mxu1 }
 0xf37   :  { %v2633_v11 = vadd.f32 %v2632_v24, %v2555_v34 }
 0xf39   :  { %v2636_v27 = vpop.f32.mrf.mxu1 }
 0xf3a   :  { %v2637_v17 = vadd.f32 %v2636_v27, %v2551_v7 }
 0xf3b   :  { %v2638_v22 = vpop.f32.mrf.mxu1 }
 0xf3c   :  { %v2639_v28 = vadd.f32 %v2638_v22, %v2555_v34 }
 0xf3e   :  { %2669 = vmatprep.subr.mxu1 %v2639_v28 }
 0xf3f   :  { %2670 = vmatpush1.msra.mxu1 %v2637_v17 }
 0xf40   :  { %2671 = vmatprep.subr.mxu1 %v2633_v11 }
 0xf41   :  { %2672 = vmatpush1.msra.mxu1 %v2631_v47 }
 0xf42   :  { %6582 = vmatmul.mubr.msk.f32.vlgmr.msra.gmra.mxu1 %vm379_vm3, %v7684_v61 }
 0xf43   :  { %2711 = vmatprep.mubr.f32.mxu1 %v11615_v16 }
 0xf46   :  { %6583 = vmatmul.mubr.msk.f32.gmra.mxu1 %vm379_vm3, %v7685_v20 }
 0xf47   :  { %2717 = vmatprep.mubr.f32.mxu1 %v11615_v16 }
 0xf4a   :  { %6584 = vmatmul.mubr.msk.f32.gmra.mxu1 %vm379_vm3, %v7686_v0 }
 0xf4b   :  { %2723 = vmatprep.mubr.f32.mxu1 %v11615_v16 }
 0xf4e   :  { %6585 = vmatmul.mubr.msk.f32.gmra.mxu1 %vm379_vm3, %v7687_v41 }
 0xf4f   :  { %2729 = vmatprep.mubr.f32.mxu1 %v11615_v16 }
 0xf52   :  { %6586 = vmatmul.mubr.msk.f32.gmra.mxu1 %vm379_vm3, %v7688_v42 }
 0xf53   :  { %2735 = vmatprep.mubr.f32.mxu1 %v11615_v16 }
 0xf56   :  { %6587 = vmatmul.mubr.msk.f32.gmra.mxu1 %vm379_vm3, %v7689_v31 }
 0xf57   :  { %2741 = vmatprep.mubr.f32.mxu1 %v11615_v16 }
 0xf5a   :  { %6588 = vmatmul.mubr.msk.f32.gmra.mxu1 %vm379_vm3, %v7690_v25 }
 0xf5b   :  { %2747 = vmatprep.mubr.f32.mxu1 %v11615_v16 }
 0xf5e   :  { %6589 = vmatmul.mubr.msk.f32.gmra.mxu1 %vm379_vm3, %v7691_v19 }
0x1002   :  { %v9373_v15 = vpop.f32.mrf.mxu1 }
0x1003   :  { %v2762_v31 = vmul.f32 %v9373_v15, %v11609_v55  ;;  %v2810_v19 = vmul.f32 %v9373_v15, %v11608_v62 }
0x1004   :  { %v9375_v26 = vpop.f32.mrf.mxu1 }
0x1006   :  { %v9377_v48 = vpop.f32.mrf.mxu1 }
0x1007   :  { %v2763_v25 = vmul.f32 %v9377_v48, %v11604_v36 }
0x1008   :  { %v9379_v46 = vpop.f32.mrf.mxu1 }
0x100a   :  { %v9381_v56 = vpop.f32.mrf.mxu1 }
0x100b   :  { %v2764_v47 = vmul.f32 %v9381_v56, %v11600_v4  ;;  %v2812_v20 = vmul.f32 %v9381_v56, %v11592_v8  ;;  %v2860_v41 = vmul.f32 %v9381_v56, %v11611_v32 }
0x100c   :  { %v9383_v63 = vpop.f32.mrf.mxu1 }
0x100e   :  { %v9385_v37 = vpop.f32.mrf.mxu1 }
0x100f   :  { %v2765_v61 = vmul.f32 %v9385_v37, %v11597_v33  ;;  %v2813_v0 = vmul.f32 %v9385_v37, %v11601_v54  ;;  %v2861_v42 = vmul.f32 %v9385_v37, %v11605_v30 }
0x1010   :  { %v9387_v29 = vpop.f32.mrf.mxu1 }
0x1012   :  { %v9389_v14 = vpop.f32.mrf.mxu1 }
0x1013   :  { %v2766_v38 = vmul.f32 %v9389_v14, %v11586_v18  ;;  %v2814_v22 = vmul.f32 %v9389_v14, %v11598_v60  ;;  %v2862_v17 = vmul.f32 %v9389_v14, %v11602_v53 }
0x1014   :  { %v9393_v23 = vpop.f32.mrf.mxu1 }
0x1015   :  { %2786 = vrot.lane.b32.xlu0 %v2766_v38, %s11451_s2  ;;  %v2811_v38 = vmul.f32 %v9377_v48, %v11610_v35 }
0x1016   :  { %v9396_v51 = vpop.f32.mrf.mxu1 }
0x1017   :  { %v2767_v6 = vmul.f32 %v9396_v51, %v11589_v12  ;;  %v2815_v40 = vmul.f32 %v9396_v51, %v11595_v57  ;;  %v2863_v24 = vmul.f32 %v9396_v51, %v11599_v10 }
0x1018   :  { %v9400_v52 = vpop.f32.mrf.mxu1 }
0x1019   :  { %2788 = vrot.lane.b32.xlu1 %v2767_v6, %s11451_s2  ;;  %v2859_v6 = vmul.f32 %v9377_v48, %v11613_v2 }
0x101a   :  { %v2743_v21 = vpop.f32.mrf.mxu1 }
0x101b   :  { %v2816_v13 = vmul.f32 %v2743_v21, %v11593_v49  ;;  %v2864_v58 = vmul.f32 %v2743_v21, %v11590_v5  ;;  %v2768_v34 = vmul.f32 %v2743_v21, %v8218_v44 }
0x101c   :  { %v9406_v50 = vpop.f32.mrf.mxu1 }
0x101d   :  { %2836 = vrot.lane.b32.xlu1 %v2815_v40, %s11622_s6  ;;  %2838 = vrot.lane.b32.xlu0 %v2816_v13, %s11622_s6  ;;  %v11624_v40 = vld [vmem:[#allocation30_spill] sm:$0xff] }
0x101e   :  { %v2749_v27 = vpop.f32.mrf.mxu1  ;;  %v2858_v13 = vmul.f32 %v9373_v15, %v11624_v40 }
0x101f   :  { %v2817_v7 = vmul.f32 %v2749_v27, %v11587_v3  ;;  %v2769_v28 = vmul.f32 %v2749_v27, %v11584_v1  ;;  %v2865_v11 = vmul.f32 %v2749_v27, %v11594_v9 }
0x1021   :  { %2884 = vrot.lane.b32.xlu1 %v2863_v24, %s11623_s29  ;;  %2886 = vrot.lane.b32.xlu0 %v2864_v58, %s11623_s29 }
0x1025   :  { %2790 = vrot.lane.b32.xlu1 %v2768_v34, %s11451_s2  ;;  %2840 = vrot.lane.b32.xlu0 %v2817_v7, %s11622_s6 }
0x1029   :  { %2834 = vrot.lane.b32.xlu0 %v2814_v22, %s11622_s6  ;;  %2792 = vrot.lane.b32.xlu1 %v2769_v28, %s11451_s2 }
0x102d   :  { %2882 = vrot.lane.b32.xlu0 %v2862_v17, %s11623_s29  ;;  %2888 = vrot.lane.b32.xlu1 %v2865_v11, %s11623_s29  ;;  %v11625_v17 = vld [vmem:[#allocation45_spill] sm:$0xff] }
0x102e   :  { %v2760_v11 = vmul.f32 %v2743_v21, %v11625_v17  ;;  %v11629_v21 = vld [vmem:[#allocation48_spill] sm:$0xff] }
0x1031   :  { %2782 = vrot.lane.b32.xlu0 %v2764_v47, %s11451_s2  ;;  %2784 = vrot.lane.b32.xlu1 %v2765_v61, %s11451_s2 }
0x1035   :  { %2830 = vrot.lane.b32.xlu0 %v2812_v20, %s11622_s6  ;;  %2832 = vrot.lane.b32.xlu1 %v2813_v0, %s11622_s6 }
0x1039   :  { %2878 = vrot.lane.b32.xlu0 %v2860_v41, %s11623_s29  ;;  %2880 = vrot.lane.b32.xlu1 %v2861_v42, %s11623_s29  ;;  %v11626_v41 = vld [vmem:[#allocation36_spill] sm:$0xff] }
0x103a   :  { %v2761_v42 = vmul.f32 %v2749_v27, %v11626_v41 }
0x103d   :  { %2778 = vrot.lane.b32.xlu0 %v2762_v31, %s11451_s2  ;;  %2780 = vrot.lane.b32.xlu1 %v2763_v25, %s11451_s2 }
0x1041   :  { %2826 = vrot.lane.b32.xlu0 %v2810_v19, %s11622_s6  ;;  %2828 = vrot.lane.b32.xlu1 %v2811_v38, %s11622_s6  ;;  %v11627_v19 = vld [vmem:[#allocation38_spill] sm:$0xff] }
0x1042   :  { %v2759_v38 = vmul.f32 %v9396_v51, %v11627_v19 }
0x1045   :  { %2876 = vrot.lane.b32.xlu1 %v2859_v6, %s11623_s29 }
0x1049   :  { %2874 = vrot.lane.b32.xlu1 %v2858_v13, %s11623_s29 }
0x1087   :  { %v2787_v24 = vpop.permute.xlu0 %2786 }
0x108b   :  { %v2789_v58 = vpop.permute.xlu1 %2788 }
0x108c   :  { %v2807_v45 = vadd.f32 %v2789_v58, %v2759_v38 }
0x108f   :  { %v2837_v34 = vpop.permute.xlu1 %2836  ;;  %v2839_v7 = vpop.permute.xlu0 %2838 }
0x1093   :  { %v2885_v22 = vpop.permute.xlu1 %2884  ;;  %v2887_v28 = vpop.permute.xlu0 %2886 }
0x1097   :  { %v2791_v47 = vpop.permute.xlu1 %2790  ;;  %v2841_v61 = vpop.permute.xlu0 %2840 }
0x1098   :  { %v2808_v20 = vadd.f32 %v2791_v47, %v2760_v11  ;;  %v11630_v47 = vld [vmem:[#allocation40_spill] sm:$0xff] }
0x1099   :  { %v2758_v27 = vmul.f32 %v9389_v14, %v11630_v47 }
0x109a   :  { %v2856_v0 = vadd.f32 %v2839_v7, %v2808_v20  ;;  %v2855_v20 = vadd.f32 %v2837_v34, %v2807_v45  ;;  %v11634_v45 = vld [vmem:[#allocation42_spill] sm:$0xff] }
0x109b   :  { %v2835_v31 = vpop.permute.xlu0 %2834  ;;  %v2793_v25 = vpop.permute.xlu1 %2792  ;;  %v2806_v51 = vadd.f32 %v2787_v24, %v2758_v27  ;;  %v11636_v24 = vld [vmem:[#allocation47_spill] sm:$0xff]  ;;  %v11637_v27 = vld [vmem:[#allocation44_spill] sm:$0xff] }
0x109c   :  { %v9469_v6 = vadd.f32 %v2887_v28, %v2856_v0  ;;  %v2809_v13 = vadd.f32 %v2793_v25, %v2761_v42  ;;  %v9481_v58 = vadd.f32 %v2885_v22, %v2855_v20  ;;  %v11632_v28 = vld [vmem:[#allocation46_spill] sm:$0xff]  ;;  %v11633_v0 = vld [vmem:[#allocation41_spill] sm:$0xff] }
0x109e   :  { %v2857_v43 = vadd.f32 %v2841_v61, %v2809_v13  ;;  %v3072_v39 = vmul.f32 %v9469_v6, %v11628_v59  ;;  %v3128_v16 = vmul.f32 %v9469_v6, %v11629_v21  ;;  %v2854_v13 = vadd.f32 %v2835_v31, %v2806_v51  ;;  %v11660_v21 = vld [vmem:[#allocation76_spill] sm:$0xff] }
0x109f   :  { %v2883_v11 = vpop.permute.xlu0 %2882  ;;  %v2889_v7 = vpop.permute.xlu1 %2888  ;;  %v3071_v34 = vmul.f32 %v9481_v58, %v11636_v24  ;;  %v2756_v31 = vmul.f32 %v9381_v56, %v11637_v27 }
0x10a0   :  { %v9477_v40 = vadd.f32 %v2889_v7, %v2857_v43  ;;  %3094 = vrot.lane.b32.xlu0 %v3072_v39, %s11631_s1  ;;  %3150 = vrot.lane.b32.xlu1 %v3128_v16, %s11631_s1  ;;  %v9489_v43 = vadd.f32 %v2883_v11, %v2854_v13  ;;  %v2757_v16 = vmul.f32 %v9385_v37, %v11634_v45  ;;  %v11635_v39 = vld [vmem:[#allocation50_spill] sm:$0xff] }
0x10a1   :  { %v3127_v14 = vmul.f32 %v9481_v58, %v11635_v39 }
0x10a2   :  { %v3129_v61 = vmul.f32 %v9477_v40, %v11632_v28  ;;  %v3073_v42 = vmul.f32 %v9477_v40, %v11633_v0 }
0x10a3   :  { %v2783_v25 = vpop.permute.xlu0 %2782  ;;  %v2785_v38 = vpop.permute.xlu1 %2784 }
0x10a4   :  { %3152 = vrot.lane.b32.xlu1 %v3129_v61, %s11631_s1  ;;  %3096 = vrot.lane.b32.xlu0 %v3073_v42, %s11631_s1  ;;  %v2805_v20 = vadd.f32 %v2785_v38, %v2757_v16  ;;  %v2804_v11 = vadd.f32 %v2783_v25, %v2756_v31  ;;  %v11638_v61 = vld [vmem:[#allocation52_spill] sm:$0xff]  ;;  %v11639_v42 = vld [vmem:[#allocation51_spill] sm:$0xff]  ;;  %v11640_v38 = vld [vmem:[#allocation54_spill] sm:$0xff] }
0x10a5   :  { %v3126_v37 = vmul.f32 %v9489_v43, %v11638_v61  ;;  %v3070_v13 = vmul.f32 %v9489_v43, %v11639_v42  ;;  %v11641_v16 = vld [vmem:[#allocation55_spill] sm:$0xff]  ;;  %v11643_v31 = vld [vmem:[#allocation56_spill] sm:$0xff] }
0x10a7   :  { %v2831_v22 = vpop.permute.xlu0 %2830  ;;  %v2833_v7 = vpop.permute.xlu1 %2832 }
0x10a8   :  { %3148 = vrot.lane.b32.xlu1 %v3127_v14, %s11631_s1  ;;  %3092 = vrot.lane.b32.xlu0 %v3071_v34, %s11631_s1  ;;  %v2853_v51 = vadd.f32 %v2833_v7, %v2805_v20  ;;  %v2852_v0 = vadd.f32 %v2831_v22, %v2804_v11 }
0x10ab   :  { %v2879_v39 = vpop.permute.xlu0 %2878  ;;  %v2881_v24 = vpop.permute.xlu1 %2880 }
0x10ac   :  { %v9505_v28 = vadd.f32 %v2881_v24, %v2853_v51  ;;  %3146 = vrot.lane.b32.xlu1 %v3126_v37, %s11631_s1  ;;  %3090 = vrot.lane.b32.xlu0 %v3070_v13, %s11631_s1  ;;  %v9509_v56 = vadd.f32 %v2879_v39, %v2852_v0  ;;  %v11642_v24 = vld [vmem:[#allocation49_spill] sm:$0xff] }
0x10ad   :  { %v2755_v7 = vmul.f32 %v9377_v48, %v11642_v24  ;;  %v11644_v0 = vld [vmem:[#allocation57_spill] sm:$0xff] }
0x10ae   :  { %v3125_v25 = vmul.f32 %v9505_v28, %v11640_v38  ;;  %v3069_v14 = vmul.f32 %v9505_v28, %v11641_v16  ;;  %v3124_v20 = vmul.f32 %v9509_v56, %v11643_v31  ;;  %v3068_v39 = vmul.f32 %v9509_v56, %v11644_v0  ;;  %v11645_v37 = vld [vmem:[#allocation53_spill] sm:$0xff]  ;;  %v11646_v31 = vld [vmem:[#allocation58_spill] sm:$0xff]  ;;  %v11647_v0 = vld [vmem:[#allocation59_spill] sm:$0xff] }
0x10af   :  { %v2781_v34 = vpop.permute.xlu1 %2780  ;;  %v2779_v22 = vpop.permute.xlu0 %2778  ;;  %v2754_v13 = vmul.f32 %v9373_v15, %v11645_v37  ;;  %v11648_v15 = vld [vmem:[#allocation60_spill] sm:$0xff]  ;;  %v11661_v37 = vld [vmem:[#allocation77_spill] sm:$0xff] }
0x10b0   :  { %3144 = vrot.lane.b32.xlu1 %v3125_v25, %s11631_s1  ;;  %3088 = vrot.lane.b32.xlu0 %v3069_v14, %s11631_s1  ;;  %v2803_v51 = vadd.f32 %v2781_v34, %v2755_v7  ;;  %v3062_v24 = vmul.f32 %v9489_v43, %v11661_v37 }
0x10b1   :  { %v2802_v38 = vadd.f32 %v2779_v22, %v2754_v13  ;;  %v11649_v22 = vld [vmem:[#allocation61_spill] sm:$0xff] }
0x10b3   :  { %v2829_v11 = vpop.permute.xlu1 %2828  ;;  %v2827_v14 = vpop.permute.xlu0 %2826 }
0x10b4   :  { %3142 = vrot.lane.b32.xlu1 %v3124_v20, %s11631_s1  ;;  %3086 = vrot.lane.b32.xlu0 %v3068_v39, %s11631_s1  ;;  %v2851_v25 = vadd.f32 %v2829_v11, %v2803_v51  ;;  %v2850_v42 = vadd.f32 %v2827_v14, %v2802_v38  ;;  %v11650_v38 = vld [vmem:[#allocation62_spill] sm:$0xff]  ;;  %v11651_v51 = vld [vmem:[#allocation63_spill] sm:$0xff] }
0x10b7   :  { %v2877_v16 = vpop.permute.xlu1 %2876 }
0x10b8   :  { %v9527_v48 = vadd.f32 %v2877_v16, %v2851_v25  ;;  %v11653_v25 = vld [vmem:[#allocation65_spill] sm:$0xff] }
0x10b9   :  { %v2972_v14 = vmul.f32 %v9509_v56, %v11653_v25 }
0x10ba   :  { %v3123_v61 = vmul.f32 %v9527_v48, %v11646_v31  ;;  %v3067_v34 = vmul.f32 %v9527_v48, %v11647_v0  ;;  %v2971_v11 = vmul.f32 %v9527_v48, %v11650_v38  ;;  %v11659_v0 = vld [vmem:[#allocation79_spill] sm:$0xff] }
0x10bb   :  { %v2875_v7 = vpop.permute.xlu1 %2874 }
0x10bc   :  { %v9533_v20 = vadd.f32 %v2875_v7, %v2850_v42  ;;  %3140 = vrot.lane.b32.xlu1 %v3123_v61, %s11631_s1  ;;  %3084 = vrot.lane.b32.xlu0 %v3067_v34, %s11631_s1  ;;  %v11652_v61 = vld [vmem:[#allocation64_spill] sm:$0xff]  ;;  %v11654_v34 = vld [vmem:[#allocation66_spill] sm:$0xff] }
0x10bd   :  { %v2973_v13 = vmul.f32 %v9505_v28, %v11652_v61  ;;  %v2975_v7 = vmul.f32 %v9481_v58, %v11654_v34  ;;  %v11657_v61 = vld [vmem:[#allocation68_spill] sm:$0xff] }
0x10be   :  { %v3122_v39 = vmul.f32 %v9533_v20, %v11648_v15  ;;  %v3066_v16 = vmul.f32 %v9533_v20, %v11649_v22  ;;  %v2970_v42 = vmul.f32 %v9533_v20, %v11651_v51  ;;  %v2977_v25 = vmul.f32 %v9477_v40, %v11657_v61  ;;  %v11658_v15 = vld [vmem:[#allocation78_spill] sm:$0xff] }
0x10c0   :  { %3138 = vrot.lane.b32.xlu1 %v3122_v39, %s11631_s1  ;;  %3082 = vrot.lane.b32.xlu0 %v3066_v16, %s11631_s1  ;;  %v11655_v39 = vld [vmem:[#allocation67_spill] sm:$0xff] }
0x10c1   :  { %v2974_v16 = vmul.f32 %v9489_v43, %v11655_v39 }
0x10c4   :  { %2988 = vrot.lane.b32.xlu1 %v2971_v11, %s11631_s1  ;;  %2986 = vrot.lane.b32.xlu0 %v2970_v42, %s11631_s1  ;;  %v11656_v11 = vld [vmem:[#allocation69_spill] sm:$0xff] }
0x10c5   :  { %v2976_v42 = vmul.f32 %v9469_v6, %v11656_v11  ;;  %v3061_v11 = vmul.f32 %v9505_v28, %v11659_v0  ;;  %v11665_v0 = vld [vmem:[#allocation75_spill] sm:$0xff] }
0x10c6   :  { %v3063_v62 = vmul.f32 %v9481_v58, %v11665_v0 }
0x10c8   :  { %2992 = vrot.lane.b32.xlu1 %v2973_v13, %s11631_s1  ;;  %2990 = vrot.lane.b32.xlu0 %v2972_v14, %s11631_s1 }
0x10cc   :  { %2996 = vrot.lane.b32.xlu1 %v2975_v7, %s11631_s1  ;;  %2994 = vrot.lane.b32.xlu0 %v2974_v16, %s11631_s1  ;;  %v3117_v16 = vmul.f32 %v9505_v28, %v11658_v15  ;;  %v11664_v15 = vld [vmem:[#allocation74_spill] sm:$0xff] }
0x10cd   :  { %v3119_v32 = vmul.f32 %v9481_v58, %v11664_v15 }
0x10d0   :  { %2998 = vrot.lane.b32.xlu0 %v2976_v42, %s11631_s1  ;;  %3000 = vrot.lane.b32.xlu1 %v2977_v25, %s11631_s1  ;;  %v3118_v25 = vmul.f32 %v9489_v43, %v11660_v21 }
0x1112   :  { %v3095_v13 = vpop.permute.xlu0 %3094  ;;  %v3151_v14 = vpop.permute.xlu1 %3150 }
0x1116   :  { %v3153_v34 = vpop.permute.xlu1 %3152  ;;  %v3097_v51 = vpop.permute.xlu0 %3096 }
0x111a   :  { %v3149_v38 = vpop.permute.xlu1 %3148  ;;  %v3093_v39 = vpop.permute.xlu0 %3092 }
0x111e   :  { %v3147_v22 = vpop.permute.xlu1 %3146  ;;  %v3091_v7 = vpop.permute.xlu0 %3090 }
0x111f   :  { %v3166_v27 = vadd.f32 %v3147_v22, %v3118_v25  ;;  %v3110_v2 = vsub.f32 %v3062_v24, %v3091_v7  ;;  %v11668_v7 = vld [vmem:[#allocation70_spill] sm:$0xff] }
0x1120   :  { %v3121_v25 = vmul.f32 %v9477_v40, %v11668_v7  ;;  %v11673_v7 = vld [vmem:[#allocation83_spill] sm:$0xff] }
0x1122   :  { %v3145_v31 = vpop.permute.xlu1 %3144  ;;  %v3089_v61 = vpop.permute.xlu0 %3088 }
0x1123   :  { %v3165_v59 = vadd.f32 %v3145_v31, %v3117_v16  ;;  %v3109_v42 = vsub.f32 %v3061_v11, %v3089_v61  ;;  %v3167_v31 = vadd.f32 %v3149_v38, %v3119_v32  ;;  %v3111_v61 = vsub.f32 %v3063_v62, %v3093_v39  ;;  %v11666_v11 = vld [vmem:[#allocation73_spill] sm:$0xff] }
0x1124   :  { %v3064_v16 = vmul.f32 %v9469_v6, %v11666_v11  ;;  %v3169_v38 = vadd.f32 %v3153_v34, %v3121_v25  ;;  %v11670_v11 = vld [vmem:[#allocation80_spill] sm:$0xff] }
0x1125   :  { %3184 = vrot.lane.b32.xlu0 %v3109_v42, %s11662_s28  ;;  %3216 = vrot.lane.b32.xlu1 %v3165_v59, %s11663_s4  ;;  %v11667_v42 = vld [vmem:[#allocation72_spill] sm:$0xff] }
0x1126   :  { %v3120_v59 = vmul.f32 %v9469_v6, %v11667_v42  ;;  %v3112_v24 = vsub.f32 %v3064_v16, %v3095_v13  ;;  %v3143_v62 = vpop.permute.xlu1 %3142  ;;  %v3087_v32 = vpop.permute.xlu0 %3086 }
0x1128   :  { %v3168_v22 = vadd.f32 %v3151_v14, %v3120_v59 }
0x1129   :  { %3186 = vrot.lane.b32.xlu0 %v3110_v2, %s11662_s28  ;;  %3218 = vrot.lane.b32.xlu1 %v3166_v27, %s11663_s4  ;;  %v11669_v2 = vld [vmem:[#allocation71_spill] sm:$0xff] }
0x112a   :  { %v3065_v27 = vmul.f32 %v9477_v40, %v11669_v2  ;;  %v11672_v2 = vld [vmem:[#allocation82_spill] sm:$0xff] }
0x112c   :  { %v3113_v39 = vsub.f32 %v3065_v27, %v3097_v51  ;;  %v3059_v51 = vmul.f32 %v9527_v48, %v11673_v7 }
0x112d   :  { %3188 = vrot.lane.b32.xlu0 %v3111_v61, %s11662_s28  ;;  %3220 = vrot.lane.b32.xlu1 %v3167_v31, %s11663_s4  ;;  %v3116_v61 = vmul.f32 %v9509_v56, %v11670_v11  ;;  %v11671_v31 = vld [vmem:[#allocation81_spill] sm:$0xff] }
0x112e   :  { %v3060_v13 = vmul.f32 %v9509_v56, %v11671_v31  ;;  %v3141_v14 = vpop.permute.xlu1 %3140  ;;  %v3085_v16 = vpop.permute.xlu0 %3084  ;;  %v11674_v31 = vld [vmem:[#allocation84_spill] sm:$0xff]  ;;  %v11675_v11 = vld [vmem:[#allocation85_spill] sm:$0xff] }
0x112f   :  { %v3164_v59 = vadd.f32 %v3143_v62, %v3116_v61  ;;  %v3107_v25 = vsub.f32 %v3059_v51, %v3085_v16  ;;  %v3058_v62 = vmul.f32 %v9533_v20, %v11675_v11  ;;  %v11677_v16 = vld [vmem:[#allocation86_spill] sm:$0xff] }
0x1130   :  { %v7692_v51 = vld [vmem:[%s11494_s27 + $0x8] sm:$0xff] }
0x1131   :  { %3190 = vrot.lane.b32.xlu0 %v3112_v24, %s11662_s28  ;;  %3222 = vrot.lane.b32.xlu1 %v3168_v22, %s11663_s4  ;;  %v3108_v24 = vsub.f32 %v3060_v13, %v3087_v32  ;;  %v3115_v22 = vmul.f32 %v9527_v48, %v11672_v2  ;;  %v11676_v13 = vld [vmem:[#allocation87_spill] sm:$0xff] }
0x1132   :  { %v3139_v27 = vpop.permute.xlu1 %3138 }
0x1133   :  { %v3163_v34 = vadd.f32 %v3141_v14, %v3115_v22  ;;  %v2914_v14 = vmul.f32 %v9533_v20, %v11676_v13 }
0x1135   :  { %3192 = vrot.lane.b32.xlu0 %v3113_v39, %s11662_s28  ;;  %3224 = vrot.lane.b32.xlu1 %v3169_v38, %s11663_s4  ;;  %v3083_v39 = vpop.permute.xlu0 %3082  ;;  %v3114_v38 = vmul.f32 %v9533_v20, %v11674_v31 }
0x1136   :  { %v3106_v61 = vsub.f32 %v3058_v62, %v3083_v39  ;;  %v11679_v62 = vld [vmem:[#allocation89_spill] sm:$0xff] }
0x1137   :  { %v3162_v32 = vadd.f32 %v3139_v27, %v3114_v38 }
0x1139   :  { %3182 = vrot.lane.b32.xlu0 %v3108_v24, %s11662_s28  ;;  %3214 = vrot.lane.b32.xlu1 %v3164_v59, %s11663_s4  ;;  %v2915_v59 = vmul.f32 %v9527_v48, %v11677_v16  ;;  %v2989_v24 = vpop.permute.xlu1 %2988  ;;  %v2987_v22 = vpop.permute.xlu0 %2986 }
0x113d   :  { %3180 = vrot.lane.b32.xlu0 %v3107_v25, %s11662_s28  ;;  %3212 = vrot.lane.b32.xlu1 %v3163_v34, %s11663_s4  ;;  %v2963_v34 = vmul.f32 %v7692_v51, %v9527_v48  ;;  %v7693_v25 = vld [vmem:[%s11494_s27] sm:$0xff]  ;;  %v2993_v16 = vpop.permute.xlu1 %2992  ;;  %v2991_v13 = vpop.permute.xlu0 %2990 }
0x113e   :  { %v2962_v27 = vmul.f32 %v7693_v25, %v9533_v20 }
0x113f   :  { %v3011_v39 = vadd.f32 %v2989_v24, %v2963_v34  ;;  %v7695_v24 = vld [vmem:[%s11494_s27 + $0x10] sm:$0xff] }
0x1140   :  { %v3010_v38 = vadd.f32 %v2987_v22, %v2962_v27  ;;  %v2964_v22 = vmul.f32 %v7695_v24, %v9509_v56  ;;  %v11681_v27 = vld [vmem:[#allocation91_spill] sm:$0xff] }
0x1141   :  { %3178 = vrot.lane.b32.xlu0 %v3106_v61, %s11662_s28  ;;  %3210 = vrot.lane.b32.xlu1 %v3162_v32, %s11663_s4  ;;  %v2916_v32 = vmul.f32 %v9509_v56, %v11679_v62  ;;  %v11680_v61 = vld [vmem:[#allocation88_spill] sm:$0xff]  ;;  %v2995_v62 = vpop.permute.xlu0 %2994 }
0x1142   :  { %v2917_v51 = vmul.f32 %v9505_v28, %v11680_v61  ;;  %v3012_v25 = vadd.f32 %v2991_v13, %v2964_v22  ;;  %v2997_v61 = vpop.permute.xlu1 %2996  ;;  %v7697_v13 = vld [vmem:[%s11494_s27 + $0x20] sm:$0xff] }
0x1143   :  { %v11683_v22 = vld [vmem:[#allocation93_spill] sm:$0xff] }
0x1145   :  { %2930 = vrot.lane.b32.xlu0 %v2914_v14, %s11631_s1  ;;  %2932 = vrot.lane.b32.xlu1 %v2915_v59, %s11631_s1  ;;  %v7694_v14 = vld [vmem:[%s11494_s27 + $0x18] sm:$0xff] }
0x1146   :  { %v2965_v59 = vmul.f32 %v7694_v14, %v9505_v28 }
0x1148   :  { %v3013_v34 = vadd.f32 %v2993_v16, %v2965_v59  ;;  %v2966_v16 = vmul.f32 %v7697_v13, %v9489_v43 }
0x1149   :  { %3026 = vrot.lane.b32.xlu0 %v3010_v38, %s11678_s7  ;;  %3028 = vrot.lane.b32.xlu1 %v3011_v39, %s11678_s7  ;;  %v2918_v39 = vmul.f32 %v9489_v43, %v11681_v27  ;;  %v11682_v38 = vld [vmem:[#allocation90_spill] sm:$0xff]  ;;  %v3001_v27 = vpop.permute.xlu1 %3000 }
0x114a   :  { %v2919_v14 = vmul.f32 %v9481_v58, %v11682_v38  ;;  %v3014_v24 = vadd.f32 %v2995_v62, %v2966_v16  ;;  %v2999_v38 = vpop.permute.xlu0 %2998  ;;  %v7699_v62 = vld [vmem:[%s11494_s27 + $0x38] sm:$0xff]  ;;  %v9677_v16 = vpop.f32.mrf.mxu1 }
0x114d   :  { %2934 = vrot.lane.b32.xlu0 %v2916_v32, %s11631_s1  ;;  %2936 = vrot.lane.b32.xlu1 %v2917_v51, %s11631_s1  ;;  %v7696_v32 = vld [vmem:[%s11494_s27 + $0x28] sm:$0xff] }
0x114e   :  { %v2967_v51 = vmul.f32 %v7696_v32, %v9481_v58 }
0x1150   :  { %v3015_v59 = vadd.f32 %v2997_v61, %v2967_v51  ;;  %v2969_v61 = vmul.f32 %v7699_v62, %v9477_v40  ;;  %v3303_v62 = vmul.f32 %v9400_v52, %v11595_v57 }
0x1151   :  { %3030 = vrot.lane.b32.xlu0 %v3012_v25, %s11678_s7  ;;  %3032 = vrot.lane.b32.xlu1 %v3013_v34, %s11678_s7  ;;  %v2920_v34 = vmul.f32 %v9469_v6, %v11683_v22  ;;  %v11684_v25 = vld [vmem:[#allocation92_spill] sm:$0xff] }
0x1152   :  { %v2921_v32 = vmul.f32 %v9477_v40, %v11684_v25  ;;  %v3017_v13 = vadd.f32 %v3001_v27, %v2969_v61  ;;  %v3305_v27 = vmul.f32 %v9677_v16, %v11587_v3  ;;  %v3253_v61 = vmul.f32 %v9387_v29, %v11597_v33 }
0x1155   :  { %2938 = vrot.lane.b32.xlu0 %v2918_v39, %s11631_s1  ;;  %2940 = vrot.lane.b32.xlu1 %v2919_v14, %s11631_s1  ;;  %v7698_v39 = vld [vmem:[%s11494_s27 + $0x30] sm:$0xff] }
0x1156   :  { %v2968_v14 = vmul.f32 %v7698_v39, %v9469_v6  ;;  %v3352_v39 = vmul.f32 %v9406_v50, %v11590_v5 }
0x1158   :  { %v3016_v51 = vadd.f32 %v2999_v38, %v2968_v14  ;;  %v3255_v38 = vmul.f32 %v9400_v52, %v11589_v12  ;;  %v3353_v14 = vmul.f32 %v9677_v16, %v11594_v9 }
0x1159   :  { %3034 = vrot.lane.b32.xlu0 %v3014_v24, %s11678_s7  ;;  %3036 = vrot.lane.b32.xlu1 %v3015_v59, %s11678_s7  ;;  %v3256_v59 = vmul.f32 %v9406_v50, %v8218_v44  ;;  %v3257_v24 = vmul.f32 %v9677_v16, %v11584_v1 }
0x115d   :  { %2942 = vrot.lane.b32.xlu0 %v2920_v34, %s11631_s1  ;;  %2944 = vrot.lane.b32.xlu1 %v2921_v32, %s11631_s1  ;;  %v3254_v34 = vmul.f32 %v9393_v23, %v11586_v18  ;;  %v3304_v32 = vmul.f32 %v9406_v50, %v11593_v49 }
0x1161   :  { %3038 = vrot.lane.b32.xlu0 %v3016_v51, %s11678_s7  ;;  %3040 = vrot.lane.b32.xlu1 %v3017_v13, %s11678_s7  ;;  %v3302_v51 = vmul.f32 %v9393_v23, %v11598_v60  ;;  %v3351_v13 = vmul.f32 %v9400_v52, %v11599_v10 }
0x1165   :  { %3278 = vrot.lane.b32.xlu0 %v3256_v59, %s11451_s2  ;;  %3280 = vrot.lane.b32.xlu1 %v3257_v24, %s11451_s2  ;;  %v3252_v59 = vmul.f32 %v9383_v63, %v11600_v4  ;;  %v3301_v24 = vmul.f32 %v9387_v29, %v11601_v54 }
0x1169   :  { %3276 = vrot.lane.b32.xlu0 %v3255_v38, %s11451_s2  ;;  %3328 = vrot.lane.b32.xlu1 %v3305_v27, %s11622_s6  ;;  %v3350_v38 = vmul.f32 %v9393_v23, %v11602_v53  ;;  %v3300_v27 = vmul.f32 %v9383_v63, %v11592_v8 }
0x116d   :  { %3326 = vrot.lane.b32.xlu0 %v3304_v32, %s11622_s6  ;;  %3274 = vrot.lane.b32.xlu1 %v3254_v34, %s11451_s2  ;;  %v3349_v34 = vmul.f32 %v9387_v29, %v11605_v30 }
0x1171   :  { %3376 = vrot.lane.b32.xlu0 %v3353_v14, %s11623_s29  ;;  %3374 = vrot.lane.b32.xlu1 %v3352_v39, %s11623_s29 }
0x1175   :  { %3324 = vrot.lane.b32.xlu0 %v3303_v62, %s11622_s6 }
0x1179   :  { %3272 = vrot.lane.b32.xlu0 %v3253_v61, %s11451_s2 }
0x117d   :  { %3322 = vrot.lane.b32.xlu0 %v3302_v51, %s11622_s6 }
0x1181   :  { %3372 = vrot.lane.b32.xlu0 %v3351_v13, %s11623_s29 }
0x1185   :  { %3270 = vrot.lane.b32.xlu0 %v3252_v59, %s11451_s2  ;;  %s11696_s2 = smov 48  }
0x1189   :  { %3320 = vrot.lane.b32.xlu0 %v3301_v24, %s11622_s6 }
0x118d   :  { %3370 = vrot.lane.b32.xlu0 %v3350_v38, %s11623_s29 }
0x1191   :  { %3318 = vrot.lane.b32.xlu0 %v3300_v27, %s11622_s6 }
0x1195   :  { %3368 = vrot.lane.b32.xlu0 %v3349_v34, %s11623_s29 }
0x1197   :  { %v3185_v32 = vpop.permute.xlu0 %3184  ;;  %v3217_v39 = vpop.permute.xlu1 %3216 }
0x119b   :  { %v3187_v14 = vpop.permute.xlu0 %3186  ;;  %v3219_v62 = vpop.permute.xlu1 %3218 }
0x119f   :  { %v3189_v61 = vpop.permute.xlu0 %3188  ;;  %v3221_v51 = vpop.permute.xlu1 %3220 }
0x11a0   :  { %v3239_v11 = vsel %vm1013_vm4, %v3189_v61, %v3221_v51  ;;  %v7700_v51 = vld [vmem:[%s11495_s8] sm:$0xff] }
0x11a3   :  { %v3191_v13 = vpop.permute.xlu0 %3190  ;;  %v3223_v59 = vpop.permute.xlu1 %3222 }
0x11a4   :  { %v3240_v27 = vsel %vm1013_vm4, %v3191_v13, %v3223_v59  ;;  %v3237_v13 = vsel %vm1013_vm4, %v3185_v32, %v3217_v39 }
0x11a7   :  { %v3193_v24 = vpop.permute.xlu0 %3192  ;;  %v3225_v38 = vpop.permute.xlu1 %3224 }
0x11a8   :  { %v3241_v25 = vsel %vm1013_vm4, %v3193_v24, %v3225_v38  ;;  %v3238_v24 = vsel %vm1013_vm4, %v3187_v14, %v3219_v62  ;;  %v2906_v14 = vmul.f32 %v7700_v51, %v9533_v20 }
0x11a9   :  { %7237 = vmatprep.subr.msk.mxu0 %vm379_vm3, %v3241_v25 }
0x11aa   :  { %7238 = vmatpush3.xpose.msk.msra.mxu0 %vm379_vm3, %v3241_v25 }
0x11ab   :  { %v3183_v22 = vpop.permute.xlu0 %3182  ;;  %7239 = vmatprep.subr.msk.mxu0 %vm379_vm3, %v3240_v27  ;;  %v3215_v34 = vpop.permute.xlu1 %3214 }
0x11ae   :  { %7240 = vmatpush3.xpose.msk.msra.mxu0 %vm379_vm3, %v3240_v27 }
0x11af   :  { %v3181_v31 = vpop.permute.xlu0 %3180  ;;  %7241 = vmatprep.subr.msk.mxu0 %vm379_vm3, %v3239_v11  ;;  %v3213_v7 = vpop.permute.xlu1 %3212 }
0x11b2   :  { %7242 = vmatpush3.xpose.msk.msra.mxu0 %vm379_vm3, %v3239_v11  ;;  %v3236_v11 = vsel %vm1013_vm4, %v3183_v22, %v3215_v34 }
0x11b3   :  { %v3179_v38 = vpop.permute.xlu0 %3178  ;;  %7243 = vmatprep.subr.msk.mxu0 %vm379_vm3, %v3238_v24  ;;  %v3211_v25 = vpop.permute.xlu1 %3210 }
0x11b4   :  { %v3234_v22 = vsel %vm1013_vm4, %v3179_v38, %v3211_v25 }
0x11b6   :  { %7244 = vmatpush3.xpose.msk.msra.mxu0 %vm379_vm3, %v3238_v24  ;;  %v3235_v24 = vsel %vm1013_vm4, %v3181_v31, %v3213_v7  ;;  %v7702_v31 = vld [vmem:[%s11495_s8 + $0x10] sm:$0xff] }
0x11b7   :  { %v2931_v59 = vpop.permute.xlu0 %2930  ;;  %7245 = vmatprep.subr.msk.mxu0 %vm379_vm3, %v3237_v13  ;;  %v2933_v61 = vpop.permute.xlu1 %2932  ;;  %v2908_v51 = vmul.f32 %v7702_v31, %v9509_v56 }
0x11b8   :  { %v2954_v62 = vsub.f32 %v2906_v14, %v2931_v59  ;;  %v7701_v59 = vld [vmem:[%s11495_s8 + $0x8] sm:$0xff] }
0x11b9   :  { %v2907_v7 = vmul.f32 %v7701_v59, %v9527_v48 }
0x11ba   :  { %7246 = vmatpush3.xpose.msk.msra.mxu0 %vm379_vm3, %v3237_v13 }
0x11bb   :  { %v3027_v27 = vpop.permute.xlu0 %3026  ;;  %7247 = vmatprep.subr.msk.mxu0 %vm379_vm3, %v3236_v11  ;;  %v3029_v32 = vpop.permute.xlu1 %3028  ;;  %v2955_v14 = vsub.f32 %v2907_v7, %v2933_v61 }
0x11bc   :  { %v3050_v39 = vsel %vm1013_vm4, %v2954_v62, %v3027_v27  ;;  %v7703_v27 = vld [vmem:[%s11495_s8 + $0x18] sm:$0xff] }
0x11bd   :  { %7253 = vmatprep.mubr.msk.f32.mxu0 %vm379_vm3, %v3050_v39  ;;  %v3051_v62 = vsel %vm1013_vm4, %v2955_v14, %v3029_v32  ;;  %v2909_v48 = vmul.f32 %v7703_v27, %v9505_v28  ;;  %v7704_v39 = vld [vmem:[%s11495_s8 + $0x20] sm:$0xff]  ;;  %v7705_v28 = vld [vmem:[%s11495_s8 + $0x28] sm:$0xff] }
0x11be   :  { %7248 = vmatpush3.xpose.msk.msra.mxu0 %vm379_vm3, %v3236_v11  ;;  %v2910_v56 = vmul.f32 %v7704_v39, %v9489_v43  ;;  %v2911_v7 = vmul.f32 %v7705_v28, %v9481_v58  ;;  %v7707_v58 = vld [vmem:[%s11495_s8 + $0x38] sm:$0xff] }
0x11bf   :  { %v2935_v2 = vpop.permute.xlu0 %2934  ;;  %7249 = vmatprep.subr.msk.mxu0 %vm379_vm3, %v3235_v24  ;;  %v2937_v20 = vpop.permute.xlu1 %2936 }
0x11c0   :  { %v2956_v38 = vsub.f32 %v2908_v51, %v2935_v2  ;;  %v2957_v2 = vsub.f32 %v2909_v48, %v2937_v20 }
0x11c2   :  { %7250 = vmatpush3.xpose.msk.msra.mxu0 %vm379_vm3, %v3235_v24 }
0x11c3   :  { %v3031_v34 = vpop.permute.xlu0 %3030  ;;  %7251 = vmatprep.subr.msk.mxu0 %vm379_vm3, %v3234_v22  ;;  %v3033_v13 = vpop.permute.xlu1 %3032 }
0x11c4   :  { %v3052_v61 = vsel %vm1013_vm4, %v2956_v38, %v3031_v34  ;;  %v3053_v59 = vsel %vm1013_vm4, %v2957_v2, %v3033_v13  ;;  %v7706_v13 = vld [vmem:[%s11495_s8 + $0x30] sm:$0xff]  ;;  %v2913_v38 = vmul.f32 %v7707_v58, %v9477_v40  ;;  %v7708_v40 = vld [vmem:[%s11614_s26] sm:$0xff] }
0x11c5   :  { %v2912_v14 = vmul.f32 %v7706_v13, %v9469_v6 }
0x11c6   :  { %7252 = vmatpush3.xpose.msk.msra.mxu0 %vm379_vm3, %v3234_v22 }
0x11c7   :  { %v2939_v25 = vpop.permute.xlu0 %2938  ;;  %v2941_v11 = vpop.permute.xlu1 %2940 }
0x11c8   :  { %v2958_v24 = vsub.f32 %v2910_v56, %v2939_v25  ;;  %v2959_v34 = vsub.f32 %v2911_v7, %v2941_v11 }
0x11c9   :  { %7254 = vmatmul.mubr.msk.f32.vlgmr.msra.gmra.mxu0 %vm379_vm3, %v3051_v62 }
0x11ca   :  { %7256 = vmatprep.mubr.msk.f32.mxu0 %vm379_vm3, %v3052_v61 }
0x11cb   :  { %v3035_v32 = vpop.permute.xlu0 %3034  ;;  %v3037_v22 = vpop.permute.xlu1 %3036 }
0x11cc   :  { %v3054_v43 = vsel %vm1013_vm4, %v2958_v24, %v3035_v32  ;;  %v3055_v51 = vsel %vm1013_vm4, %v2959_v34, %v3037_v22  ;;  %v3249_v24 = vmul.f32 %v9677_v16, %v11626_v41  ;;  %v3247_v16 = vmul.f32 %v9400_v52, %v11627_v19 }
0x11cd   :  { %7257 = vmatmul.mubr.msk.f32.gmra.mxu0 %vm379_vm3, %v3053_v59  ;;  %v3248_v59 = vmul.f32 %v9406_v50, %v11625_v17  ;;  %v3245_v52 = vmul.f32 %v9387_v29, %v11634_v45 }
0x11ce   :  { %7259 = vmatprep.mubr.msk.f32.mxu0 %vm379_vm3, %v3054_v43 }
0x11cf   :  { %v2943_v20 = vpop.permute.xlu0 %2942  ;;  %v2945_v31 = vpop.permute.xlu1 %2944 }
0x11d0   :  { %v2960_v25 = vsub.f32 %v2912_v14, %v2943_v20  ;;  %v2961_v11 = vsub.f32 %v2913_v38, %v2945_v31 }
0x11d1   :  { %7260 = vmatmul.mubr.msk.f32.gmra.mxu0 %vm379_vm3, %v3055_v51 }
0x11d3   :  { %v3039_v62 = vpop.permute.xlu0 %3038  ;;  %v3041_v27 = vpop.permute.xlu1 %3040 }
0x11d4   :  { %v3056_v48 = vsel %vm1013_vm4, %v2960_v25, %v3039_v62  ;;  %v3057_v39 = vsel %vm1013_vm4, %v2961_v11, %v3041_v27 }
0x11d5   :  { %7262 = vmatprep.mubr.msk.f32.mxu0 %vm379_vm3, %v3056_v48  ;;  %v3246_v48 = vmul.f32 %v9393_v23, %v11630_v47 }
0x11d6   :  { %7263 = vmatmul.mubr.msk.f32.gmra.mxu0 %vm379_vm3, %v3057_v39 }
0x11d7   :  { %v3279_v6 = vpop.permute.xlu0 %3278  ;;  %v3281_v56 = vpop.permute.xlu1 %3280  ;;  %7309 = vmatprep.mubr.msk.f32.mxu0 %vm224_vm2, %v7708_v40 }
0x11d8   :  { %v3297_v28 = vadd.f32 %v3281_v56, %v3249_v24  ;;  %v3296_v7 = vadd.f32 %v3279_v6, %v3248_v59 }
0x11db   :  { %v3277_v61 = vpop.permute.xlu0 %3276  ;;  %v3329_v2 = vpop.permute.xlu1 %3328 }
0x11dc   :  { %v3345_v43 = vadd.f32 %v3329_v2, %v3297_v28  ;;  %v3295_v25 = vadd.f32 %v3277_v61, %v3247_v16  ;;  %v7711_v16 = vld [vmem:[%s11606_s30 + $0x18] sm:$0xff] }
0x11df   :  { %v3327_v32 = vpop.permute.xlu0 %3326  ;;  %v3275_v22 = vpop.permute.xlu1 %3274 }
0x11e0   :  { %v3344_v31 = vadd.f32 %v3327_v32, %v3296_v7  ;;  %v3294_v6 = vadd.f32 %v3275_v22, %v3246_v48  ;;  %v7709_v22 = vld [vmem:[%s11606_s30 + $0x8] sm:$0xff]  ;;  %v7712_v48 = vld [vmem:[%s11606_s30 + $0x10] sm:$0xff] }
0x11e3   :  { %v3377_v34 = vpop.permute.xlu0 %3376  ;;  %v3375_v20 = vpop.permute.xlu1 %3374 }
0x11e4   :  { %v3393_v51 = vadd.f32 %v3377_v34, %v3345_v43  ;;  %v3392_v13 = vadd.f32 %v3375_v20, %v3344_v31  ;;  %v7710_v31 = vld [vmem:[%s11606_s30] sm:$0xff] }
0x11e6   :  { %7265 = vmatprep.subr.mxu1 %v3393_v51 }
0x11e7   :  { %v3325_v14 = vpop.permute.xlu0 %3324  ;;  %7266 = vmatpush3.msra.mxu1 %v3393_v51 }
0x11e8   :  { %7267 = vmatprep.subr.mxu1 %v3392_v13  ;;  %v3343_v50 = vadd.f32 %v3325_v14, %v3295_v25 }
0x11e9   :  { %7268 = vmatpush3.msra.mxu1 %v3392_v13 }
0x11eb   :  { %v3273_v58 = vpop.permute.xlu0 %3272 }
0x11ec   :  { %v3293_v24 = vadd.f32 %v3273_v58, %v3245_v52 }
0x11ef   :  { %v3323_v38 = vpop.permute.xlu0 %3322 }
0x11f0   :  { %v3342_v56 = vadd.f32 %v3323_v38, %v3294_v6 }
0x11f3   :  { %v3373_v11 = vpop.permute.xlu0 %3372 }
0x11f4   :  { %v3391_v62 = vadd.f32 %v3373_v11, %v3343_v50 }
0x11f6   :  { %7269 = vmatprep.subr.mxu1 %v3391_v62 }
0x11f7   :  { %v9814_v27 = vpop.permute.xlu0 %3270  ;;  %7270 = vmatpush3.msra.mxu1 %v3391_v62 }
0x11fb   :  { %v3321_v39 = vpop.permute.xlu0 %3320 }
0x11fc   :  { %v3341_v32 = vadd.f32 %v3321_v39, %v3293_v24 }
0x11ff   :  { %v3371_v40 = vpop.permute.xlu0 %3370 }
0x1200   :  { %v3390_v2 = vadd.f32 %v3371_v40, %v3342_v56 }
0x1202   :  { %7271 = vmatprep.subr.mxu1 %v3390_v2 }
0x1203   :  { %v9820_v61 = vpop.permute.xlu0 %3318  ;;  %7272 = vmatpush3.msra.mxu1 %v3390_v2  ;;  %v7713_v2 = vld [vmem:[%s11606_s30 + $0x28] sm:$0xff] }
0x1207   :  { %v3369_v59 = vpop.permute.xlu0 %3368 }
0x1208   :  { %v3389_v28 = vadd.f32 %v3369_v59, %v3341_v32  ;;  %v7714_v59 = vld [vmem:[%s11606_s30 + $0x38] sm:$0xff] }
0x120a   :  { %7273 = vmatprep.subr.mxu1 %v3389_v28 }
0x120b   :  { %7274 = vmatpush3.msra.mxu1 %v3389_v28 }
0x1289   :  { %v7255_v7 = vpop.f32.mrf.mxu0 }
0x128a   :  { %v3548_v23 = vmul.f32 0.25, %v7255_v7 }
0x128b   :  { %v3508_v43 = vpop.f32.mrf.mxu0 }
0x128c   :  { %v3556_v34 = vadd.f32 %v7709_v22, %v3548_v23  ;;  %v3547_v20 = vmul.f32 0.25, %v3508_v43  ;;  %v3251_v23 = vmul.f32 %v9379_v46, %v11604_v36  ;;  %v3250_v22 = vmul.f32 %v9375_v26, %v11609_v55 }
0x128d   :  { %v7258_v29 = vpop.f32.mrf.mxu0 }
0x128e   :  { %v3555_v51 = vadd.f32 %v7710_v31, %v3547_v20  ;;  %v3550_v13 = vmul.f32 0.25, %v7258_v29  ;;  %v3566_v14 = vsel %vm224_vm2, %v3556_v34, -inf  ;;  %v3299_v20 = vmul.f32 %v9379_v46, %v11610_v35 }
0x128f   :  { %v3518_v58 = vpop.f32.mrf.mxu0  ;;  %3567 = vmax.xlane.f32.xlu1 %v3566_v14 }
0x1290   :  { %v3558_v38 = vadd.f32 %v7711_v16, %v3550_v13  ;;  %v3549_v25 = vmul.f32 0.25, %v3518_v58  ;;  %v3563_v50 = vsel %vm224_vm2, %v3555_v51, -inf  ;;  %v11686_v13 = vld [vmem:[#allocation32_spill] sm:$0xff] }
0x1291   :  { %v7261_v11 = vpop.f32.mrf.mxu0  ;;  %3564 = vmax.xlane.f32.xlu0 %v3563_v50  ;;  %v3298_v14 = vmul.f32 %v9375_v26, %v11686_v13  ;;  %v7715_v58 = vld [vmem:[%s11606_s30 + $0x20] sm:$0xff]  ;;  %v7716_v50 = vld [vmem:[%s11606_s30 + $0x30] sm:$0xff]  ;;  %s11695_s30 = smov 32  }
0x1292   :  { %v3557_v39 = vadd.f32 %v7712_v48, %v3549_v25  ;;  %v3552_v6 = vmul.f32 0.25, %v7261_v11  ;;  %v3572_v56 = vsel %vm224_vm2, %v3558_v38, -inf }
0x1293   :  { %v3528_v62 = vpop.f32.mrf.mxu0 }
0x1294   :  { %v3560_v52 = vadd.f32 %v7713_v2, %v3552_v6  ;;  %v3569_v32 = vsel %vm224_vm2, %v3557_v39, -inf  ;;  %v3551_v29 = vmul.f32 0.25, %v3528_v62  ;;  %v11687_v6 = vld [vmem:[#allocation24_spill] sm:$0xff] }
0x1295   :  { %3573 = vmax.xlane.f32.xlu0 %v3572_v56  ;;  %v3348_v56 = vmul.f32 %v9383_v63, %v11687_v6 }
0x1296   :  { %v7264_v40 = vpop.f32.mrf.mxu0  ;;  %v3578_v7 = vsel %vm224_vm2, %v3560_v52, -inf  ;;  %v3559_v16 = vadd.f32 %v7715_v58, %v3551_v29 }
0x1297   :  { %v3554_v24 = vmul.f32 0.25, %v7264_v40 }
0x1298   :  { %v3538_v31 = vpop.f32.mrf.mxu0  ;;  %v3575_v62 = vsel %vm224_vm2, %v3559_v16, -inf }
0x1299   :  { %3570 = vmax.xlane.f32.xlu0 %v3569_v32  ;;  %v3562_v28 = vadd.f32 %v7714_v59, %v3554_v24  ;;  %v3553_v25 = vmul.f32 0.25, %v3538_v31 }
0x129b   :  { %v3584_v43 = vsel %vm224_vm2, %v3562_v28, -inf  ;;  %v3561_v11 = vadd.f32 %v7716_v50, %v3553_v25 }
0x129d   :  { %3579 = vmax.xlane.f32.xlu0 %v3578_v7  ;;  %v3581_v48 = vsel %vm224_vm2, %v3561_v11, -inf }
0x12a0   :  { %3268 = vrot.lane.b32.xlu1 %v3251_v23, %s11685_s9 }
0x12a1   :  { %3585 = vmax.xlane.f32.xlu0 %v3584_v43 }
0x12b7   :  { %3266 = vrot.lane.b32.xlu0 %v3250_v22, %s11685_s9 }
0x12bb   :  { %3316 = vrot.lane.b32.xlu0 %v3299_v20, %s11622_s6 }
0x12bf   :  { %3314 = vrot.lane.b32.xlu0 %v3298_v14, %s11622_s6 }
0x12c4   :  { %3576 = vmax.xlane.f32.xlu1 %v3575_v62 }
0x12c8   :  { %3582 = vmax.xlane.f32.xlu1 %v3581_v48 }
0x12d9   :  { %3366 = vrot.lane.b32.xlu1 %v3348_v56, %s11623_s29 }
0x1318   :  { %v3568_v40 = vpop.xlane.xlu1 %3567 }
0x1319   :  { %v3588_v2 = vsub.f32 %v3556_v34, %v3568_v40 }
0x131a   :  { %v3565_v24 = vpop.xlane.xlu0 %3564 }
0x131b   :  { %v3597_v32 = vmul.f32 1.442695, %v3588_v2  ;;  %v3587_v59 = vsub.f32 %v3555_v51, %v3565_v24 }
0x131d   :  { %7568 = vpow2.f32 %v3597_v32  ;;  %v3595_v7 = vmul.f32 1.442695, %v3587_v59 }
0x131e   :  { %v3574_v23 = vpop.xlane.xlu0 %3573 }
0x131f   :  { %7570 = vpow2.f32 %v3595_v7  ;;  %v3590_v43 = vsub.f32 %v3558_v38, %v3574_v23  ;;  %v3269_v7 = vpop.permute.xlu1 %3268  ;;  %v11688_v23 = vld [vmem:[#allocation28_spill] sm:$0xff] }
0x1321   :  { %v3601_v22 = vmul.f32 1.442695, %v3590_v43  ;;  %v3347_v43 = vmul.f32 %v9379_v46, %v11688_v23 }
0x1322   :  { %v3571_v20 = vpop.xlane.xlu0 %3570 }
0x1323   :  { %7572 = vpow2.f32 %v3601_v22  ;;  %v3589_v29 = vsub.f32 %v3557_v39, %v3571_v20 }
0x1325   :  { %v3599_v31 = vmul.f32 1.442695, %v3589_v29  ;;  %v11689_v29 = vld [vmem:[#allocation44_spill] sm:$0xff] }
0x1326   :  { %v3580_v14 = vpop.xlane.xlu0 %3579 }
0x1327   :  { %7574 = vpow2.f32 %v3599_v31  ;;  %v3592_v58 = vsub.f32 %v3560_v52, %v3580_v14  ;;  %v3244_v31 = vmul.f32 %v9383_v63, %v11689_v29 }
0x1329   :  { %v3605_v25 = vmul.f32 1.442695, %v3592_v58 }
0x132a   :  { %v9869_v50 = vpop.eup %7568  ;;  %v3586_v34 = vpop.xlane.xlu0 %3585 }
0x132b   :  { %7576 = vpow2.f32 %v3605_v25  ;;  %v3594_v62 = vsub.f32 %v3562_v28, %v3586_v34  ;;  %v3614_v51 = vsel %vm224_vm2, %v9869_v50, 0.0  ;;  %v3292_v25 = vadd.f32 %v9814_v27, %v3244_v31 }
0x132c   :  { %v7571_v48 = vpop.eup %7570  ;;  %3615 = vadd.xlane.f32.xlu0 %v3614_v51 }
0x132d   :  { %v3609_v38 = vmul.f32 1.442695, %v3594_v62  ;;  %v3611_v56 = vsel %vm224_vm2, %v7571_v48, 0.0  ;;  %v3340_v62 = vadd.f32 %v9820_v61, %v3292_v25 }
0x132e   :  { %3612 = vadd.xlane.f32.xlu1 %v3611_v56 }
0x132f   :  { %7578 = vpow2.f32 %v3609_v38 }
0x1330   :  { %v9874_v39 = vpop.eup %7572 }
0x1331   :  { %v3620_v52 = vsel %vm224_vm2, %v9874_v39, 0.0 }
0x1332   :  { %3621 = vadd.xlane.f32.xlu0 %v3620_v52 }
0x1334   :  { %v9878_v40 = vpop.eup %7574 }
0x1335   :  { %v3617_v28 = vsel %vm224_vm2, %v9878_v40, 0.0 }
0x1336   :  { %3618 = vadd.xlane.f32.xlu1 %v3617_v28 }
0x1338   :  { %v9882_v2 = vpop.eup %7576 }
0x1339   :  { %v3626_v24 = vsel %vm224_vm2, %v9882_v2, 0.0 }
0x133a   :  { %3627 = vadd.xlane.f32.xlu1 %v3626_v24  ;;  %v11690_v24 = vld [vmem:[#allocation30_spill] sm:$0xff] }
0x133b   :  { %v3346_v27 = vmul.f32 %v9375_v26, %v11690_v24 }
0x133c   :  { %v9886_v32 = vpop.eup %7578 }
0x133d   :  { %v3632_v59 = vsel %vm224_vm2, %v9886_v32, 0.0 }
0x133e   :  { %3633 = vadd.xlane.f32.xlu1 %v3632_v59  ;;  %v3267_v59 = vpop.permute.xlu0 %3266 }
0x134d   :  { %v3577_v22 = vpop.xlane.xlu1 %3576 }
0x134e   :  { %v3591_v20 = vsub.f32 %v3559_v16, %v3577_v22 }
0x134f   :  { %3364 = vrot.lane.b32.xlu1 %v3347_v43, %s11623_s29 }
0x1350   :  { %v3603_v14 = vmul.f32 1.442695, %v3591_v20  ;;  %v11691_v20 = vld [vmem:[#allocation49_spill] sm:$0xff] }
0x1351   :  { %v3583_v58 = vpop.xlane.xlu1 %3582  ;;  %v3243_v31 = vmul.f32 %v9379_v46, %v11691_v20  ;;  %v11692_v46 = vld [vmem:[#allocation53_spill] sm:$0xff] }
0x1352   :  { %7580 = vpow2.f32 %v3603_v14  ;;  %v3593_v34 = vsub.f32 %v3561_v11, %v3583_v58  ;;  %v3317_v58 = vpop.permute.xlu0 %3316 }
0x1354   :  { %v3607_v51 = vmul.f32 1.442695, %v3593_v34  ;;  %v3291_v34 = vadd.f32 %v3269_v7, %v3243_v31 }
0x1355   :  { %v3367_v38 = vpop.permute.xlu1 %3366 }
0x1356   :  { %7582 = vpow2.f32 %v3607_v51  ;;  %v3388_v56 = vadd.f32 %v3367_v38, %v3340_v62  ;;  %v3339_v62 = vadd.f32 %v3317_v58, %v3291_v34 }
0x1358   :  { %7275 = vmatprep.subr.mxu1 %v3388_v56 }
0x1359   :  { %7276 = vmatpush3.msra.mxu1 %v3388_v56  ;;  %v3315_v56 = vpop.permute.xlu0 %3314 }
0x135f   :  { %v7581_v16 = vpop.eup %7580 }
0x1360   :  { %v3623_v52 = vsel %vm224_vm2, %v7581_v16, 0.0 }
0x1361   :  { %3624 = vadd.xlane.f32.xlu0 %v3623_v52 }
0x1363   :  { %v7583_v28 = vpop.eup %7582 }
0x1364   :  { %v3629_v63 = vsel %vm224_vm2, %v7583_v28, 0.0 }
0x1365   :  { %3630 = vadd.xlane.f32.xlu0 %v3629_v63 }
0x137b   :  { %3362 = vrot.lane.b32.xlu0 %v3346_v27, %s11623_s29 }
0x13b5   :  { %v3616_v52 = vpop.xlane.xlu0 %3615 }
0x13b7   :  { %v3613_v61 = vpop.xlane.xlu1 %3612 }
0x13b8   :  { %7584 = vrcp.f32 %v3613_v61 }
0x13b9   :  { %7586 = vrcp.f32 %v3616_v52 }
0x13bb   :  { %v3622_v63 = vpop.xlane.xlu0 %3621 }
0x13bf   :  { %v3619_v11 = vpop.xlane.xlu1 %3618 }
0x13c0   :  { %7588 = vrcp.f32 %v3619_v11 }
0x13c1   :  { %7590 = vrcp.f32 %v3622_v63 }
0x13c3   :  { %v3628_v43 = vpop.xlane.xlu1 %3627 }
0x13c5   :  { %v7585_v22 = vpop.eup %7584 }
0x13c6   :  { %v3636_v14 = vmul.f32 %v7585_v22, %v7571_v48  ;;  %v3242_v48 = vmul.f32 %v9375_v26, %v11692_v46  ;;  %v7587_v31 = vpop.eup %7586 }
0x13c7   :  { %v3634_v25 = vpop.xlane.xlu1 %3633 }
0x13c8   :  { %7281 = vmatprep.mubr.msk.f32.mxu1 %vm224_vm2, %v3636_v14  ;;  %v3290_v61 = vadd.f32 %v3267_v59, %v3242_v48 }
0x13ca   :  { %v3338_v22 = vadd.f32 %v3315_v56, %v3290_v61 }
0x13cb   :  { %v3365_v51 = vpop.permute.xlu1 %3364 }
0x13cc   :  { %v3387_v38 = vadd.f32 %v3365_v51, %v3339_v62  ;;  %v3638_v62 = vmul.f32 %v7587_v31, %v9869_v50  ;;  %v7720_v31 = vld [vmem:[%s11614_s26 + $0x20] sm:$0xff] }
0x13cd   :  { %v7589_v58 = vpop.eup %7588 }
0x13ce   :  { %7277 = vmatprep.subr.mxu1 %v3387_v38  ;;  %v7591_v11 = vpop.eup %7590  ;;  %v3640_v51 = vmul.f32 %v7589_v58, %v9878_v40  ;;  %v7722_v58 = vld [vmem:[%s11614_s26 + $0x30] sm:$0xff] }
0x13cf   :  { %7278 = vmatpush3.msra.mxu1 %v3387_v38  ;;  %v3642_v59 = vmul.f32 %v7591_v11, %v9874_v39  ;;  %v6629_v11 = vld [vmem:[%s11235_s14 + $0x78] sm:$0xff] }
0x13ea   :  { %v3625_v27 = vpop.xlane.xlu0 %3624 }
0x13eb   :  { %7592 = vrcp.f32 %v3625_v27 }
0x13ec   :  { %7594 = vrcp.f32 %v3628_v43 }
0x13ee   :  { %v3631_v7 = vpop.xlane.xlu0 %3630 }
0x13ef   :  { %7596 = vrcp.f32 %v3631_v7 }
0x13f0   :  { %7598 = vrcp.f32 %v3634_v25 }
0x13f2   :  { %v3363_v14 = vpop.permute.xlu0 %3362 }
0x13f3   :  { %v3386_v34 = vadd.f32 %v3363_v14, %v3338_v22  ;;  %v7721_v14 = vld [vmem:[%s11614_s26 + $0x28] sm:$0xff] }
0x13f5   :  { %7279 = vmatprep.subr.mxu1 %v3386_v34 }
0x13f6   :  { %7280 = vmatpush3.msra.mxu1 %v3386_v34  ;;  %v7723_v34 = vld [vmem:[%s11614_s26 + $0x38] sm:$0xff] }
0x13f7   :  { %7282 = vmatmul.mubr.msk.f32.vlgmr.msra.gmra.mxu1 %vm224_vm2, %v3638_v62  ;;  %v11693_v62 = vmov 0.0   ;;  %7321 = vmatprep.subr.mxu1 %v6629_v11 }
0x13f8   :  { %v7593_v26 = vpop.eup %7592  ;;  %7284 = vmatprep.mubr.msk.f32.mxu1 %vm224_vm2, %v3640_v51  ;;  %v6628_v51 = vld [vmem:[%s11235_s14 + $0x70] sm:$0xff]  ;;  %7322 = vmatpush3.msra.mxu1 %v6629_v11 }
0x13f9   :  { %v3644_v43 = vmul.f32 %v7593_v26, %v7581_v16  ;;  %v7595_v25 = vpop.eup %7594  ;;  %7323 = vmatprep.subr.mxu1 %v6628_v51  ;;  %v6627_v26 = vld [vmem:[%s11235_s14 + $0x68] sm:$0xff] }
0x13fa   :  { %v3646_v50 = vmul.f32 %v7595_v25, %v9882_v2  ;;  %v7717_v2 = vld [vmem:[%s11614_s26 + $0x8] sm:$0xff]  ;;  %7324 = vmatpush3.msra.mxu1 %v6628_v51  ;;  %v6624_v25 = vld [vmem:[%s11235_s14 + $0x50] sm:$0xff] }
0x13fb   :  { %7285 = vmatmul.mubr.msk.f32.gmra.mxu1 %vm224_vm2, %v3642_v59  ;;  %7325 = vmatprep.subr.mxu1 %v6627_v26  ;;  %v6626_v59 = vld [vmem:[%s11235_s14 + $0x60] sm:$0xff] }
0x13fc   :  { %v7597_v38 = vpop.eup %7596  ;;  %7287 = vmatprep.mubr.msk.f32.mxu1 %vm224_vm2, %v3644_v43  ;;  %7326 = vmatpush3.msra.mxu1 %v6627_v26  ;;  %v6625_v43 = vld [vmem:[%s11235_s14 + $0x58] sm:$0xff] }
0x13fd   :  { %v3648_v56 = vmul.f32 %v7597_v38, %v7583_v28  ;;  %v7599_v52 = vpop.eup %7598  ;;  %v7719_v28 = vld [vmem:[%s11614_s26 + $0x18] sm:$0xff]  ;;  %7327 = vmatprep.subr.mxu1 %v6626_v59 }
0x13fe   :  { %v3650_v40 = vmul.f32 %v7599_v52, %v9886_v32  ;;  %v7718_v32 = vld [vmem:[%s11614_s26 + $0x10] sm:$0xff]  ;;  %7328 = vmatpush3.msra.mxu1 %v6626_v59  ;;  %v6622_v52 = vld [vmem:[%s11235_s14 + $0x40] sm:$0xff] }
0x13ff   :  { %7288 = vmatmul.mubr.msk.f32.gmra.mxu1 %vm224_vm2, %v3646_v50  ;;  %7329 = vmatprep.subr.mxu1 %v6625_v43  ;;  %v6623_v50 = vld [vmem:[%s11235_s14 + $0x48] sm:$0xff]  ;;  %v6633_v59 = vld [vmem:[%s11236_s15 + $0x1] ss:$0 sm:$0xff] }
0x1400   :  { %7290 = vmatprep.mubr.msk.f32.mxu1 %vm224_vm2, %v3648_v56  ;;  %7330 = vmatpush3.msra.mxu1 %v6625_v43  ;;  %v11697_v43 = vld [vmem:[#allocation37_spill] sm:$0xff] }
0x1401   :  { %7331 = vmatprep.subr.mxu1 %v6624_v25 }
0x1402   :  { %7332 = vmatpush3.msra.mxu1 %v6624_v25 }
0x1403   :  { %7291 = vmatmul.mubr.msk.f32.gmra.mxu1 %vm224_vm2, %v3650_v40  ;;  %7333 = vmatprep.subr.mxu1 %v6623_v50 }
0x1404   :  { %7334 = vmatpush3.msra.mxu1 %v6623_v50 }
0x1405   :  { %7335 = vmatprep.subr.mxu1 %v6622_v52 }
0x1406   :  { %7336 = vmatpush3.msra.mxu1 %v6622_v52 }
0x14b7   :  { %v7283_v39 = vpop.f32.mrf.mxu1 }
0x14b9   :  { %v3741_v16 = vpop.f32.mrf.mxu1 }
0x14bb   :  { %v7286_v63 = vpop.f32.mrf.mxu1 }
0x14bd   :  { %v3751_v27 = vpop.f32.mrf.mxu1 }
0x14bf   :  { %v7289_v48 = vpop.f32.mrf.mxu1 }
0x14c1   :  { %v3761_v7 = vpop.f32.mrf.mxu1 }
0x14c3   :  { %v7292_v61 = vpop.f32.mrf.mxu1 }
0x14c4   :  { %7293 = vmatprep.subr.mxu0 %v7292_v61 }
0x14c5   :  { %v3771_v22 = vpop.f32.mrf.mxu1  ;;  %7294 = vmatpush3.msra.mxu0 %v7292_v61 }
0x14c6   :  { %7295 = vmatprep.subr.mxu0 %v3771_v22 }
0x14c7   :  { %7296 = vmatpush3.msra.mxu0 %v3771_v22 }
0x14c8   :  { %7297 = vmatprep.subr.mxu0 %v7289_v48 }
0x14c9   :  { %7298 = vmatpush3.msra.mxu0 %v7289_v48 }
0x14ca   :  { %7299 = vmatprep.subr.mxu0 %v3761_v7 }
0x14cb   :  { %7300 = vmatpush3.msra.mxu0 %v3761_v7 }
0x14cc   :  { %7301 = vmatprep.subr.mxu0 %v7286_v63 }
0x14cd   :  { %7302 = vmatpush3.msra.mxu0 %v7286_v63 }
0x14ce   :  { %7303 = vmatprep.subr.mxu0 %v3751_v27 }
0x14cf   :  { %7304 = vmatpush3.msra.mxu0 %v3751_v27 }
0x14d0   :  { %7305 = vmatprep.subr.mxu0 %v7283_v39 }
0x14d1   :  { %7306 = vmatpush3.msra.mxu0 %v7283_v39 }
0x14d2   :  { %7307 = vmatprep.subr.mxu0 %v3741_v16 }
0x14d3   :  { %7308 = vmatpush3.msra.mxu0 %v3741_v16 }
0x14d4   :  { %7310 = vmatmul.mubr.msk.f32.vlgmr.msra.gmra.mxu0 %vm224_vm2, %v7717_v2 }
0x14d5   :  { %7312 = vmatprep.mubr.msk.f32.mxu0 %vm224_vm2, %v7718_v32 }
0x14d8   :  { %7313 = vmatmul.mubr.msk.f32.gmra.mxu0 %vm224_vm2, %v7719_v28 }
0x14d9   :  { %7315 = vmatprep.mubr.msk.f32.mxu0 %vm224_vm2, %v7720_v31 }
0x14dc   :  { %7316 = vmatmul.mubr.msk.f32.gmra.mxu0 %vm224_vm2, %v7721_v14 }
0x14dd   :  { %7318 = vmatprep.mubr.msk.f32.mxu0 %vm224_vm2, %v7722_v58 }
0x14e0   :  { %7319 = vmatmul.mubr.msk.f32.gmra.mxu0 %vm224_vm2, %v7723_v34 }
0x14e1   :  { %4163 = vmatprep.mubr.f32.mxu0 %v11693_v62 }
0x1594   :  { %v7311_v38 = vpop.f32.mrf.mxu0 }
0x1596   :  { %v3846_v56 = vpop.f32.mrf.mxu0 }
0x1598   :  { %v7314_v40 = vpop.f32.mrf.mxu0 }
0x1599   :  { %3889 = vrot.lane.b32.xlu0 %v7314_v40, %s11694_s22 }
0x159a   :  { %v3856_v39 = vpop.f32.mrf.mxu0 }
0x159b   :  { %3887 = vrot.lane.b32.xlu1 %v3856_v39, %s11694_s22 }
0x159c   :  { %v7317_v16 = vpop.f32.mrf.mxu0 }
0x159d   :  { %3897 = vrot.lane.b32.xlu0 %v7317_v16, %s11695_s30 }
0x159e   :  { %v3866_v63 = vpop.f32.mrf.mxu0 }
0x159f   :  { %3895 = vrot.lane.b32.xlu1 %v3866_v63, %s11695_s30  ;;  %s11781_s30 = sld [smem:[#allocation106_spill]] }
0x15a0   :  { %v7320_v27 = vpop.f32.mrf.mxu0 }
0x15a1   :  { %3905 = vrot.lane.b32.xlu0 %v7320_v27, %s11696_s2 }
0x15a2   :  { %v3876_v48 = vpop.f32.mrf.mxu0 }
0x15a3   :  { %3903 = vrot.lane.b32.xlu1 %v3876_v48, %s11696_s2 }
0x160b   :  { %v3890_v7 = vpop.permute.xlu0 %3889 }
0x160c   :  { %v3910_v31 = vsel %vm379_vm3, %v7311_v38, %v3890_v7 }
0x160d   :  { %v3888_v61 = vpop.permute.xlu1 %3887 }
0x160e   :  { %v3909_v32 = vsel %vm379_vm3, %v3846_v56, %v3888_v61  ;;  %v11698_v56 = vld [vmem:[#allocation23_spill] sm:$0xff] }
0x160f   :  { %v3898_v22 = vpop.permute.xlu0 %3897 }
0x1610   :  { %v3912_v34 = vsel %vm1995_vm5, %v3910_v31, %v3898_v22 }
0x1611   :  { %v3896_v2 = vpop.permute.xlu1 %3895 }
0x1612   :  { %v3911_v14 = vsel %vm1995_vm5, %v3909_v32, %v3896_v2 }
0x1613   :  { %v3906_v28 = vpop.permute.xlu0 %3905 }
0x1614   :  { %v3914_v51 = vsel %vm1998_vm6, %v3912_v34, %v3906_v28  ;;  %v6651_v34 = vld [vmem:[%s11239_s18 + $0xe8] sm:$0xff] }
0x1615   :  { %v3904_v58 = vpop.permute.xlu1 %3903 }
0x1616   :  { %v3913_v11 = vsel %vm1998_vm6, %v3911_v14, %v3904_v58  ;;  %v6653_v14 = vld [vmem:[%s11239_s18 + $0xf8] sm:$0xff]  ;;  %v6652_v58 = vld [vmem:[%s11239_s18 + $0xf0] sm:$0xff] }
0x1617   :  { %7337 = vmatprep.mubr.msk.f32.mxu1 %vm224_vm2, %v3913_v11  ;;  %4115 = vmatprep.subr.mxu0 %v6653_v14  ;;  %v6650_v11 = vld [vmem:[%s11239_s18 + $0xe0] sm:$0xff] }
0x1618   :  { %7338 = vmatmul.mubr.msk.f32.vlgmr.msra.gmra.mxu1 %vm224_vm2, %v3914_v51  ;;  %4116 = vmatpush1.msra.mxu0 %v6652_v58  ;;  %v6649_v51 = vld [vmem:[%s11239_s18 + $0xd8] sm:$0xff]  ;;  %v6636_v58 = vld [vmem:[%s11237_s16 + $0x1] ss:$0 sm:$0xff] }
0x1619   :  { %4117 = vmatprep.subr.mxu0 %v6651_v34 }
0x161a   :  { %4118 = vmatpush1.msra.mxu0 %v6650_v11  ;;  %v6637_v11 = vld [vmem:[%s11238_s17 + $0x1] ss:$0 sm:$0xff] }
0x161b   :  { %4119 = vmatprep.subr.mxu0 %v6649_v51 }
0x16d8   :  { %v7339_v26 = vpop.f32.mrf.mxu1 }
0x16d9   :  { %v4006_v25 = vadd.f32 %v7339_v26, %v11697_v43  ;;  %v6648_v26 = vld [vmem:[%s11239_s18 + $0xd0] sm:$0xff]  ;;  %v6646_v43 = vld [vmem:[%s11239_s18 + $0xc0] sm:$0xff] }
0x16da   :  { %v3996_v38 = vpop.f32.mrf.mxu1  ;;  %4120 = vmatpush1.msra.mxu0 %v6648_v26 }
0x16db   :  { %v9990_v50 = vadd.f32 %v6633_v59, %v4006_v25  ;;  %v4005_v52 = vadd.f32 %v3996_v38, %v11698_v56  ;;  %v6645_v25 = vld [vmem:[%s11239_s18 + $0xb8] sm:$0xff]  ;;  %v6644_v38 = vld [vmem:[%s11239_s18 + $0xb0] sm:$0xff]  ;;  %v6643_v56 = vld [vmem:[%s11239_s18 + $0xa8] sm:$0xff] }
0x16dd   :  { %v9993_v40 = vadd.f32 %v6633_v59, %v4005_v52  ;;  %v4024_v39 = vsel %vm224_vm2, %v9990_v50, 0.0  ;;  %v6647_v59 = vld [vmem:[%s11239_s18 + $0xc8] sm:$0xff]  ;;  %v6642_v52 = vld [vmem:[%s11239_s18 + $0xa0] sm:$0xff] }
0x16de   :  { %4025 = vadd.xlane.f32.xlu0 %v4024_v39  ;;  %4121 = vmatprep.subr.mxu0 %v6647_v59  ;;  %v6641_v39 = vld [vmem:[%s11239_s18 + $0x98] sm:$0xff] }
0x16df   :  { %v4021_v16 = vsel %vm224_vm2, %v9993_v40, 0.0  ;;  %4122 = vmatpush1.msra.mxu0 %v6646_v43 }
0x16e0   :  { %4022 = vadd.xlane.f32.xlu1 %v4021_v16  ;;  %4123 = vmatprep.subr.mxu0 %v6645_v25  ;;  %v6640_v16 = vld [vmem:[%s11239_s18 + $0x90] sm:$0xff] }
0x16e1   :  { %4124 = vmatpush1.msra.mxu0 %v6644_v38 }
0x16e2   :  { %4125 = vmatprep.subr.mxu0 %v6643_v56  ;;  %v6672_v56 = vld [vmem:[%s11241_s20 + $0x178] sm:$0xff] }
0x16e3   :  { %4126 = vmatpush1.msra.mxu0 %v6642_v52  ;;  %v6671_v52 = vld [vmem:[%s11241_s20 + $0x170] sm:$0xff] }
0x16e4   :  { %4127 = vmatprep.subr.mxu0 %v6641_v39  ;;  %v6686_v39 = vld [vmem:[%s11241_s20 + $0x1e8] sm:$0xff] }
0x16e5   :  { %4128 = vmatpush1.msra.mxu0 %v6640_v16  ;;  %v6670_v16 = vld [vmem:[%s11241_s20 + $0x168] sm:$0xff] }
0x1767   :  { %v4026_v63 = vpop.xlane.xlu0 %4025 }
0x1768   :  { %v4028_v27 = vmul.f32 0.015625, %v4026_v63  ;;  %v6639_v63 = vld [vmem:[%s11239_s18 + $0x88] sm:$0xff] }
0x1769   :  { %v4023_v48 = vpop.xlane.xlu1 %4022  ;;  %4129 = vmatprep.subr.mxu0 %v6639_v63  ;;  %v6685_v63 = vld [vmem:[%s11241_s20 + $0x1e0] sm:$0xff] }
0x176a   :  { %v4027_v7 = vmul.f32 0.015625, %v4023_v48  ;;  %v4030_v61 = vsub.f32 %v9990_v50, %v4028_v27  ;;  %v6638_v27 = vld [vmem:[%s11239_s18 + $0x80] sm:$0xff] }
0x176b   :  { %4130 = vmatpush1.msra.mxu0 %v6638_v27  ;;  %v6669_v27 = vld [vmem:[%s11241_s20 + $0x160] sm:$0xff] }
0x176c   :  { %v4029_v22 = vsub.f32 %v9993_v40, %v4027_v7  ;;  %v4032_v28 = vmul.f32 %v4030_v61, %v4030_v61 }
0x176e   :  { %v4031_v2 = vmul.f32 %v4029_v22, %v4029_v22  ;;  %v4036_v31 = vsel %vm224_vm2, %v4032_v28, 0.0 }
0x1770   :  { %v4033_v32 = vsel %vm224_vm2, %v4031_v2, 0.0 }
0x1771   :  { %4034 = vadd.xlane.f32.xlu0 %v4033_v32 }
0x1775   :  { %4037 = vadd.xlane.f32.xlu0 %v4036_v31 }
0x17fa   :  { %v4035_v48 = vpop.xlane.xlu0 %4034 }
0x17fb   :  { %v4039_v7 = vmul.f32 0.015625, %v4035_v48  ;;  %v6684_v48 = vld [vmem:[%s11241_s20 + $0x1d8] sm:$0xff] }
0x17fd   :  { %v4041_v2 = vadd.f32 1e-05, %v4039_v7  ;;  %v6668_v7 = vld [vmem:[%s11241_s20 + $0x158] sm:$0xff] }
0x17fe   :  { %v4038_v32 = vpop.xlane.xlu0 %4037 }
0x17ff   :  { %7600 = vrsqrt.f32 %v4041_v2  ;;  %v4040_v28 = vmul.f32 0.015625, %v4038_v32  ;;  %v6683_v2 = vld [vmem:[%s11241_s20 + $0x1d0] sm:$0xff] }
0x1800   :  { %v6667_v32 = vld [vmem:[%s11241_s20 + $0x150] sm:$0xff] }
0x1801   :  { %v4042_v31 = vadd.f32 1e-05, %v4040_v28  ;;  %v6682_v28 = vld [vmem:[%s11241_s20 + $0x1c8] sm:$0xff] }
0x1803   :  { %7602 = vrsqrt.f32 %v4042_v31  ;;  %v6666_v31 = vld [vmem:[%s11241_s20 + $0x148] sm:$0xff] }
0x180c   :  { %v7601_v14 = vpop.eup %7600 }
0x180d   :  { %v4045_v34 = vmul.f32 %v7601_v14, %v4029_v22  ;;  %v6688_v22 = vld [vmem:[%s11241_s20 + $0x1f8] sm:$0xff]  ;;  %v6681_v14 = vld [vmem:[%s11241_s20 + $0x1c0] sm:$0xff] }
0x180e   :  { %6983 = vmatprep.subr.mxu1 %v6688_v22  ;;  %v6676_v22 = vld [vmem:[%s11241_s20 + $0x198] sm:$0xff] }
0x180f   :  { %v4053_v51 = vmul.f32 %v6636_v58, %v4045_v34  ;;  %6984 = vmatpush3.msra.mxu1 %v6672_v56  ;;  %v6680_v34 = vld [vmem:[%s11241_s20 + $0x1b8] sm:$0xff] }
0x1810   :  { %v7603_v26 = vpop.eup %7602  ;;  %v6660_v56 = vld [vmem:[%s11241_s20 + $0x118] sm:$0xff] }
0x1811   :  { %v4061_v59 = vadd.f32 %v6637_v11, %v4053_v51  ;;  %v4046_v43 = vmul.f32 %v7603_v26, %v4030_v61  ;;  %v6687_v61 = vld [vmem:[%s11241_s20 + $0x1f0] sm:$0xff] }
0x1812   :  { %6985 = vmatprep.subr.mxu1 %v6687_v61  ;;  %v6679_v51 = vld [vmem:[%s11241_s20 + $0x1b0] sm:$0xff] }
0x1813   :  { %6655 = vmatmul.mubr.msk.f32.vlgmr.msra.gmra.mxu0 %vm224_vm2, %v4061_v59  ;;  %v4054_v25 = vmul.f32 %v6636_v58, %v4046_v43  ;;  %6986 = vmatpush3.msra.mxu1 %v6671_v52  ;;  %v6665_v58 = vld [vmem:[%s11241_s20 + $0x140] sm:$0xff]  ;;  %v6663_v26 = vld [vmem:[%s11241_s20 + $0x130] sm:$0xff]  ;;  %v6678_v59 = vld [vmem:[%s11241_s20 + $0x1a8] sm:$0xff] }
0x1814   :  { %4169 = vmatprep.mubr.f32.mxu0 %v11693_v62  ;;  %6987 = vmatprep.subr.mxu1 %v6686_v39  ;;  %v6662_v43 = vld [vmem:[%s11241_s20 + $0x128] sm:$0xff]  ;;  %v6675_v61 = vld [vmem:[%s11241_s20 + $0x190] sm:$0xff] }
0x1815   :  { %v4062_v38 = vadd.f32 %v6637_v11, %v4054_v25  ;;  %6988 = vmatpush3.msra.mxu1 %v6670_v16  ;;  %v6664_v11 = vld [vmem:[%s11241_s20 + $0x138] sm:$0xff]  ;;  %v6677_v25 = vld [vmem:[%s11241_s20 + $0x1a0] sm:$0xff]  ;;  %v6659_v52 = vld [vmem:[%s11241_s20 + $0x110] sm:$0xff] }
0x1816   :  { %6989 = vmatprep.subr.mxu1 %v6685_v63  ;;  %v6674_v39 = vld [vmem:[%s11241_s20 + $0x188] sm:$0xff]  ;;  %v6673_v63 = vld [vmem:[%s11241_s20 + $0x180] sm:$0xff] }
0x1817   :  { %6656 = vmatmul.mubr.msk.f32.gmra.mxu0 %vm224_vm2, %v4062_v38  ;;  %6990 = vmatpush3.msra.mxu1 %v6669_v27  ;;  %v6661_v38 = vld [vmem:[%s11241_s20 + $0x120] sm:$0xff]  ;;  %v6658_v16 = vld [vmem:[%s11241_s20 + $0x108] sm:$0xff] }
0x1818   :  { %4550 = vmatprep.mubr.f32.mxu0 %v11693_v62  ;;  %6991 = vmatprep.subr.mxu1 %v6684_v48  ;;  %v6657_v27 = vld [vmem:[%s11241_s20 + $0x100] sm:$0xff] }
0x1819   :  { %6992 = vmatpush3.msra.mxu1 %v6668_v7  ;;  %v6654_v48 = vld [vmem:[%s11240_s19 + $0x2] sm:$0x3]  ;;  %v11699_v7 = vld [vmem:[#allocation8_spill] sm:$0xff] }
0x181a   :  { %6993 = vmatprep.subr.mxu1 %v6683_v2  ;;  %v4086_v2 = vrot.slane %v6654_v48, %v11699_v7 }
0x181b   :  { %6994 = vmatpush3.msra.mxu1 %v6667_v32  ;;  %v11700_v32 = vld [vmem:[#allocation7_spill] sm:$0xff] }
0x181c   :  { %6995 = vmatprep.subr.mxu1 %v6682_v28  ;;  %v4090_v28 = vrot.slane %v6654_v48, %v11700_v32 }
0x181d   :  { %6996 = vmatpush3.msra.mxu1 %v6666_v31 }
0x181e   :  { %6997 = vmatprep.subr.mxu1 %v6681_v14 }
0x181f   :  { %6998 = vmatpush3.msra.mxu1 %v6665_v58 }
0x1820   :  { %6999 = vmatprep.subr.mxu1 %v6680_v34 }
0x1821   :  { %7000 = vmatpush3.msra.mxu1 %v6664_v11 }
0x1822   :  { %7001 = vmatprep.subr.mxu1 %v6679_v51 }
0x1823   :  { %7002 = vmatpush3.msra.mxu1 %v6663_v26 }
0x1824   :  { %7003 = vmatprep.subr.mxu1 %v6678_v59 }
0x1825   :  { %7004 = vmatpush3.msra.mxu1 %v6662_v43 }
0x1826   :  { %7005 = vmatprep.subr.mxu1 %v6677_v25 }
0x1827   :  { %7006 = vmatpush3.msra.mxu1 %v6661_v38 }
0x1828   :  { %7007 = vmatprep.subr.mxu1 %v6676_v22 }
0x1829   :  { %7008 = vmatpush3.msra.mxu1 %v6660_v56 }
0x182a   :  { %7009 = vmatprep.subr.mxu1 %v6675_v61 }
0x182b   :  { %7010 = vmatpush3.msra.mxu1 %v6659_v52 }
0x182c   :  { %7011 = vmatprep.subr.mxu1 %v6674_v39 }
0x182d   :  { %7012 = vmatpush3.msra.mxu1 %v6658_v16 }
0x182e   :  { %7013 = vmatprep.subr.mxu1 %v6673_v63 }
0x182f   :  { %7014 = vmatpush3.msra.mxu1 %v6657_v27 }
0x18d3   :  { %v4165_v31 = vpop.f32.mrf.mxu0 }
0x18d4   :  { %v10162_v14 = vadd.f32 %v4165_v31, %v4086_v2 }
0x18d5   :  { %v4167_v58 = vpop.f32.mrf.mxu0 }
0x18d6   :  { %v10165_v34 = vmul.f32 0.70710677, %v10162_v14  ;;  %v10167_v11 = vadd.f32 %v4167_v58, %v4090_v28 }
0x18d7   :  { %v4171_v51 = vpop.f32.mrf.mxu0 }
0x18d8   :  { %v4184_v26 = vand.u32 2147483647, %v10165_v34  ;;  %v10171_v59 = vmul.f32 0.70710677, %v10167_v11  ;;  %v10173_v43 = vadd.f32 %v4171_v51, %v4086_v2  ;;  %vm4264_vm11 = vcmp.ge.f32.partialorder %v10165_v34, 0.0 }
0x18d9   :  { %v4173_v25 = vpop.f32.mrf.mxu0  ;;  %v4176_v34 = vmul.f32 0.5, %v10162_v14 }
0x18da   :  { %v4188_v38 = vmul.f32 0.3275911, %v4184_v26  ;;  %v4185_v22 = vand.u32 2147483647, %v10171_v59  ;;  %v10177_v56 = vmul.f32 0.70710677, %v10173_v43  ;;  %v10179_v61 = vadd.f32 %v4173_v25, %v4090_v28 }
0x18db   :  { %v4240_v42 = vsub.f32 0.0, %v4184_v26  ;;  %vm4265_vm12 = vcmp.ge.f32.partialorder %v10171_v59, 0.0 }
0x18dc   :  { %v4192_v52 = vadd.f32 1.0, %v4188_v38  ;;  %v4189_v39 = vmul.f32 0.3275911, %v4185_v22  ;;  %v4186_v16 = vand.u32 2147483647, %v10177_v56  ;;  %v4241_v28 = vsub.f32 0.0, %v4185_v22 }
0x18dd   :  { %v10183_v63 = vmul.f32 0.70710677, %v10179_v61  ;;  %v4244_v25 = vmul.f32 %v4240_v42, %v4184_v26  ;;  %vm4266_vm13 = vcmp.ge.f32.partialorder %v10177_v56, 0.0 }
0x18de   :  { %7604 = vrcp.f32 %v4192_v52  ;;  %v4193_v27 = vadd.f32 1.0, %v4189_v39  ;;  %v4190_v48 = vmul.f32 0.3275911, %v4186_v16  ;;  %v4242_v38 = vsub.f32 0.0, %v4186_v16 }
0x18df   :  { %v4187_v2 = vand.u32 2147483647, %v10183_v63  ;;  %v4245_v15 = vmul.f32 %v4241_v28, %v4185_v22  ;;  %v4248_v21 = vmul.f32 1.442695, %v4244_v25  ;;  %vm4267_vm14 = vcmp.ge.f32.partialorder %v10183_v63, 0.0 }
0x18e0   :  { %7606 = vrcp.f32 %v4193_v27  ;;  %v4194_v31 = vadd.f32 1.0, %v4190_v48  ;;  %v4246_v52 = vmul.f32 %v4242_v38, %v4186_v16  ;;  %v6690_v63 = vld [vmem:[%s11242_s21 + $0x1] ss:$0 sm:$0xff] }
0x18e1   :  { %v4191_v58 = vmul.f32 0.3275911, %v4187_v2  ;;  %v4243_v46 = vsub.f32 0.0, %v4187_v2  ;;  %v4250_v29 = vmul.f32 1.442695, %v4245_v15 }
0x18e2   :  { %7608 = vrcp.f32 %v4194_v31 }
0x18e3   :  { %v4195_v51 = vadd.f32 1.0, %v4191_v58  ;;  %v4247_v31 = vmul.f32 %v4243_v46, %v4187_v2  ;;  %v4252_v58 = vmul.f32 1.442695, %v4246_v52 }
0x18e5   :  { %7610 = vrcp.f32 %v4195_v51  ;;  %v4254_v25 = vmul.f32 1.442695, %v4247_v31 }
0x18e6   :  { %7612 = vpow2.f32 %v4248_v21 }
0x18e7   :  { %7614 = vpow2.f32 %v4250_v29 }
0x18e8   :  { %7616 = vpow2.f32 %v4252_v58 }
0x18e9   :  { %7618 = vpow2.f32 %v4254_v25 }
0x18eb   :  { %v7605_v0 = vpop.eup %7604 }
0x18ec   :  { %v4204_v37 = vmul.f32 1.0614054, %v7605_v0 }
0x18ed   :  { %v7607_v39 = vpop.eup %7606 }
0x18ee   :  { %v4208_v20 = vadd.f32 -1.4531521, %v4204_v37  ;;  %v4205_v45 = vmul.f32 1.0614054, %v7607_v39 }
0x18ef   :  { %v7609_v27 = vpop.eup %7608 }
0x18f0   :  { %v4212_v48 = vmul.f32 %v7605_v0, %v4208_v20  ;;  %v4209_v47 = vadd.f32 -1.4531521, %v4205_v45  ;;  %v4206_v51 = vmul.f32 1.0614054, %v7609_v27 }
0x18f2   :  { %v4216_v19 = vadd.f32 1.4214138, %v4212_v48  ;;  %v7611_v42 = vpop.eup %7610  ;;  %v4213_v26 = vmul.f32 %v7607_v39, %v4209_v47  ;;  %v4210_v22 = vadd.f32 -1.4531521, %v4206_v51 }
0x18f3   :  { %v4207_v41 = vmul.f32 1.0614054, %v7611_v42  ;;  %v7613_v31 = vpop.eup %7612 }
0x18f4   :  { %v4220_v28 = vmul.f32 %v7605_v0, %v4216_v19  ;;  %v4217_v16 = vadd.f32 1.4214138, %v4213_v26  ;;  %v4214_v37 = vmul.f32 %v7609_v27, %v4210_v22 }
0x18f5   :  { %v4211_v38 = vadd.f32 -1.4531521, %v4207_v41 }
0x18f6   :  { %v4224_v15 = vadd.f32 -0.28449672, %v4220_v28  ;;  %v4221_v17 = vmul.f32 %v7607_v39, %v4217_v16  ;;  %v4218_v20 = vadd.f32 1.4214138, %v4214_v37  ;;  %v7615_v16 = vpop.eup %7614 }
0x18f7   :  { %v4215_v46 = vmul.f32 %v7611_v42, %v4211_v38 }
0x18f8   :  { %v4228_v21 = vmul.f32 %v7605_v0, %v4224_v15  ;;  %v4225_v45 = vadd.f32 -0.28449672, %v4221_v17  ;;  %v4222_v2 = vmul.f32 %v7609_v27, %v4218_v20  ;;  %v7617_v17 = vpop.eup %7616 }
0x18f9   :  { %v4219_v48 = vadd.f32 1.4214138, %v4215_v46 }
0x18fa   :  { %v4232_v52 = vadd.f32 0.2548296, %v4228_v21  ;;  %v4229_v29 = vmul.f32 %v7607_v39, %v4225_v45  ;;  %v4226_v47 = vadd.f32 -0.28449672, %v4222_v2 }
0x18fb   :  { %v4223_v19 = vmul.f32 %v7611_v42, %v4219_v48 }
0x18fc   :  { %v4236_v51 = vmul.f32 %v7605_v0, %v4232_v52  ;;  %v4233_v13 = vadd.f32 0.2548296, %v4229_v29  ;;  %v4230_v58 = vmul.f32 %v7609_v27, %v4226_v47  ;;  %v7619_v52 = vpop.eup %7618 }
0x18fd   :  { %v4227_v22 = vadd.f32 -0.28449672, %v4223_v19 }
0x18fe   :  { %v4256_v26 = vmul.f32 %v7613_v31, %v4236_v51  ;;  %v4237_v28 = vmul.f32 %v7607_v39, %v4233_v13  ;;  %v4234_v41 = vadd.f32 0.2548296, %v4230_v58 }
0x18ff   :  { %v4231_v15 = vmul.f32 %v7611_v42, %v4227_v22 }
0x1900   :  { %v4260_v37 = vsub.f32 1.0, %v4256_v26  ;;  %v4257_v25 = vmul.f32 %v7615_v16, %v4237_v28  ;;  %v4238_v38 = vmul.f32 %v7609_v27, %v4234_v41  ;;  %v4177_v27 = vmul.f32 0.5, %v10167_v11 }
0x1901   :  { %v4235_v21 = vadd.f32 0.2548296, %v4231_v15  ;;  %v4179_v41 = vmul.f32 0.5, %v10179_v61  ;;  %v4178_v11 = vmul.f32 0.5, %v10173_v43 }
0x1902   :  { %v4268_v20 = vsub.f32 0.0, %v4260_v37  ;;  %v4261_v46 = vsub.f32 1.0, %v4257_v25  ;;  %v4258_v0 = vmul.f32 %v7617_v17, %v4238_v38 }
0x1903   :  { %v4239_v2 = vmul.f32 %v7611_v42, %v4235_v21 }
0x1904   :  { %v4272_v45 = vsel %vm4264_vm11, %v4260_v37, %v4268_v20  ;;  %v4269_v48 = vsub.f32 0.0, %v4261_v46  ;;  %v4262_v29 = vsub.f32 1.0, %v4258_v0 }
0x1905   :  { %v4259_v13 = vmul.f32 %v7619_v52, %v4239_v2  ;;  %v4276_v39 = vadd.f32 1.0, %v4272_v45 }
0x1906   :  { %v4273_v47 = vsel %vm4265_vm12, %v4261_v46, %v4269_v48  ;;  %v4270_v51 = vsub.f32 0.0, %v4262_v29 }
0x1907   :  { %v4277_v19 = vadd.f32 1.0, %v4273_v47  ;;  %v4263_v31 = vsub.f32 1.0, %v4259_v13  ;;  %v4280_v22 = vmul.f32 %v4276_v39, %v4176_v34  ;;  %v6707_v34 = vld [vmem:[%s11233_s12 + $0x160] sm:$0xff] }
0x1908   :  { %v4274_v58 = vsel %vm4266_vm13, %v4262_v29, %v4270_v51 }
0x1909   :  { %v4281_v26 = vmul.f32 %v4277_v19, %v4177_v27  ;;  %v4271_v42 = vsub.f32 0.0, %v4263_v31  ;;  %v4278_v28 = vadd.f32 1.0, %v4274_v58  ;;  %v6710_v27 = vld [vmem:[%s11233_s12 + $0x178] sm:$0xff]  ;;  %v6709_v19 = vld [vmem:[%s11233_s12 + $0x170] sm:$0xff] }
0x190a   :  { %4502 = vmatprep.subr.mxu0 %v6710_v27  ;;  %v6706_v58 = vld [vmem:[%s11233_s12 + $0x158] sm:$0xff] }
0x190b   :  { %4381 = vmatprep.mubr.f32.mxu1 %v4281_v26  ;;  %v4275_v59 = vsel %vm4267_vm14, %v4263_v31, %v4271_v42  ;;  %v4282_v37 = vmul.f32 %v4278_v28, %v4178_v11  ;;  %4503 = vmatpush1.msra.mxu0 %v6709_v19  ;;  %v6708_v31 = vld [vmem:[%s11233_s12 + $0x168] sm:$0xff]  ;;  %v6705_v26 = vld [vmem:[%s11233_s12 + $0x150] sm:$0xff]  ;;  %v6698_v11 = vld [vmem:[%s11233_s12 + $0x118] sm:$0xff] }
0x190c   :  { %4382 = vmatmul.mubr.f32.vlgmr.msra.gmra.mxu1 %v4280_v22  ;;  %v4279_v16 = vadd.f32 1.0, %v4275_v59  ;;  %4504 = vmatprep.subr.mxu0 %v6708_v31  ;;  %v6704_v42 = vld [vmem:[%s11233_s12 + $0x148] sm:$0xff]  ;;  %v6703_v22 = vld [vmem:[%s11233_s12 + $0x140] sm:$0xff]  ;;  %v6702_v59 = vld [vmem:[%s11233_s12 + $0x138] sm:$0xff] }
0x190d   :  { %4505 = vmatpush1.msra.mxu0 %v6707_v34  ;;  %v6701_v28 = vld [vmem:[%s11233_s12 + $0x130] sm:$0xff] }
0x190e   :  { %v4283_v56 = vmul.f32 %v4279_v16, %v4179_v41  ;;  %4506 = vmatprep.subr.mxu0 %v6706_v58  ;;  %v6700_v41 = vld [vmem:[%s11233_s12 + $0x128] sm:$0xff]  ;;  %v6699_v16 = vld [vmem:[%s11233_s12 + $0x120] sm:$0xff] }
0x190f   :  { %4507 = vmatpush1.msra.mxu0 %v6705_v26 }
0x1910   :  { %4386 = vmatprep.mubr.f32.mxu1 %v4283_v56  ;;  %4508 = vmatprep.subr.mxu0 %v6704_v42  ;;  %v6697_v56 = vld [vmem:[%s11233_s12 + $0x110] sm:$0xff] }
0x1911   :  { %4387 = vmatmul.mubr.f32.gmra.mxu1 %v4282_v37  ;;  %4509 = vmatpush1.msra.mxu0 %v6703_v22  ;;  %v6696_v37 = vld [vmem:[%s11233_s12 + $0x108] sm:$0xff]  ;;  %v7724_v22 = vld [vmem:[%s11498_s25] sm:$0xff] }
0x1912   :  { %4510 = vmatprep.subr.mxu0 %v6702_v59  ;;  %v7725_v59 = vld [vmem:[%s11498_s25 + $0x8] sm:$0xff] }
0x1913   :  { %4511 = vmatpush1.msra.mxu0 %v6701_v28  ;;  %v7726_v28 = vld [vmem:[%s11498_s25 + $0x10] sm:$0xff] }
0x1914   :  { %4512 = vmatprep.subr.mxu0 %v6700_v41  ;;  %v7727_v41 = vld [vmem:[%s11498_s25 + $0x18] sm:$0xff] }
0x1915   :  { %4513 = vmatpush1.msra.mxu0 %v6699_v16  ;;  %v7728_v16 = vld [vmem:[%s11498_s25 + $0x20] sm:$0xff] }
0x1916   :  { %4514 = vmatprep.subr.mxu0 %v6698_v11  ;;  %v7729_v11 = vld [vmem:[%s11498_s25 + $0x28] sm:$0xff] }
0x1917   :  { %4515 = vmatpush1.msra.mxu0 %v6697_v56  ;;  %v7730_v56 = vld [vmem:[%s11498_s25 + $0x30] sm:$0xff] }
0x1918   :  { %4516 = vmatprep.subr.mxu0 %v6696_v37  ;;  %v7731_v37 = vld [vmem:[%s11498_s25 + $0x38] sm:$0xff] }
0x19cc   :  { %v7015_v14 = vpop.f32.mrf.mxu1 }
0x19ce   :  { %v7016_v15 = vpop.f32.mrf.mxu1 }
0x19cf   :  { %v7017_v25 = vadd.f32 %v7016_v15, %v7015_v14  ;;  %v6695_v14 = vld [vmem:[%s11233_s12 + $0x100] sm:$0xff]  ;;  %s11773_s12 = smov 48  }
0x19d0   :  { %4517 = vmatpush1.msra.mxu0 %v6695_v14 }
0x19d1   :  { %v4392_v38 = vadd.f32 %v7017_v25, %v9993_v40  ;;  %v7018_v17 = vpop.f32.mrf.mxu1 }
0x19d3   :  { %v10198_v20 = vadd.f32 %v6690_v63, %v4392_v38  ;;  %v7019_v61 = vpop.f32.mrf.mxu1 }
0x19d4   :  { %v7020_v21 = vadd.f32 %v7019_v61, %v7018_v17 }
0x19d5   :  { %11701 = vst [vmem:[#allocation15_spill] sm:$0xff] %v10198_v20  ;;  %v4408_v43 = vsel %vm224_vm2, %v10198_v20, 0.0 }
0x19d6   :  { %v4393_v46 = vadd.f32 %v7020_v21, %v9990_v50  ;;  %4409 = vadd.xlane.f32.xlu1 %v4408_v43  ;;  %v6693_v43 = vld [vmem:[%s11231_s10 + $0x2] ss:$0 sm:$0xff]  ;;  %s11772_s10 = smov 32  }
0x19d8   :  { %v10203_v0 = vadd.f32 %v6690_v63, %v4393_v46 }
0x19da   :  { %11702 = vst [vmem:[#allocation9_spill] sm:$0xff] %v10203_v0  ;;  %v4411_v45 = vsel %vm224_vm2, %v10203_v0, 0.0 }
0x19db   :  { %4412 = vadd.xlane.f32.xlu0 %v4411_v45  ;;  %v6694_v45 = vld [vmem:[%s11232_s11 + $0x2] ss:$0 sm:$0xff]  ;;  %s11761_s11 = sld [smem:[#allocation99_spill]] }
0x1a5f   :  { %v4410_v2 = vpop.xlane.xlu1 %4409 }
0x1a60   :  { %v4414_v52 = vmul.f32 0.015625, %v4410_v2 }
0x1a62   :  { %v4416_v40 = vsub.f32 %v10198_v20, %v4414_v52 }
0x1a64   :  { %v4413_v48 = vpop.xlane.xlu0 %4412  ;;  %v4418_v29 = vmul.f32 %v4416_v40, %v4416_v40 }
0x1a65   :  { %v4415_v13 = vmul.f32 0.015625, %v4413_v48 }
0x1a66   :  { %v4420_v39 = vsel %vm224_vm2, %v4418_v29, 0.0 }
0x1a67   :  { %v4417_v47 = vsub.f32 %v10203_v0, %v4415_v13  ;;  %4421 = vadd.xlane.f32.xlu1 %v4420_v39  ;;  %v11711_v0 = vld [vmem:[#allocation46_spill] sm:$0xff] }
0x1a69   :  { %v4419_v50 = vmul.f32 %v4417_v47, %v4417_v47 }
0x1a6b   :  { %v4423_v51 = vsel %vm224_vm2, %v4419_v50, 0.0 }
0x1a6c   :  { %4424 = vadd.xlane.f32.xlu0 %v4423_v51  ;;  %v6711_v51 = vld [vmem:[%s11234_s13 + $0x4] sm:$0x3] }
0x1a6d   :  { %v4477_v19 = vrot.slane %v6711_v51, %v11700_v32 }
0x1af0   :  { %v4422_v15 = vpop.xlane.xlu1 %4421 }
0x1af1   :  { %v4426_v25 = vmul.f32 0.015625, %v4422_v15 }
0x1af3   :  { %v4428_v63 = vadd.f32 1e-05, %v4426_v25 }
0x1af5   :  { %7620 = vrsqrt.f32 %v4428_v63  ;;  %v4425_v38 = vpop.xlane.xlu0 %4424 }
0x1af6   :  { %v4427_v17 = vmul.f32 0.015625, %v4425_v38 }
0x1af8   :  { %v4429_v61 = vadd.f32 1e-05, %v4427_v17 }
0x1afa   :  { %7622 = vrsqrt.f32 %v4429_v61 }
0x1b02   :  { %v7621_v21 = vpop.eup %7620 }
0x1b03   :  { %v4432_v46 = vmul.f32 %v7621_v21, %v4416_v40 }
0x1b05   :  { %v4440_v2 = vmul.f32 %v6693_v43, %v4432_v46 }
0x1b07   :  { %v7623_v52 = vpop.eup %7622  ;;  %v4448_v48 = vadd.f32 %v6694_v45, %v4440_v2 }
0x1b08   :  { %v4433_v29 = vmul.f32 %v7623_v52, %v4417_v47  ;;  %v4473_v47 = vrot.slane %v6711_v51, %v11699_v7  ;;  %v11709_v7 = vld [vmem:[#allocation38_spill] sm:$0xff] }
0x1b09   :  { %6712 = vmatmul.mubr.msk.f32.vlgmr.msra.gmra.mxu0 %vm224_vm2, %v4448_v48 }
0x1b0a   :  { %4556 = vmatprep.mubr.f32.mxu0 %v11693_v62  ;;  %v4441_v13 = vmul.f32 %v6693_v43, %v4433_v29 }
0x1b0c   :  { %v4449_v39 = vadd.f32 %v6694_v45, %v4441_v13 }
0x1b0e   :  { %6713 = vmatmul.mubr.msk.f32.gmra.mxu0 %vm224_vm2, %v4449_v39 }
0x1b0f   :  { %4627 = vmatprep.mubr.f32.mxu0 %v11693_v62 }
0x1bc9   :  { %v4552_v50 = vpop.f32.mrf.mxu0 }
0x1bca   :  { %v4553_v42 = vadd.f32 %v4552_v50, %v4473_v47 }
0x1bcb   :  { %v4554_v40 = vpop.f32.mrf.mxu0 }
0x1bcc   :  { %v4555_v26 = vadd.f32 %v4554_v40, %v4477_v19 }
0x1bce   :  { %v4558_v27 = vpop.f32.mrf.mxu0 }
0x1bcf   :  { %v4559_v58 = vadd.f32 %v4558_v27, %v4473_v47 }
0x1bd0   :  { %v4560_v31 = vpop.f32.mrf.mxu0 }
0x1bd1   :  { %v4561_v34 = vadd.f32 %v4560_v31, %v4477_v19 }
0x1bd3   :  { %4591 = vmatprep.subr.mxu0 %v4561_v34 }
0x1bd4   :  { %4592 = vmatpush1.msra.mxu0 %v4559_v58 }
0x1bd5   :  { %4593 = vmatprep.subr.mxu0 %v4555_v26 }
0x1bd6   :  { %4594 = vmatpush1.msra.mxu0 %v4553_v42 }
0x1bd7   :  { %6714 = vmatmul.mubr.msk.f32.vlgmr.msra.gmra.mxu0 %vm379_vm3, %v7724_v22 }
0x1bd8   :  { %4633 = vmatprep.mubr.f32.mxu0 %v11693_v62 }
0x1bdb   :  { %6715 = vmatmul.mubr.msk.f32.gmra.mxu0 %vm379_vm3, %v7725_v59 }
0x1bdc   :  { %4639 = vmatprep.mubr.f32.mxu0 %v11693_v62 }
0x1bdf   :  { %6716 = vmatmul.mubr.msk.f32.gmra.mxu0 %vm379_vm3, %v7726_v28 }
0x1be0   :  { %4645 = vmatprep.mubr.f32.mxu0 %v11693_v62 }
0x1be3   :  { %6717 = vmatmul.mubr.msk.f32.gmra.mxu0 %vm379_vm3, %v7727_v41 }
0x1be4   :  { %4651 = vmatprep.mubr.f32.mxu0 %v11693_v62 }
0x1be7   :  { %6718 = vmatmul.mubr.msk.f32.gmra.mxu0 %vm379_vm3, %v7728_v16 }
0x1be8   :  { %4657 = vmatprep.mubr.f32.mxu0 %v11693_v62 }
0x1beb   :  { %6719 = vmatmul.mubr.msk.f32.gmra.mxu0 %vm379_vm3, %v7729_v11 }
0x1bec   :  { %4663 = vmatprep.mubr.f32.mxu0 %v11693_v62 }
0x1bef   :  { %6720 = vmatmul.mubr.msk.f32.gmra.mxu0 %vm379_vm3, %v7730_v56 }
0x1bf0   :  { %4669 = vmatprep.mubr.f32.mxu0 %v11693_v62  ;;  %v11723_v62 = vld [vmem:[#allocation57_spill] sm:$0xff] }
0x1bf3   :  { %6721 = vmatmul.mubr.msk.f32.gmra.mxu0 %vm379_vm3, %v7731_v37 }
0x1c97   :  { %v10313_v14 = vpop.f32.mrf.mxu0 }
0x1c98   :  { %v4780_v37 = vmul.f32 %v10313_v14, %v11690_v24  ;;  %v11740_v24 = vld [vmem:[#allocation77_spill] sm:$0xff] }
0x1c99   :  { %v10315_v15 = vpop.f32.mrf.mxu0 }
0x1c9a   :  { %11703 = vst [vmem:[#allocation39_spill] sm:$0xff] %v10315_v15 }
0x1c9b   :  { %v10317_v25 = vpop.f32.mrf.mxu0 }
0x1c9c   :  { %v4685_v59 = vmul.f32 %v10317_v25, %v11604_v36  ;;  %v4733_v41 = vmul.f32 %v10317_v25, %v11610_v35  ;;  %v4781_v11 = vmul.f32 %v10317_v25, %v11688_v23 }
0x1c9d   :  { %v10319_v63 = vpop.f32.mrf.mxu0 }
0x1c9f   :  { %v10321_v38 = vpop.f32.mrf.mxu0 }
0x1ca0   :  { %v4686_v16 = vmul.f32 %v10321_v38, %v11600_v4  ;;  %v4734_v56 = vmul.f32 %v10321_v38, %v11592_v8 }
0x1ca1   :  { %v10323_v17 = vpop.f32.mrf.mxu0 }
0x1ca3   :  { %v10325_v61 = vpop.f32.mrf.mxu0 }
0x1ca4   :  { %v4687_v31 = vmul.f32 %v10325_v61, %v11597_v33  ;;  %v4735_v58 = vmul.f32 %v10325_v61, %v11601_v54  ;;  %v4783_v42 = vmul.f32 %v10325_v61, %v11605_v30 }
0x1ca5   :  { %v10327_v21 = vpop.f32.mrf.mxu0 }
0x1ca7   :  { %v10329_v43 = vpop.f32.mrf.mxu0 }
0x1ca8   :  { %v4688_v46 = vmul.f32 %v10329_v43, %v11586_v18  ;;  %v4736_v22 = vmul.f32 %v10329_v43, %v11598_v60  ;;  %v4784_v28 = vmul.f32 %v10329_v43, %v11602_v53 }
0x1ca9   :  { %v10333_v45 = vpop.f32.mrf.mxu0 }
0x1caa   :  { %4708 = vrot.lane.b32.xlu1 %v4688_v46, %s11685_s9  ;;  %v4782_v46 = vmul.f32 %v10321_v38, %v11687_v6 }
0x1cab   :  { %v10336_v2 = vpop.f32.mrf.mxu0 }
0x1cac   :  { %v4689_v52 = vmul.f32 %v10336_v2, %v11589_v12  ;;  %v4737_v13 = vmul.f32 %v10336_v2, %v11595_v57  ;;  %v4785_v19 = vmul.f32 %v10336_v2, %v11599_v10 }
0x1cad   :  { %v10340_v48 = vpop.f32.mrf.mxu0 }
0x1cae   :  { %4710 = vrot.lane.b32.xlu0 %v4689_v52, %s11685_s9  ;;  %v4684_v52 = vmul.f32 %v10313_v14, %v11609_v55 }
0x1caf   :  { %v4665_v29 = vpop.f32.mrf.mxu0 }
0x1cb0   :  { %v4690_v39 = vmul.f32 %v4665_v29, %v8218_v44  ;;  %v4738_v51 = vmul.f32 %v4665_v29, %v11593_v49  ;;  %v4786_v47 = vmul.f32 %v4665_v29, %v11590_v5 }
0x1cb1   :  { %v10346_v50 = vpop.f32.mrf.mxu0 }
0x1cb2   :  { %4758 = vrot.lane.b32.xlu0 %v4737_v13, %s11622_s6  ;;  %4712 = vrot.lane.b32.xlu1 %v4690_v39, %s11685_s9  ;;  %v11704_v13 = vld [vmem:[#allocation32_spill] sm:$0xff] }
0x1cb3   :  { %v4671_v40 = vpop.f32.mrf.mxu0  ;;  %v4732_v39 = vmul.f32 %v10313_v14, %v11704_v13 }
0x1cb4   :  { %v4739_v27 = vmul.f32 %v4671_v40, %v11587_v3  ;;  %v4691_v34 = vmul.f32 %v4671_v40, %v11584_v1  ;;  %v4787_v26 = vmul.f32 %v4671_v40, %v11594_v9 }
0x1cb6   :  { %4760 = vrot.lane.b32.xlu1 %v4738_v51, %s11622_s6  ;;  %4762 = vrot.lane.b32.xlu0 %v4739_v27, %s11622_s6 }
0x1cba   :  { %4808 = vrot.lane.b32.xlu1 %v4786_v47, %s11623_s29  ;;  %4806 = vrot.lane.b32.xlu0 %v4785_v19, %s11623_s29 }
0x1cbe   :  { %4706 = vrot.lane.b32.xlu0 %v4687_v31, %s11685_s9  ;;  %4714 = vrot.lane.b32.xlu1 %v4691_v34, %s11685_s9  ;;  %v11705_v31 = vld [vmem:[#allocation45_spill] sm:$0xff] }
0x1cbf   :  { %v4682_v34 = vmul.f32 %v4665_v29, %v11705_v31  ;;  %v4681_v29 = vmul.f32 %v10336_v2, %v11709_v7 }
0x1cc2   :  { %4754 = vrot.lane.b32.xlu0 %v4735_v58, %s11622_s6  ;;  %4810 = vrot.lane.b32.xlu1 %v4787_v26, %s11623_s29 }
0x1cc6   :  { %4802 = vrot.lane.b32.xlu0 %v4783_v42, %s11623_s29  ;;  %4756 = vrot.lane.b32.xlu1 %v4736_v22, %s11622_s6 }
0x1cca   :  { %4702 = vrot.lane.b32.xlu0 %v4685_v59, %s11685_s9  ;;  %4804 = vrot.lane.b32.xlu1 %v4784_v28, %s11623_s29 }
0x1cce   :  { %4750 = vrot.lane.b32.xlu0 %v4733_v41, %s11622_s6  ;;  %4704 = vrot.lane.b32.xlu1 %v4686_v16, %s11685_s9  ;;  %v11706_v16 = vld [vmem:[#allocation36_spill] sm:$0xff] }
0x1cd2   :  { %4798 = vrot.lane.b32.xlu0 %v4781_v11, %s11623_s29  ;;  %4752 = vrot.lane.b32.xlu1 %v4734_v56, %s11622_s6  ;;  %v4683_v11 = vmul.f32 %v4671_v40, %v11706_v16  ;;  %v11707_v56 = vld [vmem:[#allocation48_spill] sm:$0xff] }
0x1cd6   :  { %4796 = vrot.lane.b32.xlu0 %v4780_v37, %s11623_s29  ;;  %4800 = vrot.lane.b32.xlu1 %v4782_v46, %s11623_s29  ;;  %v11708_v46 = vld [vmem:[#allocation43_spill] sm:$0xff] }
0x1cda   :  { %4700 = vrot.lane.b32.xlu1 %v4684_v52, %s11685_s9 }
0x1cde   :  { %4748 = vrot.lane.b32.xlu1 %v4732_v39, %s11622_s6 }
0x1d1c   :  { %v4709_v51 = vpop.permute.xlu1 %4708 }
0x1d20   :  { %v4711_v27 = vpop.permute.xlu0 %4710 }
0x1d24   :  { %v4759_v19 = vpop.permute.xlu0 %4758  ;;  %v4713_v47 = vpop.permute.xlu1 %4712 }
0x1d25   :  { %v4730_v42 = vadd.f32 %v4713_v47, %v4682_v34  ;;  %v4729_v47 = vadd.f32 %v4711_v27, %v4681_v29 }
0x1d28   :  { %v4761_v58 = vpop.permute.xlu1 %4760  ;;  %v4763_v26 = vpop.permute.xlu0 %4762 }
0x1d29   :  { %v4778_v22 = vadd.f32 %v4761_v58, %v4730_v42  ;;  %v4777_v42 = vadd.f32 %v4759_v19, %v4729_v47  ;;  %v11715_v47 = vld [vmem:[#allocation47_spill] sm:$0xff] }
0x1d2c   :  { %v4809_v59 = vpop.permute.xlu1 %4808  ;;  %v4807_v28 = vpop.permute.xlu0 %4806 }
0x1d2d   :  { %v10406_v41 = vadd.f32 %v4809_v59, %v4778_v22  ;;  %v11710_v59 = vld [vmem:[#allocation40_spill] sm:$0xff] }
0x1d2f   :  { %v5050_v37 = vmul.f32 %v10406_v41, %v11707_v56  ;;  %v4994_v52 = vmul.f32 %v10406_v41, %v11708_v46  ;;  %v4680_v56 = vmul.f32 %v10329_v43, %v11710_v59  ;;  %v10421_v46 = vadd.f32 %v4807_v28, %v4777_v42  ;;  %v11714_v28 = vld [vmem:[#allocation50_spill] sm:$0xff] }
0x1d30   :  { %v4707_v39 = vpop.permute.xlu0 %4706  ;;  %v4715_v32 = vpop.permute.xlu1 %4714 }
0x1d31   :  { %v4731_v20 = vadd.f32 %v4715_v32, %v4683_v11  ;;  %5072 = vrot.lane.b32.xlu0 %v5050_v37, %s11631_s1  ;;  %5016 = vrot.lane.b32.xlu1 %v4994_v52, %s11631_s1  ;;  %v11712_v32 = vld [vmem:[#allocation41_spill] sm:$0xff]  ;;  %v4728_v27 = vadd.f32 %v4709_v51, %v4680_v56  ;;  %v5049_v29 = vmul.f32 %v10421_v46, %v11714_v28  ;;  %v11716_v51 = vld [vmem:[#allocation52_spill] sm:$0xff]  ;;  %v11717_v56 = vld [vmem:[#allocation51_spill] sm:$0xff] }
0x1d33   :  { %v4779_v34 = vadd.f32 %v4763_v26, %v4731_v20  ;;  %v11713_v20 = vld [vmem:[#allocation42_spill] sm:$0xff] }
0x1d34   :  { %v4755_v58 = vpop.permute.xlu0 %4754  ;;  %v4811_v40 = vpop.permute.xlu1 %4810  ;;  %v4679_v26 = vmul.f32 %v10325_v61, %v11713_v20 }
0x1d35   :  { %v10417_v22 = vadd.f32 %v4811_v40, %v4779_v34 }
0x1d36   :  { %v4727_v19 = vadd.f32 %v4707_v39, %v4679_v26  ;;  %v11719_v26 = vld [vmem:[#allocation54_spill] sm:$0xff] }
0x1d37   :  { %v5051_v2 = vmul.f32 %v10417_v22, %v11711_v0  ;;  %v4995_v11 = vmul.f32 %v10417_v22, %v11712_v32  ;;  %v4993_v0 = vmul.f32 %v10421_v46, %v11715_v47 }
0x1d38   :  { %v4803_v37 = vpop.permute.xlu0 %4802  ;;  %v4757_v52 = vpop.permute.xlu1 %4756  ;;  %v4775_v42 = vadd.f32 %v4755_v58, %v4727_v19 }
0x1d39   :  { %5074 = vrot.lane.b32.xlu0 %v5051_v2, %s11631_s1  ;;  %5018 = vrot.lane.b32.xlu1 %v4995_v11, %s11631_s1  ;;  %v4776_v43 = vadd.f32 %v4757_v52, %v4728_v27  ;;  %v11718_v52 = vld [vmem:[#allocation44_spill] sm:$0xff] }
0x1d3a   :  { %v10439_v61 = vadd.f32 %v4803_v37, %v4775_v42  ;;  %v4678_v27 = vmul.f32 %v10321_v38, %v11718_v52  ;;  %v11720_v37 = vld [vmem:[#allocation55_spill] sm:$0xff] }
0x1d3c   :  { %v4703_v34 = vpop.permute.xlu0 %4702  ;;  %v4805_v40 = vpop.permute.xlu1 %4804  ;;  %v5047_v19 = vmul.f32 %v10439_v61, %v11719_v26  ;;  %v11722_v26 = vld [vmem:[#allocation56_spill] sm:$0xff] }
0x1d3d   :  { %v10435_v32 = vadd.f32 %v4805_v40, %v4776_v43  ;;  %5070 = vrot.lane.b32.xlu0 %v5049_v29, %s11631_s1  ;;  %5014 = vrot.lane.b32.xlu1 %v4993_v0, %s11631_s1  ;;  %v4991_v43 = vmul.f32 %v10439_v61, %v11720_v37  ;;  %v11721_v29 = vld [vmem:[#allocation49_spill] sm:$0xff] }
0x1d3e   :  { %v4677_v47 = vmul.f32 %v10317_v25, %v11721_v29 }
0x1d3f   :  { %v5048_v39 = vmul.f32 %v10435_v32, %v11716_v51  ;;  %v4992_v2 = vmul.f32 %v10435_v32, %v11717_v56  ;;  %v4984_v23 = vmul.f32 %v10435_v32, %v11740_v24 }
0x1d40   :  { %v4705_v11 = vpop.permute.xlu1 %4704  ;;  %v4751_v58 = vpop.permute.xlu0 %4750  ;;  %v4725_v40 = vadd.f32 %v4703_v34, %v4677_v47 }
0x1d41   :  { %5068 = vrot.lane.b32.xlu0 %v5048_v39, %s11631_s1  ;;  %5012 = vrot.lane.b32.xlu1 %v4992_v2, %s11631_s1  ;;  %v4726_v0 = vadd.f32 %v4705_v11, %v4678_v27  ;;  %v11724_v27 = vld [vmem:[#allocation53_spill] sm:$0xff] }
0x1d42   :  { %v4773_v38 = vadd.f32 %v4751_v58, %v4725_v40  ;;  %v11725_v58 = vld [vmem:[#allocation58_spill] sm:$0xff] }
0x1d44   :  { %v4753_v28 = vpop.permute.xlu1 %4752  ;;  %v4799_v51 = vpop.permute.xlu0 %4798 }
0x1d45   :  { %5066 = vrot.lane.b32.xlu0 %v5047_v19, %s11631_s1  ;;  %5010 = vrot.lane.b32.xlu1 %v4991_v43, %s11631_s1  ;;  %v4774_v42 = vadd.f32 %v4753_v28, %v4726_v0  ;;  %v10459_v2 = vadd.f32 %v4799_v51, %v4773_v38  ;;  %v4676_v19 = vmul.f32 %v10313_v14, %v11724_v27  ;;  %v11726_v28 = vld [vmem:[#allocation59_spill] sm:$0xff]  ;;  %v11727_v14 = vld [vmem:[#allocation60_spill] sm:$0xff] }
0x1d46   :  { %v11739_v27 = vld [vmem:[#allocation76_spill] sm:$0xff] }
0x1d47   :  { %v5045_v43 = vmul.f32 %v10459_v2, %v11725_v58  ;;  %v4989_v47 = vmul.f32 %v10459_v2, %v11726_v28  ;;  %v11732_v58 = vld [vmem:[#allocation65_spill] sm:$0xff]  ;;  %v11733_v28 = vld [vmem:[#allocation66_spill] sm:$0xff] }
0x1d48   :  { %v4801_v39 = vpop.permute.xlu1 %4800 }
0x1d49   :  { %v10457_v56 = vadd.f32 %v4801_v39, %v4774_v42  ;;  %v11728_v39 = vld [vmem:[#allocation61_spill] sm:$0xff] }
0x1d4b   :  { %v5046_v37 = vmul.f32 %v10457_v56, %v11722_v26  ;;  %v4990_v25 = vmul.f32 %v10457_v56, %v11723_v62  ;;  %v4797_v62 = vpop.permute.xlu0 %4796  ;;  %v11729_v26 = vld [vmem:[#allocation62_spill] sm:$0xff] }
0x1d4c   :  { %v4701_v11 = vpop.permute.xlu1 %4700 }
0x1d4d   :  { %5064 = vrot.lane.b32.xlu0 %v5046_v37, %s11631_s1  ;;  %5008 = vrot.lane.b32.xlu1 %v4990_v25, %s11631_s1  ;;  %v4724_v34 = vadd.f32 %v4701_v11, %v4676_v19  ;;  %v4893_v37 = vmul.f32 %v10459_v2, %v11729_v26  ;;  %v11730_v25 = vld [vmem:[#allocation63_spill] sm:$0xff]  ;;  %v11731_v19 = vld [vmem:[#allocation64_spill] sm:$0xff] }
0x1d50   :  { %v4749_v0 = vpop.permute.xlu1 %4748 }
0x1d51   :  { %v4772_v40 = vadd.f32 %v4749_v0, %v4724_v34  ;;  %5062 = vrot.lane.b32.xlu0 %v5045_v43, %s11631_s1  ;;  %5006 = vrot.lane.b32.xlu1 %v4989_v47, %s11631_s1  ;;  %v4895_v34 = vmul.f32 %v10439_v61, %v11731_v19  ;;  %v4894_v43 = vmul.f32 %v10457_v56, %v11732_v58  ;;  %v11734_v0 = vld [vmem:[#allocation67_spill] sm:$0xff] }
0x1d52   :  { %v4897_v47 = vmul.f32 %v10421_v46, %v11733_v28 }
0x1d53   :  { %v10475_v42 = vadd.f32 %v4797_v62, %v4772_v40  ;;  %v4896_v40 = vmul.f32 %v10435_v32, %v11734_v0  ;;  %v11735_v62 = vld [vmem:[#allocation69_spill] sm:$0xff] }
0x1d55   :  { %v5044_v51 = vmul.f32 %v10475_v42, %v11727_v14  ;;  %v4988_v38 = vmul.f32 %v10475_v42, %v11728_v39  ;;  %v4892_v11 = vmul.f32 %v10475_v42, %v11730_v25  ;;  %v4898_v14 = vmul.f32 %v10406_v41, %v11735_v62 }
0x1d57   :  { %5060 = vrot.lane.b32.xlu0 %v5044_v51, %s11631_s1  ;;  %5004 = vrot.lane.b32.xlu1 %v4988_v38, %s11631_s1  ;;  %v11736_v51 = vld [vmem:[#allocation68_spill] sm:$0xff] }
0x1d58   :  { %v4899_v39 = vmul.f32 %v10417_v22, %v11736_v51 }
0x1d5b   :  { %4910 = vrot.lane.b32.xlu0 %v4893_v37, %s11631_s1  ;;  %4908 = vrot.lane.b32.xlu1 %v4892_v11, %s11631_s1 }
0x1d5f   :  { %4914 = vrot.lane.b32.xlu0 %v4895_v34, %s11631_s1  ;;  %4912 = vrot.lane.b32.xlu1 %v4894_v43, %s11631_s1  ;;  %v11737_v43 = vld [vmem:[#allocation78_spill] sm:$0xff] }
0x1d60   :  { %v5039_v28 = vmul.f32 %v10439_v61, %v11737_v43  ;;  %v11741_v43 = vld [vmem:[#allocation74_spill] sm:$0xff] }
0x1d61   :  { %v5041_v35 = vmul.f32 %v10421_v46, %v11741_v43  ;;  %v11748_v43 = vld [vmem:[#allocation81_spill] sm:$0xff] }
0x1d63   :  { %4918 = vrot.lane.b32.xlu0 %v4897_v47, %s11631_s1  ;;  %4916 = vrot.lane.b32.xlu1 %v4896_v40, %s11631_s1  ;;  %v11738_v47 = vld [vmem:[#allocation79_spill] sm:$0xff] }
0x1d64   :  { %v4983_v0 = vmul.f32 %v10439_v61, %v11738_v47  ;;  %v11742_v47 = vld [vmem:[#allocation75_spill] sm:$0xff] }
0x1d65   :  { %v4985_v15 = vmul.f32 %v10421_v46, %v11742_v47 }
0x1d67   :  { %4920 = vrot.lane.b32.xlu1 %v4898_v14, %s11631_s1  ;;  %4922 = vrot.lane.b32.xlu0 %v4899_v39, %s11631_s1  ;;  %v5040_v39 = vmul.f32 %v10435_v32, %v11739_v27 }
0x1da3   :  { %v5073_v38 = vpop.permute.xlu0 %5072  ;;  %v5017_v26 = vpop.permute.xlu1 %5016 }
0x1dab   :  { %v5075_v37 = vpop.permute.xlu0 %5074  ;;  %v5019_v25 = vpop.permute.xlu1 %5018 }
0x1daf   :  { %v5071_v11 = vpop.permute.xlu0 %5070  ;;  %v5015_v19 = vpop.permute.xlu1 %5014 }
0x1db0   :  { %v5089_v27 = vadd.f32 %v5071_v11, %v5041_v35 }
0x1db3   :  { %v5069_v34 = vpop.permute.xlu0 %5068  ;;  %v5013_v58 = vpop.permute.xlu1 %5012 }
0x1db4   :  { %v5088_v29 = vadd.f32 %v5069_v34, %v5040_v39  ;;  %v5032_v13 = vsub.f32 %v4984_v23, %v5013_v58  ;;  %v11745_v58 = vld [vmem:[#allocation70_spill] sm:$0xff] }
0x1db7   :  { %v5067_v40 = vpop.permute.xlu0 %5066  ;;  %v5011_v62 = vpop.permute.xlu1 %5010 }
0x1db8   :  { %v5087_v51 = vadd.f32 %v5067_v40, %v5039_v28  ;;  %v5031_v14 = vsub.f32 %v4983_v0, %v5011_v62  ;;  %v5033_v28 = vsub.f32 %v4985_v15, %v5015_v19  ;;  %v11743_v0 = vld [vmem:[#allocation72_spill] sm:$0xff]  ;;  %v11744_v40 = vld [vmem:[#allocation73_spill] sm:$0xff] }
0x1db9   :  { %v5042_v24 = vmul.f32 %v10406_v41, %v11743_v0  ;;  %v4986_v62 = vmul.f32 %v10406_v41, %v11744_v40  ;;  %v11749_v0 = vld [vmem:[#allocation82_spill] sm:$0xff]  ;;  %v11750_v40 = vld [vmem:[#allocation83_spill] sm:$0xff] }
0x1dba   :  { %5106 = vrot.lane.b32.xlu1 %v5031_v14, %s11662_s28  ;;  %5138 = vrot.lane.b32.xlu0 %v5087_v51, %s11663_s4  ;;  %v5043_v51 = vmul.f32 %v10417_v22, %v11745_v58  ;;  %v11747_v14 = vld [vmem:[#allocation80_spill] sm:$0xff] }
0x1dbb   :  { %v5090_v23 = vadd.f32 %v5073_v38, %v5042_v24  ;;  %v5034_v34 = vsub.f32 %v4986_v62, %v5017_v26  ;;  %v5038_v39 = vmul.f32 %v10457_v56, %v11747_v14  ;;  %v4982_v38 = vmul.f32 %v10457_v56, %v11748_v43  ;;  %v11751_v58 = vld [vmem:[#allocation84_spill] sm:$0xff]  ;;  %v11754_v14 = vld [vmem:[#allocation86_spill] sm:$0xff] }
0x1dbc   :  { %v5091_v11 = vadd.f32 %v5075_v37, %v5043_v51  ;;  %v5037_v24 = vmul.f32 %v10459_v2, %v11749_v0  ;;  %v4981_v37 = vmul.f32 %v10459_v2, %v11750_v40  ;;  %v5036_v51 = vmul.f32 %v10475_v42, %v11751_v58  ;;  %v11755_v40 = vld [vmem:[#allocation89_spill] sm:$0xff]  ;;  %v7734_v58 = vld [vmem:[%s11494_s27 + $0x18] sm:$0xff] }
0x1dbe   :  { %5108 = vrot.lane.b32.xlu1 %v5032_v13, %s11662_s28  ;;  %5140 = vrot.lane.b32.xlu0 %v5088_v29, %s11663_s4  ;;  %v11746_v13 = vld [vmem:[#allocation71_spill] sm:$0xff] }
0x1dbf   :  { %v4987_v29 = vmul.f32 %v10417_v22, %v11746_v13  ;;  %v5065_v35 = vpop.permute.xlu0 %5064  ;;  %v5009_v15 = vpop.permute.xlu1 %5008  ;;  %v11752_v13 = vld [vmem:[#allocation85_spill] sm:$0xff] }
0x1dc0   :  { %v5086_v26 = vadd.f32 %v5065_v35, %v5038_v39  ;;  %v5030_v47 = vsub.f32 %v4982_v38, %v5009_v15  ;;  %v4837_v39 = vmul.f32 %v10459_v2, %v11754_v14  ;;  %v11758_v14 = vld [vmem:[#allocation90_spill] sm:$0xff] }
0x1dc1   :  { %v5035_v19 = vsub.f32 %v4987_v29, %v5019_v25  ;;  %v4980_v29 = vmul.f32 %v10475_v42, %v11752_v13  ;;  %v7735_v13 = vld [vmem:[%s11494_s27 + $0x10] sm:$0xff] }
0x1dc2   :  { %5110 = vrot.lane.b32.xlu1 %v5033_v28, %s11662_s28  ;;  %5142 = vrot.lane.b32.xlu0 %v5089_v27, %s11663_s4 }
0x1dc3   :  { %v5063_v27 = vpop.permute.xlu0 %5062  ;;  %v5007_v28 = vpop.permute.xlu1 %5006 }
0x1dc4   :  { %v5085_v25 = vadd.f32 %v5063_v27, %v5037_v24  ;;  %v5029_v62 = vsub.f32 %v4981_v37, %v5007_v28  ;;  %v7733_v27 = vld [vmem:[%s11494_s27] sm:$0xff]  ;;  %v4838_v37 = vmul.f32 %v10457_v56, %v11755_v40 }
0x1dc5   :  { %v4884_v28 = vmul.f32 %v7733_v27, %v10475_v42  ;;  %v7737_v27 = vld [vmem:[%s11494_s27 + $0x20] sm:$0xff] }
0x1dc6   :  { %5112 = vrot.lane.b32.xlu1 %v5034_v34, %s11662_s28  ;;  %5144 = vrot.lane.b32.xlu0 %v5090_v23, %s11663_s4  ;;  %v11759_v40 = vld [vmem:[#allocation93_spill] sm:$0xff] }
0x1dc9   :  { %v5061_v23 = vpop.permute.xlu0 %5060  ;;  %v5005_v34 = vpop.permute.xlu1 %5004 }
0x1dca   :  { %5114 = vrot.lane.b32.xlu1 %v5035_v19, %s11662_s28  ;;  %5146 = vrot.lane.b32.xlu0 %v5091_v11, %s11663_s4  ;;  %v5084_v35 = vadd.f32 %v5061_v23, %v5036_v51  ;;  %v5028_v15 = vsub.f32 %v4980_v29, %v5005_v34  ;;  %v11753_v11 = vld [vmem:[#allocation87_spill] sm:$0xff]  ;;  %v4887_v51 = vmul.f32 %v7734_v58, %v10439_v61 }
0x1dcb   :  { %v4836_v19 = vmul.f32 %v10475_v42, %v11753_v11  ;;  %v4886_v29 = vmul.f32 %v7735_v13, %v10457_v56  ;;  %v11757_v11 = vld [vmem:[#allocation91_spill] sm:$0xff] }
0x1dcc   :  { %v7738_v58 = vld [vmem:[%s11494_s27 + $0x30] sm:$0xff]  ;;  %v7739_v13 = vld [vmem:[%s11494_s27 + $0x38] sm:$0xff] }
0x1dcd   :  { %v4911_v43 = vpop.permute.xlu0 %4910  ;;  %v4909_v38 = vpop.permute.xlu1 %4908 }
0x1dce   :  { %5104 = vrot.lane.b32.xlu1 %v5030_v47, %s11662_s28  ;;  %5136 = vrot.lane.b32.xlu0 %v5086_v26, %s11663_s4  ;;  %v7732_v26 = vld [vmem:[%s11494_s27 + $0x8] sm:$0xff]  ;;  %v4932_v24 = vadd.f32 %v4909_v38, %v4884_v28  ;;  %v4888_v28 = vmul.f32 %v7737_v27, %v10435_v32 }
0x1dcf   :  { %v4885_v47 = vmul.f32 %v7732_v26, %v10459_v2  ;;  %v7736_v26 = vld [vmem:[%s11494_s27 + $0x28] sm:$0xff]  ;;  %s11780_s27 = sld [smem:[#allocation105_spill]] }
0x1dd1   :  { %v4933_v0 = vadd.f32 %v4911_v43, %v4885_v47  ;;  %v4915_v23 = vpop.permute.xlu0 %4914  ;;  %v4913_v34 = vpop.permute.xlu1 %4912  ;;  %v4889_v47 = vmul.f32 %v7736_v26, %v10421_v46 }
0x1dd2   :  { %5102 = vrot.lane.b32.xlu1 %v5029_v62, %s11662_s28  ;;  %5134 = vrot.lane.b32.xlu0 %v5085_v25, %s11663_s4  ;;  %v11756_v25 = vld [vmem:[#allocation88_spill] sm:$0xff] }
0x1dd3   :  { %v4839_v62 = vmul.f32 %v10439_v61, %v11756_v25  ;;  %v11760_v25 = vld [vmem:[#allocation92_spill] sm:$0xff] }
0x1dd5   :  { %v4919_v43 = vpop.permute.xlu0 %4918  ;;  %v4917_v38 = vpop.permute.xlu1 %4916 }
0x1dd6   :  { %5100 = vrot.lane.b32.xlu1 %v5028_v15, %s11662_s28  ;;  %5132 = vrot.lane.b32.xlu0 %v5084_v35, %s11663_s4  ;;  %v4935_v35 = vadd.f32 %v4915_v23, %v4887_v51  ;;  %v4934_v15 = vadd.f32 %v4913_v34, %v4886_v29  ;;  %v4890_v51 = vmul.f32 %v7738_v58, %v10406_v41 }
0x1dd7   :  { %v4891_v29 = vmul.f32 %v7739_v13, %v10417_v22 }
0x1dd9   :  { %v4921_v23 = vpop.permute.xlu1 %4920  ;;  %v4923_v34 = vpop.permute.xlu0 %4922 }
0x1dda   :  { %4852 = vrot.lane.b32.xlu1 %v4836_v19, %s11631_s1  ;;  %4854 = vrot.lane.b32.xlu0 %v4837_v39, %s11631_s1  ;;  %v4840_v19 = vmul.f32 %v10435_v32, %v11757_v11  ;;  %v4841_v39 = vmul.f32 %v10421_v46, %v11758_v14  ;;  %v10617_v11 = vpop.f32.mrf.mxu0 }
0x1ddb   :  { %v5179_v14 = vmul.f32 %v10617_v11, %v11584_v1  ;;  %v5226_v1 = vmul.f32 %v10346_v50, %v11593_v49  ;;  %v5175_v49 = vmul.f32 %v10327_v21, %v11597_v33  ;;  %v5223_v33 = vmul.f32 %v10327_v21, %v11601_v54 }
0x1dde   :  { %4948 = vrot.lane.b32.xlu1 %v4932_v24, %s11678_s7  ;;  %4950 = vrot.lane.b32.xlu0 %v4933_v0, %s11678_s7  ;;  %v4937_v0 = vadd.f32 %v4919_v43, %v4889_v47  ;;  %v4936_v24 = vadd.f32 %v4917_v38, %v4888_v28  ;;  %v5227_v43 = vmul.f32 %v10617_v11, %v11587_v3 }
0x1ddf   :  { %v5275_v3 = vmul.f32 %v10617_v11, %v11594_v9  ;;  %v5273_v9 = vmul.f32 %v10340_v48, %v11599_v10 }
0x1de2   :  { %4856 = vrot.lane.b32.xlu1 %v4838_v37, %s11631_s1  ;;  %4858 = vrot.lane.b32.xlu0 %v4839_v62, %s11631_s1  ;;  %v4842_v37 = vmul.f32 %v10406_v41, %v11759_v40  ;;  %v4843_v62 = vmul.f32 %v10417_v22, %v11760_v25 }
0x1de6   :  { %4952 = vrot.lane.b32.xlu1 %v4934_v15, %s11678_s7  ;;  %4954 = vrot.lane.b32.xlu0 %v4935_v35, %s11678_s7  ;;  %v4938_v35 = vadd.f32 %v4921_v23, %v4890_v51  ;;  %v4939_v15 = vadd.f32 %v4923_v34, %v4891_v29 }
0x1dea   :  { %4860 = vrot.lane.b32.xlu1 %v4840_v19, %s11631_s1  ;;  %4862 = vrot.lane.b32.xlu0 %v4841_v39, %s11631_s1  ;;  %v5178_v19 = vmul.f32 %v10346_v50, %v8218_v44  ;;  %v5177_v39 = vmul.f32 %v10340_v48, %v11589_v12  ;;  %v5176_v44 = vmul.f32 %v10333_v45, %v11586_v18 }
0x1deb   :  { %v5274_v12 = vmul.f32 %v10346_v50, %v11590_v5  ;;  %v5225_v18 = vmul.f32 %v10340_v48, %v11595_v57  ;;  %v5224_v5 = vmul.f32 %v10333_v45, %v11598_v60  ;;  %v5174_v57 = vmul.f32 %v10323_v17, %v11600_v4 }
0x1dee   :  { %4956 = vrot.lane.b32.xlu1 %v4936_v24, %s11678_s7  ;;  %4958 = vrot.lane.b32.xlu0 %v4937_v0, %s11678_s7 }
0x1df2   :  { %4864 = vrot.lane.b32.xlu1 %v4842_v37, %s11631_s1  ;;  %4866 = vrot.lane.b32.xlu0 %v4843_v62, %s11631_s1  ;;  %s11774_s1 = sld [smem:[#allocation104_spill]] }
0x1df6   :  { %4960 = vrot.lane.b32.xlu1 %v4938_v35, %s11678_s7  ;;  %4962 = vrot.lane.b32.xlu0 %v4939_v15, %s11678_s7 }
0x1dfa   :  { %5200 = vrot.lane.b32.xlu0 %v5178_v19, %s11685_s9  ;;  %5202 = vrot.lane.b32.xlu1 %v5179_v14, %s11685_s9  ;;  %v7740_v19 = vld [vmem:[%s11495_s8] sm:$0xff] }
0x1dfb   :  { %v4828_v14 = vmul.f32 %v7740_v19, %v10475_v42 }
0x1dfe   :  { %5198 = vrot.lane.b32.xlu0 %v5177_v39, %s11685_s9  ;;  %5250 = vrot.lane.b32.xlu1 %v5227_v43, %s11622_s6 }
0x1e02   :  { %5248 = vrot.lane.b32.xlu0 %v5226_v1, %s11622_s6  ;;  %5196 = vrot.lane.b32.xlu1 %v5176_v44, %s11685_s9 }
0x1e06   :  { %5298 = vrot.lane.b32.xlu0 %v5275_v3, %s11623_s29  ;;  %5296 = vrot.lane.b32.xlu1 %v5274_v12, %s11623_s29 }
0x1e0a   :  { %5246 = vrot.lane.b32.xlu0 %v5225_v18, %s11622_s6 }
0x1e0e   :  { %5194 = vrot.lane.b32.xlu0 %v5175_v49, %s11685_s9 }
0x1e12   :  { %5244 = vrot.lane.b32.xlu0 %v5224_v5, %s11622_s6 }
0x1e16   :  { %5294 = vrot.lane.b32.xlu0 %v5273_v9, %s11623_s29 }
0x1e1a   :  { %5192 = vrot.lane.b32.xlu0 %v5174_v57, %s11685_s9  ;;  %v7741_v57 = vld [vmem:[%s11495_s8 + $0x8] sm:$0xff] }
0x1e1e   :  { %5242 = vrot.lane.b32.xlu0 %v5223_v33, %s11622_s6  ;;  %v4829_v33 = vmul.f32 %v7741_v57, %v10459_v2  ;;  %v5170_v57 = vmul.f32 %v10346_v50, %v11705_v31  ;;  %v5169_v50 = vmul.f32 %v10340_v48, %v11709_v7  ;;  %v7749_v7 = vld [vmem:[%s11761_s11 + $0x8] sm:$0xff] }
0x1e2c   :  { %v5107_v38 = vpop.permute.xlu1 %5106  ;;  %v5139_v26 = vpop.permute.xlu0 %5138 }
0x1e2d   :  { %v5159_v29 = vsel %vm1013_vm4, %v5107_v38, %v5139_v26  ;;  %v7742_v38 = vld [vmem:[%s11495_s8 + $0x10] sm:$0xff] }
0x1e2e   :  { %v4830_v26 = vmul.f32 %v7742_v38, %v10457_v56 }
0x1e30   :  { %v5109_v60 = vpop.permute.xlu1 %5108  ;;  %v5141_v47 = vpop.permute.xlu0 %5140 }
0x1e31   :  { %v5160_v58 = vsel %vm1013_vm4, %v5109_v60, %v5141_v47 }
0x1e34   :  { %v5111_v27 = vpop.permute.xlu1 %5110  ;;  %v5143_v28 = vpop.permute.xlu0 %5142 }
0x1e35   :  { %v5161_v62 = vsel %vm1013_vm4, %v5111_v27, %v5143_v28 }
0x1e38   :  { %v5113_v0 = vpop.permute.xlu1 %5112  ;;  %v5145_v10 = vpop.permute.xlu0 %5144 }
0x1e39   :  { %v5162_v4 = vsel %vm1013_vm4, %v5113_v0, %v5145_v10  ;;  %v7743_v10 = vld [vmem:[%s11495_s8 + $0x18] sm:$0xff] }
0x1e3a   :  { %v4831_v2 = vmul.f32 %v7743_v10, %v10439_v61  ;;  %v7745_v61 = vld [vmem:[%s11495_s8 + $0x28] sm:$0xff] }
0x1e3c   :  { %v5115_v24 = vpop.permute.xlu1 %5114  ;;  %v5147_v40 = vpop.permute.xlu0 %5146 }
0x1e3d   :  { %v5163_v37 = vsel %vm1013_vm4, %v5115_v24, %v5147_v40  ;;  %v7744_v24 = vld [vmem:[%s11495_s8 + $0x20] sm:$0xff] }
0x1e3e   :  { %7340 = vmatprep.subr.msk.mxu1 %vm379_vm3, %v5163_v37  ;;  %v4832_v56 = vmul.f32 %v7744_v24, %v10435_v32 }
0x1e3f   :  { %7341 = vmatpush3.xpose.msk.msra.mxu1 %vm379_vm3, %v5163_v37 }
0x1e40   :  { %v5105_v54 = vpop.permute.xlu1 %5104  ;;  %7342 = vmatprep.subr.msk.mxu1 %vm379_vm3, %v5162_v4  ;;  %v5137_v25 = vpop.permute.xlu0 %5136 }
0x1e41   :  { %v5158_v39 = vsel %vm1013_vm4, %v5105_v54, %v5137_v25 }
0x1e43   :  { %7343 = vmatpush3.xpose.msk.msra.mxu1 %vm379_vm3, %v5162_v4 }
0x1e44   :  { %v5103_v23 = vpop.permute.xlu1 %5102  ;;  %7344 = vmatprep.subr.msk.mxu1 %vm379_vm3, %v5161_v62  ;;  %v5135_v34 = vpop.permute.xlu0 %5134 }
0x1e45   :  { %v5157_v3 = vsel %vm1013_vm4, %v5103_v23, %v5135_v34  ;;  %v4833_v23 = vmul.f32 %v7745_v61, %v10421_v46  ;;  %v7747_v46 = vld [vmem:[%s11495_s8 + $0x38] sm:$0xff] }
0x1e47   :  { %7345 = vmatpush3.xpose.msk.msra.mxu1 %vm379_vm3, %v5161_v62 }
0x1e48   :  { %v5101_v51 = vpop.permute.xlu1 %5100  ;;  %7346 = vmatprep.subr.msk.mxu1 %vm379_vm3, %v5160_v58  ;;  %v5133_v13 = vpop.permute.xlu0 %5132 }
0x1e49   :  { %v5156_v49 = vsel %vm1013_vm4, %v5101_v51, %v5133_v13 }
0x1e4b   :  { %7347 = vmatpush3.xpose.msk.msra.mxu1 %vm379_vm3, %v5160_v58 }
0x1e4c   :  { %v4853_v35 = vpop.permute.xlu1 %4852  ;;  %7348 = vmatprep.subr.msk.mxu1 %vm379_vm3, %v5159_v29  ;;  %v4855_v15 = vpop.permute.xlu0 %4854 }
0x1e4d   :  { %v4876_v43 = vsub.f32 %v4828_v14, %v4853_v35  ;;  %v4877_v60 = vsub.f32 %v4829_v33, %v4855_v15  ;;  %v4835_v15 = vmul.f32 %v7747_v46, %v10417_v22  ;;  %v7748_v22 = vld [vmem:[%s11614_s26] sm:$0xff] }
0x1e4f   :  { %7349 = vmatpush3.xpose.msk.msra.mxu1 %vm379_vm3, %v5159_v29  ;;  %v7746_v29 = vld [vmem:[%s11495_s8 + $0x30] sm:$0xff]  ;;  %s11771_s8 = smov 16  }
0x1e50   :  { %v4949_v44 = vpop.permute.xlu1 %4948  ;;  %7350 = vmatprep.subr.msk.mxu1 %vm379_vm3, %v5158_v39  ;;  %v4951_v1 = vpop.permute.xlu0 %4950  ;;  %v4834_v35 = vmul.f32 %v7746_v29, %v10406_v41  ;;  %v5173_v29 = vmul.f32 %v10319_v63, %v11604_v36  ;;  %v7751_v36 = vld [vmem:[%s11761_s11 + $0x20] sm:$0xff] }
0x1e51   :  { %v4972_v12 = vsel %vm1013_vm4, %v4876_v43, %v4949_v44  ;;  %v4973_v0 = vsel %vm1013_vm4, %v4877_v60, %v4951_v1 }
0x1e52   :  { %7356 = vmatprep.mubr.msk.f32.mxu1 %vm379_vm3, %v4972_v12 }
0x1e53   :  { %7351 = vmatpush3.xpose.msk.msra.mxu1 %vm379_vm3, %v5158_v39 }
0x1e54   :  { %v4857_v18 = vpop.permute.xlu1 %4856  ;;  %7352 = vmatprep.subr.msk.mxu1 %vm379_vm3, %v5157_v3  ;;  %v4859_v42 = vpop.permute.xlu0 %4858 }
0x1e55   :  { %v4878_v47 = vsub.f32 %v4830_v26, %v4857_v18  ;;  %v4879_v37 = vsub.f32 %v4831_v2, %v4859_v42  ;;  %v5171_v42 = vmul.f32 %v10617_v11, %v11706_v16  ;;  %v5167_v16 = vmul.f32 %v10327_v21, %v11713_v20 }
0x1e57   :  { %7353 = vmatpush3.xpose.msk.msra.mxu1 %vm379_vm3, %v5157_v3 }
0x1e58   :  { %v4953_v5 = vpop.permute.xlu1 %4952  ;;  %7354 = vmatprep.subr.msk.mxu1 %vm379_vm3, %v5156_v49  ;;  %v4955_v9 = vpop.permute.xlu0 %4954 }
0x1e59   :  { %v4974_v40 = vsel %vm1013_vm4, %v4878_v47, %v4953_v5  ;;  %v4975_v62 = vsel %vm1013_vm4, %v4879_v37, %v4955_v9 }
0x1e5b   :  { %7355 = vmatpush3.xpose.msk.msra.mxu1 %vm379_vm3, %v5156_v49  ;;  %v5168_v49 = vmul.f32 %v10333_v45, %v11710_v59 }
0x1e5c   :  { %v4861_v27 = vpop.permute.xlu1 %4860  ;;  %v4863_v28 = vpop.permute.xlu0 %4862 }
0x1e5d   :  { %v4880_v4 = vsub.f32 %v4832_v56, %v4861_v27  ;;  %v4881_v34 = vsub.f32 %v4833_v23, %v4863_v28 }
0x1e5e   :  { %7357 = vmatmul.mubr.msk.f32.vlgmr.msra.gmra.mxu1 %vm379_vm3, %v4973_v0 }
0x1e5f   :  { %7359 = vmatprep.mubr.msk.f32.mxu1 %vm379_vm3, %v4974_v40 }
0x1e60   :  { %v4957_v54 = vpop.permute.xlu1 %4956  ;;  %v4959_v25 = vpop.permute.xlu0 %4958 }
0x1e61   :  { %v4976_v32 = vsel %vm1013_vm4, %v4880_v4, %v4957_v54  ;;  %v4977_v13 = vsel %vm1013_vm4, %v4881_v34, %v4959_v25  ;;  %v5166_v54 = vmul.f32 %v10323_v17, %v11718_v52  ;;  %v7750_v34 = vld [vmem:[%s11761_s11] sm:$0xff] }
0x1e62   :  { %7360 = vmatmul.mubr.msk.f32.gmra.mxu1 %vm379_vm3, %v4975_v62 }
0x1e63   :  { %7362 = vmatprep.mubr.msk.f32.mxu1 %vm379_vm3, %v4976_v32 }
0x1e64   :  { %v4865_v58 = vpop.permute.xlu1 %4864  ;;  %v4867_v51 = vpop.permute.xlu0 %4866 }
0x1e65   :  { %v4882_v19 = vsub.f32 %v4834_v35, %v4865_v58  ;;  %v4883_v14 = vsub.f32 %v4835_v15, %v4867_v51  ;;  %v5222_v35 = vmul.f32 %v10323_v17, %v11592_v8  ;;  %v5271_v15 = vmul.f32 %v10327_v21, %v11605_v30  ;;  %v7752_v30 = vld [vmem:[%s11761_s11 + $0x30] sm:$0xff] }
0x1e66   :  { %7363 = vmatmul.mubr.msk.f32.gmra.mxu1 %vm379_vm3, %v4977_v13  ;;  %v5272_v13 = vmul.f32 %v10333_v45, %v11602_v53 }
0x1e68   :  { %v4961_v39 = vpop.permute.xlu1 %4960  ;;  %v4963_v43 = vpop.permute.xlu0 %4962 }
0x1e69   :  { %v4978_v44 = vsel %vm1013_vm4, %v4882_v19, %v4961_v39  ;;  %v4979_v1 = vsel %vm1013_vm4, %v4883_v14, %v4963_v43 }
0x1e6a   :  { %7365 = vmatprep.mubr.msk.f32.mxu1 %vm379_vm3, %v4978_v44 }
0x1e6b   :  { %7366 = vmatmul.mubr.msk.f32.gmra.mxu1 %vm379_vm3, %v4979_v1 }
0x1e6c   :  { %v5201_v41 = vpop.permute.xlu0 %5200  ;;  %v5203_v12 = vpop.permute.xlu1 %5202  ;;  %7412 = vmatprep.mubr.msk.f32.mxu1 %vm224_vm2, %v7748_v22 }
0x1e6d   :  { %v5219_v33 = vadd.f32 %v5203_v12, %v5171_v42  ;;  %v5218_v26 = vadd.f32 %v5201_v41, %v5170_v57  ;;  %v7753_v12 = vld [vmem:[%s11761_s11 + $0x18] sm:$0xff]  ;;  %v7754_v42 = vld [vmem:[%s11761_s11 + $0x10] sm:$0xff]  ;;  %v7755_v57 = vld [vmem:[%s11761_s11 + $0x28] sm:$0xff] }
0x1e70   :  { %v5199_v3 = vpop.permute.xlu0 %5198  ;;  %v5251_v18 = vpop.permute.xlu1 %5250 }
0x1e71   :  { %v5267_v60 = vadd.f32 %v5251_v18, %v5219_v33  ;;  %v5217_v24 = vadd.f32 %v5199_v3, %v5169_v50  ;;  %v11764_v50 = vld [vmem:[#allocation32_spill] sm:$0xff] }
0x1e74   :  { %v5249_v5 = vpop.permute.xlu0 %5248  ;;  %v5197_v9 = vpop.permute.xlu1 %5196 }
0x1e75   :  { %v5216_v38 = vadd.f32 %v5197_v9, %v5168_v49  ;;  %v5266_v28 = vadd.f32 %v5249_v5, %v5218_v26 }
0x1e78   :  { %v5299_v47 = vpop.permute.xlu0 %5298  ;;  %v5297_v27 = vpop.permute.xlu1 %5296 }
0x1e79   :  { %v5315_v0 = vadd.f32 %v5299_v47, %v5267_v60  ;;  %v5314_v10 = vadd.f32 %v5297_v27, %v5266_v28  ;;  %v7756_v60 = vld [vmem:[%s11761_s11 + $0x38] sm:$0xff] }
0x1e7b   :  { %7368 = vmatprep.subr.mxu0 %v5315_v0 }
0x1e7c   :  { %v5247_v2 = vpop.permute.xlu0 %5246  ;;  %7369 = vmatpush3.msra.mxu0 %v5315_v0  ;;  %v5270_v0 = vmul.f32 %v10323_v17, %v11687_v6 }
0x1e7d   :  { %7370 = vmatprep.subr.mxu0 %v5314_v10  ;;  %v5265_v40 = vadd.f32 %v5247_v2, %v5217_v24 }
0x1e7e   :  { %7371 = vmatpush3.msra.mxu0 %v5314_v10  ;;  %v11762_v10 = vld [vmem:[#allocation39_spill] sm:$0xff] }
0x1e7f   :  { %v5172_v2 = vmul.f32 %v11762_v10, %v11609_v55 }
0x1e80   :  { %v5195_v59 = vpop.permute.xlu0 %5194 }
0x1e81   :  { %v10747_v11 = vadd.f32 %v5195_v59, %v5167_v16  ;;  %v11763_v16 = vld [vmem:[#allocation29_spill] sm:$0xff] }
0x1e82   :  { %v5221_v59 = vmul.f32 %v10319_v63, %v11763_v16 }
0x1e84   :  { %v5245_v31 = vpop.permute.xlu0 %5244 }
0x1e85   :  { %v10751_v56 = vadd.f32 %v5245_v31, %v5216_v38  ;;  %v5220_v31 = vmul.f32 %v11762_v10, %v11764_v50 }
0x1e88   :  { %v5295_v37 = vpop.permute.xlu0 %5294 }
0x1e89   :  { %v5313_v4 = vadd.f32 %v5295_v37, %v5265_v40 }
0x1e8b   :  { %7372 = vmatprep.subr.mxu0 %v5313_v4 }
0x1e8c   :  { %v5193_v25 = vpop.permute.xlu0 %5192  ;;  %7373 = vmatpush3.msra.mxu0 %v5313_v4  ;;  %v11765_v4 = vld [vmem:[#allocation49_spill] sm:$0xff] }
0x1e8d   :  { %v10755_v20 = vadd.f32 %v5193_v25, %v5166_v54  ;;  %v5165_v54 = vmul.f32 %v10319_v63, %v11765_v4 }
0x1e90   :  { %v5243_v24 = vpop.permute.xlu0 %5242 }
0x1f1e   :  { %v7358_v62 = vpop.f32.mrf.mxu1 }
0x1f1f   :  { %v5470_v61 = vmul.f32 0.25, %v7358_v62 }
0x1f20   :  { %v5430_v23 = vpop.f32.mrf.mxu1 }
0x1f21   :  { %v10760_v48 = vadd.f32 %v7749_v7, %v5470_v61  ;;  %v5469_v32 = vmul.f32 0.25, %v5430_v23 }
0x1f22   :  { %v7361_v46 = vpop.f32.mrf.mxu1 }
0x1f23   :  { %v10765_v58 = vadd.f32 %v7750_v34, %v5469_v32  ;;  %v5488_v52 = vsel %vm224_vm2, %v10760_v48, -inf  ;;  %v5472_v1 = vmul.f32 0.25, %v7361_v46 }
0x1f24   :  { %5489 = vmax.xlane.f32.xlu0 %v5488_v52  ;;  %v5440_v19 = vpop.f32.mrf.mxu1 }
0x1f25   :  { %v5485_v51 = vsel %vm224_vm2, %v10765_v58, -inf  ;;  %v10798_v22 = vadd.f32 %v7753_v12, %v5472_v1  ;;  %v5471_v3 = vmul.f32 0.25, %v5440_v19 }
0x1f26   :  { %5486 = vmax.xlane.f32.xlu1 %v5485_v51  ;;  %v7364_v53 = vpop.f32.mrf.mxu1 }
0x1f27   :  { %v10805_v49 = vadd.f32 %v7754_v42, %v5471_v3  ;;  %v5474_v5 = vmul.f32 0.25, %v7364_v53  ;;  %v5494_v9 = vsel %vm224_vm2, %v10798_v22, -inf }
0x1f28   :  { %v5450_v45 = vpop.f32.mrf.mxu1 }
0x1f29   :  { %v5473_v39 = vmul.f32 0.25, %v5450_v45  ;;  %v10812_v33 = vadd.f32 %v7755_v57, %v5474_v5  ;;  %v5491_v26 = vsel %vm224_vm2, %v10805_v49, -inf }
0x1f2b   :  { %v7367_v14 = vpop.f32.mrf.mxu1  ;;  %v10786_v44 = vadd.f32 %v7751_v36, %v5473_v39  ;;  %v5500_v27 = vsel %vm224_vm2, %v10812_v33, -inf }
0x1f2c   :  { %v5476_v38 = vmul.f32 0.25, %v7367_v14 }
0x1f2d   :  { %v5460_v43 = vpop.f32.mrf.mxu1  ;;  %v5497_v41 = vsel %vm224_vm2, %v10786_v44, -inf }
0x1f2e   :  { %v5475_v8 = vmul.f32 0.25, %v5460_v43  ;;  %v10819_v47 = vadd.f32 %v7756_v60, %v5476_v38 }
0x1f30   :  { %v10791_v21 = vadd.f32 %v7752_v30, %v5475_v8  ;;  %v5506_v28 = vsel %vm224_vm2, %v10819_v47, -inf }
0x1f32   :  { %v5503_v18 = vsel %vm224_vm2, %v10791_v21, -inf }
0x1f37   :  { %5292 = vrot.lane.b32.xlu1 %v5272_v13, %s11623_s29 }
0x1f3a   :  { %5190 = vrot.lane.b32.xlu0 %v5173_v29, %s11685_s9 }
0x1f3e   :  { %5240 = vrot.lane.b32.xlu0 %v5222_v35, %s11622_s6 }
0x1f42   :  { %5290 = vrot.lane.b32.xlu0 %v5271_v15, %s11623_s29 }
0x1f5b   :  { %5498 = vmax.xlane.f32.xlu1 %v5497_v41 }
0x1f5f   :  { %5504 = vmax.xlane.f32.xlu1 %v5503_v18 }
0x1f61   :  { %5495 = vmax.xlane.f32.xlu0 %v5494_v9 }
0x1f65   :  { %5492 = vmax.xlane.f32.xlu0 %v5491_v26 }
0x1f69   :  { %5501 = vmax.xlane.f32.xlu0 %v5500_v27  ;;  %v11766_v27 = vld [vmem:[#allocation28_spill] sm:$0xff] }
0x1f6d   :  { %5507 = vmax.xlane.f32.xlu0 %v5506_v28  ;;  %v5269_v28 = vmul.f32 %v10319_v63, %v11766_v27 }
0x1f70   :  { %5288 = vrot.lane.b32.xlu1 %v5270_v0, %s11623_s29  ;;  %v11767_v0 = vld [vmem:[#allocation30_spill] sm:$0xff] }
0x1f83   :  { %5188 = vrot.lane.b32.xlu0 %v5172_v2, %s11685_s9  ;;  %v5268_v2 = vmul.f32 %v11762_v10, %v11767_v0 }
0x1f87   :  { %5238 = vrot.lane.b32.xlu0 %v5221_v59, %s11622_s6 }
0x1f8b   :  { %5236 = vrot.lane.b32.xlu0 %v5220_v31, %s11622_s6 }
0x1fad   :  { %v5490_v40 = vpop.xlane.xlu0 %5489 }
0x1fae   :  { %v5510_v6 = vsub.f32 %v10760_v48, %v5490_v40  ;;  %v5263_v48 = vadd.f32 %v5243_v24, %v10747_v11 }
0x1faf   :  { %v5487_v17 = vpop.xlane.xlu1 %5486 }
0x1fb0   :  { %v5519_v37 = vmul.f32 1.442695, %v5510_v6  ;;  %v5509_v55 = vsub.f32 %v10765_v58, %v5487_v17 }
0x1fb1   :  { %v5191_v25 = vpop.permute.xlu0 %5190 }
0x1fb2   :  { %7624 = vpow2.f32 %v5519_v37  ;;  %v5517_v62 = vmul.f32 1.442695, %v5509_v55  ;;  %v10841_v61 = vadd.f32 %v5191_v25, %v5165_v54  ;;  %v11768_v25 = vld [vmem:[#allocation53_spill] sm:$0xff] }
0x1fb3   :  { %v5293_v23 = vpop.permute.xlu1 %5292 }
0x1fb4   :  { %7626 = vpow2.f32 %v5517_v62  ;;  %v5312_v7 = vadd.f32 %v5293_v23, %v10751_v56  ;;  %v5164_v62 = vmul.f32 %v11762_v10, %v11768_v25 }
0x1fb5   :  { %v5241_v32 = vpop.permute.xlu0 %5240 }
0x1fb6   :  { %7374 = vmatprep.subr.mxu0 %v5312_v7  ;;  %v5262_v11 = vadd.f32 %v5241_v32, %v10755_v20 }
0x1fb7   :  { %7375 = vmatpush3.msra.mxu0 %v5312_v7 }
0x1fb9   :  { %v5291_v34 = vpop.permute.xlu0 %5290 }
0x1fba   :  { %v5311_v52 = vadd.f32 %v5291_v34, %v5263_v48 }
0x1fbc   :  { %7376 = vmatprep.subr.mxu0 %v5311_v52 }
0x1fbd   :  { %7377 = vmatpush3.msra.mxu0 %v5311_v52 }
0x1fbf   :  { %v10845_v58 = vpop.eup %7624 }
0x1fc0   :  { %v5536_v51 = vsel %vm224_vm2, %v10845_v58, 0.0 }
0x1fc1   :  { %v7627_v13 = vpop.eup %7626  ;;  %5537 = vadd.xlane.f32.xlu0 %v5536_v51 }
0x1fc2   :  { %v5533_v29 = vsel %vm224_vm2, %v7627_v13, 0.0 }
0x1fc3   :  { %5534 = vadd.xlane.f32.xlu1 %v5533_v29 }
0x1fe4   :  { %v5499_v56 = vpop.xlane.xlu1 %5498 }
0x1fe5   :  { %v5513_v46 = vsub.f32 %v10786_v44, %v5499_v56 }
0x1fe7   :  { %v5525_v45 = vmul.f32 1.442695, %v5513_v46 }
0x1fe8   :  { %v5505_v35 = vpop.xlane.xlu1 %5504 }
0x1fe9   :  { %v5515_v14 = vsub.f32 %v10791_v21, %v5505_v35 }
0x1fea   :  { %v5496_v15 = vpop.xlane.xlu0 %5495 }
0x1feb   :  { %v5512_v19 = vsub.f32 %v10798_v22, %v5496_v15  ;;  %v5529_v1 = vmul.f32 1.442695, %v5515_v14 }
0x1fec   :  { %v5289_v53 = vpop.permute.xlu1 %5288 }
0x1fed   :  { %v5523_v39 = vmul.f32 1.442695, %v5512_v19  ;;  %v5310_v43 = vadd.f32 %v5289_v53, %v5262_v11 }
0x1fee   :  { %v5493_v36 = vpop.xlane.xlu0 %5492 }
0x1fef   :  { %7628 = vpow2.f32 %v5523_v39  ;;  %v5511_v8 = vsub.f32 %v10805_v49, %v5493_v36  ;;  %7378 = vmatprep.subr.mxu0 %v5310_v43 }
0x1ff0   :  { %7379 = vmatpush3.msra.mxu0 %v5310_v43  ;;  %7630 = vpow2.f32 %v5525_v45 }
0x1ff1   :  { %v5521_v44 = vmul.f32 1.442695, %v5511_v8 }
0x1ff2   :  { %v5502_v30 = vpop.xlane.xlu0 %5501 }
0x1ff3   :  { %7632 = vpow2.f32 %v5521_v44  ;;  %v5514_v20 = vsub.f32 %v10812_v33, %v5502_v30 }
0x1ff4   :  { %7634 = vpow2.f32 %v5529_v1 }
0x1ff5   :  { %v5527_v41 = vmul.f32 1.442695, %v5514_v20 }
0x1ff6   :  { %v5508_v12 = vpop.xlane.xlu0 %5507 }
0x1ff7   :  { %7636 = vpow2.f32 %v5527_v41  ;;  %v5516_v21 = vsub.f32 %v10819_v47, %v5508_v12  ;;  %v7757_v41 = vld [vmem:[%s11614_s26 + $0x8] sm:$0xff]  ;;  %v7758_v12 = vld [vmem:[%s11614_s26 + $0x10] sm:$0xff] }
0x1ff9   :  { %v5531_v22 = vmul.f32 1.442695, %v5516_v21  ;;  %v7759_v21 = vld [vmem:[%s11614_s26 + $0x18] sm:$0xff] }
0x1ffa   :  { %v5189_v31 = vpop.permute.xlu0 %5188 }
0x1ffb   :  { %7638 = vpow2.f32 %v5531_v22  ;;  %v5212_v23 = vadd.f32 %v5189_v31, %v5164_v62  ;;  %v7760_v22 = vld [vmem:[%s11614_s26 + $0x20] sm:$0xff] }
0x1ffc   :  { %v10857_v3 = vpop.eup %7628 }
0x1ffd   :  { %v5542_v18 = vsel %vm224_vm2, %v10857_v3, 0.0  ;;  %v10861_v42 = vpop.eup %7630 }
0x1ffe   :  { %5543 = vadd.xlane.f32.xlu0 %v5542_v18  ;;  %v5545_v9 = vsel %vm224_vm2, %v10861_v42, 0.0  ;;  %v5239_v24 = vpop.permute.xlu0 %5238  ;;  %v7762_v18 = vld [vmem:[%s11614_s26 + $0x30] sm:$0xff] }
0x1fff   :  { %v5261_v7 = vadd.f32 %v5239_v24, %v10841_v61 }
0x2000   :  { %v7633_v49 = vpop.eup %7632 }
0x2001   :  { %v5539_v5 = vsel %vm224_vm2, %v7633_v49, 0.0  ;;  %v10866_v57 = vpop.eup %7634 }
0x2002   :  { %5540 = vadd.xlane.f32.xlu1 %v5539_v5  ;;  %5546 = vadd.xlane.f32.xlu0 %v5545_v9  ;;  %v5551_v26 = vsel %vm224_vm2, %v10866_v57, 0.0  ;;  %v5237_v40 = vpop.permute.xlu0 %5236  ;;  %v6761_v5 = vld [vmem:[%s11770_s23 + $0xb8] sm:$0xff]  ;;  %v6760_v9 = vld [vmem:[%s11770_s23 + $0xb0] sm:$0xff] }
0x2003   :  { %v5260_v34 = vadd.f32 %v5237_v40, %v5212_v23 }
0x2004   :  { %v7637_v33 = vpop.eup %7636 }
0x2005   :  { %v5548_v38 = vsel %vm224_vm2, %v7637_v33, 0.0 }
0x2006   :  { %5549 = vadd.xlane.f32.xlu1 %v5548_v38  ;;  %5552 = vadd.xlane.f32.xlu0 %v5551_v26  ;;  %v6757_v38 = vld [vmem:[%s11770_s23 + $0x98] sm:$0xff]  ;;  %v6756_v26 = vld [vmem:[%s11770_s23 + $0x90] sm:$0xff] }
0x2008   :  { %v7639_v60 = vpop.eup %7638 }
0x2009   :  { %v5554_v47 = vsel %vm224_vm2, %v7639_v60, 0.0 }
0x200a   :  { %5555 = vadd.xlane.f32.xlu1 %v5554_v47  ;;  %v6755_v47 = vld [vmem:[%s11770_s23 + $0x88] sm:$0xff] }
0x201b   :  { %5286 = vrot.lane.b32.xlu1 %v5269_v28, %s11623_s29  ;;  %v6754_v28 = vld [vmem:[%s11770_s23 + $0x80] sm:$0xff] }
0x201c   :  { %5284 = vrot.lane.b32.xlu0 %v5268_v2, %s11623_s29 }
0x204a   :  { %v5538_v6 = vpop.xlane.xlu0 %5537 }
0x204c   :  { %v5535_v16 = vpop.xlane.xlu1 %5534 }
0x204d   :  { %7640 = vrcp.f32 %v5535_v16 }
0x204e   :  { %7642 = vrcp.f32 %v5538_v6 }
0x205a   :  { %v7641_v59 = vpop.eup %7640 }
0x205b   :  { %v5558_v50 = vmul.f32 %v7641_v59, %v7627_v13  ;;  %v7643_v51 = vpop.eup %7642 }
0x205c   :  { %v5560_v56 = vmul.f32 %v7643_v51, %v10845_v58 }
0x205d   :  { %7384 = vmatprep.mubr.msk.f32.mxu0 %vm224_vm2, %v5558_v50 }
0x2087   :  { %v5544_v17 = vpop.xlane.xlu0 %5543 }
0x208b   :  { %v5547_v37 = vpop.xlane.xlu0 %5546  ;;  %v5541_v63 = vpop.xlane.xlu1 %5540 }
0x208c   :  { %7644 = vrcp.f32 %v5541_v63 }
0x208d   :  { %7646 = vrcp.f32 %v5544_v17 }
0x208e   :  { %7648 = vrcp.f32 %v5547_v37 }
0x208f   :  { %v5550_v55 = vpop.xlane.xlu1 %5549  ;;  %v5553_v4 = vpop.xlane.xlu0 %5552 }
0x2090   :  { %7650 = vrcp.f32 %v5550_v55 }
0x2091   :  { %7652 = vrcp.f32 %v5553_v4 }
0x2093   :  { %v5556_v54 = vpop.xlane.xlu1 %5555  ;;  %v5285_v32 = vpop.permute.xlu0 %5284 }
0x2094   :  { %7654 = vrcp.f32 %v5556_v54  ;;  %v5308_v29 = vadd.f32 %v5285_v32, %v5260_v34  ;;  %v6765_v32 = vld [vmem:[%s11774_s1 + $0x2] ss:$0 sm:$0xff] }
0x2097   :  { %v5287_v48 = vpop.permute.xlu1 %5286 }
0x2098   :  { %v5309_v52 = vadd.f32 %v5287_v48, %v5261_v7  ;;  %v11775_v48 = vld [vmem:[#allocation9_spill] sm:$0xff] }
0x2099   :  { %v7645_v13 = vpop.eup %7644 }
0x209a   :  { %7380 = vmatprep.subr.mxu0 %v5309_v52  ;;  %v7647_v35 = vpop.eup %7646  ;;  %v5562_v10 = vmul.f32 %v7645_v13, %v7633_v49  ;;  %v11769_v49 = vmov 0.0   ;;  %v11776_v13 = vld [vmem:[#allocation15_spill] sm:$0xff] }
0x209b   :  { %7381 = vmatpush3.msra.mxu0 %v5309_v52  ;;  %v7649_v46 = vpop.eup %7648  ;;  %v5564_v61 = vmul.f32 %v7647_v35, %v10857_v3  ;;  %v7761_v3 = vld [vmem:[%s11614_s26 + $0x28] sm:$0xff] }
0x209c   :  { %7382 = vmatprep.subr.mxu0 %v5308_v29  ;;  %v5566_v11 = vmul.f32 %v7649_v46, %v10861_v42  ;;  %v7763_v42 = vld [vmem:[%s11614_s26 + $0x38] sm:$0xff] }
0x209d   :  { %7383 = vmatpush3.msra.mxu0 %v5308_v29  ;;  %v7651_v15 = vpop.eup %7650 }
0x209e   :  { %7385 = vmatmul.mubr.msk.f32.vlgmr.msra.gmra.mxu0 %vm224_vm2, %v5560_v56  ;;  %v7653_v19 = vpop.eup %7652  ;;  %v5568_v58 = vmul.f32 %v7651_v15, %v7637_v33  ;;  %7424 = vmatprep.subr.mxu0 %v6761_v5  ;;  %v6758_v33 = vld [vmem:[%s11770_s23 + $0xa0] sm:$0xff] }
0x209f   :  { %7387 = vmatprep.mubr.msk.f32.mxu0 %vm224_vm2, %v5562_v10  ;;  %v5570_v45 = vmul.f32 %v7653_v19, %v10866_v57  ;;  %7425 = vmatpush3.msra.mxu0 %v6761_v5  ;;  %v6759_v57 = vld [vmem:[%s11770_s23 + $0xa8] sm:$0xff] }
0x20a0   :  { %7426 = vmatprep.subr.mxu0 %v6760_v9  ;;  %v6771_v5 = vld [vmem:[%s11239_s18 + $0x108] sm:$0xff] }
0x20a1   :  { %v7655_v53 = vpop.eup %7654  ;;  %7427 = vmatpush3.msra.mxu0 %v6760_v9  ;;  %v6770_v9 = vld [vmem:[%s11239_s18 + $0x100] sm:$0xff] }
0x20a2   :  { %7388 = vmatmul.mubr.msk.f32.gmra.mxu0 %vm224_vm2, %v5564_v61  ;;  %v5572_v14 = vmul.f32 %v7655_v53, %v7639_v60  ;;  %7428 = vmatprep.subr.mxu0 %v6759_v57 }
0x20a3   :  { %7390 = vmatprep.mubr.msk.f32.mxu0 %vm224_vm2, %v5566_v11  ;;  %7429 = vmatpush3.msra.mxu0 %v6759_v57 }
0x20a4   :  { %7430 = vmatprep.subr.mxu0 %v6758_v33 }
0x20a5   :  { %7431 = vmatpush3.msra.mxu0 %v6758_v33 }
0x20a6   :  { %7391 = vmatmul.mubr.msk.f32.gmra.mxu0 %vm224_vm2, %v5568_v58  ;;  %7432 = vmatprep.subr.mxu0 %v6757_v38 }
0x20a7   :  { %7393 = vmatprep.mubr.msk.f32.mxu0 %vm224_vm2, %v5570_v45  ;;  %7433 = vmatpush3.msra.mxu0 %v6757_v38 }
0x20a8   :  { %7434 = vmatprep.subr.mxu0 %v6756_v26 }
0x20a9   :  { %7435 = vmatpush3.msra.mxu0 %v6756_v26 }
0x20aa   :  { %7394 = vmatmul.mubr.msk.f32.gmra.mxu0 %vm224_vm2, %v5572_v14  ;;  %7436 = vmatprep.subr.mxu0 %v6755_v47 }
0x20ab   :  { %7437 = vmatpush3.msra.mxu0 %v6755_v47 }
0x20ac   :  { %7438 = vmatprep.subr.mxu0 %v6754_v28 }
0x20ad   :  { %7439 = vmatpush3.msra.mxu0 %v6754_v28 }
0x215e   :  { %v7386_v39 = vpop.f32.mrf.mxu0 }
0x2160   :  { %v5663_v43 = vpop.f32.mrf.mxu0 }
0x2162   :  { %v7389_v36 = vpop.f32.mrf.mxu0 }
0x2164   :  { %v5673_v8 = vpop.f32.mrf.mxu0 }
0x2166   :  { %v7392_v1 = vpop.f32.mrf.mxu0 }
0x2168   :  { %v5683_v44 = vpop.f32.mrf.mxu0 }
0x216a   :  { %v7395_v30 = vpop.f32.mrf.mxu0 }
0x216b   :  { %7396 = vmatprep.subr.mxu1 %v7395_v30 }
0x216c   :  { %v5693_v20 = vpop.f32.mrf.mxu0  ;;  %7397 = vmatpush3.msra.mxu1 %v7395_v30  ;;  %v6780_v30 = vld [vmem:[%s11239_s18 + $0x150] sm:$0xff] }
0x216d   :  { %7398 = vmatprep.subr.mxu1 %v5693_v20 }
0x216e   :  { %7399 = vmatpush3.msra.mxu1 %v5693_v20  ;;  %v6779_v20 = vld [vmem:[%s11239_s18 + $0x148] sm:$0xff] }
0x216f   :  { %7400 = vmatprep.subr.mxu1 %v7392_v1 }
0x2170   :  { %7401 = vmatpush3.msra.mxu1 %v7392_v1  ;;  %v6782_v1 = vld [vmem:[%s11239_s18 + $0x160] sm:$0xff] }
0x2171   :  { %7402 = vmatprep.subr.mxu1 %v5683_v44 }
0x2172   :  { %7403 = vmatpush3.msra.mxu1 %v5683_v44  ;;  %v6781_v44 = vld [vmem:[%s11239_s18 + $0x158] sm:$0xff] }
0x2173   :  { %7404 = vmatprep.subr.mxu1 %v7389_v36 }
0x2174   :  { %7405 = vmatpush3.msra.mxu1 %v7389_v36  ;;  %v6784_v36 = vld [vmem:[%s11239_s18 + $0x170] sm:$0xff] }
0x2175   :  { %7406 = vmatprep.subr.mxu1 %v5673_v8 }
0x2176   :  { %7407 = vmatpush3.msra.mxu1 %v5673_v8  ;;  %v6783_v8 = vld [vmem:[%s11239_s18 + $0x168] sm:$0xff] }
0x2177   :  { %7408 = vmatprep.subr.mxu1 %v7386_v39 }
0x2178   :  { %7409 = vmatpush3.msra.mxu1 %v7386_v39 }
0x2179   :  { %7410 = vmatprep.subr.mxu1 %v5663_v43 }
0x217a   :  { %7411 = vmatpush3.msra.mxu1 %v5663_v43  ;;  %v6785_v43 = vld [vmem:[%s11239_s18 + $0x178] sm:$0xff] }
0x217b   :  { %7413 = vmatmul.mubr.msk.f32.vlgmr.msra.gmra.mxu1 %vm224_vm2, %v7757_v41  ;;  %6037 = vmatprep.subr.mxu1 %v6785_v43  ;;  %v6778_v41 = vld [vmem:[%s11239_s18 + $0x140] sm:$0xff]  ;;  %v6790_v43 = vld [vmem:[%s11241_s20 + $0x208] sm:$0xff] }
0x217c   :  { %7415 = vmatprep.mubr.msk.f32.mxu1 %vm224_vm2, %v7758_v12  ;;  %6038 = vmatpush1.msra.mxu1 %v6784_v36  ;;  %v6777_v12 = vld [vmem:[%s11239_s18 + $0x138] sm:$0xff]  ;;  %v6805_v36 = vld [vmem:[%s11241_s20 + $0x280] sm:$0xff] }
0x217d   :  { %6039 = vmatprep.subr.mxu1 %v6783_v8  ;;  %v6789_v8 = vld [vmem:[%s11241_s20 + $0x200] sm:$0xff] }
0x217e   :  { %6040 = vmatpush1.msra.mxu1 %v6782_v1  ;;  %v6786_v1 = vld [vmem:[%s11240_s19 + $0x4] sm:$0x3] }
0x217f   :  { %7416 = vmatmul.mubr.msk.f32.gmra.mxu1 %vm224_vm2, %v7759_v21  ;;  %6041 = vmatprep.subr.mxu1 %v6781_v44  ;;  %v6776_v21 = vld [vmem:[%s11239_s18 + $0x130] sm:$0xff]  ;;  %v11777_v44 = vld [vmem:[#allocation8_spill] sm:$0xff] }
0x2180   :  { %7418 = vmatprep.mubr.msk.f32.mxu1 %vm224_vm2, %v7760_v22  ;;  %6042 = vmatpush1.msra.mxu1 %v6780_v30  ;;  %v6775_v22 = vld [vmem:[%s11239_s18 + $0x128] sm:$0xff]  ;;  %v6008_v30 = vrot.slane %v6786_v1, %v11777_v44 }
0x2181   :  { %6043 = vmatprep.subr.mxu1 %v6779_v20  ;;  %v11778_v20 = vld [vmem:[#allocation7_spill] sm:$0xff] }
0x2182   :  { %6044 = vmatpush1.msra.mxu1 %v6778_v41  ;;  %v6012_v41 = vrot.slane %v6786_v1, %v11778_v20 }
0x2183   :  { %7419 = vmatmul.mubr.msk.f32.gmra.mxu1 %vm224_vm2, %v7761_v3  ;;  %6045 = vmatprep.subr.mxu1 %v6777_v12  ;;  %v6774_v3 = vld [vmem:[%s11239_s18 + $0x120] sm:$0xff] }
0x2184   :  { %7421 = vmatprep.mubr.msk.f32.mxu1 %vm224_vm2, %v7762_v18  ;;  %6046 = vmatpush1.msra.mxu1 %v6776_v21  ;;  %v6773_v18 = vld [vmem:[%s11239_s18 + $0x118] sm:$0xff] }
0x2185   :  { %6047 = vmatprep.subr.mxu1 %v6775_v22 }
0x2186   :  { %6048 = vmatpush1.msra.mxu1 %v6774_v3 }
0x2187   :  { %7422 = vmatmul.mubr.msk.f32.gmra.mxu1 %vm224_vm2, %v7763_v42  ;;  %v6772_v42 = vld [vmem:[%s11239_s18 + $0x110] sm:$0xff]  ;;  %6049 = vmatprep.subr.mxu1 %v6773_v18 }
0x2188   :  { %6085 = vmatprep.mubr.f32.mxu1 %v11769_v49  ;;  %6050 = vmatpush1.msra.mxu1 %v6772_v42 }
0x2189   :  { %6051 = vmatprep.subr.mxu1 %v6771_v5 }
0x218a   :  { %6052 = vmatpush1.msra.mxu1 %v6770_v9 }
0x218b   :  { %7443 = vmatprep.subr.mxu1 %v11769_v49 }
0x223b   :  { %v7414_v60 = vpop.f32.mrf.mxu1 }
0x223d   :  { %v5768_v27 = vpop.f32.mrf.mxu1 }
0x223f   :  { %v7417_v0 = vpop.f32.mrf.mxu1 }
0x2240   :  { %5811 = vrot.lane.b32.xlu0 %v7417_v0, %s11771_s8 }
0x2241   :  { %v5778_v2 = vpop.f32.mrf.mxu1 }
0x2242   :  { %5809 = vrot.lane.b32.xlu1 %v5778_v2, %s11771_s8 }
0x2243   :  { %v7420_v16 = vpop.f32.mrf.mxu1 }
0x2244   :  { %5819 = vrot.lane.b32.xlu0 %v7420_v16, %s11772_s10  ;;  %v6768_v16 = vld [vmem:[%s11237_s16 + $0x2] ss:$0 sm:$0xff] }
0x2245   :  { %v5788_v59 = vpop.f32.mrf.mxu1 }
0x2246   :  { %5817 = vrot.lane.b32.xlu1 %v5788_v59, %s11772_s10  ;;  %s11779_s10 = sld [smem:[#allocation101_spill]] }
0x2247   :  { %v7423_v50 = vpop.f32.mrf.mxu1 }
0x2248   :  { %5827 = vrot.lane.b32.xlu0 %v7423_v50, %s11773_s12  ;;  %v6769_v50 = vld [vmem:[%s11238_s17 + $0x2] ss:$0 sm:$0xff]  ;;  %s7802_s17 = smov [#allocation2]  }
0x2249   :  { %v5798_v31 = vpop.f32.mrf.mxu1  ;;  %s6495_s6 = sshll.u32 %s7802_s17, 4  ;;  %s6496_s6 = int_to_ptr.vmem [resolvable:$true] %s6495_s6 }
0x224a   :  { %5825 = vrot.lane.b32.xlu1 %v5798_v31, %s11773_s12  ;;  %s7764_s29 = scalar_lea.vmem %s6496_s6, 32  ;;  %p7769_p1 = scmp.lt.s32.totalorder %s6496_s6, %s6496_s6 }
0x224b   :  { %p7765_p0 = scmp.ne.s32.totalorder %s6496_s6, %s7764_s29  ;;  %p7770_p2 = scmp.lt.s32.totalorder %s7764_s29, %s7764_s29 }
0x224d   :  { %p7771_p3 = por %p7770_p2, %p7769_p1 }
0x224f   :  { %p7772_p4 = pnand %p7771_p3, %p7765_p0 }
0x22b2   :  { %v5812_v24 = vpop.permute.xlu0 %5811 }
0x22b3   :  { %v5832_v55 = vsel %vm379_vm3, %v7414_v60, %v5812_v24 }
0x22b4   :  { %v5810_v40 = vpop.permute.xlu1 %5809 }
0x22b5   :  { %v5831_v37 = vsel %vm379_vm3, %v5768_v27, %v5810_v40 }
0x22b6   :  { %v5820_v6 = vpop.permute.xlu0 %5819 }
0x22b7   :  { %v5834_v25 = vsel %vm1995_vm5, %v5832_v55, %v5820_v6  ;;  %v6820_v6 = vld [vmem:[%s11241_s20 + $0x2f8] sm:$0xff]  ;;  %v6818_v55 = vld [vmem:[%s11241_s20 + $0x2e8] sm:$0xff] }
0x22b8   :  { %v5818_v17 = vpop.permute.xlu1 %5817  ;;  %7079 = vmatprep.subr.mxu0 %v6820_v6 }
0x22b9   :  { %v5833_v4 = vsel %vm1995_vm5, %v5831_v37, %v5818_v17  ;;  %v6804_v17 = vld [vmem:[%s11241_s20 + $0x278] sm:$0xff]  ;;  %v6819_v37 = vld [vmem:[%s11241_s20 + $0x2f0] sm:$0xff]  ;;  %vm7801_vm5 = vmmov 0  }
0x22ba   :  { %v5828_v63 = vpop.permute.xlu0 %5827 }
0x22bb   :  { %v5836_v23 = vsel %vm1998_vm6, %v5834_v25, %v5828_v63  ;;  %v6803_v63 = vld [vmem:[%s11241_s20 + $0x270] sm:$0xff]  ;;  %v6801_v25 = vld [vmem:[%s11241_s20 + $0x260] sm:$0xff] }
0x22bc   :  { %v5826_v54 = vpop.permute.xlu1 %5825 }
0x22bd   :  { %v5835_v62 = vsel %vm1998_vm6, %v5833_v4, %v5826_v54  ;;  %v6802_v4 = vld [vmem:[%s11241_s20 + $0x268] sm:$0xff]  ;;  %v6817_v54 = vld [vmem:[%s11241_s20 + $0x2e0] sm:$0xff] }
0x22be   :  { %7440 = vmatprep.mubr.msk.f32.mxu0 %vm224_vm2, %v5835_v62  ;;  %v6816_v62 = vld [vmem:[%s11241_s20 + $0x2d8] sm:$0xff] }
0x22bf   :  { %7441 = vmatmul.mubr.msk.f32.vlgmr.msra.gmra.mxu0 %vm224_vm2, %v5836_v23  ;;  %v6800_v23 = vld [vmem:[%s11241_s20 + $0x258] sm:$0xff] }
0x22c0   :  { %7080 = vmatpush3.msra.mxu0 %v6804_v17 }
0x22c1   :  { %7081 = vmatprep.subr.mxu0 %v6819_v37 }
0x22c2   :  { %7082 = vmatpush3.msra.mxu0 %v6803_v63 }
0x22c3   :  { %7083 = vmatprep.subr.mxu0 %v6818_v55 }
0x22c4   :  { %7084 = vmatpush3.msra.mxu0 %v6802_v4 }
0x22c5   :  { %7085 = vmatprep.subr.mxu0 %v6817_v54 }
0x22c6   :  { %7086 = vmatpush3.msra.mxu0 %v6801_v25 }
0x22c7   :  { %7087 = vmatprep.subr.mxu0 %v6816_v62 }
0x22c8   :  { %7088 = vmatpush3.msra.mxu0 %v6800_v23 }
0x237f   :  { %v7442_v7 = vpop.f32.mrf.mxu0 }
0x2380   :  { %v5928_v34 = vadd.f32 %v7442_v7, %v11775_v48  ;;  %v6815_v7 = vld [vmem:[%s11241_s20 + $0x2d0] sm:$0xff]  ;;  %v6814_v48 = vld [vmem:[%s11241_s20 + $0x2c8] sm:$0xff] }
0x2381   :  { %v5918_v52 = vpop.f32.mrf.mxu0  ;;  %7089 = vmatprep.subr.mxu0 %v6815_v7 }
0x2382   :  { %v10964_v51 = vadd.f32 %v6765_v32, %v5928_v34  ;;  %v5927_v29 = vadd.f32 %v5918_v52, %v11776_v13  ;;  %v6798_v34 = vld [vmem:[%s11241_s20 + $0x248] sm:$0xff]  ;;  %v6813_v52 = vld [vmem:[%s11241_s20 + $0x2c0] sm:$0xff] }
0x2383   :  { %v6797_v13 = vld [vmem:[%s11241_s20 + $0x240] sm:$0xff] }
0x2384   :  { %v10967_v56 = vadd.f32 %v6765_v32, %v5927_v29  ;;  %v5946_v35 = vsel %vm224_vm2, %v10964_v51, 0.0  ;;  %v6799_v32 = vld [vmem:[%s11241_s20 + $0x250] sm:$0xff]  ;;  %v6812_v29 = vld [vmem:[%s11241_s20 + $0x2b8] sm:$0xff] }
0x2385   :  { %5947 = vadd.xlane.f32.xlu0 %v5946_v35  ;;  %7090 = vmatpush3.msra.mxu0 %v6799_v32  ;;  %v6796_v35 = vld [vmem:[%s11241_s20 + $0x238] sm:$0xff] }
0x2386   :  { %v5943_v10 = vsel %vm224_vm2, %v10967_v56, 0.0  ;;  %7091 = vmatprep.subr.mxu0 %v6814_v48 }
0x2387   :  { %5944 = vadd.xlane.f32.xlu1 %v5943_v10  ;;  %7092 = vmatpush3.msra.mxu0 %v6798_v34  ;;  %v6811_v10 = vld [vmem:[%s11241_s20 + $0x2b0] sm:$0xff] }
0x2388   :  { %7093 = vmatprep.subr.mxu0 %v6813_v52 }
0x2389   :  { %7094 = vmatpush3.msra.mxu0 %v6797_v13 }
0x238a   :  { %7095 = vmatprep.subr.mxu0 %v6812_v29 }
0x238b   :  { %7096 = vmatpush3.msra.mxu0 %v6796_v35 }
0x238c   :  { %7097 = vmatprep.subr.mxu0 %v6811_v10 }
0x240e   :  { %v5948_v46 = vpop.xlane.xlu0 %5947 }
0x240f   :  { %v5950_v61 = vmul.f32 0.015625, %v5948_v46  ;;  %v6795_v46 = vld [vmem:[%s11241_s20 + $0x230] sm:$0xff] }
0x2410   :  { %v5945_v15 = vpop.xlane.xlu1 %5944  ;;  %7098 = vmatpush3.msra.mxu0 %v6795_v46 }
0x2411   :  { %v5952_v11 = vsub.f32 %v10964_v51, %v5950_v61  ;;  %v5949_v19 = vmul.f32 0.015625, %v5945_v15  ;;  %v6810_v61 = vld [vmem:[%s11241_s20 + $0x2a8] sm:$0xff] }
0x2412   :  { %7099 = vmatprep.subr.mxu0 %v6810_v61  ;;  %v6794_v15 = vld [vmem:[%s11241_s20 + $0x228] sm:$0xff] }
0x2413   :  { %v5951_v58 = vsub.f32 %v10967_v56, %v5949_v19  ;;  %v5954_v53 = vmul.f32 %v5952_v11, %v5952_v11  ;;  %7100 = vmatpush3.msra.mxu0 %v6794_v15  ;;  %v6793_v19 = vld [vmem:[%s11241_s20 + $0x220] sm:$0xff] }
0x2415   :  { %v5958_v45 = vsel %vm224_vm2, %v5954_v53, 0.0  ;;  %v5953_v14 = vmul.f32 %v5951_v58, %v5951_v58  ;;  %v6792_v53 = vld [vmem:[%s11241_s20 + $0x218] sm:$0xff] }
0x2416   :  { %5959 = vadd.xlane.f32.xlu1 %v5958_v45  ;;  %v6807_v45 = vld [vmem:[%s11241_s20 + $0x290] sm:$0xff] }
0x2417   :  { %v5955_v39 = vsel %vm224_vm2, %v5953_v14, 0.0  ;;  %v6791_v14 = vld [vmem:[%s11241_s20 + $0x210] sm:$0xff] }
0x2418   :  { %5956 = vadd.xlane.f32.xlu0 %v5955_v39  ;;  %v6806_v39 = vld [vmem:[%s11241_s20 + $0x288] sm:$0xff] }
0x249f   :  { %v5960_v57 = vpop.xlane.xlu1 %5959 }
0x24a0   :  { %v5962_v33 = vmul.f32 0.015625, %v5960_v57 }
0x24a1   :  { %v5957_v38 = vpop.xlane.xlu0 %5956 }
0x24a2   :  { %v5964_v26 = vadd.f32 1e-05, %v5962_v33  ;;  %v5961_v60 = vmul.f32 0.015625, %v5957_v38 }
0x24a4   :  { %7656 = vrsqrt.f32 %v5964_v26  ;;  %v5963_v47 = vadd.f32 1e-05, %v5961_v60 }
0x24a6   :  { %7658 = vrsqrt.f32 %v5963_v47 }
0x24b1   :  { %v7657_v27 = vpop.eup %7656 }
0x24b2   :  { %v5968_v2 = vmul.f32 %v7657_v27, %v5952_v11  ;;  %v6809_v11 = vld [vmem:[%s11241_s20 + $0x2a0] sm:$0xff] }
0x24b3   :  { %v7659_v28 = vpop.eup %7658  ;;  %7101 = vmatprep.subr.mxu0 %v6809_v11 }
0x24b4   :  { %v5967_v0 = vmul.f32 %v7659_v28, %v5951_v58  ;;  %v5976_v24 = vmul.f32 %v6768_v16, %v5968_v2  ;;  %7102 = vmatpush3.msra.mxu0 %v6793_v19  ;;  %v6808_v58 = vld [vmem:[%s11241_s20 + $0x298] sm:$0xff] }
0x24b5   :  { %7103 = vmatprep.subr.mxu0 %v6808_v58 }
0x24b6   :  { %v5975_v59 = vmul.f32 %v6768_v16, %v5967_v0  ;;  %v5984_v40 = vadd.f32 %v6769_v50, %v5976_v24  ;;  %7104 = vmatpush3.msra.mxu0 %v6792_v53 }
0x24b7   :  { %7105 = vmatprep.subr.mxu0 %v6807_v45 }
0x24b8   :  { %v5983_v31 = vadd.f32 %v6769_v50, %v5975_v59  ;;  %7106 = vmatpush3.msra.mxu0 %v6791_v14 }
0x24b9   :  { %7107 = vmatprep.subr.mxu0 %v6806_v39 }
0x24ba   :  { %6787 = vmatmul.mubr.msk.f32.vlgmr.msra.gmra.mxu1 %vm224_vm2, %v5983_v31  ;;  %7108 = vmatpush3.msra.mxu0 %v6790_v43 }
0x24bb   :  { %6091 = vmatprep.mubr.f32.mxu1 %v11769_v49  ;;  %7109 = vmatprep.subr.mxu0 %v6805_v36 }
0x24bc   :  { %7110 = vmatpush3.msra.mxu0 %v6789_v8 }
0x24be   :  { %6788 = vmatmul.mubr.msk.f32.gmra.mxu1 %vm224_vm2, %v5984_v40 }
0x24bf   :  { %7447 = vmatprep.mubr.msk.f32.mxu1 %vm7801_vm5, %v11769_v49 }
0x257a   :  { %v6087_v12 = vpop.f32.mrf.mxu1 }
0x257b   :  { %v11136_v21 = vadd.f32 %v6087_v12, %v6008_v30 }
0x257c   :  { %v6089_v22 = vpop.f32.mrf.mxu1 }
0x257d   :  { %v11139_v3 = vmul.f32 0.70710677, %v11136_v21  ;;  %v11141_v18 = vadd.f32 %v6089_v22, %v6012_v41 }
0x257e   :  { %v6093_v42 = vpop.f32.mrf.mxu1 }
0x257f   :  { %v6106_v5 = vand.u32 2147483647, %v11139_v3  ;;  %v11145_v9 = vmul.f32 0.70710677, %v11141_v18  ;;  %v11147_v57 = vadd.f32 %v6093_v42, %v6008_v30  ;;  %vm6186_vm15 = vcmp.ge.f32.partialorder %v11139_v3, 0.0 }
0x2580   :  { %v6095_v33 = vpop.f32.mrf.mxu1  ;;  %v6098_v3 = vmul.f32 0.5, %v11136_v21 }
0x2581   :  { %v6110_v38 = vmul.f32 0.3275911, %v6106_v5  ;;  %v6107_v26 = vand.u32 2147483647, %v11145_v9  ;;  %v11151_v60 = vmul.f32 0.70710677, %v11147_v57  ;;  %v11153_v47 = vadd.f32 %v6095_v33, %v6012_v41 }
0x2582   :  { %v6162_v6 = vsub.f32 0.0, %v6106_v5  ;;  %vm6187_vm0 = vcmp.ge.f32.partialorder %v11145_v9, 0.0 }
0x2583   :  { %v6114_v27 = vadd.f32 1.0, %v6110_v38  ;;  %v6111_v28 = vmul.f32 0.3275911, %v6107_v26  ;;  %v6108_v0 = vand.u32 2147483647, %v11151_v60  ;;  %v6163_v17 = vsub.f32 0.0, %v6107_v26 }
0x2584   :  { %v11157_v2 = vmul.f32 0.70710677, %v11153_v47  ;;  %v6166_v37 = vmul.f32 %v6162_v6, %v6106_v5  ;;  %vm6188_vm1 = vcmp.ge.f32.partialorder %v11151_v60, 0.0 }
0x2585   :  { %7660 = vrcp.f32 %v6114_v27  ;;  %v6115_v16 = vadd.f32 1.0, %v6111_v28  ;;  %v6112_v59 = vmul.f32 0.3275911, %v6108_v0  ;;  %v6164_v63 = vsub.f32 0.0, %v6108_v0 }
0x2586   :  { %v6109_v50 = vand.u32 2147483647, %v11157_v2  ;;  %v6167_v4 = vmul.f32 %v6163_v17, %v6107_v26  ;;  %v6170_v25 = vmul.f32 1.442695, %v6166_v37  ;;  %vm6189_vm4 = vcmp.ge.f32.partialorder %v11157_v2, 0.0 }
0x2587   :  { %7662 = vrcp.f32 %v6115_v16  ;;  %v6116_v31 = vadd.f32 1.0, %v6112_v59  ;;  %v6168_v23 = vmul.f32 %v6164_v63, %v6108_v0 }
0x2588   :  { %v6113_v24 = vmul.f32 0.3275911, %v6109_v50  ;;  %v6165_v62 = vsub.f32 0.0, %v6109_v50  ;;  %v6172_v48 = vmul.f32 1.442695, %v6167_v4 }
0x2589   :  { %7664 = vrcp.f32 %v6116_v31  ;;  %v6174_v35 = vmul.f32 1.442695, %v6168_v23 }
0x258a   :  { %v6117_v40 = vadd.f32 1.0, %v6113_v24  ;;  %v6169_v29 = vmul.f32 %v6165_v62, %v6109_v50 }
0x258c   :  { %7666 = vrcp.f32 %v6117_v40  ;;  %v6176_v53 = vmul.f32 1.442695, %v6169_v29 }
0x258d   :  { %7668 = vpow2.f32 %v6170_v25 }
0x258e   :  { %7670 = vpow2.f32 %v6172_v48 }
0x258f   :  { %7672 = vpow2.f32 %v6174_v35 }
0x2590   :  { %7674 = vpow2.f32 %v6176_v53 }
0x2592   :  { %v7661_v55 = vpop.eup %7660 }
0x2593   :  { %v6126_v54 = vmul.f32 1.0614054, %v7661_v55 }
0x2594   :  { %v7663_v7 = vpop.eup %7662 }
0x2595   :  { %v6130_v32 = vadd.f32 -1.4531521, %v6126_v54  ;;  %v6127_v34 = vmul.f32 1.0614054, %v7663_v7 }
0x2596   :  { %v7665_v52 = vpop.eup %7664 }
0x2597   :  { %v6134_v13 = vmul.f32 %v7661_v55, %v6130_v32  ;;  %v6131_v10 = vadd.f32 -1.4531521, %v6127_v34  ;;  %v6128_v46 = vmul.f32 1.0614054, %v7665_v52 }
0x2599   :  { %v6138_v61 = vadd.f32 1.4214138, %v6134_v13  ;;  %v7667_v15 = vpop.eup %7666  ;;  %v6135_v11 = vmul.f32 %v7663_v7, %v6131_v10  ;;  %v6132_v19 = vadd.f32 -1.4531521, %v6128_v46 }
0x259a   :  { %v6129_v45 = vmul.f32 1.0614054, %v7667_v15  ;;  %v7669_v26 = vpop.eup %7668 }
0x259b   :  { %v6142_v58 = vmul.f32 %v7661_v55, %v6138_v61  ;;  %v6139_v14 = vadd.f32 1.4214138, %v6135_v11  ;;  %v6136_v39 = vmul.f32 %v7665_v52, %v6132_v19  ;;  %v7671_v31 = vpop.eup %7670 }
0x259c   :  { %v6133_v36 = vadd.f32 -1.4531521, %v6129_v45  ;;  %v7673_v37 = vpop.eup %7672 }
0x259d   :  { %v6146_v43 = vadd.f32 -0.28449672, %v6142_v58  ;;  %v6143_v8 = vmul.f32 %v7663_v7, %v6139_v14  ;;  %v6140_v1 = vadd.f32 1.4214138, %v6136_v39  ;;  %v7675_v23 = vpop.eup %7674  ;;  %v6101_v58 = vmul.f32 0.5, %v11153_v47 }
0x259e   :  { %v6137_v30 = vmul.f32 %v7667_v15, %v6133_v36 }
0x259f   :  { %v6150_v44 = vmul.f32 %v7661_v55, %v6146_v43  ;;  %v6147_v20 = vadd.f32 -0.28449672, %v6143_v8  ;;  %v6144_v41 = vmul.f32 %v7665_v52, %v6140_v1 }
0x25a0   :  { %v6141_v22 = vadd.f32 1.4214138, %v6137_v30  ;;  %v6326_v30 = vld [vmem:[%s11779_s10] sm:$0x3] }
0x25a1   :  { %v6154_v12 = vadd.f32 0.2548296, %v6150_v44  ;;  %v6151_v42 = vmul.f32 %v7663_v7, %v6147_v20  ;;  %v6148_v5 = vadd.f32 -0.28449672, %v6144_v41  ;;  %v6407_v20 = vld [vmem:[%s11780_s27 + $0x38] sm:$0xff]  ;;  %v6404_v41 = vld [vmem:[%s11780_s27 + $0x20] sm:$0xff] }
0x25a2   :  { %v6145_v38 = vmul.f32 %v7667_v15, %v6141_v22  ;;  %v6402_v22 = vld [vmem:[%s11780_s27 + $0x10] sm:$0xff] }
0x25a3   :  { %v6158_v33 = vmul.f32 %v7661_v55, %v6154_v12  ;;  %v6155_v27 = vadd.f32 0.2548296, %v6151_v42  ;;  %v6152_v28 = vmul.f32 %v7665_v52, %v6148_v5  ;;  %v6403_v12 = vld [vmem:[%s11780_s27 + $0x18] sm:$0xff]  ;;  %v6401_v42 = vld [vmem:[%s11780_s27 + $0x8] sm:$0xff]  ;;  %v6400_v5 = vld [vmem:[%s11780_s27] sm:$0xff] }
0x25a4   :  { %v6149_v16 = vadd.f32 -0.28449672, %v6145_v38 }
0x25a5   :  { %v6178_v0 = vmul.f32 %v7669_v26, %v6158_v33  ;;  %v6159_v59 = vmul.f32 %v7663_v7, %v6155_v27  ;;  %v6156_v50 = vadd.f32 0.2548296, %v6152_v28  ;;  %v6824_v26 = vld [vmem:[%s11781_s30] ss:$0 sm:$0xff] }
0x25a6   :  { %v6153_v40 = vmul.f32 %v7667_v15, %v6149_v16 }
0x25a7   :  { %v6182_v24 = vsub.f32 1.0, %v6178_v0  ;;  %v6179_v6 = vmul.f32 %v7671_v31, %v6159_v59  ;;  %v6160_v17 = vmul.f32 %v7665_v52, %v6156_v50  ;;  %v6099_v52 = vmul.f32 0.5, %v11141_v18 }
0x25a8   :  { %v6157_v4 = vadd.f32 0.2548296, %v6153_v40  ;;  %v6100_v18 = vmul.f32 0.5, %v11147_v57  ;;  %v6822_v57 = vld [vmem:[%s11242_s21 + $0x2] ss:$0 sm:$0xff] }
0x25a9   :  { %v6190_v63 = vsub.f32 0.0, %v6182_v24  ;;  %v6183_v54 = vsub.f32 1.0, %v6179_v6  ;;  %v6180_v55 = vmul.f32 %v7673_v37, %v6160_v17 }
0x25aa   :  { %v6161_v62 = vmul.f32 %v7667_v15, %v6157_v4 }
0x25ab   :  { %v6194_v25 = vsel %vm6186_vm15, %v6182_v24, %v6190_v63  ;;  %v6191_v32 = vsub.f32 0.0, %v6183_v54  ;;  %v6184_v48 = vsub.f32 1.0, %v6180_v55 }
0x25ac   :  { %v6181_v7 = vmul.f32 %v7675_v23, %v6161_v62  ;;  %v6198_v34 = vadd.f32 1.0, %v6194_v25 }
0x25ad   :  { %v6195_v13 = vsel %vm6187_vm0, %v6183_v54, %v6191_v32  ;;  %v6192_v29 = vsub.f32 0.0, %v6184_v48 }
0x25ae   :  { %v6199_v35 = vadd.f32 1.0, %v6195_v13  ;;  %v6185_v10 = vsub.f32 1.0, %v6181_v7  ;;  %v6202_v11 = vmul.f32 %v6198_v34, %v6098_v3 }
0x25af   :  { %v6196_v46 = vsel %vm6188_vm1, %v6184_v48, %v6192_v29 }
0x25b0   :  { %v6203_v61 = vmul.f32 %v6199_v35, %v6099_v52  ;;  %v6193_v15 = vsub.f32 0.0, %v6185_v10  ;;  %v6200_v19 = vadd.f32 1.0, %v6196_v46 }
0x25b2   :  { %6303 = vmatprep.mubr.f32.mxu0 %v6203_v61  ;;  %v6197_v9 = vsel %vm6189_vm4, %v6185_v10, %v6193_v15  ;;  %v6204_v45 = vmul.f32 %v6200_v19, %v6100_v18 }
0x25b3   :  { %6304 = vmatmul.mubr.f32.vlgmr.msra.gmra.mxu0 %v6202_v11  ;;  %v6201_v53 = vadd.f32 1.0, %v6197_v9 }
0x25b5   :  { %v6205_v60 = vmul.f32 %v6201_v53, %v6101_v58 }
0x25b7   :  { %6308 = vmatprep.mubr.f32.mxu0 %v6205_v60 }
0x25b8   :  { %6309 = vmatmul.mubr.f32.gmra.mxu0 %v6204_v45 }
0x2673   :  { %v7111_v21 = vpop.f32.mrf.mxu0 }
0x2675   :  { %v7112_v14 = vpop.f32.mrf.mxu0 }
0x2676   :  { %v7113_v39 = vadd.f32 %v7112_v14, %v7111_v21 }
0x2678   :  { %v7114_v2 = vpop.f32.mrf.mxu0  ;;  %v6314_v47 = vadd.f32 %v7113_v39, %v10967_v56  ;;  %v6405_v56 = vld [vmem:[%s11780_s27 + $0x28] sm:$0xff] }
0x267a   :  { %v7115_v43 = vpop.f32.mrf.mxu0  ;;  %v6324_v44 = vadd.f32 %v6822_v57, %v6314_v47 }
0x267b   :  { %v7116_v36 = vadd.f32 %v7115_v43, %v7114_v2 }
0x267d   :  { %v6315_v8 = vadd.f32 %v7116_v36, %v10964_v51  ;;  %v6406_v51 = vld [vmem:[%s11780_s27 + $0x30] sm:$0xff] }
0x267f   :  { %v6325_v1 = vadd.f32 %v6822_v57, %v6315_v8 }
0x2681   :  { %7444 = vmatpush3.msra.mxu1 %v6325_v1 }
0x2682   :  { %7445 = vmatprep.subr.mxu1 %v11769_v49 }
0x2683   :  { %7446 = vmatpush3.msra.mxu1 %v6324_v44 }
0x2684   :  { %7448 = vmatmul.mubr.msk.f32.vlgmr.msra.gmra.mxu1 %vm379_vm3, %v6326_v30  ;;  %7450 = vmatprep.subr.mxu1 %v11769_v49 }
0x2685   :  { %7451 = vmatpush3.msra.mxu1 %v6407_v20  ;;  %7466 = vmatprep.mubr.msk.f32.mxu1 %vm7801_vm5, %v11769_v49 }
0x2686   :  { %7452 = vmatprep.subr.mxu1 %v11769_v49 }
0x2687   :  { %7453 = vmatpush3.msra.mxu1 %v6406_v51 }
0x2688   :  { %7454 = vmatprep.subr.mxu1 %v11769_v49 }
0x2689   :  { %7455 = vmatpush3.msra.mxu1 %v6405_v56 }
0x268a   :  { %7456 = vmatprep.subr.mxu1 %v11769_v49 }
0x268b   :  { %7457 = vmatpush3.msra.mxu1 %v6404_v41 }
0x268c   :  { %7458 = vmatprep.subr.mxu1 %v11769_v49 }
0x268d   :  { %7459 = vmatpush3.msra.mxu1 %v6403_v12 }
0x268e   :  { %7460 = vmatprep.subr.mxu1 %v11769_v49 }
0x268f   :  { %7461 = vmatpush3.msra.mxu1 %v6402_v22 }
0x2690   :  { %7462 = vmatprep.subr.mxu1 %v11769_v49 }
0x2691   :  { %7463 = vmatpush3.msra.mxu1 %v6401_v42 }
0x2692   :  { %7464 = vmatprep.subr.mxu1 %v11769_v49 }
0x2693   :  { %7465 = vmatpush3.msra.mxu1 %v6400_v5 }
0x2744   :  { %v6396_v33 = vpop.f32.mrf.mxu1 }
0x2745   :  { %7467 = vmatmul.mubr.msk.f32.vlgmr.msra.gmra.mxu1 %vm224_vm2, %v6396_v33 }
0x2746   :  { %v7449_v38 = vpop.f32.mrf.mxu1 }
0x2805   :  { %v6484_v27 = vpop.f32.mrf.mxu1 }
0x2806   :  { %v6485_v28 = vadd.f32 %v6824_v26, %v6484_v27 }
0x2807   :  { %v7468_v0 = vpop.f32.mrf.mxu1 }
0x2808   :  { %6488 = vst [vmem:[#allocation2] sm:$0x3] %v6485_v28 }
0x2809   :  { %7775 = shalt.err (!%p7772_p4)
}
0x280a   :  { %s11782_s14 = sld [smem:[#allocation107_spill]] }
0x2810   :  { %6498 = dma.vmem_to_hbm [thread:$0]  %s6496_s6, 32, %s11782_s14, [#allocation3]  }
0x2811   :  { %7784 = dma.done.wait [#allocation3], 32  }
0x2812   :  { %7785 = vsyncadd [#allocation3], 4294967264 }
0x2813   :  { %6502 = vsyncpa [#allocation3], 1 }

</bundles_post_ra>
